<compile_context>
chip_gen: v5e
topology: v5e:2x2
jax: 0.10.0
libtpu: 0.0.40
codegen_flags: <defaults>
</compile_context>

<pallas_src>
import functools
import math

import jax
import jax.numpy as jnp
from jax import lax
from jax.experimental import pallas as pl
from jax.experimental.pallas import tpu as pltpu


# ----------------------------- tiling helper --------------------------------

def _pick_tile(dim, target, align):
    """Largest multiple of `align` <= target that evenly divides dim, else full dim."""
    if dim <= target:
        return dim
    t = (target // align) * align
    while t >= align:
        if dim % t == 0:
            return t
        t -= align
    return dim


# ----------------------------- Pallas kernels -------------------------------

def _matmul_kernel(*refs, has_bias, has_res, act):
    """Tiled matmul with fused bias / QuickGELU / residual epilogue."""
    x_ref, w_ref = refs[0], refs[1]
    idx = 2
    b_ref = refs[idx] if has_bias else None
    idx += 1 if has_bias else 0
    r_ref = refs[idx] if has_res else None
    idx += 1 if has_res else 0
    o_ref, acc_ref = refs[idx], refs[idx + 1]

    k = pl.program_id(2)

    @pl.when(k == 0)
    def _():
        acc_ref[...] = jnp.zeros_like(acc_ref)

    acc_ref[...] += jnp.dot(x_ref[...], w_ref[...],
                            preferred_element_type=jnp.float32)

    @pl.when(k == pl.num_programs(2) - 1)
    def _():
        y = acc_ref[...]
        if has_bias:
            y = y + b_ref[...].astype(jnp.float32)
        if act == "quick_gelu":          # CLIP QuickGELU: x * sigmoid(1.702 x)
            y = y * jax.nn.sigmoid(1.702 * y)
        if has_res:
            y = y + r_ref[...].astype(jnp.float32)
        o_ref[...] = y.astype(o_ref.dtype)


def pallas_matmul(x2d, w, b=None, act=None, residual=None):
    M, K = x2d.shape
    N = w.shape[1]
    tm = _pick_tile(M, 256, 8)
    tn = _pick_tile(N, 512, 128)
    tk = _pick_tile(K, 512, 128)
    grid = (M // tm, N // tn, K // tk)

    in_specs = [pl.BlockSpec((tm, tk), lambda i, j, k: (i, k)),
                pl.BlockSpec((tk, tn), lambda i, j, k: (k, j))]
    args = [x2d, w]
    if b is not None:
        in_specs.append(pl.BlockSpec((1, tn), lambda i, j, k: (0, j)))
        args.append(b.reshape(1, N))
    if residual is not None:
        in_specs.append(pl.BlockSpec((tm, tn), lambda i, j, k: (i, j)))
        args.append(residual)

    kern = functools.partial(_matmul_kernel, has_bias=b is not None,
                             has_res=residual is not None, act=act)
    return pl.pallas_call(
        kern,
        grid=grid,
        in_specs=in_specs,
        out_specs=pl.BlockSpec((tm, tn), lambda i, j, k: (i, j)),
        out_shape=jax.ShapeDtypeStruct((M, N), x2d.dtype),
        scratch_shapes=[pltpu.VMEM((tm, tn), jnp.float32)],
        compiler_params=pltpu.CompilerParams(
            dimension_semantics=("parallel", "parallel", "arbitrary")),
    )(*args)


def _ln_matmul_kernel(*refs, has_bias, act):
    """LayerNorm fused with the matmul that consumes it (K kept whole)."""
    x_ref, g_ref, beta_ref, w_ref = refs[:4]
    idx = 4
    b_ref = refs[idx] if has_bias else None
    idx += 1 if has_bias else 0
    o_ref = refs[idx]

    x = x_ref[...].astype(jnp.float32)
    mu = jnp.mean(x, axis=-1, keepdims=True)
    var = jnp.mean(jnp.square(x - mu), axis=-1, keepdims=True)
    xn = (x - mu) * lax.rsqrt(var + 1e-5)
    xn = xn * g_ref[...].astype(jnp.float32) + beta_ref[...].astype(jnp.float32)

    y = jnp.dot(xn.astype(w_ref.dtype), w_ref[...],
                preferred_element_type=jnp.float32)
    if has_bias:
        y = y + b_ref[...].astype(jnp.float32)
    if act == "quick_gelu":
        y = y * jax.nn.sigmoid(1.702 * y)
    o_ref[...] = y.astype(o_ref.dtype)


def pallas_ln_matmul(x2d, gamma, beta, w, b=None, act=None):
    M, K = x2d.shape
    N = w.shape[1]
    tm = _pick_tile(M, 256, 8)
    tn = _pick_tile(N, 512, 128)
    grid = (M // tm, N // tn)

    in_specs = [pl.BlockSpec((tm, K), lambda i, j: (i, 0)),
                pl.BlockSpec((1, K), lambda i, j: (0, 0)),
                pl.BlockSpec((1, K), lambda i, j: (0, 0)),
                pl.BlockSpec((K, tn), lambda i, j: (0, j))]
    args = [x2d, gamma.reshape(1, K), beta.reshape(1, K), w]
    if b is not None:
        in_specs.append(pl.BlockSpec((1, tn), lambda i, j: (0, j)))
        args.append(b.reshape(1, N))

    kern = functools.partial(_ln_matmul_kernel, has_bias=b is not None, act=act)
    return pl.pallas_call(
        kern,
        grid=grid,
        in_specs=in_specs,
        out_specs=pl.BlockSpec((tm, tn), lambda i, j: (i, j)),
        out_shape=jax.ShapeDtypeStruct((M, N), x2d.dtype),
        compiler_params=pltpu.CompilerParams(
            dimension_semantics=("parallel", "parallel")),
    )(*args)


def _layernorm_kernel(x_ref, g_ref, b_ref, o_ref):
    x = x_ref[...].astype(jnp.float32)
    mu = jnp.mean(x, axis=-1, keepdims=True)
    var = jnp.mean(jnp.square(x - mu), axis=-1, keepdims=True)
    y = (x - mu) * lax.rsqrt(var + 1e-5)
    o_ref[...] = (y * g_ref[...].astype(jnp.float32)
                  + b_ref[...].astype(jnp.float32)).astype(o_ref.dtype)


def pallas_layernorm(x2d, gamma, beta):
    M, D = x2d.shape
    tm = _pick_tile(M, 512, 8)
    return pl.pallas_call(
        _layernorm_kernel,
        grid=(M // tm,),
        in_specs=[pl.BlockSpec((tm, D), lambda i: (i, 0)),
                  pl.BlockSpec((1, D), lambda i: (0, 0)),
                  pl.BlockSpec((1, D), lambda i: (0, 0))],
        out_specs=pl.BlockSpec((tm, D), lambda i: (i, 0)),
        out_shape=jax.ShapeDtypeStruct((M, D), x2d.dtype),
        compiler_params=pltpu.CompilerParams(dimension_semantics=("parallel",)),
    )(x2d, gamma.reshape(1, D), beta.reshape(1, D))


def _attention_kernel(qkv_ref, o_ref, *, scale, causal, n_heads):
    """All heads of one batch element per grid step.

    qkv_ref: (S, 3, H, hd) bf16 — sliced straight out of the fused QKV tensor.
    o_ref:   (S, H, hd)     bf16 — head-interleaved, reshapes to (S, D) for free.
    """
    S = qkv_ref.shape[0]
    if causal:  # CLIP text transformer attn_mask, built once and reused per head
        row = lax.broadcasted_iota(jnp.int32, (S, S), 0)
        col = lax.broadcasted_iota(jnp.int32, (S, S), 1)
        neg = jnp.where(col <= row, 0.0, -1e30).astype(jnp.float32)

    for h in range(n_heads):                      # static loop, all heads per step
        q = qkv_ref[:, 0, h, :]                   # (S, hd) bf16
        k = qkv_ref[:, 1, h, :]
        v = qkv_ref[:, 2, h, :]
        # q @ k^T without materializing a transpose: contract last dims.
        s = lax.dot_general(q, k, (((1,), (1,)), ((), ())),
                            preferred_element_type=jnp.float32) * scale
        if causal:
            s = s + neg
        s = s - jnp.max(s, axis=-1, keepdims=True)
        p = jnp.exp(s)
        p = p * pl.reciprocal(jnp.sum(p, axis=-1, keepdims=True), approx=True)
        o = jnp.dot(p.astype(v.dtype), v, preferred_element_type=jnp.float32)
        o_ref[:, h, :] = o.astype(o_ref.dtype)


def pallas_attention(qkv, causal):
    B, S, _, H, hd = qkv.shape
    kern = functools.partial(_attention_kernel, scale=1.0 / math.sqrt(hd),
                             causal=causal, n_heads=H)
    return pl.pallas_call(
        kern,
        grid=(B,),
        in_specs=[pl.BlockSpec((None, S, 3, H, hd), lambda b: (b, 0, 0, 0, 0))],
        out_specs=pl.BlockSpec((None, S, H, hd), lambda b: (b, 0, 0, 0)),
        out_shape=jax.ShapeDtypeStruct((B, S, H, hd), qkv.dtype),
        compiler_params=pltpu.CompilerParams(dimension_semantics=("parallel",)),
    )(qkv)


def _logits_kernel(img_ref, txt_ref, o_ref, *, scale):
    img = img_ref[...].astype(jnp.float32)
    txt = txt_ref[...].astype(jnp.float32)
    # image_features / image_features.norm(dim=-1, keepdim=True)
    img = img * lax.rsqrt(jnp.sum(img * img, axis=-1, keepdims=True))
    # text_features / text_features.norm(...); torch.stack([t],0).mean(0) is identity.
    txt = txt * lax.rsqrt(jnp.sum(txt * txt, axis=-1, keepdims=True))
    logits = lax.dot_general(img.astype(jnp.bfloat16), txt.astype(jnp.bfloat16),
                             (((1,), (1,)), ((), ())),
                             preferred_element_type=jnp.float32)
    o_ref[...] = (scale * logits).astype(o_ref.dtype)


def pallas_logits(img_feat, txt_feat, logit_scale):
    B, E = img_feat.shape
    C = txt_feat.shape[0]
    # logit_scale.exp(); logit_scale is a frozen buffer in the module, so it is
    # baked at trace time.
    return pl.pallas_call(
        functools.partial(_logits_kernel, scale=math.exp(logit_scale)),
        grid=(1,),
        in_specs=[pl.BlockSpec((B, E), lambda i: (0, 0)),
                  pl.BlockSpec((C, E), lambda i: (0, 0))],
        out_specs=pl.BlockSpec((B, C), lambda i: (0, 0)),
        out_shape=jax.ShapeDtypeStruct((B, C), jnp.float32),
    )(img_feat, txt_feat)


# ------------------------------ model glue ----------------------------------

def layernorm(x, g, b):
    shp = x.shape
    return pallas_layernorm(x.reshape(-1, shp[-1]), g, b).reshape(shp)


def linear(x, w, b=None, act=None, residual=None):
    shp = x.shape
    res2d = None if residual is None else residual.reshape(-1, residual.shape[-1])
    y = pallas_matmul(x.reshape(-1, shp[-1]), w, b, act, res2d)
    return y.reshape(shp[:-1] + (w.shape[1],))


def ln_linear(x, g, b, w, bias=None, act=None):
    shp = x.shape
    y = pallas_ln_matmul(x.reshape(-1, shp[-1]), g, b, w, bias, act)
    return y.reshape(shp[:-1] + (w.shape[1],))


def resblock(x, p, n_heads, causal):
    B, S, D = x.shape
    hd = D // n_heads
    # LN1 + fused QKV projection
    qkv = ln_linear(x, p["ln1_g"], p["ln1_b"], p["w_qkv"], p["b_qkv"])
    qkv = qkv.reshape(B, S, 3, n_heads, hd)          # contiguous reshape, no copy
    attn = pallas_attention(qkv, causal).reshape(B, S, D)
    # attention out-projection + residual add fused into the matmul epilogue
    x = linear(attn, p["w_out"], p["b_out"], residual=x)
    # LN2 + FC1 + QuickGELU fused
    h = ln_linear(x, p["ln2_g"], p["ln2_b"], p["w_fc1"], p["b_fc1"], act="quick_gelu")
    # FC2 + residual add fused
    return linear(h, p["w_fc2"], p["b_fc2"], residual=x)


def transformer(x, layers, n_heads, causal):
    for p in layers:
        x = resblock(x, p, n_heads, causal)
    return x


def image_encoder(image, vp, cfg):
    B, C, H, W = image.shape
    p = cfg["patch"]
    gh, gw = H // p, W // p
    x = image.astype(vp["conv1_w"].dtype)            # image.type(self.dtype)
    # conv1 (kernel == stride, no bias) == patchify + matmul
    patches = x.reshape(B, C, gh, p, gw, p).transpose(0, 2, 4, 1, 3, 5)
    patches = patches.reshape(B * gh * gw, C * p * p)
    x = pallas_matmul(patches, vp["conv1_w"]).reshape(B, gh * gw, -1)
    cls = jnp.broadcast_to(vp["class_embedding"][None, None, :], (B, 1, x.shape[-1]))
    x = jnp.concatenate([cls, x], axis=1)
    x = x + vp["pos_emb"][None]
    x = layernorm(x, vp["ln_pre_g"], vp["ln_pre_b"])
    x = transformer(x, vp["layers"], cfg["heads_v"], causal=False)
    # ln_post on the CLS token fused with the output projection
    return pallas_ln_matmul(x[:, 0, :], vp["ln_post_g"], vp["ln_post_b"], vp["proj"])


def prompt_learner_forward(tp):
    # class_token_position == 'end', learned_cls=False, batch_size=None
    ctx = tp["ctx"]                                          # (n_ctx, D), dim()==2
    n_cls = tp["token_prefix"].shape[0]
    ctx = jnp.broadcast_to(ctx[None], (n_cls,) + ctx.shape)
    return jnp.concatenate([tp["token_prefix"], ctx, tp["token_suffix"]], axis=1)


def text_encoder(prompts, tokenized_prompts, tp, cfg):
    x = prompts + tp["pos_emb"][None]
    x = transformer(x, tp["layers"], cfg["heads_t"], causal=True)
    eot = jnp.argmax(tokenized_prompts, axis=-1)             # (n_cls,)
    # row-wise LN commutes with the EOT gather, so gather first, then fuse
    # ln_final with the text projection.
    x_eot = x[jnp.arange(x.shape[0]), eot]                   # (n_cls, D)
    return pallas_ln_matmul(x_eot, tp["ln_final_g"], tp["ln_final_b"],
                            tp["text_projection"])           # (n_cls, E)


def clip_inference(image, params, cfg):
    img_feat = image_encoder(image, params["visual"], cfg)
    prompts = prompt_learner_forward(params["text"])
    txt_feat = text_encoder(prompts, params["text"]["tokenized_prompts"],
                            params["text"], cfg)
    # L2 normalization of both feature sets + logit_scale.exp() * img @ txt.T
    return pallas_logits(img_feat, txt_feat, cfg["logit_scale"])


# ------------------------------ param init ----------------------------------

def make_layer_params(key, D, D_mlp):
    ks = jax.random.split(key, 4)
    s = 0.02
    f32 = jnp.float32
    return dict(
        ln1_g=jnp.ones((D,), f32), ln1_b=jnp.zeros((D,), f32),
        w_qkv=jax.random.normal(ks[0], (D, 3 * D), f32) * s,
        b_qkv=jnp.zeros((3 * D,), f32),
        w_out=jax.random.normal(ks[1], (D, D), f32) * s,
        b_out=jnp.zeros((D,), f32),
        ln2_g=jnp.ones((D,), f32), ln2_b=jnp.zeros((D,), f32),
        w_fc1=jax.random.normal(ks[2], (D, D_mlp), f32) * s,
        b_fc1=jnp.zeros((D_mlp,), f32),
        w_fc2=jax.random.normal(ks[3], (D_mlp, D), f32) * s,
        b_fc2=jnp.zeros((D,), f32),
    )


def init_params(key, cfg):
    ks = iter(jax.random.split(key, 64))
    s = 0.02
    f32 = jnp.float32
    Dv, Dt, E = cfg["width_v"], cfg["width_t"], cfg["embed_dim"]
    C, p = cfg["in_ch"], cfg["patch"]
    n_patches = (cfg["img_size"] // p) ** 2
    visual = dict(
        conv1_w=jax.random.normal(next(ks), (C * p * p, Dv), f32) * s,
        class_embedding=jax.random.normal(next(ks), (Dv,), f32) * s,
        pos_emb=jax.random.normal(next(ks), (n_patches + 1, Dv), f32) * s,
        ln_pre_g=jnp.ones((Dv,), f32), ln_pre_b=jnp.zeros((Dv,), f32),
        layers=[make_layer_params(next(ks), Dv, 4 * Dv) for _ in range(cfg["layers_v"])],
        ln_post_g=jnp.ones((Dv,), f32), ln_post_b=jnp.zeros((Dv,), f32),
        proj=jax.random.normal(next(ks), (Dv, E), f32) * s,
    )
    n_cls, n_ctx, L = cfg["n_cls"], cfg["n_ctx"], cfg["context_len"]
    # synthetic tokenized prompts: EOT (largest id) lives at 1 + n_ctx + name_len
    tokenized = jnp.zeros((n_cls, L), jnp.int32)
    eot_pos = jnp.arange(n_cls, dtype=jnp.int32) + (1 + n_ctx + 1)
    tokenized = tokenized.at[jnp.arange(n_cls), eot_pos].set(49407)
    text = dict(
        token_prefix=jax.random.normal(next(ks), (n_cls, 1, Dt), f32) * s,
        token_suffix=jax.random.normal(next(ks), (n_cls, L - 1 - n_ctx, Dt), f32) * s,
        ctx=jax.random.normal(next(ks), (n_ctx, Dt), f32) * s,   # nn.Parameter ctx
        pos_emb=jax.random.normal(next(ks), (L, Dt), f32) * s,
        layers=[make_layer_params(next(ks), Dt, 4 * Dt) for _ in range(cfg["layers_t"])],
        ln_final_g=jnp.ones((Dt,), f32), ln_final_b=jnp.zeros((Dt,), f32),
        text_projection=jax.random.normal(next(ks), (Dt, E), f32) * s,
        tokenized_prompts=tokenized,
    )
    return dict(visual=visual, text=text)


def to_bf16(tree):
    """Cast floating-point params/activations to bf16 (MXU-friendly), keep ints."""
    return jax.tree_util.tree_map(
        lambda a: a.astype(jnp.bfloat16)
        if jnp.issubdtype(a.dtype, jnp.floating) else a, tree)


# --------------------------------- main --------------------------------------

if __name__ == "__main__":
    cfg = dict(
        img_size=16, in_ch=3, patch=8,
        width_v=32, heads_v=2, layers_v=2,
        width_t=32, heads_t=2, layers_t=2,
        embed_dim=32,
        n_cls=3, n_ctx=4, context_len=16,
        logit_scale=float(math.log(1.0 / 0.07)),
    )
    key = jax.random.PRNGKey(0)
    k_params, k_img = jax.random.split(key)
    params = to_bf16(init_params(k_params, cfg))
    image = jax.random.normal(k_img, (2, cfg["in_ch"], cfg["img_size"], cfg["img_size"]),
                              jnp.float32)

    run = jax.jit(lambda im: clip_inference(im, params, cfg))
    logits = run(image)
    jax.block_until_ready(logits)
    assert logits.shape == (2, cfg["n_cls"])
    assert logits.dtype == jnp.float32
    assert bool(jnp.all(jnp.isfinite(logits)))
    print("KERNEL_OK")
</pallas_src>

<mosaic_0001>
module attributes {stable_mosaic.version = 11 : i64} {
  func.func @_ln_matmul_kernel(%arg0: i32, %arg1: i32, %arg2: memref<48x32xbf16, #tpu.memory_space<vmem>>, %arg3: memref<1x32xbf16, #tpu.memory_space<vmem>>, %arg4: memref<1x32xbf16, #tpu.memory_space<vmem>>, %arg5: memref<32x96xbf16, #tpu.memory_space<vmem>>, %arg6: memref<1x96xbf16, #tpu.memory_space<vmem>>, %arg7: memref<48x96xbf16, #tpu.memory_space<vmem>>) attributes {dimension_semantics = [#tpu.dimension_semantics<parallel>, #tpu.dimension_semantics<parallel>], iteration_bounds = array<i64: 1, 1>, scalar_prefetch = 0 : i64, scratch_operands = 0 : i64, tpu.core_type = #tpu.core_type<tc>, window_params = [{transform_indices = @transform_0, window_bounds = array<i64: 48, 32>}, {pipeline_mode = #tpu.pipeline_mode<synchronous>, transform_indices = @transform_1, window_bounds = array<i64: 1, 32>}, {pipeline_mode = #tpu.pipeline_mode<synchronous>, transform_indices = @transform_2, window_bounds = array<i64: 1, 32>}, {transform_indices = @transform_3, window_bounds = array<i64: 32, 96>}, {transform_indices = @transform_4, window_bounds = array<i64: 1, 96>}, {transform_indices = @transform_5, window_bounds = array<i64: 48, 96>}]} {
    %c0 = arith.constant 0 : index
    %c0_0 = arith.constant 0 : index
    %0 = vector.load %arg2[%c0, %c0_0] : memref<48x32xbf16, #tpu.memory_space<vmem>>, vector<48x32xbf16>
    %1 = arith.extf %0 : vector<48x32xbf16> to vector<48x32xf32>
    %cst = arith.constant dense<0.000000e+00> : vector<48xf32>
    %2 = vector.multi_reduction <add>, %1, %cst [1] : vector<48x32xf32> to vector<48xf32>
    %3 = vector.shape_cast %2 : vector<48xf32> to vector<48x1xf32>
    %cst_1 = arith.constant 3.200000e+01 : f32
    %4 = vector.broadcast %cst_1 : f32 to vector<48x1xf32>
    %5 = arith.divf %3, %4 : vector<48x1xf32>
    %6 = vector.broadcast %5 : vector<48x1xf32> to vector<48x32xf32>
    %7 = arith.subf %1, %6 : vector<48x32xf32>
    %8 = arith.mulf %7, %7 : vector<48x32xf32>
    %cst_2 = arith.constant dense<0.000000e+00> : vector<48xf32>
    %9 = vector.multi_reduction <add>, %8, %cst_2 [1] : vector<48x32xf32> to vector<48xf32>
    %10 = vector.shape_cast %9 : vector<48xf32> to vector<48x1xf32>
    %cst_3 = arith.constant 3.200000e+01 : f32
    %11 = vector.broadcast %cst_3 : f32 to vector<48x1xf32>
    %12 = arith.divf %10, %11 : vector<48x1xf32>
    %13 = vector.broadcast %5 : vector<48x1xf32> to vector<48x32xf32>
    %14 = arith.subf %1, %13 : vector<48x32xf32>
    %cst_4 = arith.constant 9.99999974E-6 : f32
    %15 = vector.broadcast %cst_4 : f32 to vector<48x1xf32>
    %16 = arith.addf %12, %15 : vector<48x1xf32>
    %17 = math.rsqrt %16 : vector<48x1xf32>
    %18 = vector.broadcast %17 : vector<48x1xf32> to vector<48x32xf32>
    %19 = arith.mulf %14, %18 : vector<48x32xf32>
    %c0_5 = arith.constant 0 : index
    %c0_6 = arith.constant 0 : index
    %20 = vector.load %arg3[%c0_5, %c0_6] : memref<1x32xbf16, #tpu.memory_space<vmem>>, vector<1x32xbf16>
    %21 = arith.extf %20 : vector<1x32xbf16> to vector<1x32xf32>
    %22 = vector.broadcast %21 : vector<1x32xf32> to vector<48x32xf32>
    %23 = arith.mulf %19, %22 : vector<48x32xf32>
    %c0_7 = arith.constant 0 : index
    %c0_8 = arith.constant 0 : index
    %24 = vector.load %arg4[%c0_7, %c0_8] : memref<1x32xbf16, #tpu.memory_space<vmem>>, vector<1x32xbf16>
    %25 = arith.extf %24 : vector<1x32xbf16> to vector<1x32xf32>
    %26 = vector.broadcast %25 : vector<1x32xf32> to vector<48x32xf32>
    %27 = arith.addf %23, %26 : vector<48x32xf32>
    %28 = arith.truncf %27 : vector<48x32xf32> to vector<48x32xbf16>
    %c0_9 = arith.constant 0 : index
    %c0_10 = arith.constant 0 : index
    %29 = vector.load %arg5[%c0_9, %c0_10] : memref<32x96xbf16, #tpu.memory_space<vmem>>, vector<32x96xbf16>
    %cst_11 = arith.constant dense<0.000000e+00> : vector<48x96xf32>
    %30 = tpu.matmul %28, %29, %cst_11 {dimension_numbers = #tpu.dot_dimension_numbers<[1], [0], [0], [1], [0, 0, 1, 1], [], []>} : vector<48x32xbf16>, vector<32x96xbf16>, vector<48x96xf32> -> vector<48x96xf32>
    %c0_12 = arith.constant 0 : index
    %c0_13 = arith.constant 0 : index
    %31 = vector.load %arg6[%c0_12, %c0_13] : memref<1x96xbf16, #tpu.memory_space<vmem>>, vector<1x96xbf16>
    %32 = arith.extf %31 : vector<1x96xbf16> to vector<1x96xf32>
    %33 = vector.broadcast %32 : vector<1x96xf32> to vector<48x96xf32>
    %34 = arith.addf %30, %33 : vector<48x96xf32>
    %35 = arith.truncf %34 : vector<48x96xf32> to vector<48x96xbf16>
    %c0_14 = arith.constant 0 : index
    %c0_15 = arith.constant 0 : index
    %36 = vector.load %arg7[%c0_14, %c0_15] : memref<48x96xbf16, #tpu.memory_space<vmem>>, vector<48x96xbf16>
    tpu.vector_store %arg7[%c0_14, %c0_15], %35 {strides = array<i32>} : memref<48x96xbf16, #tpu.memory_space<vmem>>, vector<48x96xbf16>,
    return
  }
  func.func @transform_0(%arg0: i32, %arg1: i32) -> (i32, i32) {
    %c0_i32 = arith.constant 0 : i32
    %c0_i32_0 = arith.constant 0 : i32
    return %arg0, %c0_i32 : i32, i32
  }
  func.func @transform_1(%arg0: i32, %arg1: i32) -> (i32, i32) {
    %c0_i32 = arith.constant 0 : i32
    %c0_i32_0 = arith.constant 0 : i32
    %c0_i32_1 = arith.constant 0 : i32
    return %c0_i32, %c0_i32_0 : i32, i32
  }
  func.func @transform_2(%arg0: i32, %arg1: i32) -> (i32, i32) {
    %c0_i32 = arith.constant 0 : i32
    %c0_i32_0 = arith.constant 0 : i32
    %c0_i32_1 = arith.constant 0 : i32
    return %c0_i32, %c0_i32_0 : i32, i32
  }
  func.func @transform_3(%arg0: i32, %arg1: i32) -> (i32, i32) {
    %c0_i32 = arith.constant 0 : i32
    %c0_i32_0 = arith.constant 0 : i32
    return %c0_i32, %arg1 : i32, i32
  }
  func.func @transform_4(%arg0: i32, %arg1: i32) -> (i32, i32) {
    %c0_i32 = arith.constant 0 : i32
    %c0_i32_0 = arith.constant 0 : i32
    return %c0_i32, %arg1 : i32, i32
  }
  func.func @transform_5(%arg0: i32, %arg1: i32) -> (i32, i32) {
    %c0_i32 = arith.constant 0 : i32
    return %arg0, %arg1 : i32, i32
  }
}

module attributes {stable_mosaic.version = 11 : i64} {
  func.func @_attention_kernel(%arg0: i32, %arg1: memref<1x16x3x2x16xbf16, #tpu.memory_space<vmem>>, %arg2: memref<1x16x2x16xbf16, #tpu.memory_space<vmem>>) attributes {dimension_semantics = [#tpu.dimension_semantics<parallel>], iteration_bounds = array<i64: 3>, scalar_prefetch = 0 : i64, scratch_operands = 0 : i64, tpu.core_type = #tpu.core_type<tc>, window_params = [{transform_indices = @transform_0, window_bounds = array<i64: 1, 16, 3, 2, 16>}, {transform_indices = @transform_1, window_bounds = array<i64: 1, 16, 2, 16>}]} {
    %0 = tpu.iota {dimensions = array<i32: 0>} : vector<16x16xi32>
    %1 = tpu.iota {dimensions = array<i32: 1>} : vector<16x16xi32>
    %2 = arith.cmpi sle, %1, %0 : vector<16x16xi32>
    %cst = arith.constant 0.000000e+00 : f32
    %cst_0 = arith.constant -1.000000e+30 : f32
    %3 = vector.broadcast %cst : f32 to vector<16x16xf32>
    %4 = vector.broadcast %cst_0 : f32 to vector<16x16xf32>
    %5 = arith.select %2, %3, %4 : vector<16x16xi1>, vector<16x16xf32>
    %c0 = arith.constant 0 : index
    %c0_1 = arith.constant 0 : index
    %c0_2 = arith.constant 0 : index
    %c0_3 = arith.constant 0 : index
    %c0_4 = arith.constant 0 : index
    %6 = vector.load %arg1[%c0, %c0_1, %c0_2, %c0_3, %c0_4] : memref<1x16x3x2x16xbf16, #tpu.memory_space<vmem>>, vector<1x16x1x1x16xbf16>
    %7 = vector.shape_cast %6 : vector<1x16x1x1x16xbf16> to vector<16x16xbf16>
    %c0_5 = arith.constant 0 : index
    %c0_6 = arith.constant 0 : index
    %c1 = arith.constant 1 : index
    %c0_7 = arith.constant 0 : index
    %c0_8 = arith.constant 0 : index
    %8 = vector.load %arg1[%c0_5, %c0_6, %c1, %c0_7, %c0_8] : memref<1x16x3x2x16xbf16, #tpu.memory_space<vmem>>, vector<1x16x1x1x16xbf16>
    %9 = vector.shape_cast %8 : vector<1x16x1x1x16xbf16> to vector<16x16xbf16>
    %c0_9 = arith.constant 0 : index
    %c0_10 = arith.constant 0 : index
    %c2 = arith.constant 2 : index
    %c0_11 = arith.constant 0 : index
    %c0_12 = arith.constant 0 : index
    %10 = vector.load %arg1[%c0_9, %c0_10, %c2, %c0_11, %c0_12] : memref<1x16x3x2x16xbf16, #tpu.memory_space<vmem>>, vector<1x16x1x1x16xbf16>
    %11 = vector.shape_cast %10 : vector<1x16x1x1x16xbf16> to vector<16x16xbf16>
    %cst_13 = arith.constant dense<0.000000e+00> : vector<16x16xf32>
    %12 = tpu.matmul %7, %9, %cst_13 {dimension_numbers = #tpu.dot_dimension_numbers<[1], [1], [0], [0], [0, 0, 1, 0], [], []>} : vector<16x16xbf16>, vector<16x16xbf16>, vector<16x16xf32> -> vector<16x16xf32>
    %cst_14 = arith.constant 2.500000e-01 : f32
    %13 = vector.broadcast %cst_14 : f32 to vector<16x16xf32>
    %14 = arith.mulf %12, %13 : vector<16x16xf32>
    %15 = arith.addf %14, %5 : vector<16x16xf32>
    %cst_15 = arith.constant dense<0xFF800000> : vector<16xf32>
    %16 = vector.multi_reduction <maximumf>, %15, %cst_15 [1] : vector<16x16xf32> to vector<16xf32>
    %17 = vector.shape_cast %16 : vector<16xf32> to vector<16x1xf32>
    %18 = vector.broadcast %17 : vector<16x1xf32> to vector<16x16xf32>
    %19 = arith.subf %15, %18 : vector<16x16xf32>
    %20 = math.exp %19 : vector<16x16xf32>
    %cst_16 = arith.constant dense<0.000000e+00> : vector<16xf32>
    %21 = vector.multi_reduction <add>, %20, %cst_16 [1] : vector<16x16xf32> to vector<16xf32>
    %22 = vector.shape_cast %21 : vector<16xf32> to vector<16x1xf32>
    %23 = tpu.reciprocal %22 {approx = true} : vector<16x1xf32> -> vector<16x1xf32>
    %24 = vector.broadcast %23 : vector<16x1xf32> to vector<16x16xf32>
    %25 = arith.mulf %20, %24 : vector<16x16xf32>
    %26 = arith.truncf %25 : vector<16x16xf32> to vector<16x16xbf16>
    %cst_17 = arith.constant dense<0.000000e+00> : vector<16x16xf32>
    %27 = tpu.matmul %26, %11, %cst_17 {dimension_numbers = #tpu.dot_dimension_numbers<[1], [0], [0], [1], [0, 0, 1, 1], [], []>} : vector<16x16xbf16>, vector<16x16xbf16>, vector<16x16xf32> -> vector<16x16xf32>
    %28 = arith.truncf %27 : vector<16x16xf32> to vector<16x16xbf16>
    %c0_18 = arith.constant 0 : index
    %c0_19 = arith.constant 0 : index
    %c0_20 = arith.constant 0 : index
    %c0_21 = arith.constant 0 : index
    %29 = vector.load %arg2[%c0_18, %c0_19, %c0_20, %c0_21] : memref<1x16x2x16xbf16, #tpu.memory_space<vmem>>, vector<1x16x1x16xbf16>
    %30 = vector.shape_cast %29 : vector<1x16x1x16xbf16> to vector<16x16xbf16>
    %31 = vector.shape_cast %28 : vector<16x16xbf16> to vector<1x16x1x16xbf16>
    tpu.vector_store %arg2[%c0_18, %c0_19, %c0_20, %c0_21], %31 {strides = array<i32>} : memref<1x16x2x16xbf16, #tpu.memory_space<vmem>>, vector<1x16x1x16xbf16>,
    %c0_22 = arith.constant 0 : index
    %c0_23 = arith.constant 0 : index
    %c0_24 = arith.constant 0 : index
    %c1_25 = arith.constant 1 : index
    %c0_26 = arith.constant 0 : index
    %32 = vector.load %arg1[%c0_22, %c0_23, %c0_24, %c1_25, %c0_26] : memref<1x16x3x2x16xbf16, #tpu.memory_space<vmem>>, vector<1x16x1x1x16xbf16>
    %33 = vector.shape_cast %32 : vector<1x16x1x1x16xbf16> to vector<16x16xbf16>
    %c0_27 = arith.constant 0 : index
    %c0_28 = arith.constant 0 : index
    %c1_29 = arith.constant 1 : index
    %c1_30 = arith.constant 1 : index
    %c0_31 = arith.constant 0 : index
    %34 = vector.load %arg1[%c0_27, %c0_28, %c1_29, %c1_30, %c0_31] : memref<1x16x3x2x16xbf16, #tpu.memory_space<vmem>>, vector<1x16x1x1x16xbf16>
    %35 = vector.shape_cast %34 : vector<1x16x1x1x16xbf16> to vector<16x16xbf16>
    %c0_32 = arith.constant 0 : index
    %c0_33 = arith.constant 0 : index
    %c2_34 = arith.constant 2 : index
    %c1_35 = arith.constant 1 : index
    %c0_36 = arith.constant 0 : index
    %36 = vector.load %arg1[%c0_32, %c0_33, %c2_34, %c1_35, %c0_36] : memref<1x16x3x2x16xbf16, #tpu.memory_space<vmem>>, vector<1x16x1x1x16xbf16>
    %37 = vector.shape_cast %36 : vector<1x16x1x1x16xbf16> to vector<16x16xbf16>
    %cst_37 = arith.constant dense<0.000000e+00> : vector<16x16xf32>
    %38 = tpu.matmul %33, %35, %cst_37 {dimension_numbers = #tpu.dot_dimension_numbers<[1], [1], [0], [0], [0, 0, 1, 0], [], []>} : vector<16x16xbf16>, vector<16x16xbf16>, vector<16x16xf32> -> vector<16x16xf32>
    %cst_38 = arith.constant 2.500000e-01 : f32
    %39 = vector.broadcast %cst_38 : f32 to vector<16x16xf32>
    %40 = arith.mulf %38, %39 : vector<16x16xf32>
    %41 = arith.addf %40, %5 : vector<16x16xf32>
    %cst_39 = arith.constant dense<0xFF800000> : vector<16xf32>
    %42 = vector.multi_reduction <maximumf>, %41, %cst_39 [1] : vector<16x16xf32> to vector<16xf32>
    %43 = vector.shape_cast %42 : vector<16xf32> to vector<16x1xf32>
    %44 = vector.broadcast %43 : vector<16x1xf32> to vector<16x16xf32>
    %45 = arith.subf %41, %44 : vector<16x16xf32>
    %46 = math.exp %45 : vector<16x16xf32>
    %cst_40 = arith.constant dense<0.000000e+00> : vector<16xf32>
    %47 = vector.multi_reduction <add>, %46, %cst_40 [1] : vector<16x16xf32> to vector<16xf32>
    %48 = vector.shape_cast %47 : vector<16xf32> to vector<16x1xf32>
    %49 = tpu.reciprocal %48 {approx = true} : vector<16x1xf32> -> vector<16x1xf32>
    %50 = vector.broadcast %49 : vector<16x1xf32> to vector<16x16xf32>
    %51 = arith.mulf %46, %50 : vector<16x16xf32>
    %52 = arith.truncf %51 : vector<16x16xf32> to vector<16x16xbf16>
    %cst_41 = arith.constant dense<0.000000e+00> : vector<16x16xf32>
    %53 = tpu.matmul %52, %37, %cst_41 {dimension_numbers = #tpu.dot_dimension_numbers<[1], [0], [0], [1], [0, 0, 1, 1], [], []>} : vector<16x16xbf16>, vector<16x16xbf16>, vector<16x16xf32> -> vector<16x16xf32>
    %54 = arith.truncf %53 : vector<16x16xf32> to vector<16x16xbf16>
    %c0_42 = arith.constant 0 : index
    %c0_43 = arith.constant 0 : index
    %c1_44 = arith.constant 1 : index
    %c0_45 = arith.constant 0 : index
    %55 = vector.load %arg2[%c0_42, %c0_43, %c1_44, %c0_45] : memref<1x16x2x16xbf16, #tpu.memory_space<vmem>>, vector<1x16x1x16xbf16>
    %56 = vector.shape_cast %55 : vector<1x16x1x16xbf16> to vector<16x16xbf16>
    %57 = vector.shape_cast %54 : vector<16x16xbf16> to vector<1x16x1x16xbf16>
    tpu.vector_store %arg2[%c0_42, %c0_43, %c1_44, %c0_45], %57 {strides = array<i32>} : memref<1x16x2x16xbf16, #tpu.memory_space<vmem>>, vector<1x16x1x16xbf16>,
    return
  }
  func.func @transform_0(%arg0: i32) -> (i32, i32, i32, i32, i32) {
    %c0_i32 = arith.constant 0 : i32
    %c0_i32_0 = arith.constant 0 : i32
    %c0_i32_1 = arith.constant 0 : i32
    %c0_i32_2 = arith.constant 0 : i32
    %c0_i32_3 = arith.constant 0 : i32
    return %arg0, %c0_i32, %c0_i32_0, %c0_i32_1, %c0_i32_2 : i32, i32, i32, i32, i32
  }
  func.func @transform_1(%arg0: i32) -> (i32, i32, i32, i32) {
    %c0_i32 = arith.constant 0 : i32
    %c0_i32_0 = arith.constant 0 : i32
    %c0_i32_1 = arith.constant 0 : i32
    %c0_i32_2 = arith.constant 0 : i32
    return %arg0, %c0_i32, %c0_i32_0, %c0_i32_1 : i32, i32, i32, i32
  }
}

module attributes {stable_mosaic.version = 11 : i64} {
  func.func @_matmul_kernel(%arg0: i32, %arg1: i32, %arg2: i32, %arg3: memref<48x32xbf16, #tpu.memory_space<vmem>>, %arg4: memref<32x32xbf16, #tpu.memory_space<vmem>>, %arg5: memref<1x32xbf16, #tpu.memory_space<vmem>>, %arg6: memref<48x32xbf16, #tpu.memory_space<vmem>>, %arg7: memref<48x32xbf16, #tpu.memory_space<vmem>>, %arg8: memref<48x32xf32, #tpu.memory_space<vmem>>) attributes {dimension_semantics = [#tpu.dimension_semantics<parallel>, #tpu.dimension_semantics<parallel>, #tpu.dimension_semantics<arbitrary>], iteration_bounds = array<i64: 1, 1, 1>, scalar_prefetch = 0 : i64, scratch_operands = 1 : i64, tpu.core_type = #tpu.core_type<tc>, window_params = [{transform_indices = @transform_0, window_bounds = array<i64: 48, 32>}, {transform_indices = @transform_1, window_bounds = array<i64: 32, 32>}, {transform_indices = @transform_2, window_bounds = array<i64: 1, 32>}, {transform_indices = @transform_3, window_bounds = array<i64: 48, 32>}, {transform_indices = @transform_4, window_bounds = array<i64: 48, 32>}]} {
    %c0_i32 = arith.constant 0 : i32
    %0 = arith.cmpi eq, %arg2, %c0_i32 : i32
    %1 = arith.extui %0 : i1 to i32
    %c0_i32_0 = arith.constant 0 : i32
    %2 = arith.cmpi ne, %1, %c0_i32_0 : i32
    scf.if %2 {
      %cst_10 = arith.constant 0.000000e+00 : f32
      %12 = vector.broadcast %cst_10 : f32 to vector<48x32xf32>
      %c0_11 = arith.constant 0 : index
      %c0_12 = arith.constant 0 : index
      %13 = vector.load %arg8[%c0_11, %c0_12] : memref<48x32xf32, #tpu.memory_space<vmem>>, vector<48x32xf32>
      tpu.vector_store %arg8[%c0_11, %c0_12], %12 {strides = array<i32>} : memref<48x32xf32, #tpu.memory_space<vmem>>, vector<48x32xf32>,
    } else {
    }
    %c0 = arith.constant 0 : index
    %c0_1 = arith.constant 0 : index
    %3 = vector.load %arg8[%c0, %c0_1] : memref<48x32xf32, #tpu.memory_space<vmem>>, vector<48x32xf32>
    %c0_2 = arith.constant 0 : index
    %c0_3 = arith.constant 0 : index
    %4 = vector.load %arg3[%c0_2, %c0_3] : memref<48x32xbf16, #tpu.memory_space<vmem>>, vector<48x32xbf16>
    %c0_4 = arith.constant 0 : index
    %c0_5 = arith.constant 0 : index
    %5 = vector.load %arg4[%c0_4, %c0_5] : memref<32x32xbf16, #tpu.memory_space<vmem>>, vector<32x32xbf16>
    %cst = arith.constant dense<0.000000e+00> : vector<48x32xf32>
    %6 = tpu.matmul %4, %5, %cst {dimension_numbers = #tpu.dot_dimension_numbers<[1], [0], [0], [1], [0, 0, 1, 1], [], []>} : vector<48x32xbf16>, vector<32x32xbf16>, vector<48x32xf32> -> vector<48x32xf32>
    %7 = arith.addf %3, %6 : vector<48x32xf32>
    %c0_6 = arith.constant 0 : index
    %c0_7 = arith.constant 0 : index
    %8 = vector.load %arg8[%c0_6, %c0_7] : memref<48x32xf32, #tpu.memory_space<vmem>>, vector<48x32xf32>
    tpu.vector_store %arg8[%c0_6, %c0_7], %7 {strides = array<i32>} : memref<48x32xf32, #tpu.memory_space<vmem>>, vector<48x32xf32>,
    %c0_i32_8 = arith.constant 0 : i32
    %9 = arith.cmpi eq, %arg2, %c0_i32_8 : i32
    %10 = arith.extui %9 : i1 to i32
    %c0_i32_9 = arith.constant 0 : i32
    %11 = arith.cmpi ne, %10, %c0_i32_9 : i32
    scf.if %11 {
      %c0_10 = arith.constant 0 : index
      %c0_11 = arith.constant 0 : index
      %12 = vector.load %arg8[%c0_10, %c0_11] : memref<48x32xf32, #tpu.memory_space<vmem>>, vector<48x32xf32>
      %c0_12 = arith.constant 0 : index
      %c0_13 = arith.constant 0 : index
      %13 = vector.load %arg5[%c0_12, %c0_13] : memref<1x32xbf16, #tpu.memory_space<vmem>>, vector<1x32xbf16>
      %14 = arith.extf %13 : vector<1x32xbf16> to vector<1x32xf32>
      %15 = vector.broadcast %14 : vector<1x32xf32> to vector<48x32xf32>
      %16 = arith.addf %12, %15 : vector<48x32xf32>
      %c0_14 = arith.constant 0 : index
      %c0_15 = arith.constant 0 : index
      %17 = vector.load %arg6[%c0_14, %c0_15] : memref<48x32xbf16, #tpu.memory_space<vmem>>, vector<48x32xbf16>
      %18 = arith.extf %17 : vector<48x32xbf16> to vector<48x32xf32>
      %19 = arith.addf %16, %18 : vector<48x32xf32>
      %20 = arith.truncf %19 : vector<48x32xf32> to vector<48x32xbf16>
      %c0_16 = arith.constant 0 : index
      %c0_17 = arith.constant 0 : index
      %21 = vector.load %arg7[%c0_16, %c0_17] : memref<48x32xbf16, #tpu.memory_space<vmem>>, vector<48x32xbf16>
      tpu.vector_store %arg7[%c0_16, %c0_17], %20 {strides = array<i32>} : memref<48x32xbf16, #tpu.memory_space<vmem>>, vector<48x32xbf16>,
    } else {
    }
    return
  }
  func.func @transform_0(%arg0: i32, %arg1: i32, %arg2: i32) -> (i32, i32) {
    %c0_i32 = arith.constant 0 : i32
    return %arg0, %arg2 : i32, i32
  }
  func.func @transform_1(%arg0: i32, %arg1: i32, %arg2: i32) -> (i32, i32) {
    %c0_i32 = arith.constant 0 : i32
    return %arg2, %arg1 : i32, i32
  }
  func.func @transform_2(%arg0: i32, %arg1: i32, %arg2: i32) -> (i32, i32) {
    %c0_i32 = arith.constant 0 : i32
    %c0_i32_0 = arith.constant 0 : i32
    return %c0_i32, %arg1 : i32, i32
  }
  func.func @transform_3(%arg0: i32, %arg1: i32, %arg2: i32) -> (i32, i32) {
    %c0_i32 = arith.constant 0 : i32
    return %arg0, %arg1 : i32, i32
  }
  func.func @transform_4(%arg0: i32, %arg1: i32, %arg2: i32) -> (i32, i32) {
    %c0_i32 = arith.constant 0 : i32
    return %arg0, %arg1 : i32, i32
  }
}

module attributes {stable_mosaic.version = 11 : i64} {
  func.func @_ln_matmul_kernel(%arg0: i32, %arg1: i32, %arg2: memref<48x32xbf16, #tpu.memory_space<vmem>>, %arg3: memref<1x32xbf16, #tpu.memory_space<vmem>>, %arg4: memref<1x32xbf16, #tpu.memory_space<vmem>>, %arg5: memref<32x128xbf16, #tpu.memory_space<vmem>>, %arg6: memref<1x128xbf16, #tpu.memory_space<vmem>>, %arg7: memref<48x128xbf16, #tpu.memory_space<vmem>>) attributes {dimension_semantics = [#tpu.dimension_semantics<parallel>, #tpu.dimension_semantics<parallel>], iteration_bounds = array<i64: 1, 1>, scalar_prefetch = 0 : i64, scratch_operands = 0 : i64, tpu.core_type = #tpu.core_type<tc>, window_params = [{transform_indices = @transform_0, window_bounds = array<i64: 48, 32>}, {pipeline_mode = #tpu.pipeline_mode<synchronous>, transform_indices = @transform_1, window_bounds = array<i64: 1, 32>}, {pipeline_mode = #tpu.pipeline_mode<synchronous>, transform_indices = @transform_2, window_bounds = array<i64: 1, 32>}, {transform_indices = @transform_3, window_bounds = array<i64: 32, 128>}, {transform_indices = @transform_4, window_bounds = array<i64: 1, 128>}, {transform_indices = @transform_5, window_bounds = array<i64: 48, 128>}]} {
    %c0 = arith.constant 0 : index
    %c0_0 = arith.constant 0 : index
    %0 = vector.load %arg2[%c0, %c0_0] : memref<48x32xbf16, #tpu.memory_space<vmem>>, vector<48x32xbf16>
    %1 = arith.extf %0 : vector<48x32xbf16> to vector<48x32xf32>
    %cst = arith.constant dense<0.000000e+00> : vector<48xf32>
    %2 = vector.multi_reduction <add>, %1, %cst [1] : vector<48x32xf32> to vector<48xf32>
    %3 = vector.shape_cast %2 : vector<48xf32> to vector<48x1xf32>
    %cst_1 = arith.constant 3.200000e+01 : f32
    %4 = vector.broadcast %cst_1 : f32 to vector<48x1xf32>
    %5 = arith.divf %3, %4 : vector<48x1xf32>
    %6 = vector.broadcast %5 : vector<48x1xf32> to vector<48x32xf32>
    %7 = arith.subf %1, %6 : vector<48x32xf32>
    %8 = arith.mulf %7, %7 : vector<48x32xf32>
    %cst_2 = arith.constant dense<0.000000e+00> : vector<48xf32>
    %9 = vector.multi_reduction <add>, %8, %cst_2 [1] : vector<48x32xf32> to vector<48xf32>
    %10 = vector.shape_cast %9 : vector<48xf32> to vector<48x1xf32>
    %cst_3 = arith.constant 3.200000e+01 : f32
    %11 = vector.broadcast %cst_3 : f32 to vector<48x1xf32>
    %12 = arith.divf %10, %11 : vector<48x1xf32>
    %13 = vector.broadcast %5 : vector<48x1xf32> to vector<48x32xf32>
    %14 = arith.subf %1, %13 : vector<48x32xf32>
    %cst_4 = arith.constant 9.99999974E-6 : f32
    %15 = vector.broadcast %cst_4 : f32 to vector<48x1xf32>
    %16 = arith.addf %12, %15 : vector<48x1xf32>
    %17 = math.rsqrt %16 : vector<48x1xf32>
    %18 = vector.broadcast %17 : vector<48x1xf32> to vector<48x32xf32>
    %19 = arith.mulf %14, %18 : vector<48x32xf32>
    %c0_5 = arith.constant 0 : index
    %c0_6 = arith.constant 0 : index
    %20 = vector.load %arg3[%c0_5, %c0_6] : memref<1x32xbf16, #tpu.memory_space<vmem>>, vector<1x32xbf16>
    %21 = arith.extf %20 : vector<1x32xbf16> to vector<1x32xf32>
    %22 = vector.broadcast %21 : vector<1x32xf32> to vector<48x32xf32>
    %23 = arith.mulf %19, %22 : vector<48x32xf32>
    %c0_7 = arith.constant 0 : index
    %c0_8 = arith.constant 0 : index
    %24 = vector.load %arg4[%c0_7, %c0_8] : memref<1x32xbf16, #tpu.memory_space<vmem>>, vector<1x32xbf16>
    %25 = arith.extf %24 : vector<1x32xbf16> to vector<1x32xf32>
    %26 = vector.broadcast %25 : vector<1x32xf32> to vector<48x32xf32>
    %27 = arith.addf %23, %26 : vector<48x32xf32>
    %28 = arith.truncf %27 : vector<48x32xf32> to vector<48x32xbf16>
    %c0_9 = arith.constant 0 : index
    %c0_10 = arith.constant 0 : index
    %29 = vector.load %arg5[%c0_9, %c0_10] : memref<32x128xbf16, #tpu.memory_space<vmem>>, vector<32x128xbf16>
    %cst_11 = arith.constant dense<0.000000e+00> : vector<48x128xf32>
    %30 = tpu.matmul %28, %29, %cst_11 {dimension_numbers = #tpu.dot_dimension_numbers<[1], [0], [0], [1], [0, 0, 1, 1], [], []>} : vector<48x32xbf16>, vector<32x128xbf16>, vector<48x128xf32> -> vector<48x128xf32>
    %c0_12 = arith.constant 0 : index
    %c0_13 = arith.constant 0 : index
    %31 = vector.load %arg6[%c0_12, %c0_13] : memref<1x128xbf16, #tpu.memory_space<vmem>>, vector<1x128xbf16>
    %32 = arith.extf %31 : vector<1x128xbf16> to vector<1x128xf32>
    %33 = vector.broadcast %32 : vector<1x128xf32> to vector<48x128xf32>
    %34 = arith.addf %30, %33 : vector<48x128xf32>
    %cst_14 = arith.constant 1.702000e+00 : f32
    %35 = vector.broadcast %cst_14 : f32 to vector<48x128xf32>
    %36 = arith.mulf %35, %34 : vector<48x128xf32>
    %37 = arith.negf %36 : vector<48x128xf32>
    %38 = math.exp %37 : vector<48x128xf32>
    %cst_15 = arith.constant 1.000000e+00 : f32
    %39 = vector.broadcast %cst_15 : f32 to vector<48x128xf32>
    %40 = arith.addf %39, %38 : vector<48x128xf32>
    %41 = arith.divf %39, %40 : vector<48x128xf32>
    %42 = arith.mulf %34, %41 : vector<48x128xf32>
    %43 = arith.truncf %42 : vector<48x128xf32> to vector<48x128xbf16>
    %c0_16 = arith.constant 0 : index
    %c0_17 = arith.constant 0 : index
    %44 = vector.load %arg7[%c0_16, %c0_17] : memref<48x128xbf16, #tpu.memory_space<vmem>>, vector<48x128xbf16>
    tpu.vector_store %arg7[%c0_16, %c0_17], %43 {strides = array<i32>} : memref<48x128xbf16, #tpu.memory_space<vmem>>, vector<48x128xbf16>,
    return
  }
  func.func @transform_0(%arg0: i32, %arg1: i32) -> (i32, i32) {
    %c0_i32 = arith.constant 0 : i32
    %c0_i32_0 = arith.constant 0 : i32
    return %arg0, %c0_i32 : i32, i32
  }
  func.func @transform_1(%arg0: i32, %arg1: i32) -> (i32, i32) {
    %c0_i32 = arith.constant 0 : i32
    %c0_i32_0 = arith.constant 0 : i32
    %c0_i32_1 = arith.constant 0 : i32
    return %c0_i32, %c0_i32_0 : i32, i32
  }
  func.func @transform_2(%arg0: i32, %arg1: i32) -> (i32, i32) {
    %c0_i32 = arith.constant 0 : i32
    %c0_i32_0 = arith.constant 0 : i32
    %c0_i32_1 = arith.constant 0 : i32
    return %c0_i32, %c0_i32_0 : i32, i32
  }
  func.func @transform_3(%arg0: i32, %arg1: i32) -> (i32, i32) {
    %c0_i32 = arith.constant 0 : i32
    %c0_i32_0 = arith.constant 0 : i32
    return %c0_i32, %arg1 : i32, i32
  }
  func.func @transform_4(%arg0: i32, %arg1: i32) -> (i32, i32) {
    %c0_i32 = arith.constant 0 : i32
    %c0_i32_0 = arith.constant 0 : i32
    return %c0_i32, %arg1 : i32, i32
  }
  func.func @transform_5(%arg0: i32, %arg1: i32) -> (i32, i32) {
    %c0_i32 = arith.constant 0 : i32
    return %arg0, %arg1 : i32, i32
  }
}

module attributes {stable_mosaic.version = 11 : i64} {
  func.func @_matmul_kernel(%arg0: i32, %arg1: i32, %arg2: i32, %arg3: memref<48x128xbf16, #tpu.memory_space<vmem>>, %arg4: memref<128x32xbf16, #tpu.memory_space<vmem>>, %arg5: memref<1x32xbf16, #tpu.memory_space<vmem>>, %arg6: memref<48x32xbf16, #tpu.memory_space<vmem>>, %arg7: memref<48x32xbf16, #tpu.memory_space<vmem>>, %arg8: memref<48x32xf32, #tpu.memory_space<vmem>>) attributes {dimension_semantics = [#tpu.dimension_semantics<parallel>, #tpu.dimension_semantics<parallel>, #tpu.dimension_semantics<arbitrary>], iteration_bounds = array<i64: 1, 1, 1>, scalar_prefetch = 0 : i64, scratch_operands = 1 : i64, tpu.core_type = #tpu.core_type<tc>, window_params = [{transform_indices = @transform_0, window_bounds = array<i64: 48, 128>}, {transform_indices = @transform_1, window_bounds = array<i64: 128, 32>}, {transform_indices = @transform_2, window_bounds = array<i64: 1, 32>}, {transform_indices = @transform_3, window_bounds = array<i64: 48, 32>}, {transform_indices = @transform_4, window_bounds = array<i64: 48, 32>}]} {
    %c0_i32 = arith.constant 0 : i32
    %0 = arith.cmpi eq, %arg2, %c0_i32 : i32
    %1 = arith.extui %0 : i1 to i32
    %c0_i32_0 = arith.constant 0 : i32
    %2 = arith.cmpi ne, %1, %c0_i32_0 : i32
    scf.if %2 {
      %cst_10 = arith.constant 0.000000e+00 : f32
      %12 = vector.broadcast %cst_10 : f32 to vector<48x32xf32>
      %c0_11 = arith.constant 0 : index
      %c0_12 = arith.constant 0 : index
      %13 = vector.load %arg8[%c0_11, %c0_12] : memref<48x32xf32, #tpu.memory_space<vmem>>, vector<48x32xf32>
      tpu.vector_store %arg8[%c0_11, %c0_12], %12 {strides = array<i32>} : memref<48x32xf32, #tpu.memory_space<vmem>>, vector<48x32xf32>,
    } else {
    }
    %c0 = arith.constant 0 : index
    %c0_1 = arith.constant 0 : index
    %3 = vector.load %arg8[%c0, %c0_1] : memref<48x32xf32, #tpu.memory_space<vmem>>, vector<48x32xf32>
    %c0_2 = arith.constant 0 : index
    %c0_3 = arith.constant 0 : index
    %4 = vector.load %arg3[%c0_2, %c0_3] : memref<48x128xbf16, #tpu.memory_space<vmem>>, vector<48x128xbf16>
    %c0_4 = arith.constant 0 : index
    %c0_5 = arith.constant 0 : index
    %5 = vector.load %arg4[%c0_4, %c0_5] : memref<128x32xbf16, #tpu.memory_space<vmem>>, vector<128x32xbf16>
    %cst = arith.constant dense<0.000000e+00> : vector<48x32xf32>
    %6 = tpu.matmul %4, %5, %cst {dimension_numbers = #tpu.dot_dimension_numbers<[1], [0], [0], [1], [0, 0, 1, 1], [], []>} : vector<48x128xbf16>, vector<128x32xbf16>, vector<48x32xf32> -> vector<48x32xf32>
    %7 = arith.addf %3, %6 : vector<48x32xf32>
    %c0_6 = arith.constant 0 : index
    %c0_7 = arith.constant 0 : index
    %8 = vector.load %arg8[%c0_6, %c0_7] : memref<48x32xf32, #tpu.memory_space<vmem>>, vector<48x32xf32>
    tpu.vector_store %arg8[%c0_6, %c0_7], %7 {strides = array<i32>} : memref<48x32xf32, #tpu.memory_space<vmem>>, vector<48x32xf32>,
    %c0_i32_8 = arith.constant 0 : i32
    %9 = arith.cmpi eq, %arg2, %c0_i32_8 : i32
    %10 = arith.extui %9 : i1 to i32
    %c0_i32_9 = arith.constant 0 : i32
    %11 = arith.cmpi ne, %10, %c0_i32_9 : i32
    scf.if %11 {
      %c0_10 = arith.constant 0 : index
      %c0_11 = arith.constant 0 : index
      %12 = vector.load %arg8[%c0_10, %c0_11] : memref<48x32xf32, #tpu.memory_space<vmem>>, vector<48x32xf32>
      %c0_12 = arith.constant 0 : index
      %c0_13 = arith.constant 0 : index
      %13 = vector.load %arg5[%c0_12, %c0_13] : memref<1x32xbf16, #tpu.memory_space<vmem>>, vector<1x32xbf16>
      %14 = arith.extf %13 : vector<1x32xbf16> to vector<1x32xf32>
      %15 = vector.broadcast %14 : vector<1x32xf32> to vector<48x32xf32>
      %16 = arith.addf %12, %15 : vector<48x32xf32>
      %c0_14 = arith.constant 0 : index
      %c0_15 = arith.constant 0 : index
      %17 = vector.load %arg6[%c0_14, %c0_15] : memref<48x32xbf16, #tpu.memory_space<vmem>>, vector<48x32xbf16>
      %18 = arith.extf %17 : vector<48x32xbf16> to vector<48x32xf32>
      %19 = arith.addf %16, %18 : vector<48x32xf32>
      %20 = arith.truncf %19 : vector<48x32xf32> to vector<48x32xbf16>
      %c0_16 = arith.constant 0 : index
      %c0_17 = arith.constant 0 : index
      %21 = vector.load %arg7[%c0_16, %c0_17] : memref<48x32xbf16, #tpu.memory_space<vmem>>, vector<48x32xbf16>
      tpu.vector_store %arg7[%c0_16, %c0_17], %20 {strides = array<i32>} : memref<48x32xbf16, #tpu.memory_space<vmem>>, vector<48x32xbf16>,
    } else {
    }
    return
  }
  func.func @transform_0(%arg0: i32, %arg1: i32, %arg2: i32) -> (i32, i32) {
    %c0_i32 = arith.constant 0 : i32
    return %arg0, %arg2 : i32, i32
  }
  func.func @transform_1(%arg0: i32, %arg1: i32, %arg2: i32) -> (i32, i32) {
    %c0_i32 = arith.constant 0 : i32
    return %arg2, %arg1 : i32, i32
  }
  func.func @transform_2(%arg0: i32, %arg1: i32, %arg2: i32) -> (i32, i32) {
    %c0_i32 = arith.constant 0 : i32
    %c0_i32_0 = arith.constant 0 : i32
    return %c0_i32, %arg1 : i32, i32
  }
  func.func @transform_3(%arg0: i32, %arg1: i32, %arg2: i32) -> (i32, i32) {
    %c0_i32 = arith.constant 0 : i32
    return %arg0, %arg1 : i32, i32
  }
  func.func @transform_4(%arg0: i32, %arg1: i32, %arg2: i32) -> (i32, i32) {
    %c0_i32 = arith.constant 0 : i32
    return %arg0, %arg1 : i32, i32
  }
}

module attributes {stable_mosaic.version = 11 : i64} {
  func.func @_ln_matmul_kernel(%arg0: i32, %arg1: i32, %arg2: memref<48x32xbf16, #tpu.memory_space<vmem>>, %arg3: memref<1x32xbf16, #tpu.memory_space<vmem>>, %arg4: memref<1x32xbf16, #tpu.memory_space<vmem>>, %arg5: memref<32x96xbf16, #tpu.memory_space<vmem>>, %arg6: memref<1x96xbf16, #tpu.memory_space<vmem>>, %arg7: memref<48x96xbf16, #tpu.memory_space<vmem>>) attributes {dimension_semantics = [#tpu.dimension_semantics<parallel>, #tpu.dimension_semantics<parallel>], iteration_bounds = array<i64: 1, 1>, scalar_prefetch = 0 : i64, scratch_operands = 0 : i64, tpu.core_type = #tpu.core_type<tc>, window_params = [{transform_indices = @transform_0, window_bounds = array<i64: 48, 32>}, {pipeline_mode = #tpu.pipeline_mode<synchronous>, transform_indices = @transform_1, window_bounds = array<i64: 1, 32>}, {pipeline_mode = #tpu.pipeline_mode<synchronous>, transform_indices = @transform_2, window_bounds = array<i64: 1, 32>}, {transform_indices = @transform_3, window_bounds = array<i64: 32, 96>}, {transform_indices = @transform_4, window_bounds = array<i64: 1, 96>}, {transform_indices = @transform_5, window_bounds = array<i64: 48, 96>}]} {
    %c0 = arith.constant 0 : index
    %c0_0 = arith.constant 0 : index
    %0 = vector.load %arg2[%c0, %c0_0] : memref<48x32xbf16, #tpu.memory_space<vmem>>, vector<48x32xbf16>
    %1 = arith.extf %0 : vector<48x32xbf16> to vector<48x32xf32>
    %cst = arith.constant dense<0.000000e+00> : vector<48xf32>
    %2 = vector.multi_reduction <add>, %1, %cst [1] : vector<48x32xf32> to vector<48xf32>
    %3 = vector.shape_cast %2 : vector<48xf32> to vector<48x1xf32>
    %cst_1 = arith.constant 3.200000e+01 : f32
    %4 = vector.broadcast %cst_1 : f32 to vector<48x1xf32>
    %5 = arith.divf %3, %4 : vector<48x1xf32>
    %6 = vector.broadcast %5 : vector<48x1xf32> to vector<48x32xf32>
    %7 = arith.subf %1, %6 : vector<48x32xf32>
    %8 = arith.mulf %7, %7 : vector<48x32xf32>
    %cst_2 = arith.constant dense<0.000000e+00> : vector<48xf32>
    %9 = vector.multi_reduction <add>, %8, %cst_2 [1] : vector<48x32xf32> to vector<48xf32>
    %10 = vector.shape_cast %9 : vector<48xf32> to vector<48x1xf32>
    %cst_3 = arith.constant 3.200000e+01 : f32
    %11 = vector.broadcast %cst_3 : f32 to vector<48x1xf32>
    %12 = arith.divf %10, %11 : vector<48x1xf32>
    %13 = vector.broadcast %5 : vector<48x1xf32> to vector<48x32xf32>
    %14 = arith.subf %1, %13 : vector<48x32xf32>
    %cst_4 = arith.constant 9.99999974E-6 : f32
    %15 = vector.broadcast %cst_4 : f32 to vector<48x1xf32>
    %16 = arith.addf %12, %15 : vector<48x1xf32>
    %17 = math.rsqrt %16 : vector<48x1xf32>
    %18 = vector.broadcast %17 : vector<48x1xf32> to vector<48x32xf32>
    %19 = arith.mulf %14, %18 : vector<48x32xf32>
    %c0_5 = arith.constant 0 : index
    %c0_6 = arith.constant 0 : index
    %20 = vector.load %arg3[%c0_5, %c0_6] : memref<1x32xbf16, #tpu.memory_space<vmem>>, vector<1x32xbf16>
    %21 = arith.extf %20 : vector<1x32xbf16> to vector<1x32xf32>
    %22 = vector.broadcast %21 : vector<1x32xf32> to vector<48x32xf32>
    %23 = arith.mulf %19, %22 : vector<48x32xf32>
    %c0_7 = arith.constant 0 : index
    %c0_8 = arith.constant 0 : index
    %24 = vector.load %arg4[%c0_7, %c0_8] : memref<1x32xbf16, #tpu.memory_space<vmem>>, vector<1x32xbf16>
    %25 = arith.extf %24 : vector<1x32xbf16> to vector<1x32xf32>
    %26 = vector.broadcast %25 : vector<1x32xf32> to vector<48x32xf32>
    %27 = arith.addf %23, %26 : vector<48x32xf32>
    %28 = arith.truncf %27 : vector<48x32xf32> to vector<48x32xbf16>
    %c0_9 = arith.constant 0 : index
    %c0_10 = arith.constant 0 : index
    %29 = vector.load %arg5[%c0_9, %c0_10] : memref<32x96xbf16, #tpu.memory_space<vmem>>, vector<32x96xbf16>
    %cst_11 = arith.constant dense<0.000000e+00> : vector<48x96xf32>
    %30 = tpu.matmul %28, %29, %cst_11 {dimension_numbers = #tpu.dot_dimension_numbers<[1], [0], [0], [1], [0, 0, 1, 1], [], []>} : vector<48x32xbf16>, vector<32x96xbf16>, vector<48x96xf32> -> vector<48x96xf32>
    %c0_12 = arith.constant 0 : index
    %c0_13 = arith.constant 0 : index
    %31 = vector.load %arg6[%c0_12, %c0_13] : memref<1x96xbf16, #tpu.memory_space<vmem>>, vector<1x96xbf16>
    %32 = arith.extf %31 : vector<1x96xbf16> to vector<1x96xf32>
    %33 = vector.broadcast %32 : vector<1x96xf32> to vector<48x96xf32>
    %34 = arith.addf %30, %33 : vector<48x96xf32>
    %35 = arith.truncf %34 : vector<48x96xf32> to vector<48x96xbf16>
    %c0_14 = arith.constant 0 : index
    %c0_15 = arith.constant 0 : index
    %36 = vector.load %arg7[%c0_14, %c0_15] : memref<48x96xbf16, #tpu.memory_space<vmem>>, vector<48x96xbf16>
    tpu.vector_store %arg7[%c0_14, %c0_15], %35 {strides = array<i32>} : memref<48x96xbf16, #tpu.memory_space<vmem>>, vector<48x96xbf16>,
    return
  }
  func.func @transform_0(%arg0: i32, %arg1: i32) -> (i32, i32) {
    %c0_i32 = arith.constant 0 : i32
    %c0_i32_0 = arith.constant 0 : i32
    return %arg0, %c0_i32 : i32, i32
  }
  func.func @transform_1(%arg0: i32, %arg1: i32) -> (i32, i32) {
    %c0_i32 = arith.constant 0 : i32
    %c0_i32_0 = arith.constant 0 : i32
    %c0_i32_1 = arith.constant 0 : i32
    return %c0_i32, %c0_i32_0 : i32, i32
  }
  func.func @transform_2(%arg0: i32, %arg1: i32) -> (i32, i32) {
    %c0_i32 = arith.constant 0 : i32
    %c0_i32_0 = arith.constant 0 : i32
    %c0_i32_1 = arith.constant 0 : i32
    return %c0_i32, %c0_i32_0 : i32, i32
  }
  func.func @transform_3(%arg0: i32, %arg1: i32) -> (i32, i32) {
    %c0_i32 = arith.constant 0 : i32
    %c0_i32_0 = arith.constant 0 : i32
    return %c0_i32, %arg1 : i32, i32
  }
  func.func @transform_4(%arg0: i32, %arg1: i32) -> (i32, i32) {
    %c0_i32 = arith.constant 0 : i32
    %c0_i32_0 = arith.constant 0 : i32
    return %c0_i32, %arg1 : i32, i32
  }
  func.func @transform_5(%arg0: i32, %arg1: i32) -> (i32, i32) {
    %c0_i32 = arith.constant 0 : i32
    return %arg0, %arg1 : i32, i32
  }
}

module attributes {stable_mosaic.version = 11 : i64} {
  func.func @_ln_matmul_kernel(%arg0: i32, %arg1: i32, %arg2: memref<3x32xbf16, #tpu.memory_space<vmem>>, %arg3: memref<1x32xbf16, #tpu.memory_space<vmem>>, %arg4: memref<1x32xbf16, #tpu.memory_space<vmem>>, %arg5: memref<32x32xbf16, #tpu.memory_space<vmem>>, %arg6: memref<3x32xbf16, #tpu.memory_space<vmem>>) attributes {dimension_semantics = [#tpu.dimension_semantics<parallel>, #tpu.dimension_semantics<parallel>], iteration_bounds = array<i64: 1, 1>, scalar_prefetch = 0 : i64, scratch_operands = 0 : i64, tpu.core_type = #tpu.core_type<tc>, window_params = [{transform_indices = @transform_0, window_bounds = array<i64: 3, 32>}, {pipeline_mode = #tpu.pipeline_mode<synchronous>, transform_indices = @transform_1, window_bounds = array<i64: 1, 32>}, {pipeline_mode = #tpu.pipeline_mode<synchronous>, transform_indices = @transform_2, window_bounds = array<i64: 1, 32>}, {transform_indices = @transform_3, window_bounds = array<i64: 32, 32>}, {transform_indices = @transform_4, window_bounds = array<i64: 3, 32>}]} {
    %c0 = arith.constant 0 : index
    %c0_0 = arith.constant 0 : index
    %0 = vector.load %arg2[%c0, %c0_0] : memref<3x32xbf16, #tpu.memory_space<vmem>>, vector<3x32xbf16>
    %1 = arith.extf %0 : vector<3x32xbf16> to vector<3x32xf32>
    %cst = arith.constant dense<0.000000e+00> : vector<3xf32>
    %2 = vector.multi_reduction <add>, %1, %cst [1] : vector<3x32xf32> to vector<3xf32>
    %3 = vector.shape_cast %2 : vector<3xf32> to vector<3x1xf32>
    %cst_1 = arith.constant 3.200000e+01 : f32
    %4 = vector.broadcast %cst_1 : f32 to vector<3x1xf32>
    %5 = arith.divf %3, %4 : vector<3x1xf32>
    %6 = vector.broadcast %5 : vector<3x1xf32> to vector<3x32xf32>
    %7 = arith.subf %1, %6 : vector<3x32xf32>
    %8 = arith.mulf %7, %7 : vector<3x32xf32>
    %cst_2 = arith.constant dense<0.000000e+00> : vector<3xf32>
    %9 = vector.multi_reduction <add>, %8, %cst_2 [1] : vector<3x32xf32> to vector<3xf32>
    %10 = vector.shape_cast %9 : vector<3xf32> to vector<3x1xf32>
    %cst_3 = arith.constant 3.200000e+01 : f32
    %11 = vector.broadcast %cst_3 : f32 to vector<3x1xf32>
    %12 = arith.divf %10, %11 : vector<3x1xf32>
    %13 = vector.broadcast %5 : vector<3x1xf32> to vector<3x32xf32>
    %14 = arith.subf %1, %13 : vector<3x32xf32>
    %cst_4 = arith.constant 9.99999974E-6 : f32
    %15 = vector.broadcast %cst_4 : f32 to vector<3x1xf32>
    %16 = arith.addf %12, %15 : vector<3x1xf32>
    %17 = math.rsqrt %16 : vector<3x1xf32>
    %18 = vector.broadcast %17 : vector<3x1xf32> to vector<3x32xf32>
    %19 = arith.mulf %14, %18 : vector<3x32xf32>
    %c0_5 = arith.constant 0 : index
    %c0_6 = arith.constant 0 : index
    %20 = vector.load %arg3[%c0_5, %c0_6] : memref<1x32xbf16, #tpu.memory_space<vmem>>, vector<1x32xbf16>
    %21 = arith.extf %20 : vector<1x32xbf16> to vector<1x32xf32>
    %22 = vector.broadcast %21 : vector<1x32xf32> to vector<3x32xf32>
    %23 = arith.mulf %19, %22 : vector<3x32xf32>
    %c0_7 = arith.constant 0 : index
    %c0_8 = arith.constant 0 : index
    %24 = vector.load %arg4[%c0_7, %c0_8] : memref<1x32xbf16, #tpu.memory_space<vmem>>, vector<1x32xbf16>
    %25 = arith.extf %24 : vector<1x32xbf16> to vector<1x32xf32>
    %26 = vector.broadcast %25 : vector<1x32xf32> to vector<3x32xf32>
    %27 = arith.addf %23, %26 : vector<3x32xf32>
    %28 = arith.truncf %27 : vector<3x32xf32> to vector<3x32xbf16>
    %c0_9 = arith.constant 0 : index
    %c0_10 = arith.constant 0 : index
    %29 = vector.load %arg5[%c0_9, %c0_10] : memref<32x32xbf16, #tpu.memory_space<vmem>>, vector<32x32xbf16>
    %cst_11 = arith.constant dense<0.000000e+00> : vector<3x32xf32>
    %30 = tpu.matmul %28, %29, %cst_11 {dimension_numbers = #tpu.dot_dimension_numbers<[1], [0], [0], [1], [0, 0, 1, 1], [], []>} : vector<3x32xbf16>, vector<32x32xbf16>, vector<3x32xf32> -> vector<3x32xf32>
    %31 = arith.truncf %30 : vector<3x32xf32> to vector<3x32xbf16>
    %c0_12 = arith.constant 0 : index
    %c0_13 = arith.constant 0 : index
    %32 = vector.load %arg6[%c0_12, %c0_13] : memref<3x32xbf16, #tpu.memory_space<vmem>>, vector<3x32xbf16>
    tpu.vector_store %arg6[%c0_12, %c0_13], %31 {strides = array<i32>} : memref<3x32xbf16, #tpu.memory_space<vmem>>, vector<3x32xbf16>,
    return
  }
  func.func @transform_0(%arg0: i32, %arg1: i32) -> (i32, i32) {
    %c0_i32 = arith.constant 0 : i32
    %c0_i32_0 = arith.constant 0 : i32
    return %arg0, %c0_i32 : i32, i32
  }
  func.func @transform_1(%arg0: i32, %arg1: i32) -> (i32, i32) {
    %c0_i32 = arith.constant 0 : i32
    %c0_i32_0 = arith.constant 0 : i32
    %c0_i32_1 = arith.constant 0 : i32
    return %c0_i32, %c0_i32_0 : i32, i32
  }
  func.func @transform_2(%arg0: i32, %arg1: i32) -> (i32, i32) {
    %c0_i32 = arith.constant 0 : i32
    %c0_i32_0 = arith.constant 0 : i32
    %c0_i32_1 = arith.constant 0 : i32
    return %c0_i32, %c0_i32_0 : i32, i32
  }
  func.func @transform_3(%arg0: i32, %arg1: i32) -> (i32, i32) {
    %c0_i32 = arith.constant 0 : i32
    %c0_i32_0 = arith.constant 0 : i32
    return %c0_i32, %arg1 : i32, i32
  }
  func.func @transform_4(%arg0: i32, %arg1: i32) -> (i32, i32) {
    %c0_i32 = arith.constant 0 : i32
    return %arg0, %arg1 : i32, i32
  }
}

module attributes {stable_mosaic.version = 11 : i64} {
  func.func @_matmul_kernel(%arg0: i32, %arg1: i32, %arg2: i32, %arg3: memref<8x192xbf16, #tpu.memory_space<vmem>>, %arg4: memref<192x32xbf16, #tpu.memory_space<vmem>>, %arg5: memref<8x32xbf16, #tpu.memory_space<vmem>>, %arg6: memref<8x32xf32, #tpu.memory_space<vmem>>) attributes {dimension_semantics = [#tpu.dimension_semantics<parallel>, #tpu.dimension_semantics<parallel>, #tpu.dimension_semantics<arbitrary>], iteration_bounds = array<i64: 1, 1, 1>, scalar_prefetch = 0 : i64, scratch_operands = 1 : i64, tpu.core_type = #tpu.core_type<tc>, window_params = [{transform_indices = @transform_0, window_bounds = array<i64: 8, 192>}, {transform_indices = @transform_1, window_bounds = array<i64: 192, 32>}, {transform_indices = @transform_2, window_bounds = array<i64: 8, 32>}]} {
    %c0_i32 = arith.constant 0 : i32
    %0 = arith.cmpi eq, %arg2, %c0_i32 : i32
    %1 = arith.extui %0 : i1 to i32
    %c0_i32_0 = arith.constant 0 : i32
    %2 = arith.cmpi ne, %1, %c0_i32_0 : i32
    scf.if %2 {
      %cst_10 = arith.constant 0.000000e+00 : f32
      %12 = vector.broadcast %cst_10 : f32 to vector<8x32xf32>
      %c0_11 = arith.constant 0 : index
      %c0_12 = arith.constant 0 : index
      %13 = vector.load %arg6[%c0_11, %c0_12] : memref<8x32xf32, #tpu.memory_space<vmem>>, vector<8x32xf32>
      tpu.vector_store %arg6[%c0_11, %c0_12], %12 {strides = array<i32>} : memref<8x32xf32, #tpu.memory_space<vmem>>, vector<8x32xf32>,
    } else {
    }
    %c0 = arith.constant 0 : index
    %c0_1 = arith.constant 0 : index
    %3 = vector.load %arg6[%c0, %c0_1] : memref<8x32xf32, #tpu.memory_space<vmem>>, vector<8x32xf32>
    %c0_2 = arith.constant 0 : index
    %c0_3 = arith.constant 0 : index
    %4 = vector.load %arg3[%c0_2, %c0_3] : memref<8x192xbf16, #tpu.memory_space<vmem>>, vector<8x192xbf16>
    %c0_4 = arith.constant 0 : index
    %c0_5 = arith.constant 0 : index
    %5 = vector.load %arg4[%c0_4, %c0_5] : memref<192x32xbf16, #tpu.memory_space<vmem>>, vector<192x32xbf16>
    %cst = arith.constant dense<0.000000e+00> : vector<8x32xf32>
    %6 = tpu.matmul %4, %5, %cst {dimension_numbers = #tpu.dot_dimension_numbers<[1], [0], [0], [1], [0, 0, 1, 1], [], []>} : vector<8x192xbf16>, vector<192x32xbf16>, vector<8x32xf32> -> vector<8x32xf32>
    %7 = arith.addf %3, %6 : vector<8x32xf32>
    %c0_6 = arith.constant 0 : index
    %c0_7 = arith.constant 0 : index
    %8 = vector.load %arg6[%c0_6, %c0_7] : memref<8x32xf32, #tpu.memory_space<vmem>>, vector<8x32xf32>
    tpu.vector_store %arg6[%c0_6, %c0_7], %7 {strides = array<i32>} : memref<8x32xf32, #tpu.memory_space<vmem>>, vector<8x32xf32>,
    %c0_i32_8 = arith.constant 0 : i32
    %9 = arith.cmpi eq, %arg2, %c0_i32_8 : i32
    %10 = arith.extui %9 : i1 to i32
    %c0_i32_9 = arith.constant 0 : i32
    %11 = arith.cmpi ne, %10, %c0_i32_9 : i32
    scf.if %11 {
      %c0_10 = arith.constant 0 : index
      %c0_11 = arith.constant 0 : index
      %12 = vector.load %arg6[%c0_10, %c0_11] : memref<8x32xf32, #tpu.memory_space<vmem>>, vector<8x32xf32>
      %13 = arith.truncf %12 : vector<8x32xf32> to vector<8x32xbf16>
      %c0_12 = arith.constant 0 : index
      %c0_13 = arith.constant 0 : index
      %14 = vector.load %arg5[%c0_12, %c0_13] : memref<8x32xbf16, #tpu.memory_space<vmem>>, vector<8x32xbf16>
      tpu.vector_store %arg5[%c0_12, %c0_13], %13 {strides = array<i32>} : memref<8x32xbf16, #tpu.memory_space<vmem>>, vector<8x32xbf16>,
    } else {
    }
    return
  }
  func.func @transform_0(%arg0: i32, %arg1: i32, %arg2: i32) -> (i32, i32) {
    %c0_i32 = arith.constant 0 : i32
    return %arg0, %arg2 : i32, i32
  }
  func.func @transform_1(%arg0: i32, %arg1: i32, %arg2: i32) -> (i32, i32) {
    %c0_i32 = arith.constant 0 : i32
    return %arg2, %arg1 : i32, i32
  }
  func.func @transform_2(%arg0: i32, %arg1: i32, %arg2: i32) -> (i32, i32) {
    %c0_i32 = arith.constant 0 : i32
    return %arg0, %arg1 : i32, i32
  }
}

module attributes {stable_mosaic.version = 11 : i64} {
  func.func @_layernorm_kernel(%arg0: i32, %arg1: memref<10x32xbf16, #tpu.memory_space<vmem>>, %arg2: memref<1x32xbf16, #tpu.memory_space<vmem>>, %arg3: memref<1x32xbf16, #tpu.memory_space<vmem>>, %arg4: memref<10x32xbf16, #tpu.memory_space<vmem>>) attributes {dimension_semantics = [#tpu.dimension_semantics<parallel>], iteration_bounds = array<i64: 1>, scalar_prefetch = 0 : i64, scratch_operands = 0 : i64, tpu.core_type = #tpu.core_type<tc>, window_params = [{transform_indices = @transform_0, window_bounds = array<i64: 10, 32>}, {pipeline_mode = #tpu.pipeline_mode<synchronous>, transform_indices = @transform_1, window_bounds = array<i64: 1, 32>}, {pipeline_mode = #tpu.pipeline_mode<synchronous>, transform_indices = @transform_2, window_bounds = array<i64: 1, 32>}, {transform_indices = @transform_3, window_bounds = array<i64: 10, 32>}]} {
    %c0 = arith.constant 0 : index
    %c0_0 = arith.constant 0 : index
    %0 = vector.load %arg1[%c0, %c0_0] : memref<10x32xbf16, #tpu.memory_space<vmem>>, vector<10x32xbf16>
    %1 = arith.extf %0 : vector<10x32xbf16> to vector<10x32xf32>
    %cst = arith.constant dense<0.000000e+00> : vector<10xf32>
    %2 = vector.multi_reduction <add>, %1, %cst [1] : vector<10x32xf32> to vector<10xf32>
    %3 = vector.shape_cast %2 : vector<10xf32> to vector<10x1xf32>
    %cst_1 = arith.constant 3.200000e+01 : f32
    %4 = vector.broadcast %cst_1 : f32 to vector<10x1xf32>
    %5 = arith.divf %3, %4 : vector<10x1xf32>
    %6 = vector.broadcast %5 : vector<10x1xf32> to vector<10x32xf32>
    %7 = arith.subf %1, %6 : vector<10x32xf32>
    %8 = arith.mulf %7, %7 : vector<10x32xf32>
    %cst_2 = arith.constant dense<0.000000e+00> : vector<10xf32>
    %9 = vector.multi_reduction <add>, %8, %cst_2 [1] : vector<10x32xf32> to vector<10xf32>
    %10 = vector.shape_cast %9 : vector<10xf32> to vector<10x1xf32>
    %cst_3 = arith.constant 3.200000e+01 : f32
    %11 = vector.broadcast %cst_3 : f32 to vector<10x1xf32>
    %12 = arith.divf %10, %11 : vector<10x1xf32>
    %13 = vector.broadcast %5 : vector<10x1xf32> to vector<10x32xf32>
    %14 = arith.subf %1, %13 : vector<10x32xf32>
    %cst_4 = arith.constant 9.99999974E-6 : f32
    %15 = vector.broadcast %cst_4 : f32 to vector<10x1xf32>
    %16 = arith.addf %12, %15 : vector<10x1xf32>
    %17 = math.rsqrt %16 : vector<10x1xf32>
    %18 = vector.broadcast %17 : vector<10x1xf32> to vector<10x32xf32>
    %19 = arith.mulf %14, %18 : vector<10x32xf32>
    %c0_5 = arith.constant 0 : index
    %c0_6 = arith.constant 0 : index
    %20 = vector.load %arg2[%c0_5, %c0_6] : memref<1x32xbf16, #tpu.memory_space<vmem>>, vector<1x32xbf16>
    %21 = arith.extf %20 : vector<1x32xbf16> to vector<1x32xf32>
    %22 = vector.broadcast %21 : vector<1x32xf32> to vector<10x32xf32>
    %23 = arith.mulf %19, %22 : vector<10x32xf32>
    %c0_7 = arith.constant 0 : index
    %c0_8 = arith.constant 0 : index
    %24 = vector.load %arg3[%c0_7, %c0_8] : memref<1x32xbf16, #tpu.memory_space<vmem>>, vector<1x32xbf16>
    %25 = arith.extf %24 : vector<1x32xbf16> to vector<1x32xf32>
    %26 = vector.broadcast %25 : vector<1x32xf32> to vector<10x32xf32>
    %27 = arith.addf %23, %26 : vector<10x32xf32>
    %28 = arith.truncf %27 : vector<10x32xf32> to vector<10x32xbf16>
    %c0_9 = arith.constant 0 : index
    %c0_10 = arith.constant 0 : index
    %29 = vector.load %arg4[%c0_9, %c0_10] : memref<10x32xbf16, #tpu.memory_space<vmem>>, vector<10x32xbf16>
    tpu.vector_store %arg4[%c0_9, %c0_10], %28 {strides = array<i32>} : memref<10x32xbf16, #tpu.memory_space<vmem>>, vector<10x32xbf16>,
    return
  }
  func.func @transform_0(%arg0: i32) -> (i32, i32) {
    %c0_i32 = arith.constant 0 : i32
    %c0_i32_0 = arith.constant 0 : i32
    return %arg0, %c0_i32 : i32, i32
  }
  func.func @transform_1(%arg0: i32) -> (i32, i32) {
    %c0_i32 = arith.constant 0 : i32
    %c0_i32_0 = arith.constant 0 : i32
    %c0_i32_1 = arith.constant 0 : i32
    return %c0_i32, %c0_i32_0 : i32, i32
  }
  func.func @transform_2(%arg0: i32) -> (i32, i32) {
    %c0_i32 = arith.constant 0 : i32
    %c0_i32_0 = arith.constant 0 : i32
    %c0_i32_1 = arith.constant 0 : i32
    return %c0_i32, %c0_i32_0 : i32, i32
  }
  func.func @transform_3(%arg0: i32) -> (i32, i32) {
    %c0_i32 = arith.constant 0 : i32
    %c0_i32_0 = arith.constant 0 : i32
    return %arg0, %c0_i32 : i32, i32
  }
}

module attributes {stable_mosaic.version = 11 : i64} {
  func.func @_ln_matmul_kernel(%arg0: i32, %arg1: i32, %arg2: memref<10x32xbf16, #tpu.memory_space<vmem>>, %arg3: memref<1x32xbf16, #tpu.memory_space<vmem>>, %arg4: memref<1x32xbf16, #tpu.memory_space<vmem>>, %arg5: memref<32x96xbf16, #tpu.memory_space<vmem>>, %arg6: memref<1x96xbf16, #tpu.memory_space<vmem>>, %arg7: memref<10x96xbf16, #tpu.memory_space<vmem>>) attributes {dimension_semantics = [#tpu.dimension_semantics<parallel>, #tpu.dimension_semantics<parallel>], iteration_bounds = array<i64: 1, 1>, scalar_prefetch = 0 : i64, scratch_operands = 0 : i64, tpu.core_type = #tpu.core_type<tc>, window_params = [{transform_indices = @transform_0, window_bounds = array<i64: 10, 32>}, {pipeline_mode = #tpu.pipeline_mode<synchronous>, transform_indices = @transform_1, window_bounds = array<i64: 1, 32>}, {pipeline_mode = #tpu.pipeline_mode<synchronous>, transform_indices = @transform_2, window_bounds = array<i64: 1, 32>}, {transform_indices = @transform_3, window_bounds = array<i64: 32, 96>}, {transform_indices = @transform_4, window_bounds = array<i64: 1, 96>}, {transform_indices = @transform_5, window_bounds = array<i64: 10, 96>}]} {
    %c0 = arith.constant 0 : index
    %c0_0 = arith.constant 0 : index
    %0 = vector.load %arg2[%c0, %c0_0] : memref<10x32xbf16, #tpu.memory_space<vmem>>, vector<10x32xbf16>
    %1 = arith.extf %0 : vector<10x32xbf16> to vector<10x32xf32>
    %cst = arith.constant dense<0.000000e+00> : vector<10xf32>
    %2 = vector.multi_reduction <add>, %1, %cst [1] : vector<10x32xf32> to vector<10xf32>
    %3 = vector.shape_cast %2 : vector<10xf32> to vector<10x1xf32>
    %cst_1 = arith.constant 3.200000e+01 : f32
    %4 = vector.broadcast %cst_1 : f32 to vector<10x1xf32>
    %5 = arith.divf %3, %4 : vector<10x1xf32>
    %6 = vector.broadcast %5 : vector<10x1xf32> to vector<10x32xf32>
    %7 = arith.subf %1, %6 : vector<10x32xf32>
    %8 = arith.mulf %7, %7 : vector<10x32xf32>
    %cst_2 = arith.constant dense<0.000000e+00> : vector<10xf32>
    %9 = vector.multi_reduction <add>, %8, %cst_2 [1] : vector<10x32xf32> to vector<10xf32>
    %10 = vector.shape_cast %9 : vector<10xf32> to vector<10x1xf32>
    %cst_3 = arith.constant 3.200000e+01 : f32
    %11 = vector.broadcast %cst_3 : f32 to vector<10x1xf32>
    %12 = arith.divf %10, %11 : vector<10x1xf32>
    %13 = vector.broadcast %5 : vector<10x1xf32> to vector<10x32xf32>
    %14 = arith.subf %1, %13 : vector<10x32xf32>
    %cst_4 = arith.constant 9.99999974E-6 : f32
    %15 = vector.broadcast %cst_4 : f32 to vector<10x1xf32>
    %16 = arith.addf %12, %15 : vector<10x1xf32>
    %17 = math.rsqrt %16 : vector<10x1xf32>
    %18 = vector.broadcast %17 : vector<10x1xf32> to vector<10x32xf32>
    %19 = arith.mulf %14, %18 : vector<10x32xf32>
    %c0_5 = arith.constant 0 : index
    %c0_6 = arith.constant 0 : index
    %20 = vector.load %arg3[%c0_5, %c0_6] : memref<1x32xbf16, #tpu.memory_space<vmem>>, vector<1x32xbf16>
    %21 = arith.extf %20 : vector<1x32xbf16> to vector<1x32xf32>
    %22 = vector.broadcast %21 : vector<1x32xf32> to vector<10x32xf32>
    %23 = arith.mulf %19, %22 : vector<10x32xf32>
    %c0_7 = arith.constant 0 : index
    %c0_8 = arith.constant 0 : index
    %24 = vector.load %arg4[%c0_7, %c0_8] : memref<1x32xbf16, #tpu.memory_space<vmem>>, vector<1x32xbf16>
    %25 = arith.extf %24 : vector<1x32xbf16> to vector<1x32xf32>
    %26 = vector.broadcast %25 : vector<1x32xf32> to vector<10x32xf32>
    %27 = arith.addf %23, %26 : vector<10x32xf32>
    %28 = arith.truncf %27 : vector<10x32xf32> to vector<10x32xbf16>
    %c0_9 = arith.constant 0 : index
    %c0_10 = arith.constant 0 : index
    %29 = vector.load %arg5[%c0_9, %c0_10] : memref<32x96xbf16, #tpu.memory_space<vmem>>, vector<32x96xbf16>
    %cst_11 = arith.constant dense<0.000000e+00> : vector<10x96xf32>
    %30 = tpu.matmul %28, %29, %cst_11 {dimension_numbers = #tpu.dot_dimension_numbers<[1], [0], [0], [1], [0, 0, 1, 1], [], []>} : vector<10x32xbf16>, vector<32x96xbf16>, vector<10x96xf32> -> vector<10x96xf32>
    %c0_12 = arith.constant 0 : index
    %c0_13 = arith.constant 0 : index
    %31 = vector.load %arg6[%c0_12, %c0_13] : memref<1x96xbf16, #tpu.memory_space<vmem>>, vector<1x96xbf16>
    %32 = arith.extf %31 : vector<1x96xbf16> to vector<1x96xf32>
    %33 = vector.broadcast %32 : vector<1x96xf32> to vector<10x96xf32>
    %34 = arith.addf %30, %33 : vector<10x96xf32>
    %35 = arith.truncf %34 : vector<10x96xf32> to vector<10x96xbf16>
    %c0_14 = arith.constant 0 : index
    %c0_15 = arith.constant 0 : index
    %36 = vector.load %arg7[%c0_14, %c0_15] : memref<10x96xbf16, #tpu.memory_space<vmem>>, vector<10x96xbf16>
    tpu.vector_store %arg7[%c0_14, %c0_15], %35 {strides = array<i32>} : memref<10x96xbf16, #tpu.memory_space<vmem>>, vector<10x96xbf16>,
    return
  }
  func.func @transform_0(%arg0: i32, %arg1: i32) -> (i32, i32) {
    %c0_i32 = arith.constant 0 : i32
    %c0_i32_0 = arith.constant 0 : i32
    return %arg0, %c0_i32 : i32, i32
  }
  func.func @transform_1(%arg0: i32, %arg1: i32) -> (i32, i32) {
    %c0_i32 = arith.constant 0 : i32
    %c0_i32_0 = arith.constant 0 : i32
    %c0_i32_1 = arith.constant 0 : i32
    return %c0_i32, %c0_i32_0 : i32, i32
  }
  func.func @transform_2(%arg0: i32, %arg1: i32) -> (i32, i32) {
    %c0_i32 = arith.constant 0 : i32
    %c0_i32_0 = arith.constant 0 : i32
    %c0_i32_1 = arith.constant 0 : i32
    return %c0_i32, %c0_i32_0 : i32, i32
  }
  func.func @transform_3(%arg0: i32, %arg1: i32) -> (i32, i32) {
    %c0_i32 = arith.constant 0 : i32
    %c0_i32_0 = arith.constant 0 : i32
    return %c0_i32, %arg1 : i32, i32
  }
  func.func @transform_4(%arg0: i32, %arg1: i32) -> (i32, i32) {
    %c0_i32 = arith.constant 0 : i32
    %c0_i32_0 = arith.constant 0 : i32
    return %c0_i32, %arg1 : i32, i32
  }
  func.func @transform_5(%arg0: i32, %arg1: i32) -> (i32, i32) {
    %c0_i32 = arith.constant 0 : i32
    return %arg0, %arg1 : i32, i32
  }
}

module attributes {stable_mosaic.version = 11 : i64} {
  func.func @_attention_kernel(%arg0: i32, %arg1: memref<1x5x3x2x16xbf16, #tpu.memory_space<vmem>>, %arg2: memref<1x5x2x16xbf16, #tpu.memory_space<vmem>>) attributes {dimension_semantics = [#tpu.dimension_semantics<parallel>], iteration_bounds = array<i64: 2>, scalar_prefetch = 0 : i64, scratch_operands = 0 : i64, tpu.core_type = #tpu.core_type<tc>, window_params = [{transform_indices = @transform_0, window_bounds = array<i64: 1, 5, 3, 2, 16>}, {transform_indices = @transform_1, window_bounds = array<i64: 1, 5, 2, 16>}]} {
    %c0 = arith.constant 0 : index
    %c0_0 = arith.constant 0 : index
    %c0_1 = arith.constant 0 : index
    %c0_2 = arith.constant 0 : index
    %c0_3 = arith.constant 0 : index
    %0 = vector.load %arg1[%c0, %c0_0, %c0_1, %c0_2, %c0_3] : memref<1x5x3x2x16xbf16, #tpu.memory_space<vmem>>, vector<1x5x1x1x16xbf16>
    %1 = vector.shape_cast %0 : vector<1x5x1x1x16xbf16> to vector<5x16xbf16>
    %c0_4 = arith.constant 0 : index
    %c0_5 = arith.constant 0 : index
    %c1 = arith.constant 1 : index
    %c0_6 = arith.constant 0 : index
    %c0_7 = arith.constant 0 : index
    %2 = vector.load %arg1[%c0_4, %c0_5, %c1, %c0_6, %c0_7] : memref<1x5x3x2x16xbf16, #tpu.memory_space<vmem>>, vector<1x5x1x1x16xbf16>
    %3 = vector.shape_cast %2 : vector<1x5x1x1x16xbf16> to vector<5x16xbf16>
    %c0_8 = arith.constant 0 : index
    %c0_9 = arith.constant 0 : index
    %c2 = arith.constant 2 : index
    %c0_10 = arith.constant 0 : index
    %c0_11 = arith.constant 0 : index
    %4 = vector.load %arg1[%c0_8, %c0_9, %c2, %c0_10, %c0_11] : memref<1x5x3x2x16xbf16, #tpu.memory_space<vmem>>, vector<1x5x1x1x16xbf16>
    %5 = vector.shape_cast %4 : vector<1x5x1x1x16xbf16> to vector<5x16xbf16>
    %cst = arith.constant dense<0.000000e+00> : vector<5x5xf32>
    %6 = tpu.matmul %1, %3, %cst {dimension_numbers = #tpu.dot_dimension_numbers<[1], [1], [0], [0], [0, 0, 1, 0], [], []>} : vector<5x16xbf16>, vector<5x16xbf16>, vector<5x5xf32> -> vector<5x5xf32>
    %cst_12 = arith.constant 2.500000e-01 : f32
    %7 = vector.broadcast %cst_12 : f32 to vector<5x5xf32>
    %8 = arith.mulf %6, %7 : vector<5x5xf32>
    %cst_13 = arith.constant dense<0xFF800000> : vector<5xf32>
    %9 = vector.multi_reduction <maximumf>, %8, %cst_13 [1] : vector<5x5xf32> to vector<5xf32>
    %10 = vector.shape_cast %9 : vector<5xf32> to vector<5x1xf32>
    %11 = vector.broadcast %10 : vector<5x1xf32> to vector<5x5xf32>
    %12 = arith.subf %8, %11 : vector<5x5xf32>
    %13 = math.exp %12 : vector<5x5xf32>
    %cst_14 = arith.constant dense<0.000000e+00> : vector<5xf32>
    %14 = vector.multi_reduction <add>, %13, %cst_14 [1] : vector<5x5xf32> to vector<5xf32>
    %15 = vector.shape_cast %14 : vector<5xf32> to vector<5x1xf32>
    %16 = tpu.reciprocal %15 {approx = true} : vector<5x1xf32> -> vector<5x1xf32>
    %17 = vector.broadcast %16 : vector<5x1xf32> to vector<5x5xf32>
    %18 = arith.mulf %13, %17 : vector<5x5xf32>
    %19 = arith.truncf %18 : vector<5x5xf32> to vector<5x5xbf16>
    %cst_15 = arith.constant dense<0.000000e+00> : vector<5x16xf32>
    %20 = tpu.matmul %19, %5, %cst_15 {dimension_numbers = #tpu.dot_dimension_numbers<[1], [0], [0], [1], [0, 0, 1, 1], [], []>} : vector<5x5xbf16>, vector<5x16xbf16>, vector<5x16xf32> -> vector<5x16xf32>
    %21 = arith.truncf %20 : vector<5x16xf32> to vector<5x16xbf16>
    %c0_16 = arith.constant 0 : index
    %c0_17 = arith.constant 0 : index
    %c0_18 = arith.constant 0 : index
    %c0_19 = arith.constant 0 : index
    %22 = vector.load %arg2[%c0_16, %c0_17, %c0_18, %c0_19] : memref<1x5x2x16xbf16, #tpu.memory_space<vmem>>, vector<1x5x1x16xbf16>
    %23 = vector.shape_cast %22 : vector<1x5x1x16xbf16> to vector<5x16xbf16>
    %24 = vector.shape_cast %21 : vector<5x16xbf16> to vector<1x5x1x16xbf16>
    tpu.vector_store %arg2[%c0_16, %c0_17, %c0_18, %c0_19], %24 {strides = array<i32>} : memref<1x5x2x16xbf16, #tpu.memory_space<vmem>>, vector<1x5x1x16xbf16>,
    %c0_20 = arith.constant 0 : index
    %c0_21 = arith.constant 0 : index
    %c0_22 = arith.constant 0 : index
    %c1_23 = arith.constant 1 : index
    %c0_24 = arith.constant 0 : index
    %25 = vector.load %arg1[%c0_20, %c0_21, %c0_22, %c1_23, %c0_24] : memref<1x5x3x2x16xbf16, #tpu.memory_space<vmem>>, vector<1x5x1x1x16xbf16>
    %26 = vector.shape_cast %25 : vector<1x5x1x1x16xbf16> to vector<5x16xbf16>
    %c0_25 = arith.constant 0 : index
    %c0_26 = arith.constant 0 : index
    %c1_27 = arith.constant 1 : index
    %c1_28 = arith.constant 1 : index
    %c0_29 = arith.constant 0 : index
    %27 = vector.load %arg1[%c0_25, %c0_26, %c1_27, %c1_28, %c0_29] : memref<1x5x3x2x16xbf16, #tpu.memory_space<vmem>>, vector<1x5x1x1x16xbf16>
    %28 = vector.shape_cast %27 : vector<1x5x1x1x16xbf16> to vector<5x16xbf16>
    %c0_30 = arith.constant 0 : index
    %c0_31 = arith.constant 0 : index
    %c2_32 = arith.constant 2 : index
    %c1_33 = arith.constant 1 : index
    %c0_34 = arith.constant 0 : index
    %29 = vector.load %arg1[%c0_30, %c0_31, %c2_32, %c1_33, %c0_34] : memref<1x5x3x2x16xbf16, #tpu.memory_space<vmem>>, vector<1x5x1x1x16xbf16>
    %30 = vector.shape_cast %29 : vector<1x5x1x1x16xbf16> to vector<5x16xbf16>
    %cst_35 = arith.constant dense<0.000000e+00> : vector<5x5xf32>
    %31 = tpu.matmul %26, %28, %cst_35 {dimension_numbers = #tpu.dot_dimension_numbers<[1], [1], [0], [0], [0, 0, 1, 0], [], []>} : vector<5x16xbf16>, vector<5x16xbf16>, vector<5x5xf32> -> vector<5x5xf32>
    %cst_36 = arith.constant 2.500000e-01 : f32
    %32 = vector.broadcast %cst_36 : f32 to vector<5x5xf32>
    %33 = arith.mulf %31, %32 : vector<5x5xf32>
    %cst_37 = arith.constant dense<0xFF800000> : vector<5xf32>
    %34 = vector.multi_reduction <maximumf>, %33, %cst_37 [1] : vector<5x5xf32> to vector<5xf32>
    %35 = vector.shape_cast %34 : vector<5xf32> to vector<5x1xf32>
    %36 = vector.broadcast %35 : vector<5x1xf32> to vector<5x5xf32>
    %37 = arith.subf %33, %36 : vector<5x5xf32>
    %38 = math.exp %37 : vector<5x5xf32>
    %cst_38 = arith.constant dense<0.000000e+00> : vector<5xf32>
    %39 = vector.multi_reduction <add>, %38, %cst_38 [1] : vector<5x5xf32> to vector<5xf32>
    %40 = vector.shape_cast %39 : vector<5xf32> to vector<5x1xf32>
    %41 = tpu.reciprocal %40 {approx = true} : vector<5x1xf32> -> vector<5x1xf32>
    %42 = vector.broadcast %41 : vector<5x1xf32> to vector<5x5xf32>
    %43 = arith.mulf %38, %42 : vector<5x5xf32>
    %44 = arith.truncf %43 : vector<5x5xf32> to vector<5x5xbf16>
    %cst_39 = arith.constant dense<0.000000e+00> : vector<5x16xf32>
    %45 = tpu.matmul %44, %30, %cst_39 {dimension_numbers = #tpu.dot_dimension_numbers<[1], [0], [0], [1], [0, 0, 1, 1], [], []>} : vector<5x5xbf16>, vector<5x16xbf16>, vector<5x16xf32> -> vector<5x16xf32>
    %46 = arith.truncf %45 : vector<5x16xf32> to vector<5x16xbf16>
    %c0_40 = arith.constant 0 : index
    %c0_41 = arith.constant 0 : index
    %c1_42 = arith.constant 1 : index
    %c0_43 = arith.constant 0 : index
    %47 = vector.load %arg2[%c0_40, %c0_41, %c1_42, %c0_43] : memref<1x5x2x16xbf16, #tpu.memory_space<vmem>>, vector<1x5x1x16xbf16>
    %48 = vector.shape_cast %47 : vector<1x5x1x16xbf16> to vector<5x16xbf16>
    %49 = vector.shape_cast %46 : vector<5x16xbf16> to vector<1x5x1x16xbf16>
    tpu.vector_store %arg2[%c0_40, %c0_41, %c1_42, %c0_43], %49 {strides = array<i32>} : memref<1x5x2x16xbf16, #tpu.memory_space<vmem>>, vector<1x5x1x16xbf16>,
    return
  }
  func.func @transform_0(%arg0: i32) -> (i32, i32, i32, i32, i32) {
    %c0_i32 = arith.constant 0 : i32
    %c0_i32_0 = arith.constant 0 : i32
    %c0_i32_1 = arith.constant 0 : i32
    %c0_i32_2 = arith.constant 0 : i32
    %c0_i32_3 = arith.constant 0 : i32
    return %arg0, %c0_i32, %c0_i32_0, %c0_i32_1, %c0_i32_2 : i32, i32, i32, i32, i32
  }
  func.func @transform_1(%arg0: i32) -> (i32, i32, i32, i32) {
    %c0_i32 = arith.constant 0 : i32
    %c0_i32_0 = arith.constant 0 : i32
    %c0_i32_1 = arith.constant 0 : i32
    %c0_i32_2 = arith.constant 0 : i32
    return %arg0, %c0_i32, %c0_i32_0, %c0_i32_1 : i32, i32, i32, i32
  }
}

module attributes {stable_mosaic.version = 11 : i64} {
  func.func @_matmul_kernel(%arg0: i32, %arg1: i32, %arg2: i32, %arg3: memref<10x32xbf16, #tpu.memory_space<vmem>>, %arg4: memref<32x32xbf16, #tpu.memory_space<vmem>>, %arg5: memref<1x32xbf16, #tpu.memory_space<vmem>>, %arg6: memref<10x32xbf16, #tpu.memory_space<vmem>>, %arg7: memref<10x32xbf16, #tpu.memory_space<vmem>>, %arg8: memref<10x32xf32, #tpu.memory_space<vmem>>) attributes {dimension_semantics = [#tpu.dimension_semantics<parallel>, #tpu.dimension_semantics<parallel>, #tpu.dimension_semantics<arbitrary>], iteration_bounds = array<i64: 1, 1, 1>, scalar_prefetch = 0 : i64, scratch_operands = 1 : i64, tpu.core_type = #tpu.core_type<tc>, window_params = [{transform_indices = @transform_0, window_bounds = array<i64: 10, 32>}, {transform_indices = @transform_1, window_bounds = array<i64: 32, 32>}, {transform_indices = @transform_2, window_bounds = array<i64: 1, 32>}, {transform_indices = @transform_3, window_bounds = array<i64: 10, 32>}, {transform_indices = @transform_4, window_bounds = array<i64: 10, 32>}]} {
    %c0_i32 = arith.constant 0 : i32
    %0 = arith.cmpi eq, %arg2, %c0_i32 : i32
    %1 = arith.extui %0 : i1 to i32
    %c0_i32_0 = arith.constant 0 : i32
    %2 = arith.cmpi ne, %1, %c0_i32_0 : i32
    scf.if %2 {
      %cst_10 = arith.constant 0.000000e+00 : f32
      %12 = vector.broadcast %cst_10 : f32 to vector<10x32xf32>
      %c0_11 = arith.constant 0 : index
      %c0_12 = arith.constant 0 : index
      %13 = vector.load %arg8[%c0_11, %c0_12] : memref<10x32xf32, #tpu.memory_space<vmem>>, vector<10x32xf32>
      tpu.vector_store %arg8[%c0_11, %c0_12], %12 {strides = array<i32>} : memref<10x32xf32, #tpu.memory_space<vmem>>, vector<10x32xf32>,
    } else {
    }
    %c0 = arith.constant 0 : index
    %c0_1 = arith.constant 0 : index
    %3 = vector.load %arg8[%c0, %c0_1] : memref<10x32xf32, #tpu.memory_space<vmem>>, vector<10x32xf32>
    %c0_2 = arith.constant 0 : index
    %c0_3 = arith.constant 0 : index
    %4 = vector.load %arg3[%c0_2, %c0_3] : memref<10x32xbf16, #tpu.memory_space<vmem>>, vector<10x32xbf16>
    %c0_4 = arith.constant 0 : index
    %c0_5 = arith.constant 0 : index
    %5 = vector.load %arg4[%c0_4, %c0_5] : memref<32x32xbf16, #tpu.memory_space<vmem>>, vector<32x32xbf16>
    %cst = arith.constant dense<0.000000e+00> : vector<10x32xf32>
    %6 = tpu.matmul %4, %5, %cst {dimension_numbers = #tpu.dot_dimension_numbers<[1], [0], [0], [1], [0, 0, 1, 1], [], []>} : vector<10x32xbf16>, vector<32x32xbf16>, vector<10x32xf32> -> vector<10x32xf32>
    %7 = arith.addf %3, %6 : vector<10x32xf32>
    %c0_6 = arith.constant 0 : index
    %c0_7 = arith.constant 0 : index
    %8 = vector.load %arg8[%c0_6, %c0_7] : memref<10x32xf32, #tpu.memory_space<vmem>>, vector<10x32xf32>
    tpu.vector_store %arg8[%c0_6, %c0_7], %7 {strides = array<i32>} : memref<10x32xf32, #tpu.memory_space<vmem>>, vector<10x32xf32>,
    %c0_i32_8 = arith.constant 0 : i32
    %9 = arith.cmpi eq, %arg2, %c0_i32_8 : i32
    %10 = arith.extui %9 : i1 to i32
    %c0_i32_9 = arith.constant 0 : i32
    %11 = arith.cmpi ne, %10, %c0_i32_9 : i32
    scf.if %11 {
      %c0_10 = arith.constant 0 : index
      %c0_11 = arith.constant 0 : index
      %12 = vector.load %arg8[%c0_10, %c0_11] : memref<10x32xf32, #tpu.memory_space<vmem>>, vector<10x32xf32>
      %c0_12 = arith.constant 0 : index
      %c0_13 = arith.constant 0 : index
      %13 = vector.load %arg5[%c0_12, %c0_13] : memref<1x32xbf16, #tpu.memory_space<vmem>>, vector<1x32xbf16>
      %14 = arith.extf %13 : vector<1x32xbf16> to vector<1x32xf32>
      %15 = vector.broadcast %14 : vector<1x32xf32> to vector<10x32xf32>
      %16 = arith.addf %12, %15 : vector<10x32xf32>
      %c0_14 = arith.constant 0 : index
      %c0_15 = arith.constant 0 : index
      %17 = vector.load %arg6[%c0_14, %c0_15] : memref<10x32xbf16, #tpu.memory_space<vmem>>, vector<10x32xbf16>
      %18 = arith.extf %17 : vector<10x32xbf16> to vector<10x32xf32>
      %19 = arith.addf %16, %18 : vector<10x32xf32>
      %20 = arith.truncf %19 : vector<10x32xf32> to vector<10x32xbf16>
      %c0_16 = arith.constant 0 : index
      %c0_17 = arith.constant 0 : index
      %21 = vector.load %arg7[%c0_16, %c0_17] : memref<10x32xbf16, #tpu.memory_space<vmem>>, vector<10x32xbf16>
      tpu.vector_store %arg7[%c0_16, %c0_17], %20 {strides = array<i32>} : memref<10x32xbf16, #tpu.memory_space<vmem>>, vector<10x32xbf16>,
    } else {
    }
    return
  }
  func.func @transform_0(%arg0: i32, %arg1: i32, %arg2: i32) -> (i32, i32) {
    %c0_i32 = arith.constant 0 : i32
    return %arg0, %arg2 : i32, i32
  }
  func.func @transform_1(%arg0: i32, %arg1: i32, %arg2: i32) -> (i32, i32) {
    %c0_i32 = arith.constant 0 : i32
    return %arg2, %arg1 : i32, i32
  }
  func.func @transform_2(%arg0: i32, %arg1: i32, %arg2: i32) -> (i32, i32) {
    %c0_i32 = arith.constant 0 : i32
    %c0_i32_0 = arith.constant 0 : i32
    return %c0_i32, %arg1 : i32, i32
  }
  func.func @transform_3(%arg0: i32, %arg1: i32, %arg2: i32) -> (i32, i32) {
    %c0_i32 = arith.constant 0 : i32
    return %arg0, %arg1 : i32, i32
  }
  func.func @transform_4(%arg0: i32, %arg1: i32, %arg2: i32) -> (i32, i32) {
    %c0_i32 = arith.constant 0 : i32
    return %arg0, %arg1 : i32, i32
  }
}

module attributes {stable_mosaic.version = 11 : i64} {
  func.func @_ln_matmul_kernel(%arg0: i32, %arg1: i32, %arg2: memref<10x32xbf16, #tpu.memory_space<vmem>>, %arg3: memref<1x32xbf16, #tpu.memory_space<vmem>>, %arg4: memref<1x32xbf16, #tpu.memory_space<vmem>>, %arg5: memref<32x128xbf16, #tpu.memory_space<vmem>>, %arg6: memref<1x128xbf16, #tpu.memory_space<vmem>>, %arg7: memref<10x128xbf16, #tpu.memory_space<vmem>>) attributes {dimension_semantics = [#tpu.dimension_semantics<parallel>, #tpu.dimension_semantics<parallel>], iteration_bounds = array<i64: 1, 1>, scalar_prefetch = 0 : i64, scratch_operands = 0 : i64, tpu.core_type = #tpu.core_type<tc>, window_params = [{transform_indices = @transform_0, window_bounds = array<i64: 10, 32>}, {pipeline_mode = #tpu.pipeline_mode<synchronous>, transform_indices = @transform_1, window_bounds = array<i64: 1, 32>}, {pipeline_mode = #tpu.pipeline_mode<synchronous>, transform_indices = @transform_2, window_bounds = array<i64: 1, 32>}, {transform_indices = @transform_3, window_bounds = array<i64: 32, 128>}, {transform_indices = @transform_4, window_bounds = array<i64: 1, 128>}, {transform_indices = @transform_5, window_bounds = array<i64: 10, 128>}]} {
    %c0 = arith.constant 0 : index
    %c0_0 = arith.constant 0 : index
    %0 = vector.load %arg2[%c0, %c0_0] : memref<10x32xbf16, #tpu.memory_space<vmem>>, vector<10x32xbf16>
    %1 = arith.extf %0 : vector<10x32xbf16> to vector<10x32xf32>
    %cst = arith.constant dense<0.000000e+00> : vector<10xf32>
    %2 = vector.multi_reduction <add>, %1, %cst [1] : vector<10x32xf32> to vector<10xf32>
    %3 = vector.shape_cast %2 : vector<10xf32> to vector<10x1xf32>
    %cst_1 = arith.constant 3.200000e+01 : f32
    %4 = vector.broadcast %cst_1 : f32 to vector<10x1xf32>
    %5 = arith.divf %3, %4 : vector<10x1xf32>
    %6 = vector.broadcast %5 : vector<10x1xf32> to vector<10x32xf32>
    %7 = arith.subf %1, %6 : vector<10x32xf32>
    %8 = arith.mulf %7, %7 : vector<10x32xf32>
    %cst_2 = arith.constant dense<0.000000e+00> : vector<10xf32>
    %9 = vector.multi_reduction <add>, %8, %cst_2 [1] : vector<10x32xf32> to vector<10xf32>
    %10 = vector.shape_cast %9 : vector<10xf32> to vector<10x1xf32>
    %cst_3 = arith.constant 3.200000e+01 : f32
    %11 = vector.broadcast %cst_3 : f32 to vector<10x1xf32>
    %12 = arith.divf %10, %11 : vector<10x1xf32>
    %13 = vector.broadcast %5 : vector<10x1xf32> to vector<10x32xf32>
    %14 = arith.subf %1, %13 : vector<10x32xf32>
    %cst_4 = arith.constant 9.99999974E-6 : f32
    %15 = vector.broadcast %cst_4 : f32 to vector<10x1xf32>
    %16 = arith.addf %12, %15 : vector<10x1xf32>
    %17 = math.rsqrt %16 : vector<10x1xf32>
    %18 = vector.broadcast %17 : vector<10x1xf32> to vector<10x32xf32>
    %19 = arith.mulf %14, %18 : vector<10x32xf32>
    %c0_5 = arith.constant 0 : index
    %c0_6 = arith.constant 0 : index
    %20 = vector.load %arg3[%c0_5, %c0_6] : memref<1x32xbf16, #tpu.memory_space<vmem>>, vector<1x32xbf16>
    %21 = arith.extf %20 : vector<1x32xbf16> to vector<1x32xf32>
    %22 = vector.broadcast %21 : vector<1x32xf32> to vector<10x32xf32>
    %23 = arith.mulf %19, %22 : vector<10x32xf32>
    %c0_7 = arith.constant 0 : index
    %c0_8 = arith.constant 0 : index
    %24 = vector.load %arg4[%c0_7, %c0_8] : memref<1x32xbf16, #tpu.memory_space<vmem>>, vector<1x32xbf16>
    %25 = arith.extf %24 : vector<1x32xbf16> to vector<1x32xf32>
    %26 = vector.broadcast %25 : vector<1x32xf32> to vector<10x32xf32>
    %27 = arith.addf %23, %26 : vector<10x32xf32>
    %28 = arith.truncf %27 : vector<10x32xf32> to vector<10x32xbf16>
    %c0_9 = arith.constant 0 : index
    %c0_10 = arith.constant 0 : index
    %29 = vector.load %arg5[%c0_9, %c0_10] : memref<32x128xbf16, #tpu.memory_space<vmem>>, vector<32x128xbf16>
    %cst_11 = arith.constant dense<0.000000e+00> : vector<10x128xf32>
    %30 = tpu.matmul %28, %29, %cst_11 {dimension_numbers = #tpu.dot_dimension_numbers<[1], [0], [0], [1], [0, 0, 1, 1], [], []>} : vector<10x32xbf16>, vector<32x128xbf16>, vector<10x128xf32> -> vector<10x128xf32>
    %c0_12 = arith.constant 0 : index
    %c0_13 = arith.constant 0 : index
    %31 = vector.load %arg6[%c0_12, %c0_13] : memref<1x128xbf16, #tpu.memory_space<vmem>>, vector<1x128xbf16>
    %32 = arith.extf %31 : vector<1x128xbf16> to vector<1x128xf32>
    %33 = vector.broadcast %32 : vector<1x128xf32> to vector<10x128xf32>
    %34 = arith.addf %30, %33 : vector<10x128xf32>
    %cst_14 = arith.constant 1.702000e+00 : f32
    %35 = vector.broadcast %cst_14 : f32 to vector<10x128xf32>
    %36 = arith.mulf %35, %34 : vector<10x128xf32>
    %37 = arith.negf %36 : vector<10x128xf32>
    %38 = math.exp %37 : vector<10x128xf32>
    %cst_15 = arith.constant 1.000000e+00 : f32
    %39 = vector.broadcast %cst_15 : f32 to vector<10x128xf32>
    %40 = arith.addf %39, %38 : vector<10x128xf32>
    %41 = arith.divf %39, %40 : vector<10x128xf32>
    %42 = arith.mulf %34, %41 : vector<10x128xf32>
    %43 = arith.truncf %42 : vector<10x128xf32> to vector<10x128xbf16>
    %c0_16 = arith.constant 0 : index
    %c0_17 = arith.constant 0 : index
    %44 = vector.load %arg7[%c0_16, %c0_17] : memref<10x128xbf16, #tpu.memory_space<vmem>>, vector<10x128xbf16>
    tpu.vector_store %arg7[%c0_16, %c0_17], %43 {strides = array<i32>} : memref<10x128xbf16, #tpu.memory_space<vmem>>, vector<10x128xbf16>,
    return
  }
  func.func @transform_0(%arg0: i32, %arg1: i32) -> (i32, i32) {
    %c0_i32 = arith.constant 0 : i32
    %c0_i32_0 = arith.constant 0 : i32
    return %arg0, %c0_i32 : i32, i32
  }
  func.func @transform_1(%arg0: i32, %arg1: i32) -> (i32, i32) {
    %c0_i32 = arith.constant 0 : i32
    %c0_i32_0 = arith.constant 0 : i32
    %c0_i32_1 = arith.constant 0 : i32
    return %c0_i32, %c0_i32_0 : i32, i32
  }
  func.func @transform_2(%arg0: i32, %arg1: i32) -> (i32, i32) {
    %c0_i32 = arith.constant 0 : i32
    %c0_i32_0 = arith.constant 0 : i32
    %c0_i32_1 = arith.constant 0 : i32
    return %c0_i32, %c0_i32_0 : i32, i32
  }
  func.func @transform_3(%arg0: i32, %arg1: i32) -> (i32, i32) {
    %c0_i32 = arith.constant 0 : i32
    %c0_i32_0 = arith.constant 0 : i32
    return %c0_i32, %arg1 : i32, i32
  }
  func.func @transform_4(%arg0: i32, %arg1: i32) -> (i32, i32) {
    %c0_i32 = arith.constant 0 : i32
    %c0_i32_0 = arith.constant 0 : i32
    return %c0_i32, %arg1 : i32, i32
  }
  func.func @transform_5(%arg0: i32, %arg1: i32) -> (i32, i32) {
    %c0_i32 = arith.constant 0 : i32
    return %arg0, %arg1 : i32, i32
  }
}

module attributes {stable_mosaic.version = 11 : i64} {
  func.func @_matmul_kernel(%arg0: i32, %arg1: i32, %arg2: i32, %arg3: memref<10x128xbf16, #tpu.memory_space<vmem>>, %arg4: memref<128x32xbf16, #tpu.memory_space<vmem>>, %arg5: memref<1x32xbf16, #tpu.memory_space<vmem>>, %arg6: memref<10x32xbf16, #tpu.memory_space<vmem>>, %arg7: memref<10x32xbf16, #tpu.memory_space<vmem>>, %arg8: memref<10x32xf32, #tpu.memory_space<vmem>>) attributes {dimension_semantics = [#tpu.dimension_semantics<parallel>, #tpu.dimension_semantics<parallel>, #tpu.dimension_semantics<arbitrary>], iteration_bounds = array<i64: 1, 1, 1>, scalar_prefetch = 0 : i64, scratch_operands = 1 : i64, tpu.core_type = #tpu.core_type<tc>, window_params = [{transform_indices = @transform_0, window_bounds = array<i64: 10, 128>}, {transform_indices = @transform_1, window_bounds = array<i64: 128, 32>}, {transform_indices = @transform_2, window_bounds = array<i64: 1, 32>}, {transform_indices = @transform_3, window_bounds = array<i64: 10, 32>}, {transform_indices = @transform_4, window_bounds = array<i64: 10, 32>}]} {
    %c0_i32 = arith.constant 0 : i32
    %0 = arith.cmpi eq, %arg2, %c0_i32 : i32
    %1 = arith.extui %0 : i1 to i32
    %c0_i32_0 = arith.constant 0 : i32
    %2 = arith.cmpi ne, %1, %c0_i32_0 : i32
    scf.if %2 {
      %cst_10 = arith.constant 0.000000e+00 : f32
      %12 = vector.broadcast %cst_10 : f32 to vector<10x32xf32>
      %c0_11 = arith.constant 0 : index
      %c0_12 = arith.constant 0 : index
      %13 = vector.load %arg8[%c0_11, %c0_12] : memref<10x32xf32, #tpu.memory_space<vmem>>, vector<10x32xf32>
      tpu.vector_store %arg8[%c0_11, %c0_12], %12 {strides = array<i32>} : memref<10x32xf32, #tpu.memory_space<vmem>>, vector<10x32xf32>,
    } else {
    }
    %c0 = arith.constant 0 : index
    %c0_1 = arith.constant 0 : index
    %3 = vector.load %arg8[%c0, %c0_1] : memref<10x32xf32, #tpu.memory_space<vmem>>, vector<10x32xf32>
    %c0_2 = arith.constant 0 : index
    %c0_3 = arith.constant 0 : index
    %4 = vector.load %arg3[%c0_2, %c0_3] : memref<10x128xbf16, #tpu.memory_space<vmem>>, vector<10x128xbf16>
    %c0_4 = arith.constant 0 : index
    %c0_5 = arith.constant 0 : index
    %5 = vector.load %arg4[%c0_4, %c0_5] : memref<128x32xbf16, #tpu.memory_space<vmem>>, vector<128x32xbf16>
    %cst = arith.constant dense<0.000000e+00> : vector<10x32xf32>
    %6 = tpu.matmul %4, %5, %cst {dimension_numbers = #tpu.dot_dimension_numbers<[1], [0], [0], [1], [0, 0, 1, 1], [], []>} : vector<10x128xbf16>, vector<128x32xbf16>, vector<10x32xf32> -> vector<10x32xf32>
    %7 = arith.addf %3, %6 : vector<10x32xf32>
    %c0_6 = arith.constant 0 : index
    %c0_7 = arith.constant 0 : index
    %8 = vector.load %arg8[%c0_6, %c0_7] : memref<10x32xf32, #tpu.memory_space<vmem>>, vector<10x32xf32>
    tpu.vector_store %arg8[%c0_6, %c0_7], %7 {strides = array<i32>} : memref<10x32xf32, #tpu.memory_space<vmem>>, vector<10x32xf32>,
    %c0_i32_8 = arith.constant 0 : i32
    %9 = arith.cmpi eq, %arg2, %c0_i32_8 : i32
    %10 = arith.extui %9 : i1 to i32
    %c0_i32_9 = arith.constant 0 : i32
    %11 = arith.cmpi ne, %10, %c0_i32_9 : i32
    scf.if %11 {
      %c0_10 = arith.constant 0 : index
      %c0_11 = arith.constant 0 : index
      %12 = vector.load %arg8[%c0_10, %c0_11] : memref<10x32xf32, #tpu.memory_space<vmem>>, vector<10x32xf32>
      %c0_12 = arith.constant 0 : index
      %c0_13 = arith.constant 0 : index
      %13 = vector.load %arg5[%c0_12, %c0_13] : memref<1x32xbf16, #tpu.memory_space<vmem>>, vector<1x32xbf16>
      %14 = arith.extf %13 : vector<1x32xbf16> to vector<1x32xf32>
      %15 = vector.broadcast %14 : vector<1x32xf32> to vector<10x32xf32>
      %16 = arith.addf %12, %15 : vector<10x32xf32>
      %c0_14 = arith.constant 0 : index
      %c0_15 = arith.constant 0 : index
      %17 = vector.load %arg6[%c0_14, %c0_15] : memref<10x32xbf16, #tpu.memory_space<vmem>>, vector<10x32xbf16>
      %18 = arith.extf %17 : vector<10x32xbf16> to vector<10x32xf32>
      %19 = arith.addf %16, %18 : vector<10x32xf32>
      %20 = arith.truncf %19 : vector<10x32xf32> to vector<10x32xbf16>
      %c0_16 = arith.constant 0 : index
      %c0_17 = arith.constant 0 : index
      %21 = vector.load %arg7[%c0_16, %c0_17] : memref<10x32xbf16, #tpu.memory_space<vmem>>, vector<10x32xbf16>
      tpu.vector_store %arg7[%c0_16, %c0_17], %20 {strides = array<i32>} : memref<10x32xbf16, #tpu.memory_space<vmem>>, vector<10x32xbf16>,
    } else {
    }
    return
  }
  func.func @transform_0(%arg0: i32, %arg1: i32, %arg2: i32) -> (i32, i32) {
    %c0_i32 = arith.constant 0 : i32
    return %arg0, %arg2 : i32, i32
  }
  func.func @transform_1(%arg0: i32, %arg1: i32, %arg2: i32) -> (i32, i32) {
    %c0_i32 = arith.constant 0 : i32
    return %arg2, %arg1 : i32, i32
  }
  func.func @transform_2(%arg0: i32, %arg1: i32, %arg2: i32) -> (i32, i32) {
    %c0_i32 = arith.constant 0 : i32
    %c0_i32_0 = arith.constant 0 : i32
    return %c0_i32, %arg1 : i32, i32
  }
  func.func @transform_3(%arg0: i32, %arg1: i32, %arg2: i32) -> (i32, i32) {
    %c0_i32 = arith.constant 0 : i32
    return %arg0, %arg1 : i32, i32
  }
  func.func @transform_4(%arg0: i32, %arg1: i32, %arg2: i32) -> (i32, i32) {
    %c0_i32 = arith.constant 0 : i32
    return %arg0, %arg1 : i32, i32
  }
}

module attributes {stable_mosaic.version = 11 : i64} {
  func.func @_logits_kernel(%arg0: i32, %arg1: memref<2x32xbf16, #tpu.memory_space<vmem>>, %arg2: memref<3x32xbf16, #tpu.memory_space<vmem>>, %arg3: memref<2x3xf32, #tpu.memory_space<vmem>>) attributes {dimension_semantics = [#tpu.dimension_semantics<arbitrary>], iteration_bounds = array<i64: 1>, scalar_prefetch = 0 : i64, scratch_operands = 0 : i64, tpu.core_type = #tpu.core_type<tc>, window_params = [{pipeline_mode = #tpu.pipeline_mode<synchronous>, transform_indices = @transform_0, window_bounds = array<i64: 2, 32>}, {pipeline_mode = #tpu.pipeline_mode<synchronous>, transform_indices = @transform_1, window_bounds = array<i64: 3, 32>}, {pipeline_mode = #tpu.pipeline_mode<synchronous>, transform_indices = @transform_2, window_bounds = array<i64: 2, 3>}]} {
    %c0 = arith.constant 0 : index
    %c0_0 = arith.constant 0 : index
    %0 = vector.load %arg1[%c0, %c0_0] : memref<2x32xbf16, #tpu.memory_space<vmem>>, vector<2x32xbf16>
    %1 = arith.extf %0 : vector<2x32xbf16> to vector<2x32xf32>
    %c0_1 = arith.constant 0 : index
    %c0_2 = arith.constant 0 : index
    %2 = vector.load %arg2[%c0_1, %c0_2] : memref<3x32xbf16, #tpu.memory_space<vmem>>, vector<3x32xbf16>
    %3 = arith.extf %2 : vector<3x32xbf16> to vector<3x32xf32>
    %4 = arith.mulf %1, %1 : vector<2x32xf32>
    %cst = arith.constant dense<0.000000e+00> : vector<2xf32>
    %5 = vector.multi_reduction <add>, %4, %cst [1] : vector<2x32xf32> to vector<2xf32>
    %6 = vector.shape_cast %5 : vector<2xf32> to vector<2x1xf32>
    %7 = math.rsqrt %6 : vector<2x1xf32>
    %8 = vector.broadcast %7 : vector<2x1xf32> to vector<2x32xf32>
    %9 = arith.mulf %1, %8 : vector<2x32xf32>
    %10 = arith.mulf %3, %3 : vector<3x32xf32>
    %cst_3 = arith.constant dense<0.000000e+00> : vector<3xf32>
    %11 = vector.multi_reduction <add>, %10, %cst_3 [1] : vector<3x32xf32> to vector<3xf32>
    %12 = vector.shape_cast %11 : vector<3xf32> to vector<3x1xf32>
    %13 = math.rsqrt %12 : vector<3x1xf32>
    %14 = vector.broadcast %13 : vector<3x1xf32> to vector<3x32xf32>
    %15 = arith.mulf %3, %14 : vector<3x32xf32>
    %16 = arith.truncf %9 : vector<2x32xf32> to vector<2x32xbf16>
    %17 = arith.truncf %15 : vector<3x32xf32> to vector<3x32xbf16>
    %cst_4 = arith.constant dense<0.000000e+00> : vector<2x3xf32>
    %18 = tpu.matmul %16, %17, %cst_4 {dimension_numbers = #tpu.dot_dimension_numbers<[1], [1], [0], [0], [0, 0, 1, 0], [], []>} : vector<2x32xbf16>, vector<3x32xbf16>, vector<2x3xf32> -> vector<2x3xf32>
    %cst_5 = arith.constant 14.2857141 : f32
    %19 = vector.broadcast %cst_5 : f32 to vector<2x3xf32>
    %20 = arith.mulf %19, %18 : vector<2x3xf32>
    %c0_6 = arith.constant 0 : index
    %c0_7 = arith.constant 0 : index
    %21 = vector.load %arg3[%c0_6, %c0_7] : memref<2x3xf32, #tpu.memory_space<vmem>>, vector<2x3xf32>
    tpu.vector_store %arg3[%c0_6, %c0_7], %20 {strides = array<i32>} : memref<2x3xf32, #tpu.memory_space<vmem>>, vector<2x3xf32>,
    return
  }
  func.func @transform_0(%arg0: i32) -> (i32, i32) {
    %c0_i32 = arith.constant 0 : i32
    %c0_i32_0 = arith.constant 0 : i32
    %c0_i32_1 = arith.constant 0 : i32
    return %c0_i32, %c0_i32_0 : i32, i32
  }
  func.func @transform_1(%arg0: i32) -> (i32, i32) {
    %c0_i32 = arith.constant 0 : i32
    %c0_i32_0 = arith.constant 0 : i32
    %c0_i32_1 = arith.constant 0 : i32
    return %c0_i32, %c0_i32_0 : i32, i32
  }
  func.func @transform_2(%arg0: i32) -> (i32, i32) {
    %c0_i32 = arith.constant 0 : i32
    %c0_i32_0 = arith.constant 0 : i32
    %c0_i32_1 = arith.constant 0 : i32
    return %c0_i32, %c0_i32_0 : i32, i32
  }
}

module attributes {stable_mosaic.version = 11 : i64} {
  func.func @_ln_matmul_kernel(%arg0: i32, %arg1: i32, %arg2: memref<2x32xbf16, #tpu.memory_space<vmem>>, %arg3: memref<1x32xbf16, #tpu.memory_space<vmem>>, %arg4: memref<1x32xbf16, #tpu.memory_space<vmem>>, %arg5: memref<32x32xbf16, #tpu.memory_space<vmem>>, %arg6: memref<2x32xbf16, #tpu.memory_space<vmem>>) attributes {dimension_semantics = [#tpu.dimension_semantics<parallel>, #tpu.dimension_semantics<parallel>], iteration_bounds = array<i64: 1, 1>, scalar_prefetch = 0 : i64, scratch_operands = 0 : i64, tpu.core_type = #tpu.core_type<tc>, window_params = [{transform_indices = @transform_0, window_bounds = array<i64: 2, 32>}, {pipeline_mode = #tpu.pipeline_mode<synchronous>, transform_indices = @transform_1, window_bounds = array<i64: 1, 32>}, {pipeline_mode = #tpu.pipeline_mode<synchronous>, transform_indices = @transform_2, window_bounds = array<i64: 1, 32>}, {transform_indices = @transform_3, window_bounds = array<i64: 32, 32>}, {transform_indices = @transform_4, window_bounds = array<i64: 2, 32>}]} {
    %c0 = arith.constant 0 : index
    %c0_0 = arith.constant 0 : index
    %0 = vector.load %arg2[%c0, %c0_0] : memref<2x32xbf16, #tpu.memory_space<vmem>>, vector<2x32xbf16>
    %1 = arith.extf %0 : vector<2x32xbf16> to vector<2x32xf32>
    %cst = arith.constant dense<0.000000e+00> : vector<2xf32>
    %2 = vector.multi_reduction <add>, %1, %cst [1] : vector<2x32xf32> to vector<2xf32>
    %3 = vector.shape_cast %2 : vector<2xf32> to vector<2x1xf32>
    %cst_1 = arith.constant 3.200000e+01 : f32
    %4 = vector.broadcast %cst_1 : f32 to vector<2x1xf32>
    %5 = arith.divf %3, %4 : vector<2x1xf32>
    %6 = vector.broadcast %5 : vector<2x1xf32> to vector<2x32xf32>
    %7 = arith.subf %1, %6 : vector<2x32xf32>
    %8 = arith.mulf %7, %7 : vector<2x32xf32>
    %cst_2 = arith.constant dense<0.000000e+00> : vector<2xf32>
    %9 = vector.multi_reduction <add>, %8, %cst_2 [1] : vector<2x32xf32> to vector<2xf32>
    %10 = vector.shape_cast %9 : vector<2xf32> to vector<2x1xf32>
    %cst_3 = arith.constant 3.200000e+01 : f32
    %11 = vector.broadcast %cst_3 : f32 to vector<2x1xf32>
    %12 = arith.divf %10, %11 : vector<2x1xf32>
    %13 = vector.broadcast %5 : vector<2x1xf32> to vector<2x32xf32>
    %14 = arith.subf %1, %13 : vector<2x32xf32>
    %cst_4 = arith.constant 9.99999974E-6 : f32
    %15 = vector.broadcast %cst_4 : f32 to vector<2x1xf32>
    %16 = arith.addf %12, %15 : vector<2x1xf32>
    %17 = math.rsqrt %16 : vector<2x1xf32>
    %18 = vector.broadcast %17 : vector<2x1xf32> to vector<2x32xf32>
    %19 = arith.mulf %14, %18 : vector<2x32xf32>
    %c0_5 = arith.constant 0 : index
    %c0_6 = arith.constant 0 : index
    %20 = vector.load %arg3[%c0_5, %c0_6] : memref<1x32xbf16, #tpu.memory_space<vmem>>, vector<1x32xbf16>
    %21 = arith.extf %20 : vector<1x32xbf16> to vector<1x32xf32>
    %22 = vector.broadcast %21 : vector<1x32xf32> to vector<2x32xf32>
    %23 = arith.mulf %19, %22 : vector<2x32xf32>
    %c0_7 = arith.constant 0 : index
    %c0_8 = arith.constant 0 : index
    %24 = vector.load %arg4[%c0_7, %c0_8] : memref<1x32xbf16, #tpu.memory_space<vmem>>, vector<1x32xbf16>
    %25 = arith.extf %24 : vector<1x32xbf16> to vector<1x32xf32>
    %26 = vector.broadcast %25 : vector<1x32xf32> to vector<2x32xf32>
    %27 = arith.addf %23, %26 : vector<2x32xf32>
    %28 = arith.truncf %27 : vector<2x32xf32> to vector<2x32xbf16>
    %c0_9 = arith.constant 0 : index
    %c0_10 = arith.constant 0 : index
    %29 = vector.load %arg5[%c0_9, %c0_10] : memref<32x32xbf16, #tpu.memory_space<vmem>>, vector<32x32xbf16>
    %cst_11 = arith.constant dense<0.000000e+00> : vector<2x32xf32>
    %30 = tpu.matmul %28, %29, %cst_11 {dimension_numbers = #tpu.dot_dimension_numbers<[1], [0], [0], [1], [0, 0, 1, 1], [], []>} : vector<2x32xbf16>, vector<32x32xbf16>, vector<2x32xf32> -> vector<2x32xf32>
    %31 = arith.truncf %30 : vector<2x32xf32> to vector<2x32xbf16>
    %c0_12 = arith.constant 0 : index
    %c0_13 = arith.constant 0 : index
    %32 = vector.load %arg6[%c0_12, %c0_13] : memref<2x32xbf16, #tpu.memory_space<vmem>>, vector<2x32xbf16>
    tpu.vector_store %arg6[%c0_12, %c0_13], %31 {strides = array<i32>} : memref<2x32xbf16, #tpu.memory_space<vmem>>, vector<2x32xbf16>,
    return
  }
  func.func @transform_0(%arg0: i32, %arg1: i32) -> (i32, i32) {
    %c0_i32 = arith.constant 0 : i32
    %c0_i32_0 = arith.constant 0 : i32
    return %arg0, %c0_i32 : i32, i32
  }
  func.func @transform_1(%arg0: i32, %arg1: i32) -> (i32, i32) {
    %c0_i32 = arith.constant 0 : i32
    %c0_i32_0 = arith.constant 0 : i32
    %c0_i32_1 = arith.constant 0 : i32
    return %c0_i32, %c0_i32_0 : i32, i32
  }
  func.func @transform_2(%arg0: i32, %arg1: i32) -> (i32, i32) {
    %c0_i32 = arith.constant 0 : i32
    %c0_i32_0 = arith.constant 0 : i32
    %c0_i32_1 = arith.constant 0 : i32
    return %c0_i32, %c0_i32_0 : i32, i32
  }
  func.func @transform_3(%arg0: i32, %arg1: i32) -> (i32, i32) {
    %c0_i32 = arith.constant 0 : i32
    %c0_i32_0 = arith.constant 0 : i32
    return %c0_i32, %arg1 : i32, i32
  }
  func.func @transform_4(%arg0: i32, %arg1: i32) -> (i32, i32) {
    %c0_i32 = arith.constant 0 : i32
    return %arg0, %arg1 : i32, i32
  }
}

</mosaic_0001>

<bundles_post_ra>
// kernel: _lambda_.38
= control target key start
LH: loop header
LB: loop body
LE: loop exit
PB: predicated region body
PF: predicated region fallthrough
CT: control target
= control target key end

     0   :  { %10 = vsyncpa [#allocation3], 0  ;;  %s355_s21 = smov [#allocation2]   ;;  %s356_s23 = smov 64   ;;  %s518_s0 = inlined_call_operand.vmem [shape: bf16[48,32], index: 0, kind: input, shape index: {}]   ;;  %s519_s1 = inlined_call_operand.vmem [shape: bf16[1,32], index: 1, kind: input, shape index: {}]   ;;  %s520_s2 = inlined_call_operand.vmem [shape: bf16[1,32], index: 2, kind: input, shape index: {}]   ;;  %s521_s3 = inlined_call_operand.hbm [shape: bf16[32,96], index: 3, kind: input, shape index: {}]   ;;  %s522_s4 = inlined_call_operand.vmem [shape: bf16[1,96], index: 4, kind: input, shape index: {}]   ;;  %s523_s5 = inlined_call_operand.vmem [shape: bf16[48,96], index: 5, kind: output, shape index: {}]  }
   0x1   :  { %s21_s20 = sshll.u32 %s521_s3, 4  ;;  %s23_s22 = sshll.u32 %s355_s21, 4  ;;  %s22_s20 = int_to_ptr.hbm [resolvable:$true] %s21_s20  ;;  %s24_s22 = int_to_ptr.vmem [resolvable:$true] %s23_s22 }
   0x2   :  { %s357_s24 = smov 4  }
   0x3   :  { %29 = dma.hbm_to_vmem [thread:$0]  %s22_s20, 256, %s24_s22, [#allocation3], %s356_s23, %s356_s23, %s357_s24  }
   0x4   :  { %353 = dma.done.wait [#allocation3], 256  }
   0x5   :  { %354 = vsyncadd [#allocation3], 4294967040  ;;  %v306_v0 = vld [vmem:[%s518_s0 + $0x10] sm:$0xff]   ;;  %vm49_vm0 = vcmask 261120   ;;  %v305_v1 = vld [vmem:[%s518_s0 + $0x8] sm:$0xff]   ;;  %v358_v15 = vmov 32.0  }
   0x6   :  { %v294_v2 = vld [vmem:[%s518_s0] sm:$0xff]   ;;  %v303_v3 = vunpack.c.l.bf16 %v306_v0  ;;  %v299_v4 = vunpack.c.l.bf16 %v305_v1  ;;  %v304_v9 = vunpack.c.h.bf16 %v306_v0  ;;  %v300_v10 = vunpack.c.h.bf16 %v305_v1  ;;  %v292_v53 = vld [vmem:[#allocation2 + $0x8] sm:$0xff] }
   0x7   :  { %v295_v5 = vunpack.c.l.bf16 %v294_v2  ;;  %v296_v11 = vunpack.c.h.bf16 %v294_v2  ;;  %315 = vrcp.f32 %v358_v15  ;;  %244 = vmatpush.bf16.msra.mxu0 %v292_v53  ;;  %308 = vmatpush.bf16.msra.mxu2 %v292_v53  ;;  %v291_v59 = vld [vmem:[#allocation2] sm:$0xff] }
   0x8   :  { %v62_v6 = vsel %vm49_vm0, %v303_v3, 0.0  ;;  %v56_v7 = vsel %vm49_vm0, %v299_v4, 0.0  ;;  %v65_v12 = vsel %vm49_vm0, %v304_v9, 0.0  ;;  %v59_v13 = vsel %vm49_vm0, %v300_v10, 0.0  ;;  %307 = vmatpush.bf16.msra.mxu1 %v292_v53  ;;  %v189_v15 = vld [vmem:[%s519_s1] sm:$0x1] }
   0x9   :  { %v50_v8 = vsel %vm49_vm0, %v295_v5, 0.0  ;;  %63 = vadd.xlane.f32.xlu0 %v62_v6  ;;  %57 = vadd.xlane.f32.xlu2 %v56_v7  ;;  %v53_v14 = vsel %vm49_vm0, %v296_v11, 0.0 }
   0xa   :  { %51 = vadd.xlane.f32.xlu1 %v50_v8 }
   0xb   :  { %245 = vmatpush.bf16.msra.mxu0 %v291_v59  ;;  %310 = vmatpush.bf16.msra.mxu2 %v291_v59 }
   0xc   :  { %309 = vmatpush.bf16.msra.mxu1 %v291_v59 }
   0xd   :  { %v316_v16 = vpop.eup %315 }
   0xe   :  { %v69_v17 = vmul.f32 32.0, %v316_v16  ;;  %vm73_vm1 = vweird.f32 %v316_v16 }
  0x10   :  { %v70_v18 = vsub.f32 1.0, %v69_v17 }
  0x11   :  { %66 = vadd.xlane.f32.xlu0 %v65_v12  ;;  %60 = vadd.xlane.f32.xlu2 %v59_v13 }
  0x12   :  { %54 = vadd.xlane.f32.xlu1 %v53_v14  ;;  %v71_v19 = vmul.f32 %v316_v16, %v70_v18 }
  0x14   :  { %v72_v20 = vadd.f32 %v316_v16, %v71_v19 }
  0x16   :  { %v407_v21 = vsel %vm73_vm1, %v316_v16, %v72_v20 }
  0x7c   :  { %v64_v22 = vpop.xlane.xlu0 %63  ;;  %v58_v23 = vpop.xlane.xlu2 %57 }
  0x7d   :  { %v79_v24 = vmul.f32 %v407_v21, %v64_v22  ;;  %v52_v25 = vpop.xlane.xlu1 %51  ;;  %v77_v39 = vmul.f32 %v407_v21, %v58_v23 }
  0x7e   :  { %v75_v26 = vmul.f32 %v407_v21, %v52_v25 }
  0x7f   :  { %v411_v27 = vsub.f32 %v303_v3, %v79_v24  ;;  %v437_v46 = vsub.f32 %v299_v4, %v77_v39  ;;  %v190_v24 = vunpack.c.l.bf16 %v189_v15 }
  0x80   :  { %v413_v28 = vsub.f32 %v295_v5, %v75_v26 }
  0x81   :  { %v91_v29 = vmul.f32 %v411_v27, %v411_v27  ;;  %v89_v50 = vmul.f32 %v437_v46, %v437_v46 }
  0x82   :  { %v87_v30 = vmul.f32 %v413_v28, %v413_v28 }
  0x83   :  { %v105_v31 = vsel %vm49_vm0, %v91_v29, 0.0  ;;  %v99_v51 = vsel %vm49_vm0, %v89_v50, 0.0 }
  0x84   :  { %106 = vadd.xlane.f32.xlu0 %v105_v31  ;;  %v67_v32 = vpop.xlane.xlu0 %66  ;;  %v61_v33 = vpop.xlane.xlu2 %60  ;;  %v93_v34 = vsel %vm49_vm0, %v87_v30, 0.0  ;;  %v198_v31 = vld [vmem:[%s520_s2] sm:$0x1] }
  0x85   :  { %v80_v35 = vmul.f32 %v407_v21, %v67_v32  ;;  %v78_v36 = vmul.f32 %v407_v21, %v61_v33  ;;  %94 = vadd.xlane.f32.xlu2 %v93_v34  ;;  %v55_v37 = vpop.xlane.xlu1 %54 }
  0x86   :  { %v76_v38 = vmul.f32 %v407_v21, %v55_v37  ;;  %v191_v37 = vperm.slane %v190_v24, 0 }
  0x87   :  { %v425_v40 = vsub.f32 %v304_v9, %v80_v35  ;;  %v427_v41 = vsub.f32 %v300_v10, %v78_v36 }
  0x88   :  { %v429_v42 = vsub.f32 %v296_v11, %v76_v38 }
  0x89   :  { %v92_v43 = vmul.f32 %v425_v40, %v425_v40  ;;  %v90_v44 = vmul.f32 %v427_v41, %v427_v41 }
  0x8a   :  { %v88_v45 = vmul.f32 %v429_v42, %v429_v42 }
  0x8b   :  { %v108_v47 = vsel %vm49_vm0, %v92_v43, 0.0  ;;  %v102_v48 = vsel %vm49_vm0, %v90_v44, 0.0  ;;  %v199_v43 = vunpack.c.l.bf16 %v198_v31 }
  0x8c   :  { %109 = vadd.xlane.f32.xlu1 %v108_v47  ;;  %v96_v49 = vsel %vm49_vm0, %v88_v45, 0.0 }
  0x8d   :  { %103 = vadd.xlane.f32.xlu2 %v102_v48  ;;  %97 = vadd.xlane.f32.xlu0 %v96_v49 }
  0x94   :  { %100 = vadd.xlane.f32.xlu1 %v99_v51 }
  0xf7   :  { %v107_v52 = vpop.xlane.xlu0 %106 }
  0xf8   :  { %v115_v54 = vmul.f32 %v107_v52, %v407_v21  ;;  %v95_v55 = vpop.xlane.xlu2 %94 }
  0xf9   :  { %v111_v56 = vmul.f32 %v95_v55, %v407_v21 }
  0xfa   :  { %v121_v57 = vadd.f32 1e-05, %v115_v54 }
  0xfb   :  { %v117_v58 = vadd.f32 1e-05, %v111_v56 }
  0xfc   :  { %317 = vrsqrt.f32 %v121_v57  ;;  %vm169_vm3 = vweird.f32 %v121_v57 }
  0xfd   :  { %319 = vrsqrt.f32 %v117_v58  ;;  %vm129_vm4 = vweird.f32 %v117_v58 }
  0xff   :  { %v110_v60 = vpop.xlane.xlu1 %109 }
 0x100   :  { %v104_v61 = vpop.xlane.xlu2 %103  ;;  %v98_v62 = vpop.xlane.xlu0 %97  ;;  %v116_v63 = vmul.f32 %v110_v60, %v407_v21  ;;  %v200_v60 = vperm.slane %v199_v43, 0 }
 0x101   :  { %v114_v0 = vmul.f32 %v104_v61, %v407_v21  ;;  %v112_v1 = vmul.f32 %v98_v62, %v407_v21 }
 0x102   :  { %v318_v2 = vpop.eup %317  ;;  %v122_v3 = vadd.f32 1e-05, %v116_v63 }
 0x103   :  { %v320_v4 = vpop.eup %319  ;;  %v164_v5 = vmul.f32 %v318_v2, %v121_v57  ;;  %v120_v6 = vadd.f32 1e-05, %v114_v0  ;;  %v118_v7 = vadd.f32 1e-05, %v112_v1  ;;  %vm170_vm2 = vweird.f32 %v318_v2 }
 0x104   :  { %v124_v8 = vmul.f32 %v320_v4, %v117_v58  ;;  %321 = vrsqrt.f32 %v122_v3  ;;  %vm130_vm5 = vweird.f32 %v320_v4  ;;  %vm460_vm6 = vmor %vm169_vm3, %vm170_vm2  ;;  %vm179_vm9 = vweird.f32 %v122_v3 }
 0x105   :  { %v165_v9 = vmul.f32 %v318_v2, %v164_v5  ;;  %323 = vrsqrt.f32 %v120_v6  ;;  %vm466_vm7 = vmor %vm129_vm4, %vm130_vm5  ;;  %vm159_vm8 = vweird.f32 %v120_v6  ;;  %vm139_vm12 = vweird.f32 %v118_v7 }
 0x106   :  { %v125_v10 = vmul.f32 %v320_v4, %v124_v8  ;;  %325 = vrsqrt.f32 %v118_v7  ;;  %vm268_vm5 = vcmask 781312  }
 0x107   :  { %v166_v11 = vmul.f32 0.5, %v165_v9  ;;  %v101_v12 = vpop.xlane.xlu1 %100 }
 0x108   :  { %v126_v13 = vmul.f32 0.5, %v125_v10  ;;  %v113_v14 = vmul.f32 %v101_v12, %v407_v21 }
 0x109   :  { %v167_v16 = vsub.f32 1.5, %v166_v11 }
 0x10a   :  { %v322_v17 = vpop.eup %321  ;;  %v127_v18 = vsub.f32 1.5, %v126_v13  ;;  %v454_v19 = vadd.f32 1e-05, %v113_v14 }
 0x10b   :  { %v324_v20 = vpop.eup %323  ;;  %v168_v22 = vmul.f32 %v318_v2, %v167_v16  ;;  %v174_v23 = vmul.f32 %v322_v17, %v122_v3  ;;  %vm180_vm10 = vweird.f32 %v322_v17 }
 0x10c   :  { %v326_v25 = vpop.eup %325  ;;  %v154_v26 = vmul.f32 %v324_v20, %v120_v6  ;;  %327 = vrsqrt.f32 %v454_v19  ;;  %v128_v21 = vmul.f32 %v320_v4, %v127_v18  ;;  %vm160_vm11 = vweird.f32 %v324_v20  ;;  %vm181_vm14 = vmor %vm179_vm9, %vm180_vm10 }
 0x10d   :  { %v134_v29 = vmul.f32 %v326_v25, %v118_v7  ;;  %v175_v30 = vmul.f32 %v322_v17, %v174_v23  ;;  %v172_v34 = vsel %vm460_vm6, %v318_v2, %v168_v22  ;;  %vm140_vm13 = vweird.f32 %v326_v25  ;;  %vm477_vm15 = vmor %vm159_vm8, %vm160_vm11 }
 0x10e   :  { %v155_v33 = vmul.f32 %v324_v20, %v154_v26  ;;  %v132_v44 = vsel %vm466_vm7, %v320_v4, %v128_v21  ;;  %v187_v49 = vmul.f32 %v172_v34, %v411_v27  ;;  %vm141_vm1 = vmor %vm139_vm12, %vm140_vm13  ;;  %vm149_vm3 = vweird.f32 %v454_v19 }
 0x10f   :  { %v135_v35 = vmul.f32 %v326_v25, %v134_v29  ;;  %v176_v36 = vmul.f32 0.5, %v175_v30  ;;  %v183_v54 = vmul.f32 %v132_v44, %v413_v28 }
 0x110   :  { %v156_v39 = vmul.f32 0.5, %v155_v33  ;;  %v196_v61 = vmul.f32 %v191_v37, %v187_v49 }
 0x111   :  { %v136_v45 = vmul.f32 0.5, %v135_v35  ;;  %v177_v47 = vsub.f32 1.5, %v176_v36  ;;  %v192_v1 = vmul.f32 %v191_v37, %v183_v54 }
 0x112   :  { %v328_v48 = vpop.eup %327  ;;  %v157_v50 = vsub.f32 1.5, %v156_v39  ;;  %v205_v6 = vadd.f32 %v200_v60, %v196_v61 }
 0x113   :  { %v137_v51 = vsub.f32 1.5, %v136_v45  ;;  %v178_v52 = vmul.f32 %v322_v17, %v177_v47  ;;  %v144_v53 = vmul.f32 %v328_v48, %v454_v19  ;;  %vm150_vm2 = vweird.f32 %v328_v48 }
 0x114   :  { %v158_v55 = vmul.f32 %v324_v20, %v157_v50  ;;  %vm151_vm4 = vmor %vm149_vm3, %vm150_vm2 }
 0x115   :  { %v138_v57 = vmul.f32 %v326_v25, %v137_v51  ;;  %v182_v27 = vsel %vm181_vm14, %v322_v17, %v178_v52  ;;  %v145_v58 = vmul.f32 %v328_v48, %v144_v53  ;;  %v214_v17 = vld [vmem:[%s522_s4] sm:$0x1] }
 0x116   :  { %v188_v59 = vmul.f32 %v182_v27, %v425_v40  ;;  %v162_v62 = vsel %vm477_vm15, %v324_v20, %v158_v55  ;;  %v201_v40 = vadd.f32 %v200_v60, %v192_v1  ;;  %v215_v18 = vunpack.c.l.bf16 %v214_v17 }
 0x117   :  { %v142_v28 = vsel %vm141_vm1, %v326_v25, %v138_v57  ;;  %v146_v63 = vmul.f32 0.5, %v145_v58  ;;  %v186_v4 = vmul.f32 %v162_v62, %v427_v41 }
 0x118   :  { %v184_v0 = vmul.f32 %v142_v28, %v429_v42  ;;  %v197_v2 = vmul.f32 %v191_v37, %v188_v59  ;;  %v216_v19 = vperm.slane %v215_v18, 0 }
 0x119   :  { %v147_v3 = vsub.f32 1.5, %v146_v63  ;;  %v195_v13 = vmul.f32 %v191_v37, %v186_v4 }
 0x11a   :  { %v193_v5 = vmul.f32 %v191_v37, %v184_v0  ;;  %v206_v7 = vadd.f32 %v200_v60, %v197_v2 }
 0x11b   :  { %v148_v8 = vmul.f32 %v328_v48, %v147_v3  ;;  %v204_v15 = vadd.f32 %v200_v60, %v195_v13 }
 0x11c   :  { %v202_v9 = vadd.f32 %v200_v60, %v193_v5  ;;  %v209_v10 = vpack.c.bf16 %v206_v7, %v205_v6 }
 0x11d   :  { %v152_v11 = vsel %vm151_vm4, %v328_v48, %v148_v8 }
 0x11e   :  { %v185_v12 = vmul.f32 %v152_v11, %v437_v46  ;;  %v207_v42 = vpack.c.bf16 %v202_v9, %v201_v40  ;;  %290 = vmatmul.msk.bf16.vlgmr.msra.gmra.mxu2 %vm49_vm0, %v209_v10 }
 0x120   :  { %288 = vmatmul.msk.bf16.vlgmr.msra.gmra.mxu0 %vm49_vm0, %v207_v42  ;;  %v194_v41 = vmul.f32 %v191_v37, %v185_v12 }
 0x122   :  { %v203_v14 = vadd.f32 %v200_v60, %v194_v41 }
 0x124   :  { %v208_v16 = vpack.c.bf16 %v204_v15, %v203_v14 }
 0x126   :  { %289 = vmatmul.msk.bf16.vlgmr.msra.gmra.mxu1 %vm49_vm0, %v208_v16 }
 0x19d   :  { %v247_v20 = vpop.f32.mrf.mxu0 }
 0x19e   :  { %v248_v46 = vadd.f32 %v247_v20, %v216_v19 }
 0x1a0   :  { %v262_v22 = vpack.c.bf16 %v248_v46, %v248_v46 }
 0x1a1   :  { %v257_v23 = vpop.f32.mrf.mxu2 }
 0x1a2   :  { %269 = vst.msk [vmem:[%s523_s5] sm:$0xf] %vm268_vm5, %v262_v22  ;;  %v258_v24 = vadd.f32 %v257_v23, %v216_v19 }
 0x1a3   :  { %v252_v25 = vpop.f32.mrf.mxu1 }
 0x1a4   :  { %v266_v26 = vpack.c.bf16 %v258_v24, %v258_v24  ;;  %v253_v21 = vadd.f32 %v252_v25, %v216_v19 }
 0x1a5   :  { %v249_v29 = vpop.f32.mrf.mxu0 }
 0x1a6   :  { %273 = vst.msk [vmem:[%s523_s5 + $0x10] sm:$0xf] %vm268_vm5, %v266_v26  ;;  %v250_v30 = vadd.f32 %v249_v29, %v216_v19  ;;  %v264_v31 = vpack.c.bf16 %v253_v21, %v253_v21 }
 0x1a8   :  { %v263_v32 = vpack.c.bf16 %v250_v30, %v250_v30  ;;  %271 = vst.msk [vmem:[%s523_s5 + $0x8] sm:$0xf] %vm268_vm5, %v264_v31 }
 0x1a9   :  { %v259_v33 = vpop.f32.mrf.mxu2 }
 0x1aa   :  { %270 = vst.msk [vmem:[%s523_s5 + $0x4] sm:$0xf] %vm268_vm5, %v263_v32  ;;  %v260_v34 = vadd.f32 %v259_v33, %v216_v19 }
 0x1ab   :  { %v254_v35 = vpop.f32.mrf.mxu1 }
 0x1ac   :  { %v267_v36 = vpack.c.bf16 %v260_v34, %v260_v34  ;;  %v255_v37 = vadd.f32 %v254_v35, %v216_v19 }
 0x1ae   :  { %274 = vst.msk [vmem:[%s523_s5 + $0x14] sm:$0xf] %vm268_vm5, %v267_v36  ;;  %v265_v38 = vpack.c.bf16 %v255_v37, %v255_v37 }
 0x1b0   :  { %272 = vst.msk [vmem:[%s523_s5 + $0xc] sm:$0xf] %vm268_vm5, %v265_v38 }
 0x1b1   :  { %279 = vsyncpa [#allocation3], 1 }

// kernel: _lambda_.40
= control target key start
LH: loop header
LB: loop body
LE: loop exit
PB: predicated region body
PF: predicated region fallthrough
CT: control target
= control target key end

     0   :  { %vm22_vm0 = vcmask 261120   ;;  %v218_v1 = vmov 0.0   ;;  %vm160_vm1 = vcmask 257024   ;;  %s310_s1 = inlined_call_operand.vmem [shape: bf16[32,32], index: 1, kind: input, shape index: {}]   ;;  %s311_s0 = inlined_call_operand.vmem [shape: bf16[48,32], index: 0, kind: input, shape index: {}]   ;;  %s312_s2 = inlined_call_operand.vmem [shape: bf16[1,32], index: 2, kind: input, shape index: {}]   ;;  %s313_s3 = inlined_call_operand.vmem [shape: bf16[48,32], index: 3, kind: input, shape index: {}]   ;;  %s314_s4 = inlined_call_operand.vmem [shape: bf16[48,32], index: 4, kind: output, shape index: {}]  }
   0x1   :  { %v198_v0 = vld [vmem:[%s310_s1 + $0x8] sm:$0xff]  ;;  %23 = vst.msk [vmem:[#allocation2] sm:$0xff] %vm22_vm0, %v218_v1  ;;  %v197_v2 = vld [vmem:[%s310_s1] sm:$0xff]  ;;  %v196_v5 = vld [vmem:[%s311_s0 + $0x10] sm:$0xff] }
   0x2   :  { %24 = vst.msk [vmem:[#allocation2 + $0x8] sm:$0xff] %vm22_vm0, %v218_v1  ;;  %88 = vmatpush.bf16.msra.mxu0 %v198_v0  ;;  %213 = vmatpush.bf16.msra.mxu1 %v198_v0  ;;  %v194_v3 = vld [vmem:[%s311_s0] sm:$0xff]  ;;  %v195_v4 = vld [vmem:[%s311_s0 + $0x8] sm:$0xff]  ;;  %v212_v33 = vld [vmem:[%s313_s3 + $0x10] sm:$0xff]  }
   0x3   :  { %25 = vst.msk [vmem:[#allocation2 + $0x10] sm:$0xff] %vm22_vm0, %v218_v1  ;;  %214 = vmatpush.bf16.msra.mxu2 %v198_v0  ;;  %v127_v9 = vld [vmem:[%s312_s2] sm:$0x1]  ;;  %v211_v19 = vld [vmem:[%s313_s3 + $0x8] sm:$0xff]   ;;  %v209_v39 = vunpack.c.l.bf16 %v212_v33  ;;  %v210_v55 = vunpack.c.h.bf16 %v212_v33 }
   0x4   :  { %26 = vst.msk [vmem:[#allocation2 + $0x18] sm:$0xff] %vm22_vm0, %v218_v1  ;;  %v128_v13 = vunpack.c.l.bf16 %v127_v9  ;;  %v200_v15 = vld [vmem:[%s313_s3] sm:$0xff]   ;;  %v205_v28 = vunpack.c.l.bf16 %v211_v19  ;;  %v206_v45 = vunpack.c.h.bf16 %v211_v19 }
   0x5   :  { %27 = vst.msk [vmem:[#allocation2 + $0x20] sm:$0xff] %vm22_vm0, %v218_v1  ;;  %v201_v24 = vunpack.c.l.bf16 %v200_v15  ;;  %v202_v42 = vunpack.c.h.bf16 %v200_v15 }
   0x6   :  { %28 = vst.msk [vmem:[#allocation2 + $0x28] sm:$0xff] %vm22_vm0, %v218_v1  ;;  %89 = vmatpush.bf16.msra.mxu0 %v197_v2  ;;  %215 = vmatpush.bf16.msra.mxu1 %v197_v2  ;;  %v129_v18 = vperm.slane %v128_v13, 0 }
   0x7   :  { %216 = vmatpush.bf16.msra.mxu2 %v197_v2 }
   0x8   :  { %v29_v6 = vld [vmem:[#allocation2] sm:$0xff] }
   0x9   :  { %191 = vmatmul.msk.bf16.vlgmr.msra.gmra.mxu0 %vm22_vm0, %v194_v3  ;;  %192 = vmatmul.msk.bf16.vlgmr.msra.gmra.mxu1 %vm22_vm0, %v195_v4  ;;  %v30_v16 = vld [vmem:[#allocation2 + $0x8] sm:$0xff] }
   0xa   :  { %193 = vmatmul.msk.bf16.vlgmr.msra.gmra.mxu2 %vm22_vm0, %v196_v5  ;;  %v31_v7 = vld [vmem:[#allocation2 + $0x10] sm:$0xff] }
   0xb   :  { %v32_v17 = vld [vmem:[#allocation2 + $0x18] sm:$0xff] }
   0xc   :  { %v33_v14 = vld [vmem:[#allocation2 + $0x20] sm:$0xff] }
   0xd   :  { %v34_v34 = vld [vmem:[#allocation2 + $0x28] sm:$0xff] }
  0x86   :  { %v91_v8 = vpop.f32.mrf.mxu0  ;;  %v96_v10 = vpop.f32.mrf.mxu1 }
  0x87   :  { %v106_v11 = vadd.f32 %v91_v8, %v29_v6  ;;  %v108_v12 = vadd.f32 %v96_v10, %v31_v7 }
  0x89   :  { %112 = vst.msk [vmem:[#allocation2] sm:$0xff] %vm22_vm0, %v106_v11 }
  0x8a   :  { %114 = vst.msk [vmem:[#allocation2 + $0x10] sm:$0xff] %vm22_vm0, %v108_v12 }
  0x8d   :  { %v101_v20 = vpop.f32.mrf.mxu2 }
  0x8e   :  { %v110_v21 = vadd.f32 %v101_v20, %v33_v14  ;;  %v93_v22 = vpop.f32.mrf.mxu0  ;;  %v98_v23 = vpop.f32.mrf.mxu1 }
  0x8f   :  { %v107_v25 = vadd.f32 %v93_v22, %v30_v16  ;;  %v109_v26 = vadd.f32 %v98_v23, %v32_v17 }
  0x90   :  { %v121_v27 = vld [vmem:[#allocation2] sm:$0xff]  ;;  %116 = vst.msk [vmem:[#allocation2 + $0x20] sm:$0xff] %vm22_vm0, %v110_v21 }
  0x91   :  { %v130_v29 = vadd.f32 %v129_v18, %v121_v27  ;;  %v123_v30 = vld [vmem:[#allocation2 + $0x10] sm:$0xff]  ;;  %113 = vst.msk [vmem:[#allocation2 + $0x8] sm:$0xff] %vm22_vm0, %v107_v25 }
  0x92   :  { %v132_v31 = vadd.f32 %v129_v18, %v123_v30  ;;  %115 = vst.msk [vmem:[#allocation2 + $0x18] sm:$0xff] %vm22_vm0, %v109_v26 }
  0x93   :  { %v148_v32 = vadd.f32 %v201_v24, %v130_v29 }
  0x94   :  { %v150_v35 = vadd.f32 %v205_v28, %v132_v31 }
  0x95   :  { %v154_v36 = vpack.c.bf16 %v148_v32, %v148_v32  ;;  %v103_v37 = vpop.f32.mrf.mxu2 }
  0x96   :  { %v156_v38 = vpack.c.bf16 %v150_v35, %v150_v35  ;;  %v111_v40 = vadd.f32 %v103_v37, %v34_v34 }
  0x97   :  { %161 = vst.msk [vmem:[%s314_s4] sm:$0xf] %vm160_vm1, %v154_v36  ;;  %v125_v41 = vld [vmem:[#allocation2 + $0x20] sm:$0xff] }
  0x98   :  { %163 = vst.msk [vmem:[%s314_s4 + $0x8] sm:$0xf] %vm160_vm1, %v156_v38  ;;  %v134_v43 = vadd.f32 %v129_v18, %v125_v41  ;;  %v122_v44 = vld [vmem:[#allocation2 + $0x8] sm:$0xff] }
  0x99   :  { %v131_v46 = vadd.f32 %v129_v18, %v122_v44  ;;  %v124_v47 = vld [vmem:[#allocation2 + $0x18] sm:$0xff]  ;;  %117 = vst.msk [vmem:[#allocation2 + $0x28] sm:$0xff] %vm22_vm0, %v111_v40 }
  0x9a   :  { %v152_v48 = vadd.f32 %v209_v39, %v134_v43  ;;  %v133_v49 = vadd.f32 %v129_v18, %v124_v47 }
  0x9b   :  { %v149_v50 = vadd.f32 %v202_v42, %v131_v46 }
  0x9c   :  { %v158_v51 = vpack.c.bf16 %v152_v48, %v152_v48  ;;  %v151_v52 = vadd.f32 %v206_v45, %v133_v49 }
  0x9d   :  { %v155_v53 = vpack.c.bf16 %v149_v50, %v149_v50 }
  0x9e   :  { %165 = vst.msk [vmem:[%s314_s4 + $0x10] sm:$0xf] %vm160_vm1, %v158_v51  ;;  %v157_v54 = vpack.c.bf16 %v151_v52, %v151_v52 }
  0x9f   :  { %162 = vst.msk [vmem:[%s314_s4 + $0x4] sm:$0xf] %vm160_vm1, %v155_v53 }
  0xa0   :  { %164 = vst.msk [vmem:[%s314_s4 + $0xc] sm:$0xf] %vm160_vm1, %v157_v54  ;;  %v126_v56 = vld [vmem:[#allocation2 + $0x28] sm:$0xff] }
  0xa1   :  { %v135_v57 = vadd.f32 %v129_v18, %v126_v56 }
  0xa3   :  { %v153_v58 = vadd.f32 %v210_v55, %v135_v57 }
  0xa5   :  { %v159_v59 = vpack.c.bf16 %v153_v58, %v153_v58 }
  0xa7   :  { %166 = vst.msk [vmem:[%s314_s4 + $0x14] sm:$0xf] %vm160_vm1, %v159_v59 }

// kernel: _lambda_.41
= control target key start
LH: loop header
LB: loop body
LE: loop exit
PB: predicated region body
PF: predicated region fallthrough
CT: control target
= control target key end

     0   :  { %vm33_vm0 = vcmask 261120   ;;  %v481_v15 = vmov 32.0   ;;  %s740_s0 = inlined_call_operand.vmem [shape: bf16[48,32], index: 0, kind: input, shape index: {}]   ;;  %s741_s3 = inlined_call_operand.vmem [shape: bf16[32,128], index: 3, kind: input, shape index: {}]   ;;  %s742_s1 = inlined_call_operand.vmem [shape: bf16[1,32], index: 1, kind: input, shape index: {}]   ;;  %s743_s2 = inlined_call_operand.vmem [shape: bf16[1,32], index: 2, kind: input, shape index: {}]   ;;  %s744_s4 = inlined_call_operand.vmem [shape: bf16[1,128], index: 4, kind: input, shape index: {}]   ;;  %s745_s5 = inlined_call_operand.vmem [shape: bf16[48,128], index: 5, kind: output, shape index: {}]  }
   0x1   :  { %v435_v0 = vld [vmem:[%s740_s0 + $0x10] sm:$0xff]   ;;  %v434_v1 = vld [vmem:[%s740_s0 + $0x8] sm:$0xff]   ;;  %v408_v2 = vld [vmem:[%s740_s0] sm:$0xff]   ;;  %443 = vrcp.f32 %v481_v15 }
   0x2   :  { %v417_v3 = vunpack.c.l.bf16 %v435_v0  ;;  %v413_v4 = vunpack.c.l.bf16 %v434_v1  ;;  %v409_v5 = vunpack.c.l.bf16 %v408_v2  ;;  %v418_v9 = vunpack.c.h.bf16 %v435_v0  ;;  %v406_v53 = vld [vmem:[%s741_s3 + $0x8] sm:$0xff]  ;;  %v405_v59 = vld [vmem:[%s741_s3] sm:$0xff] }
   0x3   :  { %v414_v10 = vunpack.c.h.bf16 %v434_v1  ;;  %v410_v11 = vunpack.c.h.bf16 %v408_v2  ;;  %228 = vmatpush.bf16.msra.mxu0 %v406_v53  ;;  %439 = vmatpush.bf16.msra.mxu2 %v406_v53  ;;  %v173_v15 = vld [vmem:[%s742_s1] sm:$0x1] }
   0x4   :  { %v46_v6 = vsel %vm33_vm0, %v417_v3, 0.0  ;;  %v40_v7 = vsel %vm33_vm0, %v413_v4, 0.0  ;;  %v34_v8 = vsel %vm33_vm0, %v409_v5, 0.0  ;;  %v49_v12 = vsel %vm33_vm0, %v418_v9, 0.0  ;;  %438 = vmatpush.bf16.msra.mxu1 %v406_v53 }
   0x5   :  { %47 = vadd.xlane.f32.xlu0 %v46_v6  ;;  %41 = vadd.xlane.f32.xlu2 %v40_v7  ;;  %v43_v13 = vsel %vm33_vm0, %v414_v10, 0.0  ;;  %v37_v14 = vsel %vm33_vm0, %v410_v11, 0.0 }
   0x6   :  { %35 = vadd.xlane.f32.xlu1 %v34_v8 }
   0x7   :  { %v444_v16 = vpop.eup %443  ;;  %229 = vmatpush.bf16.msra.mxu0 %v405_v59  ;;  %441 = vmatpush.bf16.msra.mxu2 %v405_v59 }
   0x8   :  { %v53_v17 = vmul.f32 32.0, %v444_v16  ;;  %vm57_vm1 = vweird.f32 %v444_v16  ;;  %440 = vmatpush.bf16.msra.mxu1 %v405_v59 }
   0xa   :  { %v54_v18 = vsub.f32 1.0, %v53_v17 }
   0xc   :  { %v55_v19 = vmul.f32 %v444_v16, %v54_v18 }
   0xd   :  { %50 = vadd.xlane.f32.xlu0 %v49_v12  ;;  %44 = vadd.xlane.f32.xlu2 %v43_v13 }
   0xe   :  { %38 = vadd.xlane.f32.xlu1 %v37_v14  ;;  %v56_v20 = vadd.f32 %v444_v16, %v55_v19 }
  0x10   :  { %v527_v21 = vsel %vm57_vm1, %v444_v16, %v56_v20 }
  0x78   :  { %v48_v22 = vpop.xlane.xlu0 %47  ;;  %v42_v23 = vpop.xlane.xlu2 %41 }
  0x79   :  { %v63_v24 = vmul.f32 %v527_v21, %v48_v22  ;;  %v36_v25 = vpop.xlane.xlu1 %35  ;;  %v61_v39 = vmul.f32 %v527_v21, %v42_v23 }
  0x7a   :  { %v59_v26 = vmul.f32 %v527_v21, %v36_v25 }
  0x7b   :  { %v531_v27 = vsub.f32 %v417_v3, %v63_v24  ;;  %v557_v46 = vsub.f32 %v413_v4, %v61_v39  ;;  %v174_v24 = vunpack.c.l.bf16 %v173_v15 }
  0x7c   :  { %v533_v28 = vsub.f32 %v409_v5, %v59_v26 }
  0x7d   :  { %v75_v29 = vmul.f32 %v531_v27, %v531_v27  ;;  %v73_v50 = vmul.f32 %v557_v46, %v557_v46 }
  0x7e   :  { %v71_v30 = vmul.f32 %v533_v28, %v533_v28 }
  0x7f   :  { %v89_v31 = vsel %vm33_vm0, %v75_v29, 0.0  ;;  %v83_v51 = vsel %vm33_vm0, %v73_v50, 0.0 }
  0x80   :  { %90 = vadd.xlane.f32.xlu0 %v89_v31  ;;  %v51_v32 = vpop.xlane.xlu0 %50  ;;  %v45_v33 = vpop.xlane.xlu2 %44  ;;  %v77_v34 = vsel %vm33_vm0, %v71_v30, 0.0  ;;  %v182_v31 = vld [vmem:[%s743_s2] sm:$0x1] }
  0x81   :  { %v64_v35 = vmul.f32 %v527_v21, %v51_v32  ;;  %v62_v36 = vmul.f32 %v527_v21, %v45_v33  ;;  %78 = vadd.xlane.f32.xlu2 %v77_v34  ;;  %v39_v37 = vpop.xlane.xlu1 %38 }
  0x82   :  { %v60_v38 = vmul.f32 %v527_v21, %v39_v37  ;;  %v175_v37 = vperm.slane %v174_v24, 0 }
  0x83   :  { %v545_v40 = vsub.f32 %v418_v9, %v64_v35  ;;  %v547_v41 = vsub.f32 %v414_v10, %v62_v36 }
  0x84   :  { %v549_v42 = vsub.f32 %v410_v11, %v60_v38 }
  0x85   :  { %v76_v43 = vmul.f32 %v545_v40, %v545_v40  ;;  %v74_v44 = vmul.f32 %v547_v41, %v547_v41 }
  0x86   :  { %v72_v45 = vmul.f32 %v549_v42, %v549_v42 }
  0x87   :  { %v92_v47 = vsel %vm33_vm0, %v76_v43, 0.0  ;;  %v86_v48 = vsel %vm33_vm0, %v74_v44, 0.0  ;;  %v183_v43 = vunpack.c.l.bf16 %v182_v31 }
  0x88   :  { %93 = vadd.xlane.f32.xlu1 %v92_v47  ;;  %v80_v49 = vsel %vm33_vm0, %v72_v45, 0.0 }
  0x89   :  { %87 = vadd.xlane.f32.xlu2 %v86_v48  ;;  %81 = vadd.xlane.f32.xlu0 %v80_v49 }
  0x90   :  { %84 = vadd.xlane.f32.xlu1 %v83_v51 }
  0xf3   :  { %v91_v52 = vpop.xlane.xlu0 %90 }
  0xf4   :  { %v99_v54 = vmul.f32 %v91_v52, %v527_v21  ;;  %v79_v55 = vpop.xlane.xlu2 %78 }
  0xf5   :  { %v95_v56 = vmul.f32 %v79_v55, %v527_v21 }
  0xf6   :  { %v105_v57 = vadd.f32 1e-05, %v99_v54 }
  0xf7   :  { %v101_v58 = vadd.f32 1e-05, %v95_v56 }
  0xf8   :  { %445 = vrsqrt.f32 %v105_v57  ;;  %vm153_vm3 = vweird.f32 %v105_v57 }
  0xf9   :  { %447 = vrsqrt.f32 %v101_v58  ;;  %vm113_vm4 = vweird.f32 %v101_v58 }
  0xfb   :  { %v94_v60 = vpop.xlane.xlu1 %93 }
  0xfc   :  { %v88_v61 = vpop.xlane.xlu2 %87  ;;  %v82_v62 = vpop.xlane.xlu0 %81  ;;  %v100_v63 = vmul.f32 %v94_v60, %v527_v21  ;;  %v184_v60 = vperm.slane %v183_v43, 0 }
  0xfd   :  { %v98_v0 = vmul.f32 %v88_v61, %v527_v21  ;;  %v96_v1 = vmul.f32 %v82_v62, %v527_v21 }
  0xfe   :  { %v446_v2 = vpop.eup %445  ;;  %v576_v3 = vadd.f32 1e-05, %v100_v63 }
  0xff   :  { %v448_v4 = vpop.eup %447  ;;  %v148_v5 = vmul.f32 %v446_v2, %v105_v57  ;;  %v104_v6 = vadd.f32 1e-05, %v98_v0  ;;  %v578_v7 = vadd.f32 1e-05, %v96_v1  ;;  %vm154_vm2 = vweird.f32 %v446_v2 }
 0x100   :  { %v108_v8 = vmul.f32 %v448_v4, %v101_v58  ;;  %449 = vrsqrt.f32 %v576_v3  ;;  %vm114_vm5 = vweird.f32 %v448_v4  ;;  %vm594_vm6 = vmor %vm153_vm3, %vm154_vm2  ;;  %vm163_vm9 = vweird.f32 %v576_v3 }
 0x101   :  { %v149_v9 = vmul.f32 %v446_v2, %v148_v5  ;;  %451 = vrsqrt.f32 %v104_v6  ;;  %vm600_vm7 = vmor %vm113_vm4, %vm114_vm5  ;;  %vm143_vm8 = vweird.f32 %v104_v6  ;;  %vm123_vm12 = vweird.f32 %v578_v7 }
 0x102   :  { %v109_v10 = vmul.f32 %v448_v4, %v108_v8  ;;  %453 = vrsqrt.f32 %v578_v7 }
 0x103   :  { %v150_v11 = vmul.f32 0.5, %v149_v9  ;;  %v85_v12 = vpop.xlane.xlu1 %84 }
 0x104   :  { %v110_v13 = vmul.f32 0.5, %v109_v10  ;;  %v97_v14 = vmul.f32 %v85_v12, %v527_v21 }
 0x105   :  { %v151_v16 = vsub.f32 1.5, %v150_v11 }
 0x106   :  { %v450_v17 = vpop.eup %449  ;;  %v111_v18 = vsub.f32 1.5, %v110_v13  ;;  %v586_v19 = vadd.f32 1e-05, %v97_v14 }
 0x107   :  { %v452_v20 = vpop.eup %451  ;;  %v152_v22 = vmul.f32 %v446_v2, %v151_v16  ;;  %v158_v23 = vmul.f32 %v450_v17, %v576_v3  ;;  %vm164_vm10 = vweird.f32 %v450_v17 }
 0x108   :  { %v454_v25 = vpop.eup %453  ;;  %v138_v26 = vmul.f32 %v452_v20, %v104_v6  ;;  %455 = vrsqrt.f32 %v586_v19  ;;  %v112_v21 = vmul.f32 %v448_v4, %v111_v18  ;;  %vm144_vm11 = vweird.f32 %v452_v20  ;;  %vm165_vm14 = vmor %vm163_vm9, %vm164_vm10 }
 0x109   :  { %v118_v29 = vmul.f32 %v454_v25, %v578_v7  ;;  %v159_v30 = vmul.f32 %v450_v17, %v158_v23  ;;  %v156_v34 = vsel %vm594_vm6, %v446_v2, %v152_v22  ;;  %vm124_vm13 = vweird.f32 %v454_v25  ;;  %vm614_vm15 = vmor %vm143_vm8, %vm144_vm11 }
 0x10a   :  { %v139_v33 = vmul.f32 %v452_v20, %v138_v26  ;;  %v116_v44 = vsel %vm600_vm7, %v448_v4, %v112_v21  ;;  %v171_v49 = vmul.f32 %v156_v34, %v531_v27  ;;  %vm125_vm1 = vmor %vm123_vm12, %vm124_vm13  ;;  %vm133_vm3 = vweird.f32 %v586_v19 }
 0x10b   :  { %v119_v35 = vmul.f32 %v454_v25, %v118_v29  ;;  %v160_v36 = vmul.f32 0.5, %v159_v30  ;;  %v167_v54 = vmul.f32 %v116_v44, %v533_v28 }
 0x10c   :  { %v140_v39 = vmul.f32 0.5, %v139_v33  ;;  %v180_v61 = vmul.f32 %v175_v37, %v171_v49 }
 0x10d   :  { %v120_v45 = vmul.f32 0.5, %v119_v35  ;;  %v161_v47 = vsub.f32 1.5, %v160_v36  ;;  %v176_v1 = vmul.f32 %v175_v37, %v167_v54 }
 0x10e   :  { %v456_v48 = vpop.eup %455  ;;  %v141_v50 = vsub.f32 1.5, %v140_v39  ;;  %v189_v6 = vadd.f32 %v184_v60, %v180_v61 }
 0x10f   :  { %v121_v51 = vsub.f32 1.5, %v120_v45  ;;  %v162_v52 = vmul.f32 %v450_v17, %v161_v47  ;;  %v128_v53 = vmul.f32 %v456_v48, %v586_v19  ;;  %vm134_vm2 = vweird.f32 %v456_v48 }
 0x110   :  { %v142_v55 = vmul.f32 %v452_v20, %v141_v50  ;;  %vm135_vm4 = vmor %vm133_vm3, %vm134_vm2 }
 0x111   :  { %v122_v27 = vmul.f32 %v454_v25, %v121_v51  ;;  %v166_v57 = vsel %vm165_vm14, %v450_v17, %v162_v52  ;;  %v129_v58 = vmul.f32 %v456_v48, %v128_v53  ;;  %v198_v17 = vld [vmem:[%s744_s4] sm:$0x1] }
 0x112   :  { %v172_v59 = vmul.f32 %v166_v57, %v545_v40  ;;  %v146_v28 = vsel %vm614_vm15, %v452_v20, %v142_v55  ;;  %v185_v40 = vadd.f32 %v184_v60, %v176_v1  ;;  %v199_v18 = vunpack.c.l.bf16 %v198_v17 }
 0x113   :  { %v126_v62 = vsel %vm125_vm1, %v454_v25, %v122_v27  ;;  %v130_v63 = vmul.f32 0.5, %v129_v58  ;;  %v170_v4 = vmul.f32 %v146_v28, %v547_v41 }
 0x114   :  { %v168_v0 = vmul.f32 %v126_v62, %v549_v42  ;;  %v181_v2 = vmul.f32 %v175_v37, %v172_v59  ;;  %v200_v19 = vperm.slane %v199_v18, 0 }
 0x115   :  { %v131_v3 = vsub.f32 1.5, %v130_v63  ;;  %v179_v13 = vmul.f32 %v175_v37, %v170_v4 }
 0x116   :  { %v177_v5 = vmul.f32 %v175_v37, %v168_v0  ;;  %v190_v7 = vadd.f32 %v184_v60, %v181_v2 }
 0x117   :  { %v132_v8 = vmul.f32 %v456_v48, %v131_v3  ;;  %v188_v15 = vadd.f32 %v184_v60, %v179_v13 }
 0x118   :  { %v186_v9 = vadd.f32 %v184_v60, %v177_v5  ;;  %v193_v10 = vpack.c.bf16 %v190_v7, %v189_v6 }
 0x119   :  { %v136_v11 = vsel %vm135_vm4, %v456_v48, %v132_v8 }
 0x11a   :  { %v169_v12 = vmul.f32 %v136_v11, %v557_v46  ;;  %v191_v42 = vpack.c.bf16 %v186_v9, %v185_v40  ;;  %398 = vmatmul.msk.bf16.vlgmr.msra.gmra.mxu2 %vm33_vm0, %v193_v10 }
 0x11c   :  { %396 = vmatmul.msk.bf16.vlgmr.msra.gmra.mxu0 %vm33_vm0, %v191_v42  ;;  %v178_v41 = vmul.f32 %v175_v37, %v169_v12 }
 0x11e   :  { %v187_v14 = vadd.f32 %v184_v60, %v178_v41 }
 0x120   :  { %v192_v16 = vpack.c.bf16 %v188_v15, %v187_v14 }
 0x122   :  { %397 = vmatmul.msk.bf16.vlgmr.msra.gmra.mxu1 %vm33_vm0, %v192_v16 }
 0x199   :  { %v231_v20 = vpop.f32.mrf.mxu0 }
 0x19a   :  { %v631_v46 = vadd.f32 %v231_v20, %v200_v19 }
 0x19c   :  { %v399_v22 = vmul.f32 -1.702, %v631_v46 }
 0x19d   :  { %v241_v23 = vpop.f32.mrf.mxu2 }
 0x19e   :  { %v258_v24 = vmul.f32 1.442695, %v399_v22  ;;  %v634_v25 = vadd.f32 %v241_v23, %v200_v19 }
 0x19f   :  { %v236_v26 = vpop.f32.mrf.mxu1 }
 0x1a0   :  { %457 = vpow2.f32 %v258_v24  ;;  %v403_v21 = vmul.f32 -1.702, %v634_v25  ;;  %v637_v29 = vadd.f32 %v236_v26, %v200_v19 }
 0x1a1   :  { %v233_v30 = vpop.f32.mrf.mxu0 }
 0x1a2   :  { %v266_v31 = vmul.f32 1.442695, %v403_v21  ;;  %v639_v32 = vadd.f32 %v233_v30, %v200_v19  ;;  %v401_v33 = vmul.f32 -1.702, %v637_v29 }
 0x1a4   :  { %459 = vpow2.f32 %v266_v31  ;;  %v400_v34 = vmul.f32 -1.702, %v639_v32  ;;  %v262_v35 = vmul.f32 1.442695, %v401_v33 }
 0x1a5   :  { %v243_v36 = vpop.f32.mrf.mxu2 }
 0x1a6   :  { %v458_v37 = vpop.eup %457  ;;  %v260_v38 = vmul.f32 1.442695, %v400_v34  ;;  %461 = vpow2.f32 %v262_v35  ;;  %v643_v39 = vadd.f32 %v243_v36, %v200_v19 }
 0x1a7   :  { %v270_v43 = vadd.f32 1.0, %v458_v37  ;;  %v238_v44 = vpop.f32.mrf.mxu1 }
 0x1a8   :  { %463 = vpow2.f32 %v260_v38  ;;  %v404_v45 = vmul.f32 -1.702, %v643_v39  ;;  %v646_v47 = vadd.f32 %v238_v44, %v200_v19 }
 0x1a9   :  { %465 = vrcp.f32 %v270_v43  ;;  %v285_v61 = vand.u32 2147483647, %v270_v43  ;;  %v287_v28 = vand.u32 2147483648, %v270_v43  ;;  %vm281_vm0 = vweird.f32 %v270_v43 }
 0x1aa   :  { %v460_v48 = vpop.eup %459  ;;  %v268_v49 = vmul.f32 1.442695, %v404_v45  ;;  %v402_v50 = vmul.f32 -1.702, %v646_v47 }
 0x1ab   :  { %v274_v51 = vadd.f32 1.0, %v460_v48  ;;  %vm662_vm5 = vcmp.eq.f32.partialorder %v285_v61, 8.507059e+37  ;;  %v288_v40 = vor.u32 1.1754944e-38, %v287_v28 }
 0x1ac   :  { %v462_v52 = vpop.eup %461  ;;  %467 = vpow2.f32 %v268_v49  ;;  %v264_v53 = vmul.f32 1.442695, %v402_v50 }
 0x1ad   :  { %469 = vrcp.f32 %v274_v51  ;;  %v649_v55 = vadd.f32 1.0, %v462_v52  ;;  %v347_v2 = vand.u32 2147483648, %v274_v51  ;;  %v345_v5 = vand.u32 2147483647, %v274_v51 }
 0x1ae   :  { %v464_v54 = vpop.eup %463  ;;  %471 = vpow2.f32 %v264_v53  ;;  %vm341_vm7 = vweird.f32 %v274_v51 }
 0x1af   :  { %v466_v56 = vpop.eup %465  ;;  %v271_v27 = vadd.f32 1.0, %v464_v54  ;;  %473 = vrcp.f32 %v649_v55  ;;  %v348_v42 = vor.u32 1.1754944e-38, %v347_v2  ;;  %vm670_vm8 = vcmp.eq.f32.partialorder %v345_v5, 8.507059e+37 }
 0x1b0   :  { %v277_v57 = vmul.f32 %v466_v56, %v270_v43  ;;  %vm282_vm6 = vweird.f32 %v466_v56  ;;  %vm311_vm9 = vweird.f32 %v649_v55  ;;  %v315_v26 = vand.u32 2147483647, %v649_v55 }
 0x1b1   :  { %475 = vrcp.f32 %v271_v27  ;;  %v300_v15 = vand.u32 2147483647, %v271_v27  ;;  %v302_v16 = vand.u32 2147483648, %v271_v27  ;;  %vm676_vm10 = vmor %vm281_vm0, %vm282_vm6  ;;  %vm296_vm12 = vweird.f32 %v271_v27 }
 0x1b2   :  { %v468_v58 = vpop.eup %467  ;;  %v278_v59 = vsub.f32 1.0, %v277_v57  ;;  %v317_v21 = vand.u32 2147483648, %v649_v55 }
 0x1b3   :  { %v652_v60 = vpop.eup %469  ;;  %v654_v62 = vadd.f32 1.0, %v468_v58  ;;  %vm301_vm15 = vcmp.eq.f32.partialorder %v300_v15, 8.507059e+37  ;;  %v303_v35 = vor.u32 1.1754944e-38, %v302_v16 }
 0x1b4   :  { %v472_v63 = vpop.eup %471  ;;  %v279_v0 = vmul.f32 %v466_v56, %v278_v59  ;;  %v337_v1 = vmul.f32 %v652_v60, %v274_v51  ;;  %vm342_vm11 = vweird.f32 %v652_v60  ;;  %v318_v28 = vor.u32 1.1754944e-38, %v317_v21 }
 0x1b5   :  { %477 = vrcp.f32 %v654_v62  ;;  %v658_v3 = vpop.eup %473  ;;  %v660_v6 = vadd.f32 1.0, %v472_v63  ;;  %v360_v30 = vand.u32 2147483647, %v654_v62  ;;  %v362_v31 = vand.u32 2147483648, %v654_v62  ;;  %vm691_vm14 = vmor %vm341_vm7, %vm342_vm11 }
 0x1b6   :  { %v338_v4 = vsub.f32 1.0, %v337_v1  ;;  %v307_v9 = vmul.f32 %v658_v3, %v649_v55  ;;  %v280_v10 = vadd.f32 %v466_v56, %v279_v0  ;;  %vm312_vm2 = vweird.f32 %v658_v3 }
 0x1b7   :  { %v476_v7 = vpop.eup %475  ;;  %479 = vrcp.f32 %v660_v6  ;;  %vm356_vm4 = vweird.f32 %v654_v62  ;;  %vm705_vm0 = vcmp.eq.f32.partialorder %v360_v30, 8.507059e+37  ;;  %v363_v52 = vor.u32 1.1754944e-38, %v362_v31 }
 0x1b8   :  { %v339_v11 = vmul.f32 %v652_v60, %v338_v4  ;;  %v292_v12 = vmul.f32 %v476_v7, %v271_v27  ;;  %v308_v13 = vsub.f32 1.0, %v307_v9  ;;  %v284_v22 = vsel %vm676_vm10, %v466_v56, %v280_v10 }
 0x1b9   :  { %vm297_vm13 = vweird.f32 %v476_v7  ;;  %v289_v38 = vsel %vm662_vm5, %v288_v40, %v284_v22  ;;  %vm713_vm5 = vmor %vm311_vm9, %vm312_vm2  ;;  %vm316_vm9 = vcmp.eq.f32.partialorder %v315_v26, 8.507059e+37 }
 0x1ba   :  { %v293_v14 = vsub.f32 1.0, %v292_v12  ;;  %v340_v19 = vadd.f32 %v652_v60, %v339_v11  ;;  %v309_v20 = vmul.f32 %v658_v3, %v308_v13  ;;  %vm298_vm1 = vmor %vm296_vm12, %vm297_vm13  ;;  %v366_v53 = vmul.f32 %v289_v38, %v631_v46 }
 0x1bb   :  { %v478_v17 = vpop.eup %477  ;;  %v330_v46 = vand.u32 2147483647, %v660_v6 }
 0x1bc   :  { %v294_v23 = vmul.f32 %v476_v7, %v293_v14  ;;  %v352_v24 = vmul.f32 %v478_v17, %v654_v62  ;;  %v344_v43 = vsel %vm691_vm14, %v652_v60, %v340_v19  ;;  %v310_v44 = vadd.f32 %v658_v3, %v309_v20 }
 0x1bd   :  { %v480_v37 = vpop.eup %479  ;;  %vm357_vm3 = vweird.f32 %v478_v17  ;;  %v349_v58 = vsel %vm670_vm8, %v348_v42, %v344_v43  ;;  %vm326_vm8 = vweird.f32 %v660_v6  ;;  %vm331_vm11 = vcmp.eq.f32.partialorder %v330_v46, 8.507059e+37 }
 0x1be   :  { %v295_v34 = vadd.f32 %v476_v7, %v294_v23  ;;  %v353_v36 = vsub.f32 1.0, %v352_v24  ;;  %v322_v49 = vmul.f32 %v480_v37, %v660_v6  ;;  %v314_v59 = vsel %vm713_vm5, %v658_v3, %v310_v44  ;;  %vm358_vm6 = vmor %vm356_vm4, %vm357_vm3 }
 0x1bf   :  { %vm327_vm7 = vweird.f32 %v480_v37  ;;  %v370_v63 = vmul.f32 %v349_v58, %v634_v25  ;;  %v319_v2 = vsel %vm316_vm9, %v318_v28, %v314_v59 }
 0x1c0   :  { %v299_v45 = vsel %vm298_vm1, %v476_v7, %v295_v34  ;;  %v354_v48 = vmul.f32 %v478_v17, %v353_v36  ;;  %v323_v57 = vsub.f32 1.0, %v322_v49  ;;  %vm328_vm10 = vmor %vm326_vm8, %vm327_vm7  ;;  %v368_v8 = vmul.f32 %v319_v2, %v637_v29 }
 0x1c1   :  { %v304_v50 = vsel %vm301_vm15, %v303_v35, %v299_v45 }
 0x1c2   :  { %v367_v54 = vmul.f32 %v304_v50, %v639_v32  ;;  %v355_v27 = vadd.f32 %v478_v17, %v354_v48  ;;  %v332_v32 = vand.u32 2147483648, %v660_v6  ;;  %v324_v61 = vmul.f32 %v480_v37, %v323_v57 }
 0x1c4   :  { %v422_v60 = vpack.c.bf16 %v367_v54, %v366_v53  ;;  %v359_v55 = vsel %vm358_vm6, %v478_v17, %v355_v27  ;;  %v325_v1 = vadd.f32 %v480_v37, %v324_v61  ;;  %v333_v3 = vor.u32 1.1754944e-38, %v332_v32 }
 0x1c5   :  { %v364_v62 = vsel %vm705_vm0, %v363_v52, %v359_v55 }
 0x1c6   :  { %423 = vst [vmem:[%s745_s5] sm:$0xff] %v422_v60   ;;  %v371_v0 = vmul.f32 %v364_v62, %v643_v39  ;;  %v329_v5 = vsel %vm328_vm10, %v480_v37, %v325_v1 }
 0x1c7   :  { %v334_v7 = vsel %vm331_vm11, %v333_v3, %v329_v5 }
 0x1c8   :  { %v432_v4 = vpack.c.bf16 %v371_v0, %v370_v63  ;;  %v369_v25 = vmul.f32 %v334_v7, %v646_v47 }
 0x1ca   :  { %437 = vst [vmem:[%s745_s5 + $0x10] sm:$0xff] %v432_v4   ;;  %v427_v40 = vpack.c.bf16 %v369_v25, %v368_v8 }
 0x1cc   :  { %436 = vst [vmem:[%s745_s5 + $0x8] sm:$0xff] %v427_v40  }

// kernel: _lambda_.39
= control target key start
LH: loop header
LB: loop body
LE: loop exit
PB: predicated region body
PF: predicated region fallthrough
CT: control target
= control target key end

     0   :  { %s1464_s6 = smov 0   ;;  %s2054_s0 = inlined_call_operand.vmem [shape: bf16[3,16,3,2,16], index: 0, kind: input, shape index: {}]   ;;  %s2055_s1 = inlined_call_operand.vmem [shape: bf16[3,16,2,16], index: 1, kind: output, shape index: {}]  }
   0x1 LB: > { %s1327_s7 = sadd.s32 4294967295, %s1451_s6   ;;  %p1331_p0 = scmp.ge.s32.totalorder %s1451_s6, 1  ;;  %s1451_s6 = sphi %s1464_s6, %s11_s6  }
   0x2   : > { %p86_p1 = scmp.lt.s32.totalorder %s1451_s6, 4 }
   0x4   : > { %p87_p2 = pnand %p1331_p0, %p86_p1 }
   0x5   : > { %p104_p3 = scmp.lt.s32.totalorder (!%p87_p2), %s1327_s7, 2 }
   0x6   : > { %90 = sbr.rel (%p87_p2) target bundleno = 1230 (0x4ce), region = 24 }
   0xb   : > { %s2061_s7 = smov (!%p104_p3, %s1327_s7), 2  ;;  %vm253_vm0 = vcmask 1041409   ;;  %vm256_vm1 = vcmask 1042434   ;;  %vm259_vm2 = vcmask 1043459   ;;  %vm262_vm3 = vcmask 1044484  }
   0xc   : > { %s1419_s8 = smul.u32 48, %s2061_s7  ;;  %vm265_vm4 = vcmask 1045509   ;;  %vm268_vm5 = vcmask 1046534   ;;  %vm271_vm6 = vcmask 1047559   ;;  %vm397_vm7 = vcmask 130048   ;;  %s1332_s12 = sshll.u32 %s2061_s7, 4 }
   0xd   : > { %vm578_vm10 = vcmask 1040384   ;;  %s1847_s15 = scalar_lea.vmem %s2055_s1, %s1332_s12  ;;  %vm653_vm11 = vcmask 122880   ;;  %vm654_vm12 = vsmask.f32 256  ;;  %vm1224_vm14 = vsmask.f32 7938 }
   0xe   : > { %s1478_s11 = scalar_lea.vmem %s2054_s0, %s1419_s8  ;;  %vm1857_vm13 = vmand %vm653_vm11, %vm654_vm12 }
   0xf   : > { %v122_v0 = vld [vmem:[%s1478_s11] sm:$0x1]  ;;  %v123_v1 = vld [vmem:[%s1478_s11 + $0x3] sm:$0x1]  ;;  %v124_v3 = vld [vmem:[%s1478_s11 + $0x6] sm:$0x1] }
  0x10   : > { %173 = vst [vmem:[#allocation1] ss:$9 sm:$0xff] %v122_v0  ;;  %v125_v5 = vld [vmem:[%s1478_s11 + $0x9] sm:$0x1]  ;;  %v126_v7 = vld [vmem:[%s1478_s11 + $0xc] sm:$0x1]  ;;  %vm1979_vm15 = vmand %vm653_vm11, %vm1224_vm14 }
  0x11   : > { %v127_v9 = vld [vmem:[%s1478_s11 + $0xf] sm:$0x1]  ;;  %v128_v11 = vld [vmem:[%s1478_s11 + $0x12] sm:$0x1]  ;;  %v129_v13 = vld [vmem:[%s1478_s11 + $0x15] sm:$0x1] }
  0x12   : > { %v130_v15 = vld [vmem:[%s1478_s11 + $0x18] sm:$0x1]  ;;  %v131_v17 = vld [vmem:[%s1478_s11 + $0x1b] sm:$0x1]  ;;  %v132_v19 = vld [vmem:[%s1478_s11 + $0x1e] sm:$0x1] }
  0x13   : > { %v133_v21 = vld [vmem:[%s1478_s11 + $0x21] sm:$0x1]  ;;  %v134_v23 = vld [vmem:[%s1478_s11 + $0x24] sm:$0x1]  ;;  %v135_v25 = vld [vmem:[%s1478_s11 + $0x27] sm:$0x1] }
  0x14   : > { %v136_v27 = vld [vmem:[%s1478_s11 + $0x2a] sm:$0x1]  ;;  %v137_v29 = vld [vmem:[%s1478_s11 + $0x2d] sm:$0x1]  ;;  %v1333_v31 = vld [vmem:[%s1478_s11 + $0x1] sm:$0x1] }
  0x15   : > { %v1334_v33 = vld [vmem:[%s1478_s11 + $0x4] sm:$0x1]  ;;  %v1335_v35 = vld [vmem:[%s1478_s11 + $0x7] sm:$0x1]  ;;  %v1336_v37 = vld [vmem:[%s1478_s11 + $0xa] sm:$0x1] }
  0x16   : > { %v1337_v39 = vld [vmem:[%s1478_s11 + $0xd] sm:$0x1]  ;;  %v1338_v41 = vld [vmem:[%s1478_s11 + $0x10] sm:$0x1]  ;;  %v1339_v43 = vld [vmem:[%s1478_s11 + $0x13] sm:$0x1] }
  0x17   : > { %v1482_v2 = vld [vmem:[#allocation1] sm:$0xf]  ;;  %v1340_v45 = vld [vmem:[%s1478_s11 + $0x16] sm:$0x1]  ;;  %v1341_v47 = vld [vmem:[%s1478_s11 + $0x19] sm:$0x1] }
  0x18   : > { %177 = vst [vmem:[#allocation1] ss:$9 sm:$0xff] %v123_v1  ;;  %v1342_v49 = vld [vmem:[%s1478_s11 + $0x1c] sm:$0x1]  ;;  %v1343_v51 = vld [vmem:[%s1478_s11 + $0x1f] sm:$0x1] }
  0x19   : > { %v1344_v53 = vld [vmem:[%s1478_s11 + $0x22] sm:$0x1]  ;;  %v1345_v55 = vld [vmem:[%s1478_s11 + $0x25] sm:$0x1]  ;;  %v1346_v57 = vld [vmem:[%s1478_s11 + $0x28] sm:$0x1] }
  0x1a   : > { %v1347_v1 = vld [vmem:[%s1478_s11 + $0x2b] sm:$0x1] }
  0x1f   : > { %v1485_v4 = vld [vmem:[#allocation1] sm:$0xf] }
  0x20   : > { %181 = vst [vmem:[#allocation1] ss:$9 sm:$0xff] %v124_v3 }
  0x27   : > { %v1488_v6 = vld [vmem:[#allocation1] sm:$0xf] }
  0x28   : > { %185 = vst [vmem:[#allocation1] ss:$9 sm:$0xff] %v125_v5 }
  0x2f   : > { %v1491_v8 = vld [vmem:[#allocation1] sm:$0xf] }
  0x30   : > { %189 = vst [vmem:[#allocation1] ss:$9 sm:$0xff] %v126_v7 }
  0x37   : > { %v1494_v10 = vld [vmem:[#allocation1] sm:$0xf] }
  0x38   : > { %193 = vst [vmem:[#allocation1] ss:$9 sm:$0xff] %v127_v9  ;;  %v237_v9 = vunpack.c.l.b16 %v1485_v4 }
  0x3f   : > { %v1497_v12 = vld [vmem:[#allocation1] sm:$0xf] }
  0x40   : > { %197 = vst [vmem:[#allocation1] ss:$9 sm:$0xff] %v128_v11 }
  0x47   : > { %v1500_v14 = vld [vmem:[#allocation1] sm:$0xf] }
  0x48   : > { %201 = vst [vmem:[#allocation1] ss:$9 sm:$0xff] %v129_v13 }
  0x4f   : > { %v1503_v16 = vld [vmem:[#allocation1] sm:$0xf] }
  0x50   : > { %205 = vst [vmem:[#allocation1] ss:$9 sm:$0xff] %v130_v15 }
  0x57   : > { %v1506_v18 = vld [vmem:[#allocation1] sm:$0xf] }
  0x58   : > { %209 = vst [vmem:[#allocation1] ss:$9 sm:$0xff] %v131_v17 }
  0x5f   : > { %v1509_v20 = vld [vmem:[#allocation1] sm:$0xf] }
  0x60   : > { %213 = vst [vmem:[#allocation1] ss:$9 sm:$0xff] %v132_v19  ;;  %v245_v11 = vunpack.c.l.b16 %v1509_v20  ;;  %v236_v20 = vunpack.c.l.b16 %v1482_v2 }
  0x67   : > { %v1512_v22 = vld [vmem:[#allocation1] sm:$0xf] }
  0x68   : > { %217 = vst [vmem:[#allocation1] ss:$9 sm:$0xff] %v133_v21  ;;  %v246_v4 = vunpack.c.l.b16 %v1512_v22 }
  0x6f   : > { %v1515_v24 = vld [vmem:[#allocation1] sm:$0xf] }
  0x70   : > { %221 = vst [vmem:[#allocation1] ss:$9 sm:$0xff] %v134_v23 }
  0x77   : > { %v1518_v26 = vld [vmem:[#allocation1] sm:$0xf] }
  0x78   : > { %225 = vst [vmem:[#allocation1] ss:$9 sm:$0xff] %v135_v25 }
  0x7f   : > { %v1521_v28 = vld [vmem:[#allocation1] sm:$0xf] }
  0x80   : > { %229 = vst [vmem:[#allocation1] ss:$9 sm:$0xff] %v136_v27 }
  0x87   : > { %v1524_v30 = vld [vmem:[#allocation1] sm:$0xf] }
  0x88   : > { %233 = vst [vmem:[#allocation1] ss:$9 sm:$0xff] %v137_v29  ;;  %v238_v29 = vunpack.c.l.b16 %v1488_v6  ;;  %v247_v6 = vunpack.c.l.b16 %v1515_v24  ;;  %v248_v24 = vunpack.c.l.b16 %v1518_v26  ;;  %v249_v26 = vunpack.c.l.b16 %v1521_v28 }
  0x8f   : > { %v1527_v32 = vld [vmem:[#allocation1] sm:$0xf] }
  0x90   : > { %289 = vst [vmem:[#allocation1] ss:$9 sm:$0xff] %v1333_v31  ;;  %v244_v31 = vunpack.c.l.b16 %v1506_v18  ;;  %v275_v18 = vrot.slane %v246_v4, 6 }
  0x97   : > { %v290_v34 = vld [vmem:[#allocation1] sm:$0xf] }
  0x98   : > { %293 = vst [vmem:[#allocation1] ss:$9 sm:$0xff] %v1334_v33  ;;  %v352_v62 = vunpack.c.l.b16 %v290_v34  ;;  %v252_v33 = vrot.slane %v237_v9, 7  ;;  %v273_v34 = vrot.slane %v245_v11, 7 }
  0x9f   : > { %v294_v36 = vld [vmem:[#allocation1] sm:$0xf] }
  0xa0   : > { %297 = vst [vmem:[#allocation1] ss:$9 sm:$0xff] %v1335_v35  ;;  %v353_v59 = vunpack.c.l.b16 %v294_v36 }
  0xa2   : > { %v368_v0 = vrot.slane %v353_v59, 7 }
  0xa4   : > { %v369_v21 = vsel %vm253_vm0, %v368_v0, %v352_v62 }
  0xa7   : > { %v298_v38 = vld [vmem:[#allocation1] sm:$0xf] }
  0xa8   : > { %301 = vst [vmem:[#allocation1] ss:$9 sm:$0xff] %v1336_v37  ;;  %v354_v61 = vunpack.c.l.b16 %v298_v38 }
  0xaa   : > { %v370_v15 = vrot.slane %v354_v61, 6 }
  0xac   : > { %v371_v36 = vsel %vm256_vm1, %v370_v15, %v369_v21 }
  0xaf   : > { %v302_v40 = vld [vmem:[#allocation1] sm:$0xf] }
  0xb0   : > { %305 = vst [vmem:[#allocation1] ss:$9 sm:$0xff] %v1337_v39  ;;  %v355_v63 = vunpack.c.l.b16 %v302_v40  ;;  %v239_v39 = vunpack.c.l.b16 %v1491_v8  ;;  %v1348_v40 = vld [vmem:[%s1478_s11 + $0x2e] sm:$0x1]  ;;  %v240_v8 = vunpack.c.l.b16 %v1494_v10  ;;  %v241_v10 = vunpack.c.l.b16 %v1497_v12 }
  0xb1   : > { %v250_v12 = vunpack.c.l.b16 %v1524_v30 }
  0xb2   : > { %v372_v23 = vrot.slane %v355_v63, 5  ;;  %v261_v62 = vrot.slane %v240_v8, 4  ;;  %v279_v63 = vrot.slane %v248_v24, 4  ;;  %v264_v11 = vrot.slane %v241_v10, 3  ;;  %v1356_v24 = vld [vmem:[%s1478_s11 + $0x17] sm:$0x1] }
  0xb7   : > { %v1534_v42 = vld [vmem:[#allocation1] sm:$0xf] }
  0xb8   : > { %309 = vst [vmem:[#allocation1] ss:$9 sm:$0xff] %v1338_v41  ;;  %v356_v17 = vunpack.c.l.b16 %v1534_v42  ;;  %v255_v41 = vrot.slane %v238_v29, 6  ;;  %v283_v29 = vrot.slane %v250_v12, 2  ;;  %v705_v12 = vld [vmem:[%s1478_s11 + $0x3] sm:$0x1] }
  0xba   : > { %v374_v22 = vrot.slane %v356_v17, 4 }
  0xbf   : > { %v1537_v44 = vld [vmem:[#allocation1] sm:$0xf] }
  0xc0   : > { %313 = vst [vmem:[#allocation1] ss:$9 sm:$0xff] %v1339_v43  ;;  %v357_v37 = vunpack.c.l.b16 %v1537_v44  ;;  %v373_v43 = vsel %vm259_vm2, %v372_v23, %v371_v36 }
  0xc7   : > { %v1540_v46 = vld [vmem:[#allocation1] sm:$0xf] }
  0xc8   : > { %317 = vst [vmem:[#allocation1] ss:$9 sm:$0xff] %v1340_v45  ;;  %v254_v45 = vsel %vm253_vm0, %v252_v33, %v236_v20  ;;  %v358_v44 = vunpack.c.l.b16 %v1540_v46 }
  0xcf   : > { %v1543_v48 = vld [vmem:[#allocation1] sm:$0xf] }
  0xd0   : > { %321 = vst [vmem:[#allocation1] ss:$9 sm:$0xff] %v1341_v47  ;;  %v274_v47 = vsel %vm253_vm0, %v273_v34, %v244_v31  ;;  %v359_v46 = vunpack.c.l.b16 %v1543_v48  ;;  %v242_v48 = vunpack.c.l.b16 %v1500_v14  ;;  %v251_v14 = vunpack.c.l.b16 %v1527_v32 }
  0xd2   : > { %v380_v9 = vrot.slane %v359_v46, 1 }
  0xd7   : > { %v322_v50 = vld [vmem:[#allocation1] sm:$0xf] }
  0xd8   : > { %325 = vst [vmem:[#allocation1] ss:$9 sm:$0xff] %v1342_v49  ;;  %v360_v3 = vunpack.c.l.b16 %v322_v50 }
  0xdf   : > { %v326_v52 = vld [vmem:[#allocation1] sm:$0xf] }
  0xe0   : > { %329 = vst [vmem:[#allocation1] ss:$9 sm:$0xff] %v1343_v51  ;;  %v361_v60 = vunpack.c.l.b16 %v326_v52  ;;  %v376_v51 = vrot.slane %v357_v37, 3 }
  0xe2   : > { %v382_v7 = vrot.slane %v361_v60, 7  ;;  %v378_v60 = vrot.slane %v358_v44, 2 }
  0xe4   : > { %v383_v25 = vsel %vm253_vm0, %v382_v7, %v360_v3 }
  0xe7   : > { %v330_v54 = vld [vmem:[#allocation1] sm:$0xf] }
  0xe8   : > { %333 = vst [vmem:[#allocation1] ss:$9 sm:$0xff] %v1344_v53  ;;  %v362_v5 = vunpack.c.l.b16 %v330_v54  ;;  %v258_v53 = vrot.slane %v239_v39, 5  ;;  %v277_v54 = vrot.slane %v247_v6, 5 }
  0xea   : > { %v384_v27 = vrot.slane %v362_v5, 6  ;;  %v1349_v5 = vld [vmem:[%s1478_s11 + $0x2] sm:$0x1] }
  0xec   : > { %v385_v2 = vsel %vm256_vm1, %v384_v27, %v383_v25  ;;  %v243_v25 = vunpack.c.l.b16 %v1503_v16  ;;  %v267_v27 = vrot.slane %v242_v48, 2  ;;  %v285_v16 = vrot.slane %v251_v14, 1 }
  0xef   : > { %v334_v56 = vld [vmem:[#allocation1] sm:$0xf] }
  0xf0   : > { %337 = vst [vmem:[#allocation1] ss:$9 sm:$0xff] %v1345_v55  ;;  %v363_v19 = vunpack.c.l.b16 %v334_v56  ;;  %v375_v56 = vsel %vm262_vm3, %v374_v22, %v373_v43 }
  0xf1   : > { %v377_v0 = vsel %vm265_vm4, %v376_v51, %v375_v56  ;;  %v1359_v56 = vld [vmem:[%s1478_s11 + $0x20] sm:$0x1] }
  0xf2   : > { %v386_v38 = vrot.slane %v363_v19, 5  ;;  %v379_v17 = vsel %vm268_vm5, %v378_v60, %v377_v0 }
  0xf3   : > { %v381_v4 = vsel %vm271_vm6, %v380_v9, %v379_v17 }
  0xf4   : > { %v387_v52 = vsel %vm259_vm2, %v386_v38, %v385_v2  ;;  %v1350_v38 = vld [vmem:[%s1478_s11 + $0x5] sm:$0x1] }
  0xf7   : > { %v338_v58 = vld [vmem:[#allocation1] sm:$0xf] }
  0xf8   : > { %341 = vst [vmem:[#allocation1] ss:$9 sm:$0xff] %v1346_v57  ;;  %v364_v35 = vunpack.c.l.b16 %v338_v58  ;;  %v257_v57 = vsel %vm256_vm1, %v255_v41, %v254_v45  ;;  %v276_v58 = vsel %vm256_vm1, %v275_v18, %v274_v47  ;;  %v1351_v41 = vld [vmem:[%s1478_s11 + $0x8] sm:$0x1]  ;;  %v1353_v45 = vld [vmem:[%s1478_s11 + $0xe] sm:$0x1] }
  0xf9   : > { %v278_v3 = vsel %vm259_vm2, %v277_v54, %v276_v58  ;;  %v1358_v54 = vld [vmem:[%s1478_s11 + $0x1d] sm:$0x1]  ;;  %v1360_v58 = vld [vmem:[%s1478_s11 + $0x23] sm:$0x1] }
  0xfa   : > { %v388_v50 = vrot.slane %v364_v35, 4  ;;  %v280_v21 = vsel %vm262_vm3, %v279_v63, %v278_v3  ;;  %v270_v35 = vrot.slane %v243_v25, 1  ;;  %v1364_v63 = vld [vmem:[%s1478_s11 + $0x2f] sm:$0x1] }
  0xfc   : > { %v389_v61 = vsel %vm262_vm3, %v388_v50, %v387_v52  ;;  %v1355_v50 = vld [vmem:[%s1478_s11 + $0x14] sm:$0x1]  ;;  %v1357_v52 = vld [vmem:[%s1478_s11 + $0x1a] sm:$0x1] }
  0xff   : > { %v342_v13 = vld [vmem:[#allocation1] sm:$0xf] }
 0x100   : > { %345 = vst [vmem:[#allocation1] ss:$9 sm:$0xff] %v1347_v1  ;;  %v365_v42 = vunpack.c.l.b16 %v342_v13  ;;  %v260_v1 = vsel %vm259_vm2, %v258_v53, %v257_v57  ;;  %v281_v13 = vrot.slane %v249_v26, 3  ;;  %v1362_v26 = vld [vmem:[%s1478_s11 + $0x29] sm:$0x1] }
 0x101   : > { %v263_v19 = vsel %vm262_vm3, %v261_v62, %v260_v1  ;;  %v704_v1 = vld [vmem:[%s1478_s11] sm:$0x1] }
 0x102   : > { %v390_v59 = vrot.slane %v365_v42, 3  ;;  %v266_v31 = vsel %vm265_vm4, %v264_v11, %v263_v19  ;;  %v282_v33 = vsel %vm265_vm4, %v281_v13, %v280_v21  ;;  %v1352_v42 = vld [vmem:[%s1478_s11 + $0xb] sm:$0x1]  ;;  %v1453_v11 = vmov -1e+30  }
 0x103   : > { %v269_v32 = vsel %vm268_vm5, %v267_v27, %v266_v31  ;;  %v284_v37 = vsel %vm268_vm5, %v283_v29, %v282_v33  ;;  %v706_v19 = vld [vmem:[%s1478_s11 + $0x6] sm:$0x1]  ;;  %v707_v29 = vld [vmem:[%s1478_s11 + $0x9] sm:$0x1]  ;;  %v708_v33 = vld [vmem:[%s1478_s11 + $0xc] sm:$0x1] }
 0x104   : > { %v391_v28 = vsel %vm265_vm4, %v390_v59, %v389_v61  ;;  %v286_v22 = vsel %vm271_vm6, %v285_v16, %v284_v37  ;;  %v1361_v59 = vld [vmem:[%s1478_s11 + $0x26] sm:$0x1]  ;;  %v1363_v61 = vld [vmem:[%s1478_s11 + $0x2c] sm:$0x1]  ;;  %v711_v37 = vld [vmem:[%s1478_s11 + $0x15] sm:$0x1] }
 0x107   : > { %v346_v49 = vld [vmem:[#allocation1] sm:$0xf] }
 0x108   : > { %349 = vst [vmem:[#allocation1] ss:$9 sm:$0xff] %v1348_v40  ;;  %v366_v55 = vunpack.c.l.b16 %v346_v49  ;;  %v272_v40 = vsel %vm271_vm6, %v270_v35, %v269_v32  ;;  %v1354_v49 = vld [vmem:[%s1478_s11 + $0x11] sm:$0x1]  ;;  %v709_v35 = vld [vmem:[%s1478_s11 + $0xf] sm:$0x1] }
 0x109   : > { %v287_v2 = vpack.c.b16 %v286_v22, %v272_v40  ;;  %v713_v22 = vld [vmem:[%s1478_s11 + $0x1b] sm:$0x1] }
 0x10a   : > { %v392_v7 = vrot.slane %v366_v55, 2 }
 0x10c   : > { %v393_v30 = vsel %vm268_vm5, %v392_v7, %v391_v28 }
 0x10f   : > { %v350_v15 = vld [vmem:[#allocation1] sm:$0xf] }
 0x110   : > { %v367_v23 = vunpack.c.l.b16 %v350_v15  ;;  %446 = vst [vmem:[#allocation1] ss:$9 sm:$0xff] %v1349_v5  ;;  %v113_v5 = vlaneseq }
 0x112   : > { %v394_v20 = vrot.slane %v367_v23, 1  ;;  %v114_v7 = vshrl.u32 %v113_v5, 7  ;;  %v117_v48 = vand.u32 127, %v113_v5 }
 0x114   : > { %v395_v34 = vsel %vm271_vm6, %v394_v20, %v393_v30  ;;  %vm118_vm8 = vcmp.le.s32.totalorder %v117_v48, %v114_v7  ;;  %v115_v17 = vadd.s32 8, %v114_v7  ;;  %v1377_v7 = vld [vmem:[%s1478_s11 + $0x7] sm:$0x1] }
 0x115   : > { %v396_v36 = vpack.c.b16 %v395_v34, %v381_v4  ;;  %v1654_v13 = vsel %vm118_vm8, 0.0, %v1453_v11 }
 0x116   : > { %vm119_vm9 = vcmp.le.s32.totalorder %v117_v48, %v115_v17  ;;  %v1380_v17 = vld [vmem:[%s1478_s11 + $0x10] sm:$0x1] }
 0x117   : > { %v402_v39 = vsel %vm397_vm7, %v396_v36, 0  ;;  %v1601_v6 = vld [vmem:[#allocation1] sm:$0xf]  ;;  %v1664_v14 = vsel %vm119_vm9, 0.0, %v1453_v11  ;;  %v710_v36 = vld [vmem:[%s1478_s11 + $0x12] sm:$0x1] }
 0x118   : > { %411 = vmatpush.bf16.xpose.msra.mxu0 %v402_v39  ;;  %450 = vst [vmem:[#allocation1] ss:$9 sm:$0xff] %v1350_v38  ;;  %v712_v39 = vld [vmem:[%s1478_s11 + $0x18] sm:$0x1]  ;;  %v1379_v11 = vld [vmem:[%s1478_s11 + $0xd] sm:$0x1] }
 0x11f   : > { %1365 = vmatmul.msk.bf16.vlgmr.msra.gmra.mxu0 %vm397_vm7, %v287_v2  ;;  %v1607_v18 = vld [vmem:[#allocation1] sm:$0xf] }
 0x120   : > { %454 = vst [vmem:[#allocation1] ss:$9 sm:$0xff] %v1351_v41  ;;  %v714_v41 = vld [vmem:[%s1478_s11 + $0x1e] sm:$0x1] }
 0x127   : > { %v1610_v43 = vld [vmem:[#allocation1] sm:$0xf] }
 0x128   : > { %458 = vst [vmem:[#allocation1] ss:$9 sm:$0xff] %v1352_v42 }
 0x12f   : > { %v1613_v47 = vld [vmem:[#allocation1] sm:$0xf] }
 0x130   : > { %462 = vst [vmem:[#allocation1] ss:$9 sm:$0xff] %v1353_v45  ;;  %v715_v45 = vld [vmem:[%s1478_s11 + $0x21] sm:$0x1] }
 0x137   : > { %v1616_v44 = vld [vmem:[#allocation1] sm:$0xf] }
 0x138   : > { %466 = vst [vmem:[#allocation1] ss:$9 sm:$0xff] %v1354_v49 }
 0x13f   : > { %v1619_v8 = vld [vmem:[#allocation1] sm:$0xf] }
 0x140   : > { %470 = vst [vmem:[#allocation1] ss:$9 sm:$0xff] %v1355_v50  ;;  %v716_v50 = vld [vmem:[%s1478_s11 + $0x24] sm:$0x1] }
 0x147   : > { %v1622_v51 = vld [vmem:[#allocation1] sm:$0xf] }
 0x148   : > { %474 = vst [vmem:[#allocation1] ss:$9 sm:$0xff] %v1356_v24 }
 0x14f   : > { %v1625_v53 = vld [vmem:[#allocation1] sm:$0xf] }
 0x150   : > { %478 = vst [vmem:[#allocation1] ss:$9 sm:$0xff] %v1357_v52  ;;  %v717_v52 = vld [vmem:[%s1478_s11 + $0x27] sm:$0x1] }
 0x157   : > { %v1628_v55 = vld [vmem:[#allocation1] sm:$0xf] }
 0x158   : > { %482 = vst [vmem:[#allocation1] ss:$9 sm:$0xff] %v1358_v54 }
 0x15f   : > { %v1631_v57 = vld [vmem:[#allocation1] sm:$0xf] }
 0x160   : > { %486 = vst [vmem:[#allocation1] ss:$9 sm:$0xff] %v1359_v56  ;;  %v718_v56 = vld [vmem:[%s1478_s11 + $0x2a] sm:$0x1] }
 0x167   : > { %v1634_v46 = vld [vmem:[#allocation1] sm:$0xf] }
 0x168   : > { %490 = vst [vmem:[#allocation1] ss:$9 sm:$0xff] %v1360_v58 }
 0x16f   : > { %v1637_v10 = vld [vmem:[#allocation1] sm:$0xf] }
 0x170   : > { %494 = vst [vmem:[#allocation1] ss:$9 sm:$0xff] %v1361_v59  ;;  %v719_v59 = vld [vmem:[%s1478_s11 + $0x2d] sm:$0x1] }
 0x177   : > { %v1640_v60 = vld [vmem:[#allocation1] sm:$0xf] }
 0x178   : > { %498 = vst [vmem:[#allocation1] ss:$9 sm:$0xff] %v1362_v26 }
 0x17f   : > { %v1643_v62 = vld [vmem:[#allocation1] sm:$0xf] }
 0x180   : > { %502 = vst [vmem:[#allocation1] ss:$9 sm:$0xff] %v1363_v61  ;;  %v1375_v61 = vld [vmem:[%s1478_s11 + $0x1] sm:$0x1] }
 0x187   : > { %v1646_v0 = vld [vmem:[#allocation1] sm:$0xf] }
 0x188   : > { %506 = vst [vmem:[#allocation1] ss:$9 sm:$0xff] %v1364_v63 }
 0x18f   : > { %v1649_v3 = vld [vmem:[#allocation1] sm:$0xf] }
 0x190   : > { %753 = vst [vmem:[#allocation1] ss:$9 sm:$0xff] %v704_v1  ;;  %v1376_v1 = vld [vmem:[%s1478_s11 + $0x4] sm:$0x1] }
 0x197   : > { %v1652_v9 = vld [vmem:[#allocation1] sm:$0xf] }
 0x198   : > { %757 = vst [vmem:[#allocation1] ss:$9 sm:$0xff] %v705_v12  ;;  %v1378_v12 = vld [vmem:[%s1478_s11 + $0xa] sm:$0x1] }
 0x19c   : > { %v413_v28 = vpop.f32.mrf.mxu0 }
 0x19d   : > { %v418_v15 = vmul.f32 0.25, %v413_v28 }
 0x19f   : > { %v1658_v21 = vadd.f32 %v418_v15, %v1654_v13  ;;  %v1660_v23 = vld [vmem:[#allocation1] sm:$0xf] }
 0x1a0   : > { %761 = vst [vmem:[#allocation1] ss:$9 sm:$0xff] %v706_v19 }
 0x1a1   : > { %v422_v25 = vsel %vm397_vm7, %v1658_v21, -inf }
 0x1a2   : > { %423 = vmax.xlane.f32.xlu0 %v422_v25  ;;  %v1381_v25 = vld [vmem:[%s1478_s11 + $0x13] sm:$0x1] }
 0x1a4   : > { %v415_v30 = vpop.f32.mrf.mxu0 }
 0x1a5   : > { %v419_v27 = vmul.f32 0.25, %v415_v30 }
 0x1a7   : > { %v1668_v4 = vadd.f32 %v419_v27, %v1664_v14  ;;  %v1670_v20 = vld [vmem:[#allocation1] sm:$0xf]  ;;  %v1382_v27 = vld [vmem:[%s1478_s11 + $0x16] sm:$0x1] }
 0x1a8   : > { %765 = vst [vmem:[#allocation1] ss:$9 sm:$0xff] %v707_v29 }
 0x1a9   : > { %v425_v31 = vsel %vm397_vm7, %v1668_v4, -inf }
 0x1aa   : > { %426 = vmax.xlane.f32.xlu0 %v425_v31  ;;  %v1383_v31 = vld [vmem:[%s1478_s11 + $0x19] sm:$0x1] }
 0x1af   : > { %v1675_v34 = vld [vmem:[#allocation1] sm:$0xf] }
 0x1b0   : > { %769 = vst [vmem:[#allocation1] ss:$9 sm:$0xff] %v708_v33 }
 0x1b7   : > { %v1678_v16 = vld [vmem:[#allocation1] sm:$0xf] }
 0x1b8   : > { %773 = vst [vmem:[#allocation1] ss:$9 sm:$0xff] %v709_v35  ;;  %v1384_v35 = vld [vmem:[%s1478_s11 + $0x1c] sm:$0x1] }
 0x1bf   : > { %v1681_v32 = vld [vmem:[#allocation1] sm:$0xf] }
 0x1c0   : > { %777 = vst [vmem:[#allocation1] ss:$9 sm:$0xff] %v710_v36 }
 0x1c7   : > { %v1684_v38 = vld [vmem:[#allocation1] sm:$0xf] }
 0x1c8   : > { %781 = vst [vmem:[#allocation1] ss:$9 sm:$0xff] %v711_v37  ;;  %v1385_v37 = vld [vmem:[%s1478_s11 + $0x1f] sm:$0x1] }
 0x1cf   : > { %v1687_v40 = vld [vmem:[#allocation1] sm:$0xf] }
 0x1d0   : > { %785 = vst [vmem:[#allocation1] ss:$9 sm:$0xff] %v712_v39 }
 0x1d7   : > { %v1690_v2 = vld [vmem:[#allocation1] sm:$0xf] }
 0x1d8   : > { %789 = vst [vmem:[#allocation1] ss:$9 sm:$0xff] %v713_v22  ;;  %v1386_v22 = vld [vmem:[%s1478_s11 + $0x22] sm:$0x1] }
 0x1df   : > { %v1693_v42 = vld [vmem:[#allocation1] sm:$0xf] }
 0x1e0   : > { %793 = vst [vmem:[#allocation1] ss:$9 sm:$0xff] %v714_v41 }
 0x1e7   : > { %v1696_v49 = vld [vmem:[#allocation1] sm:$0xf] }
 0x1e8   : > { %797 = vst [vmem:[#allocation1] ss:$9 sm:$0xff] %v715_v45 }
 0x1ef   : > { %v1699_v24 = vld [vmem:[#allocation1] sm:$0xf] }
 0x1f0   : > { %801 = vst [vmem:[#allocation1] ss:$9 sm:$0xff] %v716_v50  ;;  %v1387_v50 = vld [vmem:[%s1478_s11 + $0x25] sm:$0x1] }
 0x1f7   : > { %v1702_v54 = vld [vmem:[#allocation1] sm:$0xf] }
 0x1f8   : > { %805 = vst [vmem:[#allocation1] ss:$9 sm:$0xff] %v717_v52 }
 0x1ff   : > { %v1705_v58 = vld [vmem:[#allocation1] sm:$0xf] }
 0x200   : > { %809 = vst [vmem:[#allocation1] ss:$9 sm:$0xff] %v718_v56 }
 0x207   : > { %v1708_v26 = vld [vmem:[#allocation1] sm:$0xf] }
 0x208   : > { %813 = vst [vmem:[#allocation1] ss:$9 sm:$0xff] %v719_v59 }
 0x20f   : > { %v1711_v63 = vld [vmem:[#allocation1] sm:$0xf] }
 0x210   : > { %862 = vst [vmem:[#allocation1] ss:$9 sm:$0xff] %v1375_v61  ;;  %v1388_v61 = vld [vmem:[%s1478_s11 + $0x28] sm:$0x1] }
 0x215   : > { %v424_v45 = vpop.xlane.xlu0 %423 }
 0x216   : > { %v428_v52 = vsub.f32 %v1658_v21, %v424_v45 }
 0x217   : > { %v863_v5 = vld [vmem:[#allocation1] sm:$0xf] }
 0x218   : > { %866 = vst [vmem:[#allocation1] ss:$9 sm:$0xff] %v1376_v1  ;;  %v430_v59 = vmul.f32 1.442695, %v428_v52 }
 0x21a   : > { %1429 = vpow2.f32 %v430_v59  ;;  %v816_v59 = vunpack.c.l.b16 %v1652_v9  ;;  %v818_v9 = vunpack.c.l.b16 %v1670_v20  ;;  %v827_v20 = vunpack.c.l.b16 %v1699_v24 }
 0x21b   : > { %v820_v24 = vunpack.c.l.b16 %v1678_v16  ;;  %v821_v16 = vunpack.c.l.b16 %v1681_v32 }
 0x21f   : > { %v1715_v48 = vld [vmem:[#allocation1] sm:$0xf] }
 0x220   : > { %870 = vst [vmem:[#allocation1] ss:$9 sm:$0xff] %v1377_v7  ;;  %v925_v7 = vunpack.c.l.b16 %v863_v5  ;;  %v824_v5 = vunpack.c.l.b16 %v1690_v2  ;;  %v826_v2 = vunpack.c.l.b16 %v1696_v49  ;;  %v1390_v49 = vld [vmem:[%s1478_s11 + $0x2e] sm:$0x1] }
 0x227   : > { %v871_v28 = vld [vmem:[#allocation1] sm:$0xf] }
 0x228   : > { %874 = vst [vmem:[#allocation1] ss:$9 sm:$0xff] %v1378_v12  ;;  %v427_v12 = vpop.xlane.xlu0 %426 }
 0x22f   : > { %v875_v15 = vld [vmem:[#allocation1] sm:$0xf] }
 0x230   : > { %878 = vst [vmem:[#allocation1] ss:$9 sm:$0xff] %v1379_v11  ;;  %v928_v45 = vunpack.c.l.b16 %v875_v15 }
 0x232   : > { %v945_v15 = vrot.slane %v928_v45, 6  ;;  %v834_v45 = vrot.slane %v818_v9, 7 }
 0x237   : > { %v1720_v19 = vld [vmem:[#allocation1] sm:$0xf] }
 0x238   : > { %882 = vst [vmem:[#allocation1] ss:$9 sm:$0xff] %v1380_v17  ;;  %v429_v17 = vsub.f32 %v1668_v4, %v427_v12  ;;  %v817_v12 = vunpack.c.l.b16 %v1660_v23 }
 0x23f   : > { %v1723_v30 = vld [vmem:[#allocation1] sm:$0xf] }
 0x240   : > { %886 = vst [vmem:[#allocation1] ss:$9 sm:$0xff] %v1381_v25  ;;  %v927_v25 = vunpack.c.l.b16 %v871_v28  ;;  %v929_v28 = vunpack.c.l.b16 %v1720_v19 }
 0x247   : > { %v1726_v29 = vld [vmem:[#allocation1] sm:$0xf] }
 0x248   : > { %890 = vst [vmem:[#allocation1] ss:$9 sm:$0xff] %v1382_v27  ;;  %v432_v27 = vmul.f32 1.442695, %v429_v17  ;;  %v832_v17 = vrot.slane %v816_v59, 1 }
 0x24a   : > { %1431 = vpow2.f32 %v432_v27 }
 0x24f   : > { %v1729_v33 = vld [vmem:[#allocation1] sm:$0xf] }
 0x250   : > { %894 = vst [vmem:[#allocation1] ss:$9 sm:$0xff] %v1383_v31  ;;  %v1738_v31 = vpop.eup %1429 }
 0x251   : > { %v434_v4 = vsel %vm397_vm7, %v1738_v31, 0.0  ;;  %v1753_v19 = vpop.eup %1431 }
 0x252   : > { %435 = vadd.xlane.f32.xlu2 %v434_v4  ;;  %v828_v4 = vunpack.c.l.b16 %v1702_v54  ;;  %v829_v54 = vunpack.c.l.b16 %v1705_v58  ;;  %v840_v58 = vrot.slane %v821_v16, 4  ;;  %v519_v16 = vunpack.c.l.b16 %v1634_v46 }
 0x257   : > { %v895_v36 = vld [vmem:[#allocation1] sm:$0xf] }
 0x258   : > { %898 = vst [vmem:[#allocation1] ss:$9 sm:$0xff] %v1384_v35  ;;  %v933_v11 = vunpack.c.l.b16 %v895_v36  ;;  %v926_v35 = vunpack.c.l.b16 %v1715_v48 }
 0x25a   : > { %v955_v52 = vrot.slane %v933_v11, 1  ;;  %v825_v11 = vunpack.c.l.b16 %v1693_v42  ;;  %v848_v42 = vrot.slane %v826_v2, 7 }
 0x25f   : > { %v899_v39 = vld [vmem:[#allocation1] sm:$0xf] }
 0x260   : > { %902 = vst [vmem:[#allocation1] ss:$9 sm:$0xff] %v1385_v37  ;;  %v941_v37 = vrot.slane %v925_v7, 1 }
 0x267   : > { %v903_v41 = vld [vmem:[#allocation1] sm:$0xf] }
 0x268   : > { %906 = vst [vmem:[#allocation1] ss:$9 sm:$0xff] %v1386_v22  ;;  %v935_v21 = vunpack.c.l.b16 %v903_v41  ;;  %v1389_v22 = vld [vmem:[%s1478_s11 + $0x2b] sm:$0x1]  ;;  %v942_v41 = vsel %vm253_vm0, %v926_v35, %v941_v37 }
 0x26a   : > { %v957_v7 = vrot.slane %v935_v21, 7  ;;  %v947_v21 = vrot.slane %v929_v28, 5 }
 0x26f   : > { %v907_v56 = vld [vmem:[#allocation1] sm:$0xf] }
 0x270   : > { %910 = vst [vmem:[#allocation1] ss:$9 sm:$0xff] %v1387_v50  ;;  %v934_v50 = vunpack.c.l.b16 %v899_v39  ;;  %v936_v48 = vunpack.c.l.b16 %v907_v56  ;;  %v930_v56 = vunpack.c.l.b16 %v1723_v30 }
 0x272   : > { %v956_v39 = vsel %vm253_vm0, %v934_v50, %v955_v52  ;;  %v959_v37 = vrot.slane %v936_v48, 6  ;;  %v437_v50 = vsel %vm397_vm7, %v1753_v19, 0.0  ;;  %v949_v28 = vrot.slane %v930_v56, 4 }
 0x273   : > { %v958_v23 = vsel %vm256_vm1, %v957_v7, %v956_v39  ;;  %438 = vadd.xlane.f32.xlu2 %v437_v50 }
 0x274   : > { %v960_v48 = vsel %vm259_vm2, %v959_v37, %v958_v23  ;;  %v822_v37 = vunpack.c.l.b16 %v1684_v38 }
 0x277   : > { %v911_v1 = vld [vmem:[#allocation1] sm:$0xf] }
 0x278   : > { %914 = vst [vmem:[#allocation1] ss:$9 sm:$0xff] %v1388_v61  ;;  %v943_v61 = vrot.slane %v927_v25, 7  ;;  %v846_v25 = vrot.slane %v824_v5, 1  ;;  %v937_v27 = vunpack.c.l.b16 %v911_v1  ;;  %v833_v1 = vsel %vm253_vm0, %v817_v12, %v832_v17 }
 0x279   : > { %v835_v39 = vsel %vm256_vm1, %v834_v45, %v833_v1  ;;  %v838_v17 = vrot.slane %v820_v24, 5 }
 0x27a   : > { %v944_v35 = vsel %vm256_vm1, %v943_v61, %v942_v41  ;;  %v847_v59 = vsel %vm253_vm0, %v825_v11, %v846_v25  ;;  %v961_v61 = vrot.slane %v937_v27, 5  ;;  %v852_v25 = vrot.slane %v828_v4, 5 }
 0x27b   : > { %v946_v30 = vsel %vm259_vm2, %v945_v15, %v944_v35  ;;  %v849_v9 = vsel %vm256_vm1, %v848_v42, %v847_v59 }
 0x27c   : > { %v948_v15 = vsel %vm262_vm3, %v947_v21, %v946_v30  ;;  %v962_v11 = vsel %vm262_vm3, %v961_v61, %v960_v48  ;;  %v831_v30 = vunpack.c.l.b16 %v1711_v63 }
 0x27d   : > { %v950_v56 = vsel %vm265_vm4, %v949_v28, %v948_v15 }
 0x27e   : > { %v858_v28 = vrot.slane %v831_v30, 2 }
 0x27f   : > { %v915_v36 = vld [vmem:[#allocation1] sm:$0xf] }
 0x280   : > { %918 = vst [vmem:[#allocation1] ss:$9 sm:$0xff] %v1389_v22  ;;  %v819_v22 = vunpack.c.l.b16 %v1675_v34  ;;  %v938_v52 = vunpack.c.l.b16 %v915_v36  ;;  %v931_v34 = vunpack.c.l.b16 %v1726_v29  ;;  %v850_v36 = vrot.slane %v827_v20, 6 }
 0x281   : > { %v932_v29 = vunpack.c.l.b16 %v1729_v33  ;;  %v830_v33 = vunpack.c.l.b16 %v1708_v26  ;;  %v854_v20 = vrot.slane %v829_v54, 4  ;;  %v842_v26 = vrot.slane %v822_v37, 3 }
 0x282   : > { %v836_v41 = vrot.slane %v819_v22, 6  ;;  %v963_v2 = vrot.slane %v938_v52, 4  ;;  %v951_v12 = vrot.slane %v931_v34, 3  ;;  %v851_v35 = vsel %vm259_vm2, %v850_v36, %v849_v9 }
 0x283   : > { %v953_v22 = vrot.slane %v932_v29, 2  ;;  %v853_v42 = vsel %vm262_vm3, %v852_v25, %v851_v35  ;;  %v823_v52 = vunpack.c.l.b16 %v1687_v40  ;;  %v856_v1 = vrot.slane %v830_v33, 3 }
 0x284   : > { %v837_v27 = vsel %vm259_vm2, %v836_v41, %v835_v39  ;;  %v964_v32 = vsel %vm265_vm4, %v963_v2, %v962_v11  ;;  %v952_v23 = vsel %vm268_vm5, %v951_v12, %v950_v56  ;;  %v855_v61 = vsel %vm265_vm4, %v854_v20, %v853_v42 }
 0x285   : > { %v839_v45 = vsel %vm262_vm3, %v838_v17, %v837_v27  ;;  %v954_v59 = vsel %vm271_vm6, %v953_v22, %v952_v23  ;;  %v844_v4 = vrot.slane %v823_v52, 2  ;;  %v857_v63 = vsel %vm268_vm5, %v856_v1, %v855_v61 }
 0x286   : > { %v841_v34 = vsel %vm265_vm4, %v840_v58, %v839_v45  ;;  %v510_v9 = vunpack.c.l.b16 %v1607_v18  ;;  %v511_v29 = vunpack.c.l.b16 %v1610_v43  ;;  %v518_v2 = vunpack.c.l.b16 %v1631_v57 }
 0x287   : > { %v919_v5 = vld [vmem:[#allocation1] sm:$0xf]  ;;  %v843_v40 = vsel %vm268_vm5, %v842_v26, %v841_v34  ;;  %v509_v12 = vunpack.c.l.b16 %v1601_v6  ;;  %v512_v11 = vunpack.c.l.b16 %v1613_v47  ;;  %v517_v17 = vunpack.c.l.b16 %v1628_v55 }
 0x288   : > { %922 = vst [vmem:[#allocation1] ss:$9 sm:$0xff] %v1390_v49  ;;  %v939_v7 = vunpack.c.l.b16 %v919_v5  ;;  %v845_v36 = vsel %vm271_vm6, %v844_v4, %v843_v40  ;;  %v520_v25 = vunpack.c.l.b16 %v1637_v10  ;;  %v513_v56 = vunpack.c.l.b16 %v1616_v44 }
 0x289   : > { %v521_v18 = vunpack.c.l.b16 %v1640_v60  ;;  %v525_v27 = vrot.slane %v510_v9, 7  ;;  %v514_v43 = vunpack.c.l.b16 %v1619_v8  ;;  %v522_v57 = vunpack.c.l.b16 %v1643_v62 }
 0x28a   : > { %v965_v21 = vrot.slane %v939_v7, 3  ;;  %v859_v7 = vsel %vm271_vm6, %v858_v28, %v857_v63  ;;  %v527_v46 = vrot.slane %v511_v29, 6  ;;  %v529_v35 = vrot.slane %v512_v11, 5 }
 0x28b   : > { %v860_v15 = vpack.c.b16 %v859_v7, %v845_v36  ;;  %v515_v6 = vunpack.c.l.b16 %v1622_v51  ;;  %v523_v47 = vunpack.c.l.b16 %v1646_v0  ;;  %v526_v55 = vsel %vm253_vm0, %v525_v27, %v509_v12  ;;  %v1391_v7 = vld [vmem:[%s1478_s11 + $0x2] sm:$0x1] }
 0x28c   : > { %v966_v38 = vsel %vm268_vm5, %v965_v21, %v964_v32  ;;  %v531_v21 = vrot.slane %v513_v56, 4  ;;  %v516_v10 = vunpack.c.l.b16 %v1625_v53  ;;  %v524_v44 = vunpack.c.l.b16 %v1649_v3 }
 0x28d   : > { %v528_v60 = vsel %vm256_vm1, %v527_v46, %v526_v55  ;;  %v533_v37 = vrot.slane %v514_v43, 3  ;;  %v535_v62 = vrot.slane %v515_v6, 2  ;;  %v539_v22 = vrot.slane %v518_v2, 7  ;;  %v659_v43 = vld [vmem:[%s1847_s15 + $0x1] sm:$0x1] }
 0x28e   : > { %v530_v8 = vsel %vm259_vm2, %v529_v35, %v528_v60  ;;  %v541_v32 = vrot.slane %v519_v16, 6  ;;  %v543_v58 = vrot.slane %v520_v25, 5  ;;  %v545_v0 = vrot.slane %v521_v18, 4  ;;  %v656_v18 = vld [vmem:[%s1847_s15] sm:$0x1] }
 0x28f   : > { %v923_v49 = vld [vmem:[#allocation1] sm:$0xf]  ;;  %v532_v51 = vsel %vm262_vm3, %v531_v21, %v530_v8  ;;  %v537_v23 = vrot.slane %v516_v10, 1  ;;  %v540_v53 = vsel %vm253_vm0, %v539_v22, %v517_v17  ;;  %v547_v3 = vrot.slane %v522_v57, 3  ;;  %v668_v55 = vld [vmem:[%s1847_s15 + $0x4] sm:$0x1] }
 0x290   : > { %v940_v50 = vunpack.c.l.b16 %v923_v49  ;;  %v534_v49 = vsel %vm265_vm4, %v533_v37, %v532_v51  ;;  %v542_v42 = vsel %vm256_vm1, %v541_v32, %v540_v53  ;;  %v551_v30 = vrot.slane %v524_v44, 1  ;;  %1018 = vst [vmem:[#allocation1] ss:$9 sm:$0xff] %v1391_v7  ;;  %v671_v8 = vld [vmem:[%s1847_s15 + $0x5] sm:$0x1] }
 0x291   : > { %v536_v45 = vsel %vm268_vm5, %v535_v62, %v534_v49  ;;  %v544_v52 = vsel %vm259_vm2, %v543_v58, %v542_v42  ;;  %v674_v58 = vld [vmem:[%s1847_s15 + $0x6] sm:$0x1]  ;;  %v677_v49 = vld [vmem:[%s1847_s15 + $0x7] sm:$0x1] }
 0x292   : > { %v967_v5 = vrot.slane %v940_v50, 2  ;;  %v549_v50 = vrot.slane %v523_v47, 2  ;;  %v538_v26 = vsel %vm271_vm6, %v537_v23, %v536_v45  ;;  %v662_v47 = vld [vmem:[%s1847_s15 + $0x2] sm:$0x1] }
 0x294   : > { %v968_v24 = vsel %vm271_vm6, %v967_v5, %v966_v38  ;;  %v546_v38 = vsel %vm262_vm3, %v545_v0, %v544_v52 }
 0x295   : > { %v969_v48 = vpack.c.b16 %v968_v24, %v954_v59  ;;  %v548_v1 = vsel %vm265_vm4, %v547_v3, %v546_v38 }
 0x296   : > { %v550_v34 = vsel %vm268_vm5, %v549_v50, %v548_v1  ;;  %v1393_v1 = vld [vmem:[%s1478_s11 + $0x8] sm:$0x1] }
 0x297   : > { %v974_v41 = vsel %vm397_vm7, %v969_v48, 0  ;;  %v552_v61 = vsel %vm271_vm6, %v551_v30, %v550_v34  ;;  %v1850_v9 = vld [vmem:[#allocation1] sm:$0xf] }
 0x298   : > { %983 = vmatpush.bf16.xpose.msra.mxu2 %v974_v41  ;;  %v553_v24 = vpack.c.b16 %v552_v61, %v538_v26 }
 0x29a   : > { %565 = vmatpush.bf16.msra.mxu1 %v553_v24 }
 0x29f   : > { %1407 = vmatmul.msk.bf16.vlgmr.msra.gmra.mxu2 %vm397_vm7, %v860_v15 }
 0x2c5   : > { %v436_v39 = vpop.xlane.xlu2 %435 }
 0x2c6   : > { %1433 = vrcp.f32 %v436_v39 }
 0x2cc   : > { %v1434_v33 = vpop.eup %1433 }
 0x2cd   : > { %v442_v59 = vmul.f32 %v1434_v33, %v1738_v31  ;;  %v665_v33 = vld [vmem:[%s1847_s15 + $0x3] sm:$0x1] }
 0x2e6   : > { %v439_v54 = vpop.xlane.xlu2 %438 }
 0x2e7   : > { %1435 = vrcp.f32 %v439_v54 }
 0x2ed   : > { %v1436_v20 = vpop.eup %1435 }
 0x2ee   : > { %v443_v5 = vmul.f32 %v1436_v20, %v1753_v19 }
 0x2f0   : > { %v444_v4 = vpack.c.bf16 %v443_v5, %v442_v59 }
 0x2f2   : > { %1366 = vmatmul.msk.bf16.vlgmr.msra.gmra.mxu1 %vm397_vm7, %v444_v4 }
 0x322   : > { %v985_v28 = vpop.f32.mrf.mxu2 }
 0x323   : > { %v990_v48 = vmul.f32 0.25, %v985_v28 }
 0x325   : > { %v1833_v40 = vadd.f32 %v990_v48, %v1654_v13 }
 0x327   : > { %v994_v31 = vsel %vm397_vm7, %v1833_v40, -inf }
 0x328   : > { %995 = vmax.xlane.f32.xlu1 %v994_v31  ;;  %v680_v31 = vld [vmem:[%s1847_s15 + $0x8] sm:$0x1] }
 0x32a   : > { %v987_v19 = vpop.f32.mrf.mxu2 }
 0x32b   : > { %v991_v63 = vmul.f32 0.25, %v987_v19 }
 0x32d   : > { %v1838_v41 = vadd.f32 %v991_v63, %v1664_v14  ;;  %v1392_v14 = vld [vmem:[%s1478_s11 + $0x5] sm:$0x1] }
 0x32e   : > { %1022 = vst [vmem:[#allocation1] ss:$9 sm:$0xff] %v1392_v14 }
 0x32f   : > { %v997_v36 = vsel %vm397_vm7, %v1838_v41, -inf }
 0x330   : > { %998 = vmax.xlane.f32.xlu1 %v997_v36 }
 0x335   : > { %v1896_v59 = vld [vmem:[#allocation1] sm:$0xf] }
 0x336   : > { %1026 = vst [vmem:[#allocation1] ss:$9 sm:$0xff] %v1393_v1  ;;  %v1404_v1 = vld [vmem:[%s1478_s11 + $0x29] sm:$0x1] }
 0x36f   : > { %v567_v15 = vpop.f32.mrf.mxu1 }
 0x370   : > { %v572_v13 = vpack.c.bf16 %v567_v15, %v567_v15  ;;  %v683_v15 = vld [vmem:[%s1847_s15 + $0x9] sm:$0x1] }
 0x372   : > { %v576_v39 = vrot.slane %v572_v13, 3 }
 0x374   : > { %v581_v29 = vsel %vm578_vm10, %v572_v13, %v576_v39  ;;  %v583_v2 = vsel %vm253_vm0, %v572_v13, %v576_v39  ;;  %v586_v16 = vsel %vm256_vm1, %v572_v13, %v576_v39  ;;  %v589_v54 = vsel %vm259_vm2, %v572_v13, %v576_v39  ;;  %v686_v13 = vld [vmem:[%s1847_s15 + $0xa] sm:$0x1] }
 0x375   : > { %v585_v12 = vrot.slane %v583_v2, 1  ;;  %v588_v11 = vrot.slane %v586_v16, 2  ;;  %v591_v17 = vrot.slane %v589_v54, 3  ;;  %v606_v25 = vunpack.i.h.s16 %v581_v29  ;;  %v689_v2 = vld [vmem:[%s1847_s15 + $0xb] sm:$0x1] }
 0x376   : > { %v1367_v27 = vpack.i.b16 %v581_v29, %v581_v29 }
 0x377   : > { %v608_v57 = vunpack.i.h.s16 %v585_v12  ;;  %v610_v46 = vunpack.i.h.s16 %v588_v11  ;;  %v612_v35 = vunpack.i.h.s16 %v591_v17  ;;  %v622_v6 = vpack.i.b16 %v606_v25, %v606_v25  ;;  %v569_v21 = vpop.f32.mrf.mxu1 }
 0x378   : > { %v1368_v10 = vpack.i.b16 %v585_v12, %v585_v12  ;;  %v1369_v44 = vpack.i.b16 %v588_v11, %v588_v11  ;;  %v1370_v60 = vpack.i.b16 %v591_v17, %v591_v17  ;;  %v657_v37 = vsel %vm1857_vm13, %v1367_v27, %v656_v18  ;;  %v695_v17 = vld [vmem:[%s1847_s15 + $0xd] sm:$0x1] }
 0x379   : > { %v624_v62 = vpack.i.b16 %v608_v57, %v608_v57  ;;  %v626_v22 = vpack.i.b16 %v610_v46, %v610_v46  ;;  %v628_v32 = vpack.i.b16 %v612_v35, %v612_v35  ;;  %658 = vst [vmem:[%s1847_s15] sm:$0x1] %v657_v37  ;;  %v660_v51 = vsel %vm1857_vm13, %v622_v6, %v659_v43  ;;  %v698_v43 = vld [vmem:[%s1847_s15 + $0xe] sm:$0x1]  ;;  %v701_v35 = vld [vmem:[%s1847_s15 + $0xf] sm:$0x1] }
 0x37a   : > { %661 = vst [vmem:[%s1847_s15 + $0x1] sm:$0x1] %v660_v51  ;;  %v663_v0 = vsel %vm1857_vm13, %v1368_v10, %v662_v47  ;;  %v669_v20 = vsel %vm1857_vm13, %v1369_v44, %v668_v55  ;;  %v573_v23 = vpack.c.bf16 %v569_v21, %v569_v21  ;;  %v675_v45 = vsel %vm1857_vm13, %v1370_v60, %v674_v58  ;;  %v1394_v44 = vld [vmem:[%s1478_s11 + $0xb] sm:$0x1]  ;;  %v1027_v60 = vld [vmem:[#allocation1] sm:$0xf] }
 0x37b   : > { %664 = vst [vmem:[%s1847_s15 + $0x2] sm:$0x1] %v663_v0  ;;  %v666_v53 = vsel %vm1857_vm13, %v624_v62, %v665_v33  ;;  %v672_v3 = vsel %vm1857_vm13, %v626_v22, %v671_v8  ;;  %v678_v50 = vsel %vm1857_vm13, %v628_v32, %v677_v49  ;;  %v1396_v32 = vld [vmem:[%s1478_s11 + $0x11] sm:$0x1]  ;;  %v1397_v58 = vld [vmem:[%s1478_s11 + $0x14] sm:$0x1] }
 0x37c   : > { %667 = vst [vmem:[%s1847_s15 + $0x3] sm:$0x1] %v666_v53  ;;  %v577_v42 = vrot.slane %v573_v23, 3 }
 0x37d   : > { %670 = vst [vmem:[%s1847_s15 + $0x4] sm:$0x1] %v669_v20  ;;  %v1398_v20 = vld [vmem:[%s1478_s11 + $0x17] sm:$0x1] }
 0x37e   : > { %673 = vst [vmem:[%s1847_s15 + $0x5] sm:$0x1] %v672_v3  ;;  %v594_v52 = vsel %vm578_vm10, %v573_v23, %v577_v42  ;;  %v596_v30 = vsel %vm253_vm0, %v573_v23, %v577_v42  ;;  %v599_v38 = vsel %vm256_vm1, %v573_v23, %v577_v42  ;;  %v602_v26 = vsel %vm259_vm2, %v573_v23, %v577_v42  ;;  %v1399_v23 = vld [vmem:[%s1478_s11 + $0x1a] sm:$0x1]  ;;  %v1400_v3 = vld [vmem:[%s1478_s11 + $0x1d] sm:$0x1] }
 0x37f   : > { %676 = vst [vmem:[%s1847_s15 + $0x6] sm:$0x1] %v675_v45  ;;  %v598_v34 = vrot.slane %v596_v30, 1  ;;  %v601_v61 = vrot.slane %v599_v38, 2  ;;  %v604_v24 = vrot.slane %v602_v26, 3  ;;  %v614_v4 = vunpack.i.h.s16 %v594_v52 }
 0x380   : > { %679 = vst [vmem:[%s1847_s15 + $0x7] sm:$0x1] %v678_v50  ;;  %v1371_v48 = vpack.i.b16 %v594_v52, %v594_v52  ;;  %v1401_v42 = vld [vmem:[%s1478_s11 + $0x20] sm:$0x1]  ;;  %v1402_v52 = vld [vmem:[%s1478_s11 + $0x23] sm:$0x1] }
 0x381   : > { %v616_v19 = vunpack.i.h.s16 %v598_v34  ;;  %v618_v63 = vunpack.i.h.s16 %v601_v61  ;;  %v620_v36 = vunpack.i.h.s16 %v604_v24  ;;  %v630_v7 = vpack.i.b16 %v614_v4, %v614_v4  ;;  %1030 = vst [vmem:[#allocation1] ss:$9 sm:$0xff] %v1394_v44  ;;  %v1403_v38 = vld [vmem:[%s1478_s11 + $0x26] sm:$0x1] }
 0x382   : > { %v1372_v14 = vpack.i.b16 %v598_v34, %v598_v34  ;;  %v1373_v29 = vpack.i.b16 %v601_v61, %v601_v61  ;;  %v1374_v12 = vpack.i.b16 %v604_v24, %v604_v24  ;;  %v681_v11 = vsel %vm1857_vm13, %v1371_v48, %v680_v31  ;;  %v1405_v34 = vld [vmem:[%s1478_s11 + $0x2c] sm:$0x1] }
 0x383   : > { %v632_v16 = vpack.i.b16 %v616_v19, %v616_v19  ;;  %v634_v54 = vpack.i.b16 %v618_v63, %v618_v63  ;;  %v636_v25 = vpack.i.b16 %v620_v36, %v620_v36  ;;  %682 = vst [vmem:[%s1847_s15 + $0x8] sm:$0x1] %v681_v11  ;;  %v684_v18 = vsel %vm1857_vm13, %v630_v7, %v683_v15  ;;  %v1406_v11 = vld [vmem:[%s1478_s11 + $0x2f] sm:$0x1] }
 0x384   : > { %v687_v27 = vsel %vm1857_vm13, %v1372_v14, %v686_v13  ;;  %685 = vst [vmem:[%s1847_s15 + $0x9] sm:$0x1] %v684_v18  ;;  %v699_v55 = vsel %vm1857_vm13, %v1374_v12, %v698_v43  ;;  %v1081_v24 = vunpack.c.l.b16 %v1850_v9  ;;  %v1082_v31 = vunpack.c.l.b16 %v1896_v59 }
 0x385   : > { %v690_v57 = vsel %vm1857_vm13, %v632_v16, %v689_v2  ;;  %688 = vst [vmem:[%s1847_s15 + $0xa] sm:$0x1] %v687_v27  ;;  %v696_v6 = vsel %vm1857_vm13, %v634_v54, %v695_v17  ;;  %v702_v10 = vsel %vm1857_vm13, %v636_v25, %v701_v35 }
 0x386   : > { %691 = vst [vmem:[%s1847_s15 + $0xb] sm:$0x1] %v690_v57  ;;  %v1097_v13 = vrot.slane %v1081_v24, 1 }
 0x387   : > { %697 = vst [vmem:[%s1847_s15 + $0xd] sm:$0x1] %v696_v6 }
 0x388   : > { %700 = vst [vmem:[%s1847_s15 + $0xe] sm:$0x1] %v699_v55  ;;  %v1031_v22 = vld [vmem:[#allocation1] sm:$0xf]  ;;  %v1098_v54 = vsel %vm253_vm0, %v1082_v31, %v1097_v13 }
 0x389   : > { %703 = vst [vmem:[%s1847_s15 + $0xf] sm:$0x1] %v702_v10  ;;  %v1084_v19 = vunpack.c.l.b16 %v1031_v22 }
 0x38b   : > { %v1101_v2 = vrot.slane %v1084_v19, 6 }
 0x39b   : > { %v996_v5 = vpop.xlane.xlu1 %995 }
 0x39c   : > { %v1000_v28 = vsub.f32 %v1833_v40, %v996_v5  ;;  %v692_v40 = vld [vmem:[%s1847_s15 + $0xc] sm:$0x1] }
 0x39d   : > { %v693_v46 = vsel %vm1857_vm13, %v1373_v29, %v692_v40 }
 0x39e   : > { %v1002_v39 = vmul.f32 1.442695, %v1000_v28  ;;  %694 = vst [vmem:[%s1847_s15 + $0xc] sm:$0x1] %v693_v46  ;;  %v1083_v28 = vunpack.c.l.b16 %v1027_v60 }
 0x3a0   : > { %1437 = vpow2.f32 %v1002_v39  ;;  %v1099_v39 = vrot.slane %v1083_v28, 7 }
 0x3a2   : > { %v1100_v59 = vsel %vm256_vm1, %v1099_v39, %v1098_v54 }
 0x3a3   : > { %v999_v47 = vpop.xlane.xlu1 %998  ;;  %v1102_v27 = vsel %vm259_vm2, %v1101_v2, %v1100_v59  ;;  %v1229_v2 = vld [vmem:[%s1847_s15 + $0x1] sm:$0x1] }
 0x3a4   : > { %v1001_v21 = vsub.f32 %v1838_v41, %v999_v47  ;;  %v1395_v41 = vld [vmem:[%s1478_s11 + $0xe] sm:$0x1] }
 0x3a5   : > { %1034 = vst [vmem:[#allocation1] ss:$9 sm:$0xff] %v1395_v41 }
 0x3a6   : > { %v1933_v37 = vpop.eup %1437  ;;  %v1004_v33 = vmul.f32 1.442695, %v1001_v21 }
 0x3a7   : > { %v1006_v8 = vsel %vm397_vm7, %v1933_v37, 0.0 }
 0x3a8   : > { %1439 = vpow2.f32 %v1004_v33  ;;  %1007 = vadd.xlane.f32.xlu0 %v1006_v8 }
 0x3ac   : > { %v1035_v51 = vld [vmem:[#allocation1] sm:$0xf] }
 0x3ad   : > { %1038 = vst [vmem:[#allocation1] ss:$9 sm:$0xff] %v1396_v32  ;;  %v1085_v7 = vunpack.c.l.b16 %v1035_v51 }
 0x3ae   : > { %v1940_v56 = vpop.eup %1439 }
 0x3af   : > { %v1009_v62 = vsel %vm397_vm7, %v1940_v56, 0.0  ;;  %v1103_v12 = vrot.slane %v1085_v7, 5  ;;  %v1226_v7 = vld [vmem:[%s1847_s15] sm:$0x1] }
 0x3b0   : > { %1010 = vadd.xlane.f32.xlu1 %v1009_v62 }
 0x3b1   : > { %v1104_v6 = vsel %vm262_vm3, %v1103_v12, %v1102_v27  ;;  %v1232_v12 = vld [vmem:[%s1847_s15 + $0x2] sm:$0x1] }
 0x3b4   : > { %v1039_v0 = vld [vmem:[#allocation1] sm:$0xf] }
 0x3b5   : > { %1042 = vst [vmem:[#allocation1] ss:$9 sm:$0xff] %v1397_v58  ;;  %v1086_v14 = vunpack.c.l.b16 %v1039_v0 }
 0x3b7   : > { %v1105_v17 = vrot.slane %v1086_v14, 4 }
 0x3b9   : > { %v1106_v21 = vsel %vm265_vm4, %v1105_v17, %v1104_v6  ;;  %v1235_v17 = vld [vmem:[%s1847_s15 + $0x3] sm:$0x1]  ;;  %v1247_v6 = vld [vmem:[%s1847_s15 + $0x7] sm:$0x1] }
 0x3bc   : > { %v1043_v49 = vld [vmem:[#allocation1] sm:$0xf] }
 0x3bd   : > { %1046 = vst [vmem:[#allocation1] ss:$9 sm:$0xff] %v1398_v20  ;;  %v1087_v16 = vunpack.c.l.b16 %v1043_v49 }
 0x3bf   : > { %v1107_v43 = vrot.slane %v1087_v16, 3 }
 0x3c1   : > { %v1108_v60 = vsel %vm268_vm5, %v1107_v43, %v1106_v21 }
 0x3c4   : > { %v1047_v53 = vld [vmem:[#allocation1] sm:$0xf] }
 0x3c5   : > { %1050 = vst [vmem:[#allocation1] ss:$9 sm:$0xff] %v1399_v23  ;;  %v1088_v9 = vunpack.c.l.b16 %v1047_v53 }
 0x3c7   : > { %v1109_v57 = vrot.slane %v1088_v9, 2 }
 0x3c9   : > { %v1110_v33 = vsel %vm271_vm6, %v1109_v57, %v1108_v60 }
 0x3cc   : > { %v1051_v45 = vld [vmem:[#allocation1] sm:$0xf] }
 0x3cd   : > { %1054 = vst [vmem:[#allocation1] ss:$9 sm:$0xff] %v1400_v3  ;;  %v1089_v4 = vunpack.c.l.b16 %v1051_v45 }
 0x3cf   : > { %v1111_v40 = vrot.slane %v1089_v4, 1 }
 0x3d4   : > { %v1055_v50 = vld [vmem:[#allocation1] sm:$0xf] }
 0x3d5   : > { %1058 = vst [vmem:[#allocation1] ss:$9 sm:$0xff] %v1401_v42  ;;  %v1090_v63 = vunpack.c.l.b16 %v1055_v50 }
 0x3d7   : > { %v1112_v25 = vsel %vm253_vm0, %v1090_v63, %v1111_v40 }
 0x3dc   : > { %v1059_v30 = vld [vmem:[#allocation1] sm:$0xf] }
 0x3dd   : > { %1062 = vst [vmem:[#allocation1] ss:$9 sm:$0xff] %v1402_v52  ;;  %v1091_v48 = vunpack.c.l.b16 %v1059_v30 }
 0x3df   : > { %v1113_v18 = vrot.slane %v1091_v48, 7 }
 0x3e1   : > { %v1114_v47 = vsel %vm256_vm1, %v1113_v18, %v1112_v25  ;;  %v1241_v18 = vld [vmem:[%s1847_s15 + $0x5] sm:$0x1] }
 0x3e4   : > { %v1063_v26 = vld [vmem:[#allocation1] sm:$0xf] }
 0x3e5   : > { %1066 = vst [vmem:[#allocation1] ss:$9 sm:$0xff] %v1403_v38  ;;  %v1092_v36 = vunpack.c.l.b16 %v1063_v26 }
 0x3e7   : > { %v1115_v46 = vrot.slane %v1092_v36, 6 }
 0x3e9   : > { %v1116_v10 = vsel %vm259_vm2, %v1115_v46, %v1114_v47  ;;  %v1244_v46 = vld [vmem:[%s1847_s15 + $0x6] sm:$0x1] }
 0x3ec   : > { %v1067_v5 = vld [vmem:[#allocation1] sm:$0xf] }
 0x3ed   : > { %1070 = vst [vmem:[#allocation1] ss:$9 sm:$0xff] %v1404_v1  ;;  %v1093_v15 = vunpack.c.l.b16 %v1067_v5 }
 0x3ef   : > { %v1117_v55 = vrot.slane %v1093_v15, 5 }
 0x3f1   : > { %v1118_v41 = vsel %vm262_vm3, %v1117_v55, %v1116_v10 }
 0x3f4   : > { %v1071_v61 = vld [vmem:[#allocation1] sm:$0xf] }
 0x3f5   : > { %1074 = vst [vmem:[#allocation1] ss:$9 sm:$0xff] %v1405_v34  ;;  %v1094_v29 = vunpack.c.l.b16 %v1071_v61 }
 0x3f7   : > { %v1119_v8 = vrot.slane %v1094_v29, 4 }
 0x3f9   : > { %v1120_v22 = vsel %vm265_vm4, %v1119_v8, %v1118_v41 }
 0x3fc   : > { %v1075_v35 = vld [vmem:[#allocation1] sm:$0xf] }
 0x3fd   : > { %1078 = vst [vmem:[#allocation1] ss:$9 sm:$0xff] %v1406_v11  ;;  %v1095_v44 = vunpack.c.l.b16 %v1075_v35  ;;  %v1238_v11 = vld [vmem:[%s1847_s15 + $0x4] sm:$0x1] }
 0x3ff   : > { %v1121_v62 = vrot.slane %v1095_v44, 3 }
 0x401   : > { %v1122_v58 = vsel %vm268_vm5, %v1121_v62, %v1120_v22 }
 0x404   : > { %v1079_v32 = vld [vmem:[#allocation1] sm:$0xf] }
 0x405   : > { %v1096_v51 = vunpack.c.l.b16 %v1079_v32 }
 0x407   : > { %v1123_v0 = vrot.slane %v1096_v51, 2 }
 0x409   : > { %v1124_v20 = vsel %vm271_vm6, %v1123_v0, %v1122_v58 }
 0x40a   : > { %v1125_v49 = vpack.c.b16 %v1124_v20, %v1110_v33  ;;  %v1250_v20 = vld [vmem:[%s1847_s15 + $0x8] sm:$0x1] }
 0x40c   : > { %1137 = vmatpush.bf16.msra.mxu3 %v1125_v49 }
 0x41b   : > { %v1008_v23 = vpop.xlane.xlu0 %1007 }
 0x41c   : > { %1441 = vrcp.f32 %v1008_v23 }
 0x422   : > { %v1442_v3 = vpop.eup %1441 }
 0x423   : > { %v1011_v53 = vpop.xlane.xlu1 %1010  ;;  %v1014_v42 = vmul.f32 %v1442_v3, %v1933_v37 }
 0x424   : > { %1443 = vrcp.f32 %v1011_v53 }
 0x42a   : > { %v1444_v45 = vpop.eup %1443 }
 0x42b   : > { %v1015_v50 = vmul.f32 %v1444_v45, %v1940_v56  ;;  %v1253_v45 = vld [vmem:[%s1847_s15 + $0x9] sm:$0x1] }
 0x42d   : > { %v1016_v52 = vpack.c.bf16 %v1015_v50, %v1014_v42 }
 0x42f   : > { %1408 = vmatmul.msk.bf16.vlgmr.msra.gmra.mxu3 %vm397_vm7, %v1016_v52 }
 0x4b2   : > { %v1139_v30 = vpop.f32.mrf.mxu3 }
 0x4b3   : > { %v1144_v38 = vpack.c.bf16 %v1139_v30, %v1139_v30 }
 0x4b5   : > { %v1148_v26 = vrot.slane %v1144_v38, 3 }
 0x4b7   : > { %v1152_v1 = vsel %vm578_vm10, %v1144_v38, %v1148_v26  ;;  %v1154_v5 = vsel %vm253_vm0, %v1144_v38, %v1148_v26  ;;  %v1157_v34 = vsel %vm256_vm1, %v1144_v38, %v1148_v26  ;;  %v1160_v61 = vsel %vm259_vm2, %v1144_v38, %v1148_v26  ;;  %v1256_v38 = vld [vmem:[%s1847_s15 + $0xa] sm:$0x1]  ;;  %v1262_v26 = vld [vmem:[%s1847_s15 + $0xc] sm:$0x1] }
 0x4b8   : > { %v1156_v24 = vrot.slane %v1154_v5, 1  ;;  %v1159_v37 = vrot.slane %v1157_v34, 2  ;;  %v1162_v56 = vrot.slane %v1160_v61, 3  ;;  %v1177_v4 = vunpack.i.h.s16 %v1152_v1  ;;  %v1259_v5 = vld [vmem:[%s1847_s15 + $0xb] sm:$0x1] }
 0x4b9   : > { %v1409_v48 = vpack.i.b16 %v1152_v1, %v1152_v1  ;;  %v1265_v61 = vld [vmem:[%s1847_s15 + $0xd] sm:$0x1] }
 0x4ba   : > { %v1179_v31 = vunpack.i.h.s16 %v1156_v24  ;;  %v1181_v19 = vunpack.i.h.s16 %v1159_v37  ;;  %v1183_v63 = vunpack.i.h.s16 %v1162_v56  ;;  %v1193_v36 = vpack.i.b16 %v1177_v4, %v1177_v4  ;;  %v1141_v15 = vpop.f32.mrf.mxu3 }
 0x4bb   : > { %v1410_v13 = vpack.i.b16 %v1156_v24, %v1156_v24  ;;  %v1411_v39 = vpack.i.b16 %v1159_v37, %v1159_v37  ;;  %v1412_v14 = vpack.i.b16 %v1162_v56, %v1162_v56  ;;  %v1227_v29 = vsel %vm1979_vm15, %v1409_v48, %v1226_v7  ;;  %v1268_v56 = vld [vmem:[%s1847_s15 + $0xe] sm:$0x1]  ;;  %v1271_v48 = vld [vmem:[%s1847_s15 + $0xf] sm:$0x1] }
 0x4bc   : > { %v1195_v40 = vpack.i.b16 %v1179_v31, %v1179_v31  ;;  %v1197_v16 = vpack.i.b16 %v1181_v19, %v1181_v19  ;;  %v1199_v9 = vpack.i.b16 %v1183_v63, %v1183_v63  ;;  %1228 = vst [vmem:[%s1847_s15] sm:$0x1] %v1227_v29  ;;  %v1230_v54 = vsel %vm1979_vm15, %v1193_v36, %v1229_v2 }
 0x4bd   : > { %1231 = vst [vmem:[%s1847_s15 + $0x1] sm:$0x1] %v1230_v54  ;;  %v1233_v59 = vsel %vm1979_vm15, %v1410_v13, %v1232_v12  ;;  %v1239_v25 = vsel %vm1979_vm15, %v1411_v39, %v1238_v11  ;;  %v1145_v27 = vpack.c.bf16 %v1141_v15, %v1141_v15  ;;  %v1245_v35 = vsel %vm1979_vm15, %v1412_v14, %v1244_v46 }
 0x4be   : > { %1234 = vst [vmem:[%s1847_s15 + $0x2] sm:$0x1] %v1233_v59  ;;  %v1236_v43 = vsel %vm1979_vm15, %v1195_v40, %v1235_v17  ;;  %v1242_v57 = vsel %vm1979_vm15, %v1197_v16, %v1241_v18  ;;  %v1248_v55 = vsel %vm1979_vm15, %v1199_v9, %v1247_v6 }
 0x4bf   : > { %1237 = vst [vmem:[%s1847_s15 + $0x3] sm:$0x1] %v1236_v43  ;;  %v1149_v47 = vrot.slane %v1145_v27, 3 }
 0x4c0   : > { %1240 = vst [vmem:[%s1847_s15 + $0x4] sm:$0x1] %v1239_v25 }
 0x4c1   : > { %1243 = vst [vmem:[%s1847_s15 + $0x5] sm:$0x1] %v1242_v57  ;;  %v1165_v21 = vsel %vm578_vm10, %v1145_v27, %v1149_v47  ;;  %v1167_v10 = vsel %vm253_vm0, %v1145_v27, %v1149_v47  ;;  %v1170_v44 = vsel %vm256_vm1, %v1145_v27, %v1149_v47  ;;  %v1173_v60 = vsel %vm259_vm2, %v1145_v27, %v1149_v47 }
 0x4c2   : > { %1246 = vst [vmem:[%s1847_s15 + $0x6] sm:$0x1] %v1245_v35  ;;  %v1169_v33 = vrot.slane %v1167_v10, 1  ;;  %v1172_v8 = vrot.slane %v1170_v44, 2  ;;  %v1175_v41 = vrot.slane %v1173_v60, 3  ;;  %v1185_v62 = vunpack.i.h.s16 %v1165_v21 }
 0x4c3   : > { %1249 = vst [vmem:[%s1847_s15 + $0x7] sm:$0x1] %v1248_v55  ;;  %v1413_v22 = vpack.i.b16 %v1165_v21, %v1165_v21 }
 0x4c4   : > { %v1187_v32 = vunpack.i.h.s16 %v1169_v33  ;;  %v1189_v51 = vunpack.i.h.s16 %v1172_v8  ;;  %v1191_v58 = vunpack.i.h.s16 %v1175_v41  ;;  %v1201_v0 = vpack.i.b16 %v1185_v62, %v1185_v62 }
 0x4c5   : > { %v1414_v49 = vpack.i.b16 %v1169_v33, %v1169_v33  ;;  %v1415_v23 = vpack.i.b16 %v1172_v8, %v1172_v8  ;;  %v1416_v53 = vpack.i.b16 %v1175_v41, %v1175_v41  ;;  %v1251_v3 = vsel %vm1979_vm15, %v1413_v22, %v1250_v20 }
 0x4c6   : > { %v1203_v42 = vpack.i.b16 %v1187_v32, %v1187_v32  ;;  %v1205_v50 = vpack.i.b16 %v1189_v51, %v1189_v51  ;;  %v1207_v52 = vpack.i.b16 %v1191_v58, %v1191_v58  ;;  %1252 = vst [vmem:[%s1847_s15 + $0x8] sm:$0x1] %v1251_v3  ;;  %v1254_v30 = vsel %vm1979_vm15, %v1201_v0, %v1253_v45 }
 0x4c7   : > { %1255 = vst [vmem:[%s1847_s15 + $0x9] sm:$0x1] %v1254_v30  ;;  %v1257_v1 = vsel %vm1979_vm15, %v1414_v49, %v1256_v38  ;;  %v1263_v34 = vsel %vm1979_vm15, %v1415_v23, %v1262_v26  ;;  %v1269_v4 = vsel %vm1979_vm15, %v1416_v53, %v1268_v56 }
 0x4c8   : > { %1258 = vst [vmem:[%s1847_s15 + $0xa] sm:$0x1] %v1257_v1  ;;  %v1260_v24 = vsel %vm1979_vm15, %v1203_v42, %v1259_v5  ;;  %v1266_v37 = vsel %vm1979_vm15, %v1205_v50, %v1265_v61  ;;  %v1272_v31 = vsel %vm1979_vm15, %v1207_v52, %v1271_v48 }
 0x4c9   : > { %1261 = vst [vmem:[%s1847_s15 + $0xb] sm:$0x1] %v1260_v24 }
 0x4ca   : > { %1264 = vst [vmem:[%s1847_s15 + $0xc] sm:$0x1] %v1263_v34 }
 0x4cb   : > { %1267 = vst [vmem:[%s1847_s15 + $0xd] sm:$0x1] %v1266_v37 }
 0x4cc   : > { %1270 = vst [vmem:[%s1847_s15 + $0xe] sm:$0x1] %v1269_v4 }
 0x4cd   : > { %1273 = vst [vmem:[%s1847_s15 + $0xf] sm:$0x1] %v1272_v31 }
 0x4ce PF: > { %s11_s6 = sadd.s32 1, %s1451_s6  }
 0x4cf   : > { %p8_p4 = scmp.ge.s32.totalorder %s11_s6, 5  }
 0x4d1   :  { %10 = sbr.rel (!%p8_p4) target bundleno = 1 (0x1), region = 56 }

// kernel: _lambda_.43
= control target key start
LH: loop header
LB: loop body
LE: loop exit
PB: predicated region body
PF: predicated region fallthrough
CT: control target
= control target key end

     0   :  { %vm33_vm0 = vcmask 261120   ;;  %v309_v15 = vmov 32.0   ;;  %s483_s0 = inlined_call_operand.vmem [shape: bf16[48,32], index: 0, kind: input, shape index: {}]   ;;  %s484_s3 = inlined_call_operand.vmem [shape: bf16[32,96], index: 3, kind: input, shape index: {}]   ;;  %s485_s1 = inlined_call_operand.vmem [shape: bf16[1,32], index: 1, kind: input, shape index: {}]   ;;  %s486_s2 = inlined_call_operand.vmem [shape: bf16[1,32], index: 2, kind: input, shape index: {}]   ;;  %s487_s4 = inlined_call_operand.vmem [shape: bf16[1,96], index: 4, kind: input, shape index: {}]   ;;  %s488_s5 = inlined_call_operand.vmem [shape: bf16[48,96], index: 5, kind: output, shape index: {}]  }
   0x1   :  { %v289_v0 = vld [vmem:[%s483_s0 + $0x10] sm:$0xff]   ;;  %v288_v1 = vld [vmem:[%s483_s0 + $0x8] sm:$0xff]   ;;  %v277_v2 = vld [vmem:[%s483_s0] sm:$0xff]   ;;  %295 = vrcp.f32 %v309_v15 }
   0x2   :  { %v286_v3 = vunpack.c.l.bf16 %v289_v0  ;;  %v282_v4 = vunpack.c.l.bf16 %v288_v1  ;;  %v278_v5 = vunpack.c.l.bf16 %v277_v2  ;;  %v287_v9 = vunpack.c.h.bf16 %v289_v0  ;;  %v275_v53 = vld [vmem:[%s484_s3 + $0x8] sm:$0xff]  ;;  %v274_v59 = vld [vmem:[%s484_s3] sm:$0xff] }
   0x3   :  { %v283_v10 = vunpack.c.h.bf16 %v288_v1  ;;  %v279_v11 = vunpack.c.h.bf16 %v277_v2  ;;  %228 = vmatpush.bf16.msra.mxu0 %v275_v53  ;;  %291 = vmatpush.bf16.msra.mxu2 %v275_v53  ;;  %v173_v15 = vld [vmem:[%s485_s1] sm:$0x1] }
   0x4   :  { %v46_v6 = vsel %vm33_vm0, %v286_v3, 0.0  ;;  %v40_v7 = vsel %vm33_vm0, %v282_v4, 0.0  ;;  %v34_v8 = vsel %vm33_vm0, %v278_v5, 0.0  ;;  %v49_v12 = vsel %vm33_vm0, %v287_v9, 0.0  ;;  %290 = vmatpush.bf16.msra.mxu1 %v275_v53 }
   0x5   :  { %47 = vadd.xlane.f32.xlu0 %v46_v6  ;;  %41 = vadd.xlane.f32.xlu2 %v40_v7  ;;  %v43_v13 = vsel %vm33_vm0, %v283_v10, 0.0  ;;  %v37_v14 = vsel %vm33_vm0, %v279_v11, 0.0 }
   0x6   :  { %35 = vadd.xlane.f32.xlu1 %v34_v8 }
   0x7   :  { %v296_v16 = vpop.eup %295  ;;  %229 = vmatpush.bf16.msra.mxu0 %v274_v59  ;;  %293 = vmatpush.bf16.msra.mxu2 %v274_v59 }
   0x8   :  { %v53_v17 = vmul.f32 32.0, %v296_v16  ;;  %vm57_vm1 = vweird.f32 %v296_v16  ;;  %292 = vmatpush.bf16.msra.mxu1 %v274_v59 }
   0xa   :  { %v54_v18 = vsub.f32 1.0, %v53_v17 }
   0xc   :  { %v55_v19 = vmul.f32 %v296_v16, %v54_v18 }
   0xd   :  { %50 = vadd.xlane.f32.xlu0 %v49_v12  ;;  %44 = vadd.xlane.f32.xlu2 %v43_v13 }
   0xe   :  { %38 = vadd.xlane.f32.xlu1 %v37_v14  ;;  %v56_v20 = vadd.f32 %v296_v16, %v55_v19 }
  0x10   :  { %v355_v21 = vsel %vm57_vm1, %v296_v16, %v56_v20 }
  0x78   :  { %v48_v22 = vpop.xlane.xlu0 %47  ;;  %v42_v23 = vpop.xlane.xlu2 %41 }
  0x79   :  { %v63_v24 = vmul.f32 %v355_v21, %v48_v22  ;;  %v36_v25 = vpop.xlane.xlu1 %35  ;;  %v61_v39 = vmul.f32 %v355_v21, %v42_v23 }
  0x7a   :  { %v59_v26 = vmul.f32 %v355_v21, %v36_v25 }
  0x7b   :  { %v359_v27 = vsub.f32 %v286_v3, %v63_v24  ;;  %v385_v46 = vsub.f32 %v282_v4, %v61_v39  ;;  %v174_v24 = vunpack.c.l.bf16 %v173_v15 }
  0x7c   :  { %v361_v28 = vsub.f32 %v278_v5, %v59_v26 }
  0x7d   :  { %v75_v29 = vmul.f32 %v359_v27, %v359_v27  ;;  %v73_v50 = vmul.f32 %v385_v46, %v385_v46 }
  0x7e   :  { %v71_v30 = vmul.f32 %v361_v28, %v361_v28 }
  0x7f   :  { %v89_v31 = vsel %vm33_vm0, %v75_v29, 0.0  ;;  %v83_v51 = vsel %vm33_vm0, %v73_v50, 0.0 }
  0x80   :  { %90 = vadd.xlane.f32.xlu0 %v89_v31  ;;  %v51_v32 = vpop.xlane.xlu0 %50  ;;  %v45_v33 = vpop.xlane.xlu2 %44  ;;  %v77_v34 = vsel %vm33_vm0, %v71_v30, 0.0  ;;  %v182_v31 = vld [vmem:[%s486_s2] sm:$0x1] }
  0x81   :  { %v64_v35 = vmul.f32 %v355_v21, %v51_v32  ;;  %v62_v36 = vmul.f32 %v355_v21, %v45_v33  ;;  %78 = vadd.xlane.f32.xlu2 %v77_v34  ;;  %v39_v37 = vpop.xlane.xlu1 %38 }
  0x82   :  { %v60_v38 = vmul.f32 %v355_v21, %v39_v37  ;;  %v175_v37 = vperm.slane %v174_v24, 0 }
  0x83   :  { %v373_v40 = vsub.f32 %v287_v9, %v64_v35  ;;  %v375_v41 = vsub.f32 %v283_v10, %v62_v36 }
  0x84   :  { %v377_v42 = vsub.f32 %v279_v11, %v60_v38 }
  0x85   :  { %v76_v43 = vmul.f32 %v373_v40, %v373_v40  ;;  %v74_v44 = vmul.f32 %v375_v41, %v375_v41 }
  0x86   :  { %v72_v45 = vmul.f32 %v377_v42, %v377_v42 }
  0x87   :  { %v92_v47 = vsel %vm33_vm0, %v76_v43, 0.0  ;;  %v86_v48 = vsel %vm33_vm0, %v74_v44, 0.0  ;;  %v183_v43 = vunpack.c.l.bf16 %v182_v31 }
  0x88   :  { %93 = vadd.xlane.f32.xlu1 %v92_v47  ;;  %v80_v49 = vsel %vm33_vm0, %v72_v45, 0.0 }
  0x89   :  { %87 = vadd.xlane.f32.xlu2 %v86_v48  ;;  %81 = vadd.xlane.f32.xlu0 %v80_v49 }
  0x90   :  { %84 = vadd.xlane.f32.xlu1 %v83_v51 }
  0xf3   :  { %v91_v52 = vpop.xlane.xlu0 %90 }
  0xf4   :  { %v99_v54 = vmul.f32 %v91_v52, %v355_v21  ;;  %v79_v55 = vpop.xlane.xlu2 %78 }
  0xf5   :  { %v95_v56 = vmul.f32 %v79_v55, %v355_v21 }
  0xf6   :  { %v105_v57 = vadd.f32 1e-05, %v99_v54 }
  0xf7   :  { %v101_v58 = vadd.f32 1e-05, %v95_v56 }
  0xf8   :  { %297 = vrsqrt.f32 %v105_v57  ;;  %vm153_vm3 = vweird.f32 %v105_v57 }
  0xf9   :  { %299 = vrsqrt.f32 %v101_v58  ;;  %vm113_vm4 = vweird.f32 %v101_v58 }
  0xfb   :  { %v94_v60 = vpop.xlane.xlu1 %93 }
  0xfc   :  { %v88_v61 = vpop.xlane.xlu2 %87  ;;  %v82_v62 = vpop.xlane.xlu0 %81  ;;  %v100_v63 = vmul.f32 %v94_v60, %v355_v21  ;;  %v184_v60 = vperm.slane %v183_v43, 0 }
  0xfd   :  { %v98_v0 = vmul.f32 %v88_v61, %v355_v21  ;;  %v96_v1 = vmul.f32 %v82_v62, %v355_v21 }
  0xfe   :  { %v298_v2 = vpop.eup %297  ;;  %v404_v3 = vadd.f32 1e-05, %v100_v63 }
  0xff   :  { %v300_v4 = vpop.eup %299  ;;  %v148_v5 = vmul.f32 %v298_v2, %v105_v57  ;;  %v104_v6 = vadd.f32 1e-05, %v98_v0  ;;  %v406_v7 = vadd.f32 1e-05, %v96_v1  ;;  %vm154_vm2 = vweird.f32 %v298_v2 }
 0x100   :  { %v108_v8 = vmul.f32 %v300_v4, %v101_v58  ;;  %301 = vrsqrt.f32 %v404_v3  ;;  %vm114_vm5 = vweird.f32 %v300_v4  ;;  %vm422_vm6 = vmor %vm153_vm3, %vm154_vm2  ;;  %vm163_vm9 = vweird.f32 %v404_v3 }
 0x101   :  { %v149_v9 = vmul.f32 %v298_v2, %v148_v5  ;;  %303 = vrsqrt.f32 %v104_v6  ;;  %vm428_vm7 = vmor %vm113_vm4, %vm114_vm5  ;;  %vm143_vm8 = vweird.f32 %v104_v6  ;;  %vm123_vm12 = vweird.f32 %v406_v7 }
 0x102   :  { %v109_v10 = vmul.f32 %v300_v4, %v108_v8  ;;  %305 = vrsqrt.f32 %v406_v7  ;;  %vm252_vm5 = vcmask 781312  }
 0x103   :  { %v150_v11 = vmul.f32 0.5, %v149_v9  ;;  %v85_v12 = vpop.xlane.xlu1 %84 }
 0x104   :  { %v110_v13 = vmul.f32 0.5, %v109_v10  ;;  %v97_v14 = vmul.f32 %v85_v12, %v355_v21 }
 0x105   :  { %v151_v16 = vsub.f32 1.5, %v150_v11 }
 0x106   :  { %v302_v17 = vpop.eup %301  ;;  %v111_v18 = vsub.f32 1.5, %v110_v13  ;;  %v414_v19 = vadd.f32 1e-05, %v97_v14 }
 0x107   :  { %v304_v20 = vpop.eup %303  ;;  %v152_v22 = vmul.f32 %v298_v2, %v151_v16  ;;  %v158_v23 = vmul.f32 %v302_v17, %v404_v3  ;;  %vm164_vm10 = vweird.f32 %v302_v17 }
 0x108   :  { %v306_v25 = vpop.eup %305  ;;  %v138_v26 = vmul.f32 %v304_v20, %v104_v6  ;;  %307 = vrsqrt.f32 %v414_v19  ;;  %v112_v21 = vmul.f32 %v300_v4, %v111_v18  ;;  %vm144_vm11 = vweird.f32 %v304_v20  ;;  %vm165_vm14 = vmor %vm163_vm9, %vm164_vm10 }
 0x109   :  { %v118_v29 = vmul.f32 %v306_v25, %v406_v7  ;;  %v159_v30 = vmul.f32 %v302_v17, %v158_v23  ;;  %v156_v34 = vsel %vm422_vm6, %v298_v2, %v152_v22  ;;  %vm124_vm13 = vweird.f32 %v306_v25  ;;  %vm442_vm15 = vmor %vm143_vm8, %vm144_vm11 }
 0x10a   :  { %v139_v33 = vmul.f32 %v304_v20, %v138_v26  ;;  %v116_v44 = vsel %vm428_vm7, %v300_v4, %v112_v21  ;;  %v171_v49 = vmul.f32 %v156_v34, %v359_v27  ;;  %vm125_vm1 = vmor %vm123_vm12, %vm124_vm13  ;;  %vm133_vm3 = vweird.f32 %v414_v19 }
 0x10b   :  { %v119_v35 = vmul.f32 %v306_v25, %v118_v29  ;;  %v160_v36 = vmul.f32 0.5, %v159_v30  ;;  %v167_v54 = vmul.f32 %v116_v44, %v361_v28 }
 0x10c   :  { %v140_v39 = vmul.f32 0.5, %v139_v33  ;;  %v180_v61 = vmul.f32 %v175_v37, %v171_v49 }
 0x10d   :  { %v120_v45 = vmul.f32 0.5, %v119_v35  ;;  %v161_v47 = vsub.f32 1.5, %v160_v36  ;;  %v176_v1 = vmul.f32 %v175_v37, %v167_v54 }
 0x10e   :  { %v308_v48 = vpop.eup %307  ;;  %v141_v50 = vsub.f32 1.5, %v140_v39  ;;  %v189_v6 = vadd.f32 %v184_v60, %v180_v61 }
 0x10f   :  { %v121_v51 = vsub.f32 1.5, %v120_v45  ;;  %v162_v52 = vmul.f32 %v302_v17, %v161_v47  ;;  %v128_v53 = vmul.f32 %v308_v48, %v414_v19  ;;  %vm134_vm2 = vweird.f32 %v308_v48 }
 0x110   :  { %v142_v55 = vmul.f32 %v304_v20, %v141_v50  ;;  %vm135_vm4 = vmor %vm133_vm3, %vm134_vm2 }
 0x111   :  { %v122_v27 = vmul.f32 %v306_v25, %v121_v51  ;;  %v166_v57 = vsel %vm165_vm14, %v302_v17, %v162_v52  ;;  %v129_v58 = vmul.f32 %v308_v48, %v128_v53  ;;  %v198_v17 = vld [vmem:[%s487_s4] sm:$0x1] }
 0x112   :  { %v172_v59 = vmul.f32 %v166_v57, %v373_v40  ;;  %v146_v28 = vsel %vm442_vm15, %v304_v20, %v142_v55  ;;  %v185_v40 = vadd.f32 %v184_v60, %v176_v1  ;;  %v199_v18 = vunpack.c.l.bf16 %v198_v17 }
 0x113   :  { %v126_v62 = vsel %vm125_vm1, %v306_v25, %v122_v27  ;;  %v130_v63 = vmul.f32 0.5, %v129_v58  ;;  %v170_v4 = vmul.f32 %v146_v28, %v375_v41 }
 0x114   :  { %v168_v0 = vmul.f32 %v126_v62, %v377_v42  ;;  %v181_v2 = vmul.f32 %v175_v37, %v172_v59  ;;  %v200_v19 = vperm.slane %v199_v18, 0 }
 0x115   :  { %v131_v3 = vsub.f32 1.5, %v130_v63  ;;  %v179_v13 = vmul.f32 %v175_v37, %v170_v4 }
 0x116   :  { %v177_v5 = vmul.f32 %v175_v37, %v168_v0  ;;  %v190_v7 = vadd.f32 %v184_v60, %v181_v2 }
 0x117   :  { %v132_v8 = vmul.f32 %v308_v48, %v131_v3  ;;  %v188_v15 = vadd.f32 %v184_v60, %v179_v13 }
 0x118   :  { %v186_v9 = vadd.f32 %v184_v60, %v177_v5  ;;  %v193_v10 = vpack.c.bf16 %v190_v7, %v189_v6 }
 0x119   :  { %v136_v11 = vsel %vm135_vm4, %v308_v48, %v132_v8 }
 0x11a   :  { %v169_v12 = vmul.f32 %v136_v11, %v385_v46  ;;  %v191_v42 = vpack.c.bf16 %v186_v9, %v185_v40  ;;  %273 = vmatmul.msk.bf16.vlgmr.msra.gmra.mxu2 %vm33_vm0, %v193_v10 }
 0x11c   :  { %271 = vmatmul.msk.bf16.vlgmr.msra.gmra.mxu0 %vm33_vm0, %v191_v42  ;;  %v178_v41 = vmul.f32 %v175_v37, %v169_v12 }
 0x11e   :  { %v187_v14 = vadd.f32 %v184_v60, %v178_v41 }
 0x120   :  { %v192_v16 = vpack.c.bf16 %v188_v15, %v187_v14 }
 0x122   :  { %272 = vmatmul.msk.bf16.vlgmr.msra.gmra.mxu1 %vm33_vm0, %v192_v16 }
 0x199   :  { %v231_v20 = vpop.f32.mrf.mxu0 }
 0x19a   :  { %v232_v46 = vadd.f32 %v231_v20, %v200_v19 }
 0x19c   :  { %v246_v22 = vpack.c.bf16 %v232_v46, %v232_v46 }
 0x19d   :  { %v241_v23 = vpop.f32.mrf.mxu2 }
 0x19e   :  { %253 = vst.msk [vmem:[%s488_s5] sm:$0xf] %vm252_vm5, %v246_v22  ;;  %v242_v24 = vadd.f32 %v241_v23, %v200_v19 }
 0x19f   :  { %v236_v25 = vpop.f32.mrf.mxu1 }
 0x1a0   :  { %v250_v26 = vpack.c.bf16 %v242_v24, %v242_v24  ;;  %v237_v21 = vadd.f32 %v236_v25, %v200_v19 }
 0x1a1   :  { %v233_v29 = vpop.f32.mrf.mxu0 }
 0x1a2   :  { %257 = vst.msk [vmem:[%s488_s5 + $0x10] sm:$0xf] %vm252_vm5, %v250_v26  ;;  %v234_v30 = vadd.f32 %v233_v29, %v200_v19  ;;  %v248_v31 = vpack.c.bf16 %v237_v21, %v237_v21 }
 0x1a4   :  { %v247_v32 = vpack.c.bf16 %v234_v30, %v234_v30  ;;  %255 = vst.msk [vmem:[%s488_s5 + $0x8] sm:$0xf] %vm252_vm5, %v248_v31 }
 0x1a5   :  { %v243_v33 = vpop.f32.mrf.mxu2 }
 0x1a6   :  { %254 = vst.msk [vmem:[%s488_s5 + $0x4] sm:$0xf] %vm252_vm5, %v247_v32  ;;  %v244_v34 = vadd.f32 %v243_v33, %v200_v19 }
 0x1a7   :  { %v238_v35 = vpop.f32.mrf.mxu1 }
 0x1a8   :  { %v251_v36 = vpack.c.bf16 %v244_v34, %v244_v34  ;;  %v239_v37 = vadd.f32 %v238_v35, %v200_v19 }
 0x1aa   :  { %258 = vst.msk [vmem:[%s488_s5 + $0x14] sm:$0xf] %vm252_vm5, %v251_v36  ;;  %v249_v38 = vpack.c.bf16 %v239_v37, %v239_v37 }
 0x1ac   :  { %256 = vst.msk [vmem:[%s488_s5 + $0xc] sm:$0xf] %vm252_vm5, %v249_v38 }

// kernel: _lambda_.42
= control target key start
LH: loop header
LB: loop body
LE: loop exit
PB: predicated region body
PF: predicated region fallthrough
CT: control target
= control target key end

     0   :  { %vm21_vm0 = vcmask 261120   ;;  %v298_v2 = vmov 0.0   ;;  %vm201_vm1 = vcmask 257024   ;;  %s405_s1 = inlined_call_operand.vmem [shape: bf16[128,32], index: 1, kind: input, shape index: {}]   ;;  %s406_s0 = inlined_call_operand.vmem [shape: bf16[48,128], index: 0, kind: input, shape index: {}]   ;;  %s407_s2 = inlined_call_operand.vmem [shape: bf16[1,32], index: 2, kind: input, shape index: {}]   ;;  %s408_s3 = inlined_call_operand.vmem [shape: bf16[48,32], index: 3, kind: input, shape index: {}]   ;;  %s409_s4 = inlined_call_operand.vmem [shape: bf16[48,32], index: 4, kind: output, shape index: {}]  }
   0x1   :  { %v266_v0 = vld [vmem:[%s405_s1 + $0x38] sm:$0xff]  ;;  %v265_v1 = vld [vmem:[%s405_s1 + $0x30] sm:$0xff]  ;;  %22 = vst.msk [vmem:[#allocation2] sm:$0xff] %vm21_vm0, %v298_v2  ;;  %v264_v3 = vld [vmem:[%s405_s1 + $0x28] sm:$0xff] }
   0x2   :  { %122 = vmatpush.bf16.msra.mxu0 %v266_v0  ;;  %281 = vmatpush.bf16.msra.mxu1 %v266_v0  ;;  %23 = vst.msk [vmem:[#allocation2 + $0x8] sm:$0xff] %vm21_vm0, %v298_v2  ;;  %v263_v4 = vld [vmem:[%s405_s1 + $0x20] sm:$0xff]  ;;  %v262_v5 = vld [vmem:[%s405_s1 + $0x18] sm:$0xff]  ;;  %v261_v6 = vld [vmem:[%s405_s1 + $0x10] sm:$0xff] }
   0x3   :  { %282 = vmatpush.bf16.msra.mxu2 %v266_v0  ;;  %24 = vst.msk [vmem:[#allocation2 + $0x10] sm:$0xff] %vm21_vm0, %v298_v2  ;;  %v260_v7 = vld [vmem:[%s405_s1 + $0x8] sm:$0xff]  ;;  %v259_v8 = vld [vmem:[%s405_s1] sm:$0xff]  ;;  %v258_v11 = vld [vmem:[%s406_s0 + $0x10] sm:$0xff] }
   0x4   :  { %25 = vst.msk [vmem:[#allocation2 + $0x18] sm:$0xff] %vm21_vm0, %v298_v2  ;;  %v256_v9 = vld [vmem:[%s406_s0] sm:$0xff]  ;;  %v257_v10 = vld [vmem:[%s406_s0 + $0x8] sm:$0xff]  ;;  %v280_v39 = vld [vmem:[%s408_s3 + $0x10] sm:$0xff]  }
   0x5   :  { %26 = vst.msk [vmem:[#allocation2 + $0x20] sm:$0xff] %vm21_vm0, %v298_v2  ;;  %v168_v15 = vld [vmem:[%s407_s2] sm:$0x1]  ;;  %v279_v25 = vld [vmem:[%s408_s3 + $0x8] sm:$0xff]   ;;  %v277_v45 = vunpack.c.l.bf16 %v280_v39  ;;  %v278_v61 = vunpack.c.h.bf16 %v280_v39 }
   0x6   :  { %123 = vmatpush.bf16.msra.mxu0 %v265_v1  ;;  %283 = vmatpush.bf16.msra.mxu1 %v265_v1  ;;  %27 = vst.msk [vmem:[#allocation2 + $0x28] sm:$0xff] %vm21_vm0, %v298_v2  ;;  %v169_v19 = vunpack.c.l.bf16 %v168_v15  ;;  %v268_v21 = vld [vmem:[%s408_s3] sm:$0xff]   ;;  %v273_v34 = vunpack.c.l.bf16 %v279_v25  ;;  %v274_v51 = vunpack.c.h.bf16 %v279_v25 }
   0x7   :  { %284 = vmatpush.bf16.msra.mxu2 %v265_v1  ;;  %v269_v30 = vunpack.c.l.bf16 %v268_v21  ;;  %v270_v48 = vunpack.c.h.bf16 %v268_v21 }
   0x8   :  { %v28_v12 = vld [vmem:[#allocation2] sm:$0xff]  ;;  %v170_v24 = vperm.slane %v169_v19, 0 }
   0x9   :  { %v29_v22 = vld [vmem:[#allocation2 + $0x8] sm:$0xff] }
   0xa   :  { %124 = vmatpush.bf16.msra.mxu0 %v264_v3  ;;  %285 = vmatpush.bf16.msra.mxu1 %v264_v3  ;;  %v30_v13 = vld [vmem:[#allocation2 + $0x10] sm:$0xff] }
   0xb   :  { %286 = vmatpush.bf16.msra.mxu2 %v264_v3  ;;  %v31_v23 = vld [vmem:[#allocation2 + $0x18] sm:$0xff] }
   0xc   :  { %v32_v20 = vld [vmem:[#allocation2 + $0x20] sm:$0xff] }
   0xd   :  { %v33_v40 = vld [vmem:[#allocation2 + $0x28] sm:$0xff] }
   0xe   :  { %125 = vmatpush.bf16.msra.mxu0 %v263_v4  ;;  %287 = vmatpush.bf16.msra.mxu1 %v263_v4 }
   0xf   :  { %288 = vmatpush.bf16.msra.mxu2 %v263_v4 }
  0x12   :  { %126 = vmatpush.bf16.msra.mxu0 %v262_v5  ;;  %289 = vmatpush.bf16.msra.mxu1 %v262_v5 }
  0x13   :  { %290 = vmatpush.bf16.msra.mxu2 %v262_v5 }
  0x16   :  { %127 = vmatpush.bf16.msra.mxu0 %v261_v6  ;;  %291 = vmatpush.bf16.msra.mxu1 %v261_v6 }
  0x17   :  { %292 = vmatpush.bf16.msra.mxu2 %v261_v6 }
  0x1a   :  { %128 = vmatpush.bf16.msra.mxu0 %v260_v7  ;;  %293 = vmatpush.bf16.msra.mxu1 %v260_v7 }
  0x1b   :  { %294 = vmatpush.bf16.msra.mxu2 %v260_v7 }
  0x1e   :  { %129 = vmatpush.bf16.msra.mxu0 %v259_v8  ;;  %295 = vmatpush.bf16.msra.mxu1 %v259_v8 }
  0x1f   :  { %296 = vmatpush.bf16.msra.mxu2 %v259_v8 }
  0x21   :  { %130 = vmatmul.bf16.vlgmr.msra.gmra.mxu0 %v256_v9  ;;  %135 = vmatmul.bf16.vlgmr.msra.gmra.mxu1 %v257_v10 }
  0x22   :  { %140 = vmatmul.bf16.vlgmr.msra.gmra.mxu2 %v258_v11 }
  0x9e   :  { %v131_v14 = vpop.f32.mrf.mxu0  ;;  %v136_v16 = vpop.f32.mrf.mxu1 }
  0x9f   :  { %v146_v17 = vadd.f32 %v131_v14, %v28_v12  ;;  %v148_v18 = vadd.f32 %v136_v16, %v30_v13 }
  0xa1   :  { %153 = vst.msk [vmem:[#allocation2] sm:$0xff] %vm21_vm0, %v146_v17 }
  0xa2   :  { %155 = vst.msk [vmem:[#allocation2 + $0x10] sm:$0xff] %vm21_vm0, %v148_v18 }
  0xa5   :  { %v141_v26 = vpop.f32.mrf.mxu2 }
  0xa6   :  { %v150_v27 = vadd.f32 %v141_v26, %v32_v20  ;;  %v133_v28 = vpop.f32.mrf.mxu0  ;;  %v138_v29 = vpop.f32.mrf.mxu1 }
  0xa7   :  { %v147_v31 = vadd.f32 %v133_v28, %v29_v22  ;;  %v149_v32 = vadd.f32 %v138_v29, %v31_v23 }
  0xa8   :  { %v162_v33 = vld [vmem:[#allocation2] sm:$0xff]  ;;  %157 = vst.msk [vmem:[#allocation2 + $0x20] sm:$0xff] %vm21_vm0, %v150_v27 }
  0xa9   :  { %v171_v35 = vadd.f32 %v170_v24, %v162_v33  ;;  %v164_v36 = vld [vmem:[#allocation2 + $0x10] sm:$0xff]  ;;  %154 = vst.msk [vmem:[#allocation2 + $0x8] sm:$0xff] %vm21_vm0, %v147_v31 }
  0xaa   :  { %v173_v37 = vadd.f32 %v170_v24, %v164_v36  ;;  %156 = vst.msk [vmem:[#allocation2 + $0x18] sm:$0xff] %vm21_vm0, %v149_v32 }
  0xab   :  { %v189_v38 = vadd.f32 %v269_v30, %v171_v35 }
  0xac   :  { %v191_v41 = vadd.f32 %v273_v34, %v173_v37 }
  0xad   :  { %v195_v42 = vpack.c.bf16 %v189_v38, %v189_v38  ;;  %v143_v43 = vpop.f32.mrf.mxu2 }
  0xae   :  { %v197_v44 = vpack.c.bf16 %v191_v41, %v191_v41  ;;  %v151_v46 = vadd.f32 %v143_v43, %v33_v40 }
  0xaf   :  { %202 = vst.msk [vmem:[%s409_s4] sm:$0xf] %vm201_vm1, %v195_v42  ;;  %v166_v47 = vld [vmem:[#allocation2 + $0x20] sm:$0xff] }
  0xb0   :  { %204 = vst.msk [vmem:[%s409_s4 + $0x8] sm:$0xf] %vm201_vm1, %v197_v44  ;;  %v175_v49 = vadd.f32 %v170_v24, %v166_v47  ;;  %v163_v50 = vld [vmem:[#allocation2 + $0x8] sm:$0xff] }
  0xb1   :  { %v172_v52 = vadd.f32 %v170_v24, %v163_v50  ;;  %v165_v53 = vld [vmem:[#allocation2 + $0x18] sm:$0xff]  ;;  %158 = vst.msk [vmem:[#allocation2 + $0x28] sm:$0xff] %vm21_vm0, %v151_v46 }
  0xb2   :  { %v193_v54 = vadd.f32 %v277_v45, %v175_v49  ;;  %v174_v55 = vadd.f32 %v170_v24, %v165_v53 }
  0xb3   :  { %v190_v56 = vadd.f32 %v270_v48, %v172_v52 }
  0xb4   :  { %v199_v57 = vpack.c.bf16 %v193_v54, %v193_v54  ;;  %v192_v58 = vadd.f32 %v274_v51, %v174_v55 }
  0xb5   :  { %v196_v59 = vpack.c.bf16 %v190_v56, %v190_v56 }
  0xb6   :  { %206 = vst.msk [vmem:[%s409_s4 + $0x10] sm:$0xf] %vm201_vm1, %v199_v57  ;;  %v198_v60 = vpack.c.bf16 %v192_v58, %v192_v58 }
  0xb7   :  { %203 = vst.msk [vmem:[%s409_s4 + $0x4] sm:$0xf] %vm201_vm1, %v196_v59 }
  0xb8   :  { %205 = vst.msk [vmem:[%s409_s4 + $0xc] sm:$0xf] %vm201_vm1, %v198_v60  ;;  %v167_v62 = vld [vmem:[#allocation2 + $0x28] sm:$0xff] }
  0xb9   :  { %v176_v63 = vadd.f32 %v170_v24, %v167_v62 }
  0xbb   :  { %v194_v0 = vadd.f32 %v278_v61, %v176_v63 }
  0xbd   :  { %v200_v1 = vpack.c.bf16 %v194_v0, %v194_v0 }
  0xbf   :  { %207 = vst.msk [vmem:[%s409_s4 + $0x14] sm:$0xf] %vm201_vm1, %v200_v1 }

// kernel: _lambda_.48
= control target key start
LH: loop header
LB: loop body
LE: loop exit
PB: predicated region body
PF: predicated region fallthrough
CT: control target
= control target key end

     0   :  { %vm20_vm0 = vcmask 256000   ;;  %v119_v3 = vmov 32.0   ;;  %vm75_vm5 = vcmask 261120   ;;  %vm93_vm6 = vcmask 254976   ;;  %s168_s0 = inlined_call_operand.vmem [shape: bf16[3,32], index: 0, kind: input, shape index: {}]   ;;  %s169_s3 = inlined_call_operand.vmem [shape: bf16[32,32], index: 3, kind: input, shape index: {}]   ;;  %s170_s1 = inlined_call_operand.vmem [shape: bf16[1,32], index: 1, kind: input, shape index: {}]   ;;  %s171_s2 = inlined_call_operand.vmem [shape: bf16[1,32], index: 2, kind: input, shape index: {}]   ;;  %s172_s4 = inlined_call_operand.vmem [shape: bf16[3,32], index: 4, kind: output, shape index: {}]  }
   0x1   :  { %v18_v0 = vld [vmem:[%s168_s0] sm:$0x3]  ;;  %115 = vrcp.f32 %v119_v3  ;;  %v113_v15 = vld [vmem:[%s169_s3 + $0x8] sm:$0xff]  ;;  %vm94_vm7 = vsmask.f32 1280 }
   0x2   :  { %v19_v1 = vunpack.c.l.bf16 %v18_v0  ;;  %85 = vmatpush.bf16.msra.mxu0 %v113_v15  ;;  %v112_v16 = vld [vmem:[%s169_s3] sm:$0xff]  ;;  %vm95_vm8 = vmand %vm93_vm6, %vm94_vm7 }
   0x3   :  { %v50_v23 = vld [vmem:[%s170_s1] sm:$0x1] }
   0x4   :  { %v21_v2 = vsel %vm20_vm0, %v19_v1, 0.0  ;;  %v54_v25 = vld [vmem:[%s171_s2] sm:$0x1]  ;;  %v51_v26 = vunpack.c.l.bf16 %v50_v23 }
   0x5   :  { %22 = vadd.xlane.f32.xlu0 %v21_v2  ;;  %v55_v28 = vunpack.c.l.bf16 %v54_v25  ;;  %v96_v38 = vld [vmem:[%s172_s4] sm:$0x3] }
   0x6   :  { %86 = vmatpush.bf16.msra.mxu0 %v112_v16  ;;  %v52_v30 = vperm.slane %v51_v26, 0 }
   0x7   :  { %v116_v4 = vpop.eup %115  ;;  %v56_v33 = vperm.slane %v55_v28, 0 }
   0x8   :  { %v25_v5 = vmul.f32 32.0, %v116_v4  ;;  %vm29_vm1 = vweird.f32 %v116_v4 }
   0xa   :  { %v26_v6 = vsub.f32 1.0, %v25_v5 }
   0xc   :  { %v27_v7 = vmul.f32 %v116_v4, %v26_v6 }
   0xe   :  { %v28_v8 = vadd.f32 %v116_v4, %v27_v7 }
  0x10   :  { %v30_v9 = vsel %vm29_vm1, %v116_v4, %v28_v8 }
  0x78   :  { %v23_v10 = vpop.xlane.xlu0 %22 }
  0x79   :  { %v31_v11 = vmul.f32 %v30_v9, %v23_v10 }
  0x7b   :  { %v32_v12 = vsub.f32 %v19_v1, %v31_v11 }
  0x7d   :  { %v33_v13 = vmul.f32 %v32_v12, %v32_v12 }
  0x7f   :  { %v34_v14 = vsel %vm20_vm0, %v33_v13, 0.0 }
  0x80   :  { %35 = vadd.xlane.f32.xlu0 %v34_v14 }
  0xf3   :  { %v36_v17 = vpop.xlane.xlu0 %35 }
  0xf4   :  { %v37_v18 = vmul.f32 %v36_v17, %v30_v9 }
  0xf6   :  { %v38_v19 = vadd.f32 1e-05, %v37_v18 }
  0xf8   :  { %117 = vrsqrt.f32 %v38_v19  ;;  %vm45_vm3 = vweird.f32 %v38_v19 }
  0xfe   :  { %v118_v20 = vpop.eup %117 }
  0xff   :  { %v40_v21 = vmul.f32 %v118_v20, %v38_v19  ;;  %vm46_vm2 = vweird.f32 %v118_v20 }
 0x100   :  { %vm47_vm4 = vmor %vm45_vm3, %vm46_vm2 }
 0x101   :  { %v41_v22 = vmul.f32 %v118_v20, %v40_v21 }
 0x103   :  { %v42_v24 = vmul.f32 0.5, %v41_v22 }
 0x105   :  { %v43_v27 = vsub.f32 1.5, %v42_v24 }
 0x107   :  { %v44_v29 = vmul.f32 %v118_v20, %v43_v27 }
 0x109   :  { %v48_v31 = vsel %vm47_vm4, %v118_v20, %v44_v29 }
 0x10a   :  { %v49_v32 = vmul.f32 %v48_v31, %v32_v12 }
 0x10c   :  { %v53_v34 = vmul.f32 %v52_v30, %v49_v32 }
 0x10e   :  { %v57_v35 = vadd.f32 %v56_v33, %v53_v34 }
 0x110   :  { %v58_v36 = vpack.c.bf16 %v57_v35, %v57_v35 }
 0x112   :  { %111 = vmatmul.msk.bf16.vlgmr.msra.gmra.mxu0 %vm75_vm5, %v58_v36 }
 0x18f   :  { %v88_v37 = vpop.f32.mrf.mxu0 }
 0x190   :  { %v92_v39 = vpack.c.bf16 %v88_v37, %v88_v37 }
 0x192   :  { %v97_v40 = vsel %vm95_vm8, %v92_v39, %v96_v38 }
 0x193   :  { %98 = vst [vmem:[%s172_s4] sm:$0x3] %v97_v40 }
 0x197   :  { %v90_v41 = vpop.f32.mrf.mxu0 }

// kernel: _lambda_.25
= control target key start
LH: loop header
LB: loop body
LE: loop exit
PB: predicated region body
PF: predicated region fallthrough
CT: control target
= control target key end

     0   :  { %vm122_vm0 = vcmask 523264   ;;  %vm16_vm1 = vcmask 261120   ;;  %v228_v17 = vmov 0.0   ;;  %vm160_vm2 = vcmask 257024   ;;  %s286_s1 = inlined_call_operand.vmem [shape: bf16[192,32], index: 1, kind: input, shape index: {}]   ;;  %s287_s0 = inlined_call_operand.vmem [shape: bf16[8,192], index: 0, kind: input, shape index: {}]   ;;  %s288_s2 = inlined_call_operand.vmem [shape: bf16[8,32], index: 2, kind: output, shape index: {}]  }
   0x1   :  { %v222_v0 = vld [vmem:[%s286_s1 + $0x38] sm:$0xff]  ;;  %v221_v2 = vld [vmem:[%s286_s1 + $0x30] sm:$0xff]  ;;  %v220_v4 = vld [vmem:[%s286_s1 + $0x28] sm:$0xff]  ;;  %17 = vst.msk [vmem:[#allocation2] sm:$0xff] %vm16_vm1, %v228_v17 }
   0x2   :  { %v226_v1 = vld [vmem:[%s286_s1 + $0x58] sm:$0xff]  ;;  %126 = vmatpush.bf16.msra.mxu0 %v222_v0  ;;  %v225_v3 = vld [vmem:[%s286_s1 + $0x50] sm:$0xff]  ;;  %v224_v5 = vld [vmem:[%s286_s1 + $0x48] sm:$0xff] }
   0x3   :  { %143 = vmatpush.bf16.msra.mxu1 %v226_v1  ;;  %v19_v6 = vld [vmem:[%s287_s0] sm:$0xff]  ;;  %v218_v10 = vld [vmem:[%s286_s1 + $0x18] sm:$0xff]  ;;  %v217_v12 = vld [vmem:[%s286_s1 + $0x10] sm:$0xff] }
   0x4   :  { %v219_v7 = vld [vmem:[%s286_s1 + $0x20] sm:$0xff]  ;;  %v46_v8 = vunpack.c.h.b16 %v19_v6  ;;  %v216_v13 = vld [vmem:[%s286_s1 + $0x8] sm:$0xff]  ;;  %v45_v14 = vunpack.c.l.b16 %v19_v6 }
   0x5   :  { %v223_v9 = vld [vmem:[%s286_s1 + $0x40] sm:$0xff] }
   0x6   :  { %127 = vmatpush.bf16.msra.mxu0 %v221_v2  ;;  %v48_v11 = vpack.c.b16 %v46_v8, %v46_v8  ;;  %v215_v15 = vld [vmem:[%s286_s1] sm:$0xff]  ;;  %v47_v16 = vpack.c.b16 %v45_v14, %v45_v14 }
   0x7   :  { %144 = vmatpush.bf16.msra.mxu1 %v225_v3 }
   0x8   :  { %v18_v20 = vld [vmem:[#allocation2] sm:$0xff] }
   0xa   :  { %128 = vmatpush.bf16.msra.mxu0 %v220_v4 }
   0xb   :  { %145 = vmatpush.bf16.msra.mxu1 %v224_v5 }
   0xe   :  { %129 = vmatpush.bf16.msra.mxu0 %v219_v7 }
   0xf   :  { %146 = vmatpush.bf16.msra.mxu1 %v223_v9 }
  0x12   :  { %130 = vmatpush.bf16.msra.mxu0 %v218_v10  ;;  %214 = vmatmul.msk.bf16.vlgmr.msra.gmra.mxu1 %vm122_vm0, %v48_v11 }
  0x16   :  { %131 = vmatpush.bf16.msra.mxu0 %v217_v12 }
  0x1a   :  { %132 = vmatpush.bf16.msra.mxu0 %v216_v13 }
  0x1e   :  { %133 = vmatpush.bf16.msra.mxu0 %v215_v15 }
  0x21   :  { %134 = vmatmul.bf16.vlgmr.msra.gmra.mxu0 %v47_v16 }
  0x8f   :  { %v148_v18 = vpop.f32.mrf.mxu1 }
  0x97   :  { %v150_v19 = vpop.f32.mrf.mxu1 }
  0x9e   :  { %v135_v21 = vpop.f32.mrf.mxu0 }
  0x9f   :  { %v149_v22 = vadd.f32 %v148_v18, %v135_v21 }
  0xa1   :  { %v152_v23 = vadd.f32 %v149_v22, %v18_v20 }
  0xa3   :  { %154 = vst.msk [vmem:[#allocation2] sm:$0xff] %vm16_vm1, %v152_v23 }
  0xa6   :  { %v137_v24 = vpop.f32.mrf.mxu0 }
  0xaa   :  { %v158_v25 = vld [vmem:[#allocation2] sm:$0xff] }
  0xab   :  { %v159_v26 = vpack.c.bf16 %v158_v25, %v158_v25 }
  0xad   :  { %161 = vst.msk [vmem:[%s288_s2] sm:$0xf] %vm160_vm2, %v159_v26 }

// kernel: _lambda_.26
= control target key start
LH: loop header
LB: loop body
LE: loop exit
PB: predicated region body
PF: predicated region fallthrough
CT: control target
= control target key end

     0   :  { %vm18_vm0 = vcmask 261120   ;;  %vm22_vm1 = vcmask 254976   ;;  %v98_v6 = vmov 32.0   ;;  %vm83_vm7 = vcmask 257024   ;;  %s141_s0 = inlined_call_operand.vmem [shape: bf16[10,32], index: 0, kind: input, shape index: {}]   ;;  %s142_s1 = inlined_call_operand.vmem [shape: bf16[1,32], index: 1, kind: input, shape index: {}]   ;;  %s143_s2 = inlined_call_operand.vmem [shape: bf16[1,32], index: 2, kind: input, shape index: {}]   ;;  %s144_s3 = inlined_call_operand.vmem [shape: bf16[10,32], index: 3, kind: output, shape index: {}]  }
   0x1   :  { %v14_v0 = vld [vmem:[%s141_s0] sm:$0xf]  ;;  %v15_v2 = vld [vmem:[%s141_s0 + $0x4] sm:$0x1]  ;;  %92 = vrcp.f32 %v98_v6  ;;  %vm85_vm10 = vcmask 253952  }
   0x2   :  { %v16_v1 = vunpack.c.l.bf16 %v14_v0  ;;  %v17_v4 = vunpack.c.l.bf16 %v15_v2  ;;  %v71_v31 = vld [vmem:[%s142_s1] sm:$0x1] }
   0x3   :  { %v76_v33 = vld [vmem:[%s143_s2] sm:$0x1]  ;;  %v72_v35 = vunpack.c.l.bf16 %v71_v31 }
   0x4   :  { %v19_v3 = vsel %vm18_vm0, %v16_v1, 0.0  ;;  %v23_v5 = vsel %vm22_vm1, %v17_v4, 0.0  ;;  %v77_v38 = vunpack.c.l.bf16 %v76_v33 }
   0x5   :  { %20 = vadd.xlane.f32.xlu0 %v19_v3  ;;  %v73_v41 = vperm.slane %v72_v35, 0 }
   0x6   :  { %v78_v44 = vperm.slane %v77_v38, 0 }
   0x7   :  { %v93_v7 = vpop.eup %92 }
   0x8   :  { %v27_v8 = vmul.f32 32.0, %v93_v7  ;;  %vm31_vm2 = vweird.f32 %v93_v7 }
   0xa   :  { %v28_v9 = vsub.f32 1.0, %v27_v8 }
   0xc   :  { %v29_v10 = vmul.f32 %v93_v7, %v28_v9 }
   0xd   :  { %24 = vadd.xlane.f32.xlu0 %v23_v5 }
   0xe   :  { %v30_v11 = vadd.f32 %v93_v7, %v29_v10 }
  0x10   :  { %v32_v12 = vsel %vm31_vm2, %v93_v7, %v30_v11 }
  0x78   :  { %v21_v13 = vpop.xlane.xlu0 %20 }
  0x79   :  { %v33_v14 = vmul.f32 %v32_v12, %v21_v13 }
  0x7b   :  { %v35_v15 = vsub.f32 %v16_v1, %v33_v14 }
  0x7d   :  { %v37_v16 = vmul.f32 %v35_v15, %v35_v15 }
  0x7f   :  { %v39_v17 = vsel %vm18_vm0, %v37_v16, 0.0 }
  0x80   :  { %40 = vadd.xlane.f32.xlu1 %v39_v17  ;;  %v25_v18 = vpop.xlane.xlu0 %24 }
  0x81   :  { %v34_v19 = vmul.f32 %v32_v12, %v25_v18 }
  0x83   :  { %v36_v20 = vsub.f32 %v17_v4, %v34_v19 }
  0x85   :  { %v38_v21 = vmul.f32 %v36_v20, %v36_v20 }
  0x87   :  { %v42_v22 = vsel %vm22_vm1, %v38_v21, 0.0 }
  0x88   :  { %43 = vadd.xlane.f32.xlu1 %v42_v22 }
  0xf3   :  { %v41_v23 = vpop.xlane.xlu1 %40 }
  0xf4   :  { %v45_v24 = vmul.f32 %v41_v23, %v32_v12 }
  0xf6   :  { %v47_v25 = vadd.f32 1e-05, %v45_v24 }
  0xf8   :  { %94 = vrsqrt.f32 %v47_v25  ;;  %vm55_vm4 = vweird.f32 %v47_v25 }
  0xfb   :  { %v44_v26 = vpop.xlane.xlu1 %43 }
  0xfc   :  { %v46_v27 = vmul.f32 %v44_v26, %v32_v12 }
  0xfe   :  { %v95_v28 = vpop.eup %94  ;;  %v48_v29 = vadd.f32 1e-05, %v46_v27 }
  0xff   :  { %v50_v30 = vmul.f32 %v95_v28, %v47_v25  ;;  %vm56_vm3 = vweird.f32 %v95_v28 }
 0x100   :  { %96 = vrsqrt.f32 %v48_v29  ;;  %vm57_vm5 = vmor %vm55_vm4, %vm56_vm3  ;;  %vm65_vm8 = vweird.f32 %v48_v29 }
 0x101   :  { %v51_v32 = vmul.f32 %v95_v28, %v50_v30 }
 0x103   :  { %v52_v34 = vmul.f32 0.5, %v51_v32 }
 0x105   :  { %v53_v36 = vsub.f32 1.5, %v52_v34 }
 0x106   :  { %v97_v37 = vpop.eup %96 }
 0x107   :  { %v54_v39 = vmul.f32 %v95_v28, %v53_v36  ;;  %v60_v40 = vmul.f32 %v97_v37, %v48_v29  ;;  %vm66_vm6 = vweird.f32 %v97_v37 }
 0x108   :  { %vm67_vm9 = vmor %vm65_vm8, %vm66_vm6 }
 0x109   :  { %v58_v42 = vsel %vm57_vm5, %v95_v28, %v54_v39  ;;  %v61_v43 = vmul.f32 %v97_v37, %v60_v40 }
 0x10a   :  { %v69_v45 = vmul.f32 %v58_v42, %v35_v15 }
 0x10b   :  { %v62_v46 = vmul.f32 0.5, %v61_v43 }
 0x10c   :  { %v74_v47 = vmul.f32 %v73_v41, %v69_v45 }
 0x10d   :  { %v63_v48 = vsub.f32 1.5, %v62_v46 }
 0x10e   :  { %v79_v49 = vadd.f32 %v78_v44, %v74_v47 }
 0x10f   :  { %v64_v50 = vmul.f32 %v97_v37, %v63_v48 }
 0x110   :  { %v81_v51 = vpack.c.bf16 %v79_v49, %v79_v49 }
 0x111   :  { %v68_v52 = vsel %vm67_vm9, %v97_v37, %v64_v50 }
 0x112   :  { %84 = vst.msk [vmem:[%s144_s3] sm:$0xf] %vm83_vm7, %v81_v51  ;;  %v70_v53 = vmul.f32 %v68_v52, %v36_v20 }
 0x114   :  { %v75_v54 = vmul.f32 %v73_v41, %v70_v53 }
 0x116   :  { %v80_v55 = vadd.f32 %v78_v44, %v75_v54 }
 0x118   :  { %v82_v56 = vpack.c.bf16 %v80_v55, %v80_v55 }
 0x11a   :  { %86 = vst.msk [vmem:[%s144_s3 + $0x4] sm:$0x1] %vm85_vm10, %v82_v56 }

// kernel: _lambda_.27
= control target key start
LH: loop header
LB: loop body
LE: loop exit
PB: predicated region body
PF: predicated region fallthrough
CT: control target
= control target key end

     0   :  { %vm25_vm0 = vcmask 261120   ;;  %vm29_vm1 = vcmask 254976   ;;  %v153_v6 = vmov 32.0   ;;  %vm127_vm9 = vcmask 781312   ;;  %s216_s0 = inlined_call_operand.vmem [shape: bf16[10,32], index: 0, kind: input, shape index: {}]   ;;  %s217_s3 = inlined_call_operand.vmem [shape: bf16[32,96], index: 3, kind: input, shape index: {}]   ;;  %s218_s1 = inlined_call_operand.vmem [shape: bf16[1,32], index: 1, kind: input, shape index: {}]   ;;  %s219_s2 = inlined_call_operand.vmem [shape: bf16[1,32], index: 2, kind: input, shape index: {}]   ;;  %s220_s4 = inlined_call_operand.vmem [shape: bf16[1,96], index: 4, kind: input, shape index: {}]   ;;  %s221_s5 = inlined_call_operand.vmem [shape: bf16[10,96], index: 5, kind: output, shape index: {}]  }
   0x1   :  { %v21_v0 = vld [vmem:[%s216_s0] sm:$0xf]  ;;  %v22_v2 = vld [vmem:[%s216_s0 + $0x4] sm:$0x1]  ;;  %147 = vrcp.f32 %v153_v6  ;;  %v145_v23 = vld [vmem:[%s217_s3 + $0x8] sm:$0xff]  ;;  %vm129_vm10 = vcmask 778240  }
   0x2   :  { %v23_v1 = vunpack.c.l.bf16 %v21_v0  ;;  %v24_v4 = vunpack.c.l.bf16 %v22_v2  ;;  %117 = vmatpush.bf16.msra.mxu0 %v145_v23  ;;  %v144_v25 = vld [vmem:[%s217_s3] sm:$0xff] }
   0x3   :  { %v78_v39 = vld [vmem:[%s218_s1] sm:$0x1] }
   0x4   :  { %v26_v3 = vsel %vm25_vm0, %v23_v1, 0.0  ;;  %v30_v5 = vsel %vm29_vm1, %v24_v4, 0.0  ;;  %v79_v41 = vunpack.c.l.bf16 %v78_v39  ;;  %v83_v44 = vld [vmem:[%s219_s2] sm:$0x1] }
   0x5   :  { %27 = vadd.xlane.f32.xlu0 %v26_v3  ;;  %v84_v48 = vunpack.c.l.bf16 %v83_v44  ;;  %v93_v58 = vld [vmem:[%s220_s4] sm:$0x1] }
   0x6   :  { %118 = vmatpush.bf16.msra.mxu0 %v144_v25  ;;  %v80_v47 = vperm.slane %v79_v41, 0  ;;  %v94_v59 = vunpack.c.l.bf16 %v93_v58 }
   0x7   :  { %v148_v7 = vpop.eup %147  ;;  %v85_v53 = vperm.slane %v84_v48, 0 }
   0x8   :  { %v34_v8 = vmul.f32 32.0, %v148_v7  ;;  %vm38_vm2 = vweird.f32 %v148_v7  ;;  %v95_v60 = vperm.slane %v94_v59, 0 }
   0xa   :  { %v35_v9 = vsub.f32 1.0, %v34_v8 }
   0xc   :  { %v36_v10 = vmul.f32 %v148_v7, %v35_v9 }
   0xd   :  { %31 = vadd.xlane.f32.xlu0 %v30_v5 }
   0xe   :  { %v37_v11 = vadd.f32 %v148_v7, %v36_v10 }
  0x10   :  { %v39_v12 = vsel %vm38_vm2, %v148_v7, %v37_v11 }
  0x78   :  { %v28_v13 = vpop.xlane.xlu0 %27 }
  0x79   :  { %v40_v14 = vmul.f32 %v39_v12, %v28_v13 }
  0x7b   :  { %v42_v15 = vsub.f32 %v23_v1, %v40_v14 }
  0x7d   :  { %v44_v16 = vmul.f32 %v42_v15, %v42_v15 }
  0x7f   :  { %v46_v17 = vsel %vm25_vm0, %v44_v16, 0.0 }
  0x80   :  { %47 = vadd.xlane.f32.xlu1 %v46_v17  ;;  %v32_v18 = vpop.xlane.xlu0 %31 }
  0x81   :  { %v41_v19 = vmul.f32 %v39_v12, %v32_v18 }
  0x83   :  { %v43_v20 = vsub.f32 %v24_v4, %v41_v19 }
  0x85   :  { %v45_v21 = vmul.f32 %v43_v20, %v43_v20 }
  0x87   :  { %v49_v22 = vsel %vm29_vm1, %v45_v21, 0.0 }
  0x88   :  { %50 = vadd.xlane.f32.xlu1 %v49_v22 }
  0xf3   :  { %v48_v24 = vpop.xlane.xlu1 %47 }
  0xf4   :  { %v52_v26 = vmul.f32 %v48_v24, %v39_v12 }
  0xf6   :  { %v54_v27 = vadd.f32 1e-05, %v52_v26 }
  0xf8   :  { %149 = vrsqrt.f32 %v54_v27  ;;  %vm62_vm4 = vweird.f32 %v54_v27 }
  0xfb   :  { %v51_v28 = vpop.xlane.xlu1 %50 }
  0xfc   :  { %v53_v29 = vmul.f32 %v51_v28, %v39_v12 }
  0xfe   :  { %v150_v30 = vpop.eup %149  ;;  %v55_v31 = vadd.f32 1e-05, %v53_v29 }
  0xff   :  { %v57_v32 = vmul.f32 %v150_v30, %v54_v27  ;;  %vm63_vm3 = vweird.f32 %v150_v30 }
 0x100   :  { %151 = vrsqrt.f32 %v55_v31  ;;  %vm64_vm5 = vmor %vm62_vm4, %vm63_vm3  ;;  %vm72_vm7 = vweird.f32 %v55_v31 }
 0x101   :  { %v58_v33 = vmul.f32 %v150_v30, %v57_v32 }
 0x103   :  { %v59_v34 = vmul.f32 0.5, %v58_v33 }
 0x105   :  { %v60_v35 = vsub.f32 1.5, %v59_v34 }
 0x106   :  { %v152_v36 = vpop.eup %151 }
 0x107   :  { %v61_v37 = vmul.f32 %v150_v30, %v60_v35  ;;  %v67_v38 = vmul.f32 %v152_v36, %v55_v31  ;;  %vm73_vm6 = vweird.f32 %v152_v36 }
 0x108   :  { %vm74_vm8 = vmor %vm72_vm7, %vm73_vm6 }
 0x109   :  { %v68_v40 = vmul.f32 %v152_v36, %v67_v38  ;;  %v65_v42 = vsel %vm64_vm5, %v150_v30, %v61_v37 }
 0x10a   :  { %v76_v46 = vmul.f32 %v65_v42, %v42_v15 }
 0x10b   :  { %v69_v43 = vmul.f32 0.5, %v68_v40 }
 0x10c   :  { %v81_v52 = vmul.f32 %v80_v47, %v76_v46 }
 0x10d   :  { %v70_v45 = vsub.f32 1.5, %v69_v43 }
 0x10e   :  { %v86_v55 = vadd.f32 %v85_v53, %v81_v52 }
 0x10f   :  { %v71_v49 = vmul.f32 %v152_v36, %v70_v45 }
 0x111   :  { %v75_v50 = vsel %vm74_vm8, %v152_v36, %v71_v49 }
 0x112   :  { %v77_v51 = vmul.f32 %v75_v50, %v43_v20 }
 0x114   :  { %v82_v54 = vmul.f32 %v80_v47, %v77_v51 }
 0x116   :  { %v87_v56 = vadd.f32 %v85_v53, %v82_v54 }
 0x118   :  { %v88_v57 = vpack.c.bf16 %v87_v56, %v86_v55 }
 0x11a   :  { %143 = vmatmul.msk.bf16.vlgmr.msra.gmra.mxu0 %vm25_vm0, %v88_v57 }
 0x197   :  { %v120_v61 = vpop.f32.mrf.mxu0 }
 0x198   :  { %v121_v62 = vadd.f32 %v120_v61, %v95_v60 }
 0x19a   :  { %v125_v63 = vpack.c.bf16 %v121_v62, %v121_v62 }
 0x19c   :  { %128 = vst.msk [vmem:[%s221_s5] sm:$0xf] %vm127_vm9, %v125_v63 }
 0x19f   :  { %v122_v0 = vpop.f32.mrf.mxu0 }
 0x1a0   :  { %v123_v1 = vadd.f32 %v122_v0, %v95_v60 }
 0x1a2   :  { %v126_v2 = vpack.c.bf16 %v123_v1, %v123_v1 }
 0x1a4   :  { %130 = vst.msk [vmem:[%s221_s5 + $0x4] sm:$0x1] %vm129_vm10, %v126_v2 }

// kernel: _lambda_.28
= control target key start
LH: loop header
LB: loop body
LE: loop exit
PB: predicated region body
PF: predicated region fallthrough
CT: control target
= control target key end

     0   :  { %s682_s6 = smov 0   ;;  %s842_s0 = inlined_call_operand.vmem [shape: bf16[2,5,3,2,16], index: 0, kind: input, shape index: {}]   ;;  %s843_s1 = inlined_call_operand.vmem [shape: bf16[2,5,2,16], index: 1, kind: output, shape index: {}]  }
   0x1 LB: > { %s607_s7 = sadd.s32 4294967295, %s669_s6   ;;  %p611_p0 = scmp.ge.s32.totalorder %s669_s6, 1  ;;  %s669_s6 = sphi %s682_s6, %s11_s6  }
   0x2   : > { %p86_p1 = scmp.lt.s32.totalorder %s669_s6, 3 }
   0x4   : > { %p87_p2 = pnand %p611_p0, %p86_p1 }
   0x5   : > { %p104_p3 = scmp.lt.s32.totalorder (!%p87_p2), %s607_s7, 1 }
   0x6   : > { %90 = sbr.rel (%p87_p2) target bundleno = 767 (0x2ff), region = 24 }
   0xb   : > { %s849_s7 = smov (!%p104_p3, %s607_s7), 1  ;;  %vm156_vm0 = vcmask 1041409   ;;  %vm159_vm1 = vcmask 1042434   ;;  %vm162_vm2 = vcmask 1043459   ;;  %vm165_vm3 = vcmask 1044484  }
   0xc   : > { %s644_s8 = smul.u32 15, %s849_s7  ;;  %vm202_vm4 = vcmask 130048   ;;  %vm223_vm5 = vcmask 36864   ;;  %vm274_vm6 = vcmask 1041408   ;;  %vm275_vm7 = vcmask 1042432  }
   0xd   : > { %vm270_vm8 = vcmask 39936   ;;  %s645_s12 = smul.u32 5, %s849_s7  ;;  %vm297_vm9 = vcmask 1040384   ;;  %vm323_vm10 = vcmask 122880   ;;  %vm324_vm11 = vsmask.f32 256 }
   0xe   : > { %s696_s11 = scalar_lea.vmem %s842_s0, %s644_s8  ;;  %vm787_vm12 = vmand %vm323_vm10, %vm324_vm11  ;;  %vm537_vm13 = vsmask.f32 7938 }
   0xf   : > { %v113_v0 = vld [vmem:[%s696_s11] sm:$0x1]  ;;  %v114_v1 = vld [vmem:[%s696_s11 + $0x3] sm:$0x1]  ;;  %v115_v3 = vld [vmem:[%s696_s11 + $0x6] sm:$0x1]  ;;  %s781_s15 = scalar_lea.vmem %s843_s1, %s645_s12 }
  0x10   : > { %131 = vst [vmem:[#allocation1] ss:$9 sm:$0xff] %v113_v0  ;;  %v116_v5 = vld [vmem:[%s696_s11 + $0x9] sm:$0x1]  ;;  %v117_v7 = vld [vmem:[%s696_s11 + $0xc] sm:$0x1]  ;;  %vm815_vm14 = vmand %vm323_vm10, %vm537_vm13 }
  0x11   : > { %v612_v9 = vld [vmem:[%s696_s11 + $0x1] sm:$0x1]  ;;  %v613_v11 = vld [vmem:[%s696_s11 + $0x4] sm:$0x1]  ;;  %v614_v13 = vld [vmem:[%s696_s11 + $0x7] sm:$0x1] }
  0x12   : > { %v615_v15 = vld [vmem:[%s696_s11 + $0xa] sm:$0x1]  ;;  %v616_v18 = vld [vmem:[%s696_s11 + $0xd] sm:$0x1]  ;;  %v617_v30 = vld [vmem:[%s696_s11 + $0x2] sm:$0x1] }
  0x13   : > { %v618_v47 = vld [vmem:[%s696_s11 + $0x5] sm:$0x1]  ;;  %v619_v52 = vld [vmem:[%s696_s11 + $0x8] sm:$0x1]  ;;  %v620_v54 = vld [vmem:[%s696_s11 + $0xb] sm:$0x1] }
  0x14   : > { %v621_v56 = vld [vmem:[%s696_s11 + $0xe] sm:$0x1]  ;;  %v341_v58 = vld [vmem:[%s696_s11] sm:$0x1]  ;;  %v342_v60 = vld [vmem:[%s696_s11 + $0x3] sm:$0x1] }
  0x15   : > { %v343_v62 = vld [vmem:[%s696_s11 + $0x6] sm:$0x1]  ;;  %v344_v0 = vld [vmem:[%s696_s11 + $0x9] sm:$0x1] }
  0x17   : > { %v132_v2 = vld [vmem:[#allocation1] sm:$0xf] }
  0x18   : > { %135 = vst [vmem:[#allocation1] ss:$9 sm:$0xff] %v114_v1  ;;  %v150_v28 = vunpack.c.l.b16 %v132_v2  ;;  %v345_v2 = vld [vmem:[%s696_s11 + $0xc] sm:$0x1] }
  0x1f   : > { %v136_v4 = vld [vmem:[#allocation1] sm:$0xf] }
  0x20   : > { %139 = vst [vmem:[#allocation1] ss:$9 sm:$0xff] %v115_v3  ;;  %v151_v23 = vunpack.c.l.b16 %v136_v4  ;;  %v627_v4 = vld [vmem:[%s696_s11 + $0x1] sm:$0x1] }
  0x22   : > { %v155_v29 = vrot.slane %v151_v23, 7 }
  0x24   : > { %v157_v36 = vsel %vm156_vm0, %v155_v29, %v150_v28 }
  0x27   : > { %v140_v6 = vld [vmem:[#allocation1] sm:$0xf] }
  0x28   : > { %143 = vst [vmem:[#allocation1] ss:$9 sm:$0xff] %v116_v5  ;;  %v152_v26 = vunpack.c.l.b16 %v140_v6  ;;  %v628_v6 = vld [vmem:[%s696_s11 + $0x4] sm:$0x1] }
  0x2a   : > { %v158_v34 = vrot.slane %v152_v26, 6 }
  0x2c   : > { %v160_v42 = vsel %vm159_vm1, %v158_v34, %v157_v36 }
  0x2f   : > { %v144_v8 = vld [vmem:[#allocation1] sm:$0xf] }
  0x30   : > { %147 = vst [vmem:[#allocation1] ss:$9 sm:$0xff] %v117_v7  ;;  %v153_v32 = vunpack.c.l.b16 %v144_v8  ;;  %v629_v8 = vld [vmem:[%s696_s11 + $0x7] sm:$0x1] }
  0x32   : > { %v161_v40 = vrot.slane %v153_v32, 5 }
  0x34   : > { %v163_v46 = vsel %vm162_vm2, %v161_v40, %v160_v42 }
  0x37   : > { %v148_v10 = vld [vmem:[#allocation1] sm:$0xf] }
  0x38   : > { %169 = vst [vmem:[#allocation1] ss:$9 sm:$0xff] %v612_v9  ;;  %v154_v38 = vunpack.c.l.b16 %v148_v10  ;;  %v630_v10 = vld [vmem:[%s696_s11 + $0xa] sm:$0x1] }
  0x3a   : > { %v164_v44 = vrot.slane %v154_v38, 4 }
  0x3c   : > { %v166_v50 = vsel %vm165_vm3, %v164_v44, %v163_v46 }
  0x3d   : > { %v167_v51 = vpack.c.b16 %v166_v50, %v166_v50 }
  0x3f   : > { %v170_v12 = vld [vmem:[#allocation1] sm:$0xf] }
  0x40   : > { %173 = vst [vmem:[#allocation1] ss:$9 sm:$0xff] %v613_v11  ;;  %v188_v21 = vunpack.c.l.b16 %v170_v12 }
  0x47   : > { %v174_v14 = vld [vmem:[#allocation1] sm:$0xf] }
  0x48   : > { %177 = vst [vmem:[#allocation1] ss:$9 sm:$0xff] %v614_v13  ;;  %v189_v17 = vunpack.c.l.b16 %v174_v14  ;;  %v631_v13 = vld [vmem:[%s696_s11 + $0xd] sm:$0x1] }
  0x4a   : > { %v193_v22 = vrot.slane %v189_v17, 7 }
  0x4c   : > { %v194_v27 = vsel %vm156_vm0, %v193_v22, %v188_v21 }
  0x4f   : > { %v178_v16 = vld [vmem:[#allocation1] sm:$0xf] }
  0x50   : > { %181 = vst [vmem:[#allocation1] ss:$9 sm:$0xff] %v615_v15  ;;  %v190_v19 = vunpack.c.l.b16 %v178_v16 }
  0x52   : > { %v195_v25 = vrot.slane %v190_v19, 6 }
  0x54   : > { %v196_v33 = vsel %vm159_vm1, %v195_v25, %v194_v27 }
  0x57   : > { %v182_v20 = vld [vmem:[#allocation1] sm:$0xf] }
  0x58   : > { %185 = vst [vmem:[#allocation1] ss:$9 sm:$0xff] %v616_v18  ;;  %v191_v24 = vunpack.c.l.b16 %v182_v20 }
  0x5a   : > { %v197_v31 = vrot.slane %v191_v24, 5 }
  0x5c   : > { %v198_v39 = vsel %vm162_vm2, %v197_v31, %v196_v33 }
  0x5f   : > { %v186_v35 = vld [vmem:[#allocation1] sm:$0xf] }
  0x60   : > { %v192_v37 = vunpack.c.l.b16 %v186_v35  ;;  %237 = vst [vmem:[#allocation1] ss:$9 sm:$0xff] %v617_v30 }
  0x62   : > { %v199_v41 = vrot.slane %v192_v37, 4 }
  0x64   : > { %v200_v43 = vsel %vm165_vm3, %v199_v41, %v198_v39 }
  0x65   : > { %v201_v45 = vpack.c.b16 %v200_v43, %v200_v43 }
  0x67   : > { %v207_v48 = vsel %vm202_vm4, %v201_v45, 0  ;;  %v718_v49 = vld [vmem:[#allocation1] sm:$0xf] }
  0x68   : > { %216 = vmatpush.bf16.xpose.msra.mxu0 %v207_v48  ;;  %241 = vst [vmem:[#allocation1] ss:$9 sm:$0xff] %v618_v47 }
  0x6f   : > { %622 = vmatmul.msk.bf16.vlgmr.msra.gmra.mxu0 %vm202_vm4, %v167_v51  ;;  %v723_v53 = vld [vmem:[#allocation1] sm:$0xf] }
  0x70   : > { %245 = vst [vmem:[#allocation1] ss:$9 sm:$0xff] %v619_v52 }
  0x77   : > { %v726_v55 = vld [vmem:[#allocation1] sm:$0xf] }
  0x78   : > { %249 = vst [vmem:[#allocation1] ss:$9 sm:$0xff] %v620_v54 }
  0x7f   : > { %v729_v57 = vld [vmem:[#allocation1] sm:$0xf] }
  0x80   : > { %253 = vst [vmem:[#allocation1] ss:$9 sm:$0xff] %v621_v56 }
  0x87   : > { %v732_v59 = vld [vmem:[#allocation1] sm:$0xf] }
  0x88   : > { %357 = vst [vmem:[#allocation1] ss:$9 sm:$0xff] %v341_v58 }
  0x8f   : > { %v358_v61 = vld [vmem:[#allocation1] sm:$0xf] }
  0x90   : > { %361 = vst [vmem:[#allocation1] ss:$9 sm:$0xff] %v342_v60  ;;  %v376_v18 = vunpack.c.l.b16 %v358_v61 }
  0x92   : > { %v381_v24 = vrot.slane %v376_v18, 1 }
  0x97   : > { %v362_v63 = vld [vmem:[#allocation1] sm:$0xf] }
  0x98   : > { %365 = vst [vmem:[#allocation1] ss:$9 sm:$0xff] %v343_v62  ;;  %v377_v23 = vunpack.c.l.b16 %v362_v63  ;;  %v257_v62 = vunpack.c.l.b16 %v723_v53  ;;  %v258_v63 = vunpack.c.l.b16 %v726_v55  ;;  %v671_v55 = vmov 65535  }
  0x9a   : > { %v382_v30 = vsel %vm156_vm0, %v377_v23, %v381_v24  ;;  %v634_v23 = vld [vmem:[%s696_s11 + $0x8] sm:$0x1] }
  0x9f   : > { %v366_v1 = vld [vmem:[#allocation1] sm:$0xf] }
  0xa0   : > { %369 = vst [vmem:[#allocation1] ss:$9 sm:$0xff] %v344_v0  ;;  %v378_v21 = vunpack.c.l.b16 %v366_v1  ;;  %v256_v0 = vunpack.c.l.b16 %v718_v49  ;;  %v259_v1 = vunpack.c.l.b16 %v729_v57  ;;  %v276_v49 = vsel %vm274_vm6, 4294967295, %v671_v55  ;;  %v335_v55 = vld [vmem:[%s781_s15 + $0x3] sm:$0x1] }
  0xa1   : > { %v277_v57 = vsel %vm275_vm7, %v276_v49, 0 }
  0xa2   : > { %v383_v28 = vrot.slane %v378_v21, 7  ;;  %v633_v21 = vld [vmem:[%s696_s11 + $0x5] sm:$0x1] }
  0xa4   : > { %v384_v36 = vsel %vm159_vm1, %v383_v28, %v382_v30 }
  0xa7   : > { %v370_v3 = vld [vmem:[#allocation1] sm:$0xf] }
  0xa8   : > { %373 = vst [vmem:[#allocation1] ss:$9 sm:$0xff] %v345_v2  ;;  %v379_v26 = vunpack.c.l.b16 %v370_v3  ;;  %v261_v2 = vrot.slane %v257_v62, 7  ;;  %v260_v3 = vunpack.c.l.b16 %v732_v59 }
  0xaa   : > { %v385_v34 = vrot.slane %v379_v26, 6 }
  0xac   : > { %v386_v40 = vsel %vm162_vm2, %v385_v34, %v384_v36 }
  0xaf   : > { %v374_v5 = vld [vmem:[#allocation1] sm:$0xf] }
  0xb0   : > { %391 = vst [vmem:[#allocation1] ss:$9 sm:$0xff] %v627_v4  ;;  %v380_v32 = vunpack.c.l.b16 %v374_v5  ;;  %v263_v4 = vrot.slane %v258_v63, 6  ;;  %v262_v5 = vsel %vm156_vm0, %v261_v2, %v256_v0  ;;  %v329_v2 = vld [vmem:[%s781_s15 + $0x1] sm:$0x1] }
  0xb2   : > { %v387_v38 = vrot.slane %v380_v32, 5 }
  0xb4   : > { %v388_v42 = vsel %vm165_vm3, %v387_v38, %v386_v40 }
  0xb5   : > { %v389_v43 = vpack.c.b16 %v388_v42, %v388_v42 }
  0xb7   : > { %v392_v7 = vld [vmem:[#allocation1] sm:$0xf] }
  0xb8   : > { %395 = vst [vmem:[#allocation1] ss:$9 sm:$0xff] %v628_v6  ;;  %v410_v12 = vunpack.c.l.b16 %v392_v7  ;;  %v265_v6 = vrot.slane %v259_v1, 5  ;;  %v264_v7 = vsel %vm159_vm1, %v263_v4, %v262_v5  ;;  %v326_v1 = vld [vmem:[%s781_s15] sm:$0x1] }
  0xba   : > { %v415_v17 = vrot.slane %v410_v12, 1 }
  0xbf   : > { %v396_v9 = vld [vmem:[#allocation1] sm:$0xf] }
  0xc0   : > { %399 = vst [vmem:[#allocation1] ss:$9 sm:$0xff] %v629_v8  ;;  %v411_v16 = vunpack.c.l.b16 %v396_v9  ;;  %v267_v8 = vrot.slane %v260_v3, 4  ;;  %v266_v9 = vsel %vm162_vm2, %v265_v6, %v264_v7  ;;  %v332_v3 = vld [vmem:[%s781_s15 + $0x2] sm:$0x1] }
  0xc2   : > { %v416_v22 = vsel %vm156_vm0, %v411_v16, %v415_v17  ;;  %v268_v53 = vsel %vm165_vm3, %v267_v8, %v266_v9  ;;  %v338_v8 = vld [vmem:[%s781_s15 + $0x4] sm:$0x1] }
  0xc7   : > { %v400_v11 = vld [vmem:[#allocation1] sm:$0xf] }
  0xc8   : > { %403 = vst [vmem:[#allocation1] ss:$9 sm:$0xff] %v630_v10  ;;  %v412_v14 = vunpack.c.l.b16 %v400_v11  ;;  %v269_v10 = vpack.c.b16 %v268_v53, %v268_v53 }
  0xca   : > { %v417_v20 = vrot.slane %v412_v14, 7  ;;  %v279_v11 = vand.u32 %v277_v57, %v269_v10 }
  0xcc   : > { %v418_v27 = vsel %vm159_vm1, %v417_v20, %v416_v22  ;;  %288 = vmatpush.bf16.msra.mxu1 %v279_v11  ;;  %v632_v20 = vld [vmem:[%s696_s11 + $0x2] sm:$0x1] }
  0xcf   : > { %v404_v15 = vld [vmem:[#allocation1] sm:$0xf] }
  0xd0   : > { %407 = vst [vmem:[#allocation1] ss:$9 sm:$0xff] %v631_v13  ;;  %v413_v19 = vunpack.c.l.b16 %v404_v15 }
  0xd2   : > { %v419_v25 = vrot.slane %v413_v19, 6 }
  0xd4   : > { %v420_v33 = vsel %vm162_vm2, %v419_v25, %v418_v27  ;;  %v635_v25 = vld [vmem:[%s696_s11 + $0xb] sm:$0x1]  ;;  %v636_v27 = vld [vmem:[%s696_s11 + $0xe] sm:$0x1] }
  0xd7   : > { %v408_v29 = vld [vmem:[#allocation1] sm:$0xf] }
  0xd8   : > { %v414_v31 = vunpack.c.l.b16 %v408_v29  ;;  %457 = vst [vmem:[#allocation1] ss:$9 sm:$0xff] %v632_v20 }
  0xda   : > { %v421_v35 = vrot.slane %v414_v31, 5 }
  0xdc   : > { %v422_v37 = vsel %vm165_vm3, %v421_v35, %v420_v33 }
  0xdd   : > { %v423_v39 = vpack.c.b16 %v422_v37, %v422_v37 }
  0xdf   : > { %v428_v41 = vsel %vm202_vm4, %v423_v39, 0  ;;  %v458_v22 = vld [vmem:[#allocation1] sm:$0xf] }
  0xe0   : > { %437 = vmatpush.bf16.xpose.msra.mxu2 %v428_v41  ;;  %461 = vst [vmem:[#allocation1] ss:$9 sm:$0xff] %v633_v21  ;;  %v476_v29 = vunpack.c.l.b16 %v458_v22 }
  0xe2   : > { %v481_v34 = vrot.slane %v476_v29, 1 }
  0xe7   : > { %637 = vmatmul.msk.bf16.vlgmr.msra.gmra.mxu2 %vm202_vm4, %v389_v43  ;;  %v462_v24 = vld [vmem:[#allocation1] sm:$0xf] }
  0xe8   : > { %465 = vst [vmem:[#allocation1] ss:$9 sm:$0xff] %v634_v23  ;;  %v477_v32 = vunpack.c.l.b16 %v462_v24 }
  0xea   : > { %v482_v37 = vsel %vm156_vm0, %v477_v32, %v481_v34 }
  0xec   : > { %v218_v44 = vpop.f32.mrf.mxu0 }
  0xed   : > { %v222_v45 = vmul.f32 0.25, %v218_v44 }
  0xef   : > { %v224_v46 = vsel %vm223_vm5, %v222_v45, -inf  ;;  %v466_v26 = vld [vmem:[#allocation1] sm:$0xf] }
  0xf0   : > { %225 = vmax.xlane.f32.xlu0 %v224_v46  ;;  %469 = vst [vmem:[#allocation1] ss:$9 sm:$0xff] %v635_v25  ;;  %v478_v30 = vunpack.c.l.b16 %v466_v26 }
  0xf2   : > { %v483_v36 = vrot.slane %v478_v30, 7 }
  0xf4   : > { %v220_v47 = vpop.f32.mrf.mxu0  ;;  %v484_v39 = vsel %vm159_vm1, %v483_v36, %v482_v37 }
  0xf7   : > { %v470_v28 = vld [vmem:[#allocation1] sm:$0xf] }
  0xf8   : > { %473 = vst [vmem:[#allocation1] ss:$9 sm:$0xff] %v636_v27  ;;  %v479_v33 = vunpack.c.l.b16 %v470_v28 }
  0xfa   : > { %v485_v38 = vrot.slane %v479_v33, 6 }
  0xfc   : > { %v486_v41 = vsel %vm162_vm2, %v485_v38, %v484_v39 }
  0xff   : > { %v474_v31 = vld [vmem:[#allocation1] sm:$0xf] }
 0x100   : > { %v480_v35 = vunpack.c.l.b16 %v474_v31 }
 0x102   : > { %v487_v40 = vrot.slane %v480_v35, 5 }
 0x104   : > { %v488_v42 = vsel %vm165_vm3, %v487_v40, %v486_v41 }
 0x105   : > { %v489_v43 = vpack.c.b16 %v488_v42, %v488_v42 }
 0x107   : > { %v494_v44 = vand.u32 %v489_v43, %v277_v57 }
 0x109   : > { %503 = vmatpush.bf16.msra.mxu3 %v494_v44 }
 0x163   : > { %v226_v48 = vpop.xlane.xlu0 %225 }
 0x164   : > { %v227_v50 = vsub.f32 %v222_v45, %v226_v48 }
 0x166   : > { %v228_v51 = vmul.f32 1.442695, %v227_v50 }
 0x168   : > { %655 = vpow2.f32 %v228_v51 }
 0x16a   : > { %v439_v52 = vpop.f32.mrf.mxu2 }
 0x16b   : > { %v443_v54 = vmul.f32 0.25, %v439_v52 }
 0x16d   : > { %v444_v56 = vsel %vm223_vm5, %v443_v54, -inf }
 0x16e   : > { %v656_v58 = vpop.eup %655  ;;  %445 = vmax.xlane.f32.xlu0 %v444_v56 }
 0x16f   : > { %v230_v60 = vsel %vm223_vm5, %v656_v58, 0.0 }
 0x170   : > { %231 = vadd.xlane.f32.xlu1 %v230_v60 }
 0x172   : > { %v441_v61 = vpop.f32.mrf.mxu2 }
 0x1e1   : > { %v446_v59 = vpop.xlane.xlu0 %445 }
 0x1e2   : > { %v447_v12 = vsub.f32 %v443_v54, %v446_v59 }
 0x1e3   : > { %v232_v13 = vpop.xlane.xlu1 %231 }
 0x1e4   : > { %v448_v14 = vmul.f32 1.442695, %v447_v12  ;;  %657 = vrcp.f32 %v232_v13 }
 0x1e6   : > { %659 = vpow2.f32 %v448_v14 }
 0x1ea   : > { %v658_v15 = vpop.eup %657 }
 0x1eb   : > { %v234_v16 = vmul.f32 %v658_v15, %v656_v58 }
 0x1ec   : > { %v660_v17 = vpop.eup %659 }
 0x1ed   : > { %v450_v18 = vsel %vm223_vm5, %v660_v17, 0.0  ;;  %v235_v19 = vpack.c.bf16 %v234_v16, %v234_v16 }
 0x1ee   : > { %451 = vadd.xlane.f32.xlu1 %v450_v18 }
 0x1ef   : > { %623 = vmatmul.msk.bf16.vlgmr.msra.gmra.mxu1 %vm270_vm8, %v235_v19 }
 0x261   : > { %v452_v45 = vpop.xlane.xlu1 %451 }
 0x262   : > { %661 = vrcp.f32 %v452_v45 }
 0x268   : > { %v662_v46 = vpop.eup %661 }
 0x269   : > { %v454_v47 = vmul.f32 %v662_v46, %v660_v17 }
 0x26b   : > { %v455_v48 = vpack.c.bf16 %v454_v47, %v454_v47 }
 0x26c   : > { %v290_v50 = vpop.f32.mrf.mxu1 }
 0x26d   : > { %v294_v51 = vpack.c.bf16 %v290_v50, %v290_v50  ;;  %638 = vmatmul.msk.bf16.vlgmr.msra.gmra.mxu3 %vm270_vm8, %v455_v48 }
 0x26f   : > { %v296_v52 = vrot.slane %v294_v51, 3 }
 0x271   : > { %v300_v54 = vsel %vm297_vm9, %v294_v51, %v296_v52  ;;  %v302_v56 = vsel %vm156_vm0, %v294_v51, %v296_v52  ;;  %v305_v58 = vsel %vm159_vm1, %v294_v51, %v296_v52 }
 0x272   : > { %v304_v60 = vrot.slane %v302_v56, 1  ;;  %v307_v61 = vrot.slane %v305_v58, 2  ;;  %v309_v62 = vunpack.i.h.s16 %v300_v54  ;;  %v624_v63 = vpack.i.b16 %v300_v54, %v300_v54 }
 0x274   : > { %v311_v4 = vunpack.i.h.s16 %v304_v60  ;;  %v314_v5 = vpack.i.b16 %v309_v62, %v309_v62  ;;  %v625_v6 = vpack.i.b16 %v304_v60, %v304_v60  ;;  %v626_v7 = vpack.i.b16 %v307_v61, %v307_v61  ;;  %v292_v9 = vpop.f32.mrf.mxu1 }
 0x275   : > { %v327_v53 = vsel %vm787_vm12, %v624_v63, %v326_v1 }
 0x276   : > { %v316_v49 = vpack.i.b16 %v311_v4, %v311_v4  ;;  %328 = vst [vmem:[%s781_s15] sm:$0x1] %v327_v53  ;;  %v330_v10 = vsel %vm787_vm12, %v314_v5, %v329_v2  ;;  %v333_v57 = vsel %vm787_vm12, %v625_v6, %v332_v3  ;;  %v339_v11 = vsel %vm787_vm12, %v626_v7, %v338_v8 }
 0x277   : > { %331 = vst [vmem:[%s781_s15 + $0x1] sm:$0x1] %v330_v10 }
 0x278   : > { %334 = vst [vmem:[%s781_s15 + $0x2] sm:$0x1] %v333_v57  ;;  %v336_v59 = vsel %vm787_vm12, %v316_v49, %v335_v55 }
 0x279   : > { %337 = vst [vmem:[%s781_s15 + $0x3] sm:$0x1] %v336_v59 }
 0x27a   : > { %340 = vst [vmem:[%s781_s15 + $0x4] sm:$0x1] %v339_v11 }
 0x27d   : > { %v539_v27 = vld [vmem:[%s781_s15] sm:$0x1] }
 0x27e   : > { %v542_v30 = vld [vmem:[%s781_s15 + $0x1] sm:$0x1] }
 0x27f   : > { %v545_v31 = vld [vmem:[%s781_s15 + $0x2] sm:$0x1] }
 0x280   : > { %v548_v36 = vld [vmem:[%s781_s15 + $0x3] sm:$0x1] }
 0x281   : > { %v551_v35 = vld [vmem:[%s781_s15 + $0x4] sm:$0x1] }
 0x2f0   : > { %v505_v12 = vpop.f32.mrf.mxu3 }
 0x2f1   : > { %v509_v13 = vpack.c.bf16 %v505_v12, %v505_v12 }
 0x2f3   : > { %v511_v14 = vrot.slane %v509_v13, 3 }
 0x2f5   : > { %v514_v15 = vsel %vm297_vm9, %v509_v13, %v511_v14  ;;  %v516_v16 = vsel %vm156_vm0, %v509_v13, %v511_v14  ;;  %v519_v17 = vsel %vm159_vm1, %v509_v13, %v511_v14 }
 0x2f6   : > { %v518_v18 = vrot.slane %v516_v16, 1  ;;  %v521_v19 = vrot.slane %v519_v17, 2  ;;  %v523_v20 = vunpack.i.h.s16 %v514_v15  ;;  %v639_v21 = vpack.i.b16 %v514_v15, %v514_v15 }
 0x2f8   : > { %v525_v23 = vunpack.i.h.s16 %v518_v18  ;;  %v528_v24 = vpack.i.b16 %v523_v20, %v523_v20  ;;  %v640_v25 = vpack.i.b16 %v518_v18, %v518_v18  ;;  %v641_v26 = vpack.i.b16 %v521_v19, %v521_v19  ;;  %v507_v28 = vpop.f32.mrf.mxu3 }
 0x2f9   : > { %v540_v29 = vsel %vm815_vm14, %v639_v21, %v539_v27 }
 0x2fa   : > { %v530_v32 = vpack.i.b16 %v525_v23, %v525_v23  ;;  %541 = vst [vmem:[%s781_s15] sm:$0x1] %v540_v29  ;;  %v543_v33 = vsel %vm815_vm14, %v528_v24, %v542_v30  ;;  %v546_v34 = vsel %vm815_vm14, %v640_v25, %v545_v31  ;;  %v552_v37 = vsel %vm815_vm14, %v641_v26, %v551_v35 }
 0x2fb   : > { %544 = vst [vmem:[%s781_s15 + $0x1] sm:$0x1] %v543_v33 }
 0x2fc   : > { %547 = vst [vmem:[%s781_s15 + $0x2] sm:$0x1] %v546_v34  ;;  %v549_v38 = vsel %vm815_vm14, %v530_v32, %v548_v36 }
 0x2fd   : > { %550 = vst [vmem:[%s781_s15 + $0x3] sm:$0x1] %v549_v38 }
 0x2fe   : > { %553 = vst [vmem:[%s781_s15 + $0x4] sm:$0x1] %v552_v37 }
 0x2ff PF: > { %s11_s6 = sadd.s32 1, %s669_s6  }
 0x300   : > { %p8_p4 = scmp.ge.s32.totalorder %s11_s6, 4  }
 0x302   :  { %10 = sbr.rel (!%p8_p4) target bundleno = 1 (0x1), region = 56 }

// kernel: _lambda_.29
= control target key start
LH: loop header
LB: loop body
LE: loop exit
PB: predicated region body
PF: predicated region fallthrough
CT: control target
= control target key end

     0   :  { %vm22_vm0 = vcmask 261120   ;;  %vm24_vm1 = vcmask 254976   ;;  %v117_v1 = vmov 0.0   ;;  %vm92_vm2 = vcmask 257024   ;;  %s175_s1 = inlined_call_operand.vmem [shape: bf16[32,32], index: 1, kind: input, shape index: {}]   ;;  %s176_s0 = inlined_call_operand.vmem [shape: bf16[10,32], index: 0, kind: input, shape index: {}]   ;;  %s177_s2 = inlined_call_operand.vmem [shape: bf16[1,32], index: 2, kind: input, shape index: {}]   ;;  %s178_s3 = inlined_call_operand.vmem [shape: bf16[10,32], index: 3, kind: input, shape index: {}]   ;;  %s179_s4 = inlined_call_operand.vmem [shape: bf16[10,32], index: 4, kind: output, shape index: {}]  }
   0x1   :  { %v115_v0 = vld [vmem:[%s175_s1 + $0x8] sm:$0xff]  ;;  %23 = vst.msk [vmem:[#allocation2] sm:$0xff] %vm22_vm0, %v117_v1  ;;  %v114_v2 = vld [vmem:[%s175_s1] sm:$0xff]  ;;  %vm94_vm3 = vcmask 253952  }
   0x2   :  { %25 = vst.msk [vmem:[#allocation2 + $0x8] sm:$0x3] %vm24_vm1, %v117_v1  ;;  %61 = vmatpush.bf16.msra.mxu0 %v115_v0  ;;  %v102_v3 = vld [vmem:[%s176_s0] sm:$0xf]  ;;  %v113_v4 = vld [vmem:[%s176_s0] sm:$0x10] }
   0x3   :  { %v103_v5 = vor.u32 %v113_v4, %v102_v3  ;;  %v79_v8 = vld [vmem:[%s177_s2] sm:$0x1]  ;;  %v85_v20 = vld [vmem:[%s178_s3 + $0x4] sm:$0x1] }
   0x4   :  { %v80_v10 = vunpack.c.l.bf16 %v79_v8  ;;  %v84_v11 = vld [vmem:[%s178_s3] sm:$0xf]  ;;  %v87_v22 = vunpack.c.l.bf16 %v85_v20 }
   0x5   :  { %v86_v15 = vunpack.c.l.bf16 %v84_v11 }
   0x6   :  { %62 = vmatpush.bf16.msra.mxu0 %v114_v2  ;;  %v81_v13 = vperm.slane %v80_v10, 0 }
   0x8   :  { %v26_v6 = vld [vmem:[#allocation2] sm:$0xff] }
   0x9   :  { %112 = vmatmul.msk.bf16.vlgmr.msra.gmra.mxu0 %vm22_vm0, %v103_v5  ;;  %v27_v12 = vld [vmem:[#allocation2 + $0x8] sm:$0x3] }
  0x86   :  { %v64_v7 = vpop.f32.mrf.mxu0 }
  0x87   :  { %v69_v9 = vadd.f32 %v64_v7, %v26_v6 }
  0x89   :  { %71 = vst.msk [vmem:[#allocation2] sm:$0xff] %vm22_vm0, %v69_v9 }
  0x8e   :  { %v66_v14 = vpop.f32.mrf.mxu0 }
  0x8f   :  { %v70_v16 = vadd.f32 %v66_v14, %v27_v12 }
  0x90   :  { %v77_v17 = vld [vmem:[#allocation2] sm:$0xff] }
  0x91   :  { %v82_v18 = vadd.f32 %v81_v13, %v77_v17  ;;  %73 = vst.msk [vmem:[#allocation2 + $0x8] sm:$0x3] %vm24_vm1, %v70_v16 }
  0x93   :  { %v88_v19 = vadd.f32 %v86_v15, %v82_v18 }
  0x95   :  { %v90_v21 = vpack.c.bf16 %v88_v19, %v88_v19 }
  0x97   :  { %93 = vst.msk [vmem:[%s179_s4] sm:$0xf] %vm92_vm2, %v90_v21 }
  0x98   :  { %v78_v23 = vld [vmem:[#allocation2 + $0x8] sm:$0x3] }
  0x99   :  { %v83_v24 = vadd.f32 %v81_v13, %v78_v23 }
  0x9b   :  { %v89_v25 = vadd.f32 %v87_v22, %v83_v24 }
  0x9d   :  { %v91_v26 = vpack.c.bf16 %v89_v25, %v89_v25 }
  0x9f   :  { %95 = vst.msk [vmem:[%s179_s4 + $0x4] sm:$0x1] %vm94_vm3, %v91_v26 }

// kernel: _lambda_.30
= control target key start
LH: loop header
LB: loop body
LE: loop exit
PB: predicated region body
PF: predicated region fallthrough
CT: control target
= control target key end

     0   :  { %vm25_vm0 = vcmask 261120   ;;  %vm29_vm1 = vcmask 254976   ;;  %v203_v6 = vmov 32.0   ;;  %s266_s0 = inlined_call_operand.vmem [shape: bf16[10,32], index: 0, kind: input, shape index: {}]   ;;  %s267_s3 = inlined_call_operand.vmem [shape: bf16[32,128], index: 3, kind: input, shape index: {}]   ;;  %s268_s1 = inlined_call_operand.vmem [shape: bf16[1,32], index: 1, kind: input, shape index: {}]   ;;  %s269_s2 = inlined_call_operand.vmem [shape: bf16[1,32], index: 2, kind: input, shape index: {}]   ;;  %s270_s4 = inlined_call_operand.vmem [shape: bf16[1,128], index: 4, kind: input, shape index: {}]   ;;  %s271_s5 = inlined_call_operand.vmem [shape: bf16[10,128], index: 5, kind: output, shape index: {}]  }
   0x1   :  { %v21_v0 = vld [vmem:[%s266_s0] sm:$0xf]  ;;  %v22_v2 = vld [vmem:[%s266_s0 + $0x4] sm:$0x1]  ;;  %189 = vrcp.f32 %v203_v6  ;;  %v187_v23 = vld [vmem:[%s267_s3 + $0x8] sm:$0xff] }
   0x2   :  { %v23_v1 = vunpack.c.l.bf16 %v21_v0  ;;  %v24_v4 = vunpack.c.l.bf16 %v22_v2  ;;  %117 = vmatpush.bf16.msra.mxu0 %v187_v23  ;;  %v186_v25 = vld [vmem:[%s267_s3] sm:$0xff] }
   0x3   :  { %v78_v39 = vld [vmem:[%s268_s1] sm:$0x1] }
   0x4   :  { %v26_v3 = vsel %vm25_vm0, %v23_v1, 0.0  ;;  %v30_v5 = vsel %vm29_vm1, %v24_v4, 0.0  ;;  %v79_v41 = vunpack.c.l.bf16 %v78_v39  ;;  %v83_v44 = vld [vmem:[%s269_s2] sm:$0x1] }
   0x5   :  { %27 = vadd.xlane.f32.xlu0 %v26_v3  ;;  %v84_v48 = vunpack.c.l.bf16 %v83_v44  ;;  %v93_v58 = vld [vmem:[%s270_s4] sm:$0x1] }
   0x6   :  { %118 = vmatpush.bf16.msra.mxu0 %v186_v25  ;;  %v80_v47 = vperm.slane %v79_v41, 0  ;;  %v94_v59 = vunpack.c.l.bf16 %v93_v58 }
   0x7   :  { %v190_v7 = vpop.eup %189  ;;  %v85_v53 = vperm.slane %v84_v48, 0 }
   0x8   :  { %v34_v8 = vmul.f32 32.0, %v190_v7  ;;  %vm38_vm2 = vweird.f32 %v190_v7  ;;  %v95_v60 = vperm.slane %v94_v59, 0 }
   0xa   :  { %v35_v9 = vsub.f32 1.0, %v34_v8 }
   0xc   :  { %v36_v10 = vmul.f32 %v190_v7, %v35_v9 }
   0xd   :  { %31 = vadd.xlane.f32.xlu0 %v30_v5 }
   0xe   :  { %v37_v11 = vadd.f32 %v190_v7, %v36_v10 }
  0x10   :  { %v39_v12 = vsel %vm38_vm2, %v190_v7, %v37_v11 }
  0x78   :  { %v28_v13 = vpop.xlane.xlu0 %27 }
  0x79   :  { %v40_v14 = vmul.f32 %v39_v12, %v28_v13 }
  0x7b   :  { %v42_v15 = vsub.f32 %v23_v1, %v40_v14 }
  0x7d   :  { %v44_v16 = vmul.f32 %v42_v15, %v42_v15 }
  0x7f   :  { %v46_v17 = vsel %vm25_vm0, %v44_v16, 0.0 }
  0x80   :  { %47 = vadd.xlane.f32.xlu1 %v46_v17  ;;  %v32_v18 = vpop.xlane.xlu0 %31 }
  0x81   :  { %v41_v19 = vmul.f32 %v39_v12, %v32_v18 }
  0x83   :  { %v43_v20 = vsub.f32 %v24_v4, %v41_v19 }
  0x85   :  { %v45_v21 = vmul.f32 %v43_v20, %v43_v20 }
  0x87   :  { %v49_v22 = vsel %vm29_vm1, %v45_v21, 0.0 }
  0x88   :  { %50 = vadd.xlane.f32.xlu1 %v49_v22 }
  0xf3   :  { %v48_v24 = vpop.xlane.xlu1 %47 }
  0xf4   :  { %v52_v26 = vmul.f32 %v48_v24, %v39_v12 }
  0xf6   :  { %v54_v27 = vadd.f32 1e-05, %v52_v26 }
  0xf8   :  { %191 = vrsqrt.f32 %v54_v27  ;;  %vm62_vm4 = vweird.f32 %v54_v27 }
  0xfb   :  { %v51_v28 = vpop.xlane.xlu1 %50 }
  0xfc   :  { %v53_v29 = vmul.f32 %v51_v28, %v39_v12 }
  0xfe   :  { %v192_v30 = vpop.eup %191  ;;  %v55_v31 = vadd.f32 1e-05, %v53_v29 }
  0xff   :  { %v57_v32 = vmul.f32 %v192_v30, %v54_v27  ;;  %vm63_vm3 = vweird.f32 %v192_v30 }
 0x100   :  { %193 = vrsqrt.f32 %v55_v31  ;;  %vm64_vm5 = vmor %vm62_vm4, %vm63_vm3  ;;  %vm72_vm7 = vweird.f32 %v55_v31 }
 0x101   :  { %v58_v33 = vmul.f32 %v192_v30, %v57_v32 }
 0x103   :  { %v59_v34 = vmul.f32 0.5, %v58_v33 }
 0x105   :  { %v60_v35 = vsub.f32 1.5, %v59_v34 }
 0x106   :  { %v194_v36 = vpop.eup %193 }
 0x107   :  { %v61_v37 = vmul.f32 %v192_v30, %v60_v35  ;;  %v67_v38 = vmul.f32 %v194_v36, %v55_v31  ;;  %vm73_vm6 = vweird.f32 %v194_v36 }
 0x108   :  { %vm74_vm8 = vmor %vm72_vm7, %vm73_vm6 }
 0x109   :  { %v68_v40 = vmul.f32 %v194_v36, %v67_v38  ;;  %v65_v42 = vsel %vm64_vm5, %v192_v30, %v61_v37 }
 0x10a   :  { %v76_v46 = vmul.f32 %v65_v42, %v42_v15 }
 0x10b   :  { %v69_v43 = vmul.f32 0.5, %v68_v40 }
 0x10c   :  { %v81_v52 = vmul.f32 %v80_v47, %v76_v46 }
 0x10d   :  { %v70_v45 = vsub.f32 1.5, %v69_v43 }
 0x10e   :  { %v86_v55 = vadd.f32 %v85_v53, %v81_v52 }
 0x10f   :  { %v71_v49 = vmul.f32 %v194_v36, %v70_v45 }
 0x111   :  { %v75_v50 = vsel %vm74_vm8, %v194_v36, %v71_v49 }
 0x112   :  { %v77_v51 = vmul.f32 %v75_v50, %v43_v20 }
 0x114   :  { %v82_v54 = vmul.f32 %v80_v47, %v77_v51 }
 0x116   :  { %v87_v56 = vadd.f32 %v85_v53, %v82_v54 }
 0x118   :  { %v88_v57 = vpack.c.bf16 %v87_v56, %v86_v55 }
 0x11a   :  { %183 = vmatmul.msk.bf16.vlgmr.msra.gmra.mxu0 %vm25_vm0, %v88_v57 }
 0x197   :  { %v120_v61 = vpop.f32.mrf.mxu0 }
 0x198   :  { %v121_v62 = vadd.f32 %v120_v61, %v95_v60 }
 0x19a   :  { %v184_v63 = vmul.f32 -1.702, %v121_v62 }
 0x19c   :  { %v129_v0 = vmul.f32 1.442695, %v184_v63 }
 0x19e   :  { %195 = vpow2.f32 %v129_v0 }
 0x19f   :  { %v122_v1 = vpop.f32.mrf.mxu0 }
 0x1a0   :  { %v123_v2 = vadd.f32 %v122_v1, %v95_v60 }
 0x1a2   :  { %v185_v3 = vmul.f32 -1.702, %v123_v2 }
 0x1a4   :  { %v196_v4 = vpop.eup %195  ;;  %v131_v5 = vmul.f32 1.442695, %v185_v3 }
 0x1a5   :  { %v133_v6 = vadd.f32 1.0, %v196_v4 }
 0x1a6   :  { %197 = vpow2.f32 %v131_v5 }
 0x1a7   :  { %199 = vrcp.f32 %v133_v6  ;;  %v146_v12 = vand.u32 2147483648, %v133_v6  ;;  %v144_v14 = vand.u32 2147483647, %v133_v6  ;;  %vm140_vm10 = vweird.f32 %v133_v6 }
 0x1a9   :  { %v147_v17 = vor.u32 1.1754944e-38, %v146_v12  ;;  %vm145_vm12 = vcmp.eq.f32.partialorder %v144_v14, 8.507059e+37 }
 0x1ac   :  { %v198_v7 = vpop.eup %197 }
 0x1ad   :  { %v200_v8 = vpop.eup %199  ;;  %v134_v9 = vadd.f32 1.0, %v198_v7 }
 0x1ae   :  { %v136_v10 = vmul.f32 %v200_v8, %v133_v6  ;;  %vm141_vm9 = vweird.f32 %v200_v8 }
 0x1af   :  { %201 = vrcp.f32 %v134_v9  ;;  %vm142_vm11 = vmor %vm140_vm10, %vm141_vm9  ;;  %v161_v23 = vand.u32 2147483648, %v134_v9  ;;  %v159_v26 = vand.u32 2147483647, %v134_v9  ;;  %vm155_vm14 = vweird.f32 %v134_v9 }
 0x1b0   :  { %v137_v11 = vsub.f32 1.0, %v136_v10 }
 0x1b1   :  { %v162_v28 = vor.u32 1.1754944e-38, %v161_v23  ;;  %vm160_vm0 = vcmp.eq.f32.partialorder %v159_v26, 8.507059e+37 }
 0x1b2   :  { %v138_v13 = vmul.f32 %v200_v8, %v137_v11 }
 0x1b4   :  { %v139_v15 = vadd.f32 %v200_v8, %v138_v13 }
 0x1b5   :  { %v202_v16 = vpop.eup %201 }
 0x1b6   :  { %v143_v18 = vsel %vm142_vm11, %v200_v8, %v139_v15  ;;  %v151_v19 = vmul.f32 %v202_v16, %v134_v9  ;;  %vm156_vm13 = vweird.f32 %v202_v16 }
 0x1b7   :  { %v148_v20 = vsel %vm145_vm12, %v147_v17, %v143_v18  ;;  %vm157_vm15 = vmor %vm155_vm14, %vm156_vm13 }
 0x1b8   :  { %v165_v21 = vmul.f32 %v148_v20, %v121_v62  ;;  %v152_v22 = vsub.f32 1.0, %v151_v19 }
 0x1ba   :  { %v167_v24 = vpack.c.bf16 %v165_v21, %v165_v21  ;;  %v153_v25 = vmul.f32 %v202_v16, %v152_v22 }
 0x1bc   :  { %169 = vst [vmem:[%s271_s5] sm:$0xf] %v167_v24  ;;  %v154_v27 = vadd.f32 %v202_v16, %v153_v25 }
 0x1be   :  { %v158_v29 = vsel %vm157_vm15, %v202_v16, %v154_v27 }
 0x1bf   :  { %v163_v30 = vsel %vm160_vm0, %v162_v28, %v158_v29 }
 0x1c0   :  { %v166_v31 = vmul.f32 %v163_v30, %v123_v2 }
 0x1c2   :  { %v168_v32 = vpack.c.bf16 %v166_v31, %v166_v31 }
 0x1c4   :  { %170 = vst [vmem:[%s271_s5 + $0x4] sm:$0x1] %v168_v32 }

// kernel: _lambda_.31
= control target key start
LH: loop header
LB: loop body
LE: loop exit
PB: predicated region body
PF: predicated region fallthrough
CT: control target
= control target key end

     0   :  { %vm21_vm0 = vcmask 261120   ;;  %v191_v2 = vmov 0.0   ;;  %vm23_vm1 = vcmask 254976   ;;  %vm137_vm2 = vcmask 257024   ;;  %s266_s1 = inlined_call_operand.vmem [shape: bf16[128,32], index: 1, kind: input, shape index: {}]   ;;  %s267_s0 = inlined_call_operand.vmem [shape: bf16[10,128], index: 0, kind: input, shape index: {}]   ;;  %s268_s2 = inlined_call_operand.vmem [shape: bf16[1,32], index: 2, kind: input, shape index: {}]   ;;  %s269_s3 = inlined_call_operand.vmem [shape: bf16[10,32], index: 3, kind: input, shape index: {}]   ;;  %s270_s4 = inlined_call_operand.vmem [shape: bf16[10,32], index: 4, kind: output, shape index: {}]  }
   0x1   :  { %v189_v0 = vld [vmem:[%s266_s1 + $0x38] sm:$0xff]  ;;  %v188_v1 = vld [vmem:[%s266_s1 + $0x30] sm:$0xff]  ;;  %22 = vst.msk [vmem:[#allocation2] sm:$0xff] %vm21_vm0, %v191_v2  ;;  %v187_v3 = vld [vmem:[%s266_s1 + $0x28] sm:$0xff]  ;;  %vm139_vm3 = vcmask 253952  }
   0x2   :  { %99 = vmatpush.bf16.msra.mxu0 %v189_v0  ;;  %v186_v4 = vld [vmem:[%s266_s1 + $0x20] sm:$0xff]  ;;  %v185_v5 = vld [vmem:[%s266_s1 + $0x18] sm:$0xff]  ;;  %v184_v6 = vld [vmem:[%s266_s1 + $0x10] sm:$0xff]  ;;  %24 = vst.msk [vmem:[#allocation2 + $0x8] sm:$0x3] %vm23_vm1, %v191_v2 }
   0x3   :  { %v183_v7 = vld [vmem:[%s266_s1 + $0x8] sm:$0xff]  ;;  %v182_v8 = vld [vmem:[%s266_s1] sm:$0xff] }
   0x4   :  { %v147_v9 = vld [vmem:[%s267_s0] sm:$0xf]  ;;  %v181_v10 = vld [vmem:[%s267_s0] sm:$0x10] }
   0x5   :  { %v148_v11 = vor.u32 %v181_v10, %v147_v9  ;;  %v124_v14 = vld [vmem:[%s268_s2] sm:$0x1]  ;;  %v130_v26 = vld [vmem:[%s269_s3 + $0x4] sm:$0x1] }
   0x6   :  { %100 = vmatpush.bf16.msra.mxu0 %v188_v1  ;;  %v125_v16 = vunpack.c.l.bf16 %v124_v14  ;;  %v129_v17 = vld [vmem:[%s269_s3] sm:$0xf]  ;;  %v132_v28 = vunpack.c.l.bf16 %v130_v26 }
   0x7   :  { %v131_v21 = vunpack.c.l.bf16 %v129_v17 }
   0x8   :  { %v25_v12 = vld [vmem:[#allocation2] sm:$0xff]  ;;  %v126_v19 = vperm.slane %v125_v16, 0 }
   0x9   :  { %v26_v18 = vld [vmem:[#allocation2 + $0x8] sm:$0x3] }
   0xa   :  { %101 = vmatpush.bf16.msra.mxu0 %v187_v3 }
   0xe   :  { %102 = vmatpush.bf16.msra.mxu0 %v186_v4 }
  0x12   :  { %103 = vmatpush.bf16.msra.mxu0 %v185_v5 }
  0x16   :  { %104 = vmatpush.bf16.msra.mxu0 %v184_v6 }
  0x1a   :  { %105 = vmatpush.bf16.msra.mxu0 %v183_v7 }
  0x1e   :  { %106 = vmatpush.bf16.msra.mxu0 %v182_v8 }
  0x21   :  { %107 = vmatmul.bf16.vlgmr.msra.gmra.mxu0 %v148_v11 }
  0x9e   :  { %v108_v13 = vpop.f32.mrf.mxu0 }
  0x9f   :  { %v113_v15 = vadd.f32 %v108_v13, %v25_v12 }
  0xa1   :  { %116 = vst.msk [vmem:[#allocation2] sm:$0xff] %vm21_vm0, %v113_v15 }
  0xa6   :  { %v110_v20 = vpop.f32.mrf.mxu0 }
  0xa7   :  { %v114_v22 = vadd.f32 %v110_v20, %v26_v18 }
  0xa8   :  { %v122_v23 = vld [vmem:[#allocation2] sm:$0xff] }
  0xa9   :  { %v127_v24 = vadd.f32 %v126_v19, %v122_v23  ;;  %118 = vst.msk [vmem:[#allocation2 + $0x8] sm:$0x3] %vm23_vm1, %v114_v22 }
  0xab   :  { %v133_v25 = vadd.f32 %v131_v21, %v127_v24 }
  0xad   :  { %v135_v27 = vpack.c.bf16 %v133_v25, %v133_v25 }
  0xaf   :  { %138 = vst.msk [vmem:[%s270_s4] sm:$0xf] %vm137_vm2, %v135_v27 }
  0xb0   :  { %v123_v29 = vld [vmem:[#allocation2 + $0x8] sm:$0x3] }
  0xb1   :  { %v128_v30 = vadd.f32 %v126_v19, %v123_v29 }
  0xb3   :  { %v134_v31 = vadd.f32 %v132_v28, %v128_v30 }
  0xb5   :  { %v136_v32 = vpack.c.bf16 %v134_v31, %v134_v31 }
  0xb7   :  { %140 = vst.msk [vmem:[%s270_s4 + $0x4] sm:$0x1] %vm139_vm3, %v136_v32 }

// kernel: _lambda_.49
= control target key start
LH: loop header
LB: loop body
LE: loop exit
PB: predicated region body
PF: predicated region fallthrough
CT: control target
= control target key end

     0   :  { %s147_s0 = inlined_call_operand.vmem [shape: bf16[2,32], index: 0, kind: input, shape index: {}]   ;;  %s148_s1 = inlined_call_operand.vmem [shape: bf16[3,32], index: 1, kind: input, shape index: {}]   ;;  %s149_s2 = inlined_call_operand.hbm [shape: f32[2,3], index: 2, kind: output, shape index: {}]  }
   0x1   :  { %v15_v0 = vld [vmem:[%s148_s1] sm:$0x3] }
   0x2   :  { %v13_v1 = vld [vmem:[%s147_s0] sm:$0x1]  ;;  %v16_v2 = vunpack.c.l.bf16 %v15_v0 }
   0x3   :  { %7 = vsyncpa [#allocation3], 0  ;;  %vm34_vm0 = vcmask 256000   ;;  %v14_v4 = vunpack.c.l.bf16 %v13_v1  ;;  %vm18_vm1 = vcmask 254976   ;;  %vm51_vm5 = vcmask 261120   ;;  %s122_s0 = smov [#allocation2]  }
   0x4   :  { %v33_v3 = vmul.f32 %v16_v2, %v16_v2  ;;  %s79_s1 = sshll.u32 %s122_s0, 4  ;;  %s81_s15 = sshll.u32 %s149_s2, 4  ;;  %vm72_vm9 = vcmask 17408   ;;  %s80_s1 = int_to_ptr.vmem [resolvable:$true] %s79_s1  ;;  %s82_s15 = int_to_ptr.hbm [resolvable:$true] %s81_s15 }
   0x5   :  { %v17_v6 = vmul.f32 %v14_v4, %v14_v4 }
   0x6   :  { %v35_v5 = vsel %vm34_vm0, %v33_v3, 0.0 }
   0x7   :  { %36 = vadd.xlane.f32.xlu0 %v35_v5  ;;  %v19_v7 = vsel %vm18_vm1, %v17_v6, 0.0 }
   0xf   :  { %20 = vadd.xlane.f32.xlu0 %v19_v7 }
  0x7a   :  { %v37_v8 = vpop.xlane.xlu0 %36 }
  0x7b   :  { %92 = vrsqrt.f32 %v37_v8  ;;  %vm44_vm3 = vweird.f32 %v37_v8 }
  0x81   :  { %v93_v9 = vpop.eup %92 }
  0x82   :  { %v39_v10 = vmul.f32 %v93_v9, %v37_v8  ;;  %v21_v11 = vpop.xlane.xlu0 %20  ;;  %vm45_vm2 = vweird.f32 %v93_v9 }
  0x83   :  { %94 = vrsqrt.f32 %v21_v11  ;;  %vm46_vm4 = vmor %vm44_vm3, %vm45_vm2  ;;  %vm28_vm7 = vweird.f32 %v21_v11 }
  0x84   :  { %v40_v12 = vmul.f32 %v93_v9, %v39_v10 }
  0x86   :  { %v41_v13 = vmul.f32 0.5, %v40_v12 }
  0x88   :  { %v42_v14 = vsub.f32 1.5, %v41_v13 }
  0x89   :  { %v95_v15 = vpop.eup %94 }
  0x8a   :  { %v23_v16 = vmul.f32 %v95_v15, %v21_v11  ;;  %v43_v17 = vmul.f32 %v93_v9, %v42_v14  ;;  %vm29_vm6 = vweird.f32 %v95_v15 }
  0x8b   :  { %vm30_vm8 = vmor %vm28_vm7, %vm29_vm6 }
  0x8c   :  { %v24_v18 = vmul.f32 %v95_v15, %v23_v16  ;;  %v47_v19 = vsel %vm46_vm4, %v93_v9, %v43_v17 }
  0x8d   :  { %v48_v20 = vmul.f32 %v47_v19, %v16_v2 }
  0x8e   :  { %v25_v21 = vmul.f32 0.5, %v24_v18 }
  0x8f   :  { %v50_v22 = vpack.c.bf16 %v48_v20, %v48_v20 }
  0x90   :  { %v26_v23 = vsub.f32 1.5, %v25_v21 }
  0x91   :  { %v56_v24 = vsel %vm51_vm5, %v50_v22, 0 }
  0x92   :  { %v27_v25 = vmul.f32 %v95_v15, %v26_v23  ;;  %65 = vmatpush.bf16.xpose.msra.mxu0 %v56_v24 }
  0x94   :  { %v31_v26 = vsel %vm30_vm8, %v95_v15, %v27_v25 }
  0x95   :  { %v32_v27 = vmul.f32 %v31_v26, %v14_v4 }
  0x97   :  { %v49_v28 = vpack.c.bf16 %v32_v27, %v32_v27 }
  0x99   :  { %90 = vmatmul.msk.bf16.vlgmr.msra.gmra.mxu0 %vm51_vm5, %v49_v28 }
 0x116   :  { %v67_v29 = vpop.f32.mrf.mxu0 }
 0x117   :  { %v71_v30 = vmul.f32 14.285714, %v67_v29 }
 0x119   :  { %73 = vst.msk [vmem:[#allocation2] sm:$0x3] %vm72_vm9, %v71_v30 }
 0x11a   :  { %84 = dma.vmem_to_hbm [thread:$0]  %s80_s1, 32, %s82_s15, [#allocation3]  }
 0x11e   :  { %v69_v31 = vpop.f32.mrf.mxu0 }
 0x11f   :  { %120 = dma.done.wait [#allocation3], 32  }
 0x120   :  { %121 = vsyncadd [#allocation3], 4294967264 }
 0x121   :  { %89 = vsyncpa [#allocation3], 1 }

// kernel: _lambda_.37
= control target key start
LH: loop header
LB: loop body
LE: loop exit
PB: predicated region body
PF: predicated region fallthrough
CT: control target
= control target key end

     0   :  { %vm20_vm0 = vcmask 254976   ;;  %v115_v3 = vmov 32.0   ;;  %vm75_vm5 = vcmask 261120   ;;  %vm93_vm6 = vcmask 253952   ;;  %s161_s0 = inlined_call_operand.vmem [shape: bf16[2,32], index: 0, kind: input, shape index: {}]   ;;  %s162_s3 = inlined_call_operand.vmem [shape: bf16[32,32], index: 3, kind: input, shape index: {}]   ;;  %s163_s1 = inlined_call_operand.vmem [shape: bf16[1,32], index: 1, kind: input, shape index: {}]   ;;  %s164_s2 = inlined_call_operand.vmem [shape: bf16[1,32], index: 2, kind: input, shape index: {}]   ;;  %s165_s4 = inlined_call_operand.vmem [shape: bf16[2,32], index: 4, kind: output, shape index: {}]  }
   0x1   :  { %v18_v0 = vld [vmem:[%s161_s0] sm:$0x1]  ;;  %111 = vrcp.f32 %v115_v3  ;;  %v109_v15 = vld [vmem:[%s162_s3 + $0x8] sm:$0xff] }
   0x2   :  { %v19_v1 = vunpack.c.l.bf16 %v18_v0  ;;  %85 = vmatpush.bf16.msra.mxu0 %v109_v15  ;;  %v108_v16 = vld [vmem:[%s162_s3] sm:$0xff] }
   0x3   :  { %v50_v23 = vld [vmem:[%s163_s1] sm:$0x1] }
   0x4   :  { %v21_v2 = vsel %vm20_vm0, %v19_v1, 0.0  ;;  %v54_v25 = vld [vmem:[%s164_s2] sm:$0x1]  ;;  %v51_v26 = vunpack.c.l.bf16 %v50_v23 }
   0x5   :  { %22 = vadd.xlane.f32.xlu0 %v21_v2  ;;  %v55_v28 = vunpack.c.l.bf16 %v54_v25 }
   0x6   :  { %86 = vmatpush.bf16.msra.mxu0 %v108_v16  ;;  %v52_v30 = vperm.slane %v51_v26, 0 }
   0x7   :  { %v112_v4 = vpop.eup %111  ;;  %v56_v33 = vperm.slane %v55_v28, 0 }
   0x8   :  { %v25_v5 = vmul.f32 32.0, %v112_v4  ;;  %vm29_vm1 = vweird.f32 %v112_v4 }
   0xa   :  { %v26_v6 = vsub.f32 1.0, %v25_v5 }
   0xc   :  { %v27_v7 = vmul.f32 %v112_v4, %v26_v6 }
   0xe   :  { %v28_v8 = vadd.f32 %v112_v4, %v27_v7 }
  0x10   :  { %v30_v9 = vsel %vm29_vm1, %v112_v4, %v28_v8 }
  0x78   :  { %v23_v10 = vpop.xlane.xlu0 %22 }
  0x79   :  { %v31_v11 = vmul.f32 %v30_v9, %v23_v10 }
  0x7b   :  { %v32_v12 = vsub.f32 %v19_v1, %v31_v11 }
  0x7d   :  { %v33_v13 = vmul.f32 %v32_v12, %v32_v12 }
  0x7f   :  { %v34_v14 = vsel %vm20_vm0, %v33_v13, 0.0 }
  0x80   :  { %35 = vadd.xlane.f32.xlu0 %v34_v14 }
  0xf3   :  { %v36_v17 = vpop.xlane.xlu0 %35 }
  0xf4   :  { %v37_v18 = vmul.f32 %v36_v17, %v30_v9 }
  0xf6   :  { %v38_v19 = vadd.f32 1e-05, %v37_v18 }
  0xf8   :  { %113 = vrsqrt.f32 %v38_v19  ;;  %vm45_vm3 = vweird.f32 %v38_v19 }
  0xfe   :  { %v114_v20 = vpop.eup %113 }
  0xff   :  { %v40_v21 = vmul.f32 %v114_v20, %v38_v19  ;;  %vm46_vm2 = vweird.f32 %v114_v20 }
 0x100   :  { %vm47_vm4 = vmor %vm45_vm3, %vm46_vm2 }
 0x101   :  { %v41_v22 = vmul.f32 %v114_v20, %v40_v21 }
 0x103   :  { %v42_v24 = vmul.f32 0.5, %v41_v22 }
 0x105   :  { %v43_v27 = vsub.f32 1.5, %v42_v24 }
 0x107   :  { %v44_v29 = vmul.f32 %v114_v20, %v43_v27 }
 0x109   :  { %v48_v31 = vsel %vm47_vm4, %v114_v20, %v44_v29 }
 0x10a   :  { %v49_v32 = vmul.f32 %v48_v31, %v32_v12 }
 0x10c   :  { %v53_v34 = vmul.f32 %v52_v30, %v49_v32 }
 0x10e   :  { %v57_v35 = vadd.f32 %v56_v33, %v53_v34 }
 0x110   :  { %v58_v36 = vpack.c.bf16 %v57_v35, %v57_v35 }
 0x112   :  { %107 = vmatmul.msk.bf16.vlgmr.msra.gmra.mxu0 %vm75_vm5, %v58_v36 }
 0x18f   :  { %v88_v37 = vpop.f32.mrf.mxu0 }
 0x190   :  { %v92_v38 = vpack.c.bf16 %v88_v37, %v88_v37 }
 0x192   :  { %94 = vst.msk [vmem:[%s165_s4] sm:$0x1] %vm93_vm6, %v92_v38 }
 0x197   :  { %v90_v39 = vpop.f32.mrf.mxu0 }

</bundles_post_ra>
